<compile_context>
chip_gen: v7x
topology: tpu7x:2x2x1
jax: 0.10.0
libtpu: 0.0.40
codegen_flags: <defaults>
</compile_context>

<pallas_src>
import functools
import math

import jax
import jax.numpy as jnp
from jax import lax
from jax.experimental import pallas as pl
from jax.experimental.pallas import tpu as pltpu

# ----------------------------------------------------------------------------
# DenseNet121 architecture constants
# ----------------------------------------------------------------------------
GROWTH = 32
BLOCK_CONFIG = (6, 12, 24, 16)
NUM_INIT_FEATURES = 64
BN_SIZE = 4
BN_EPS = 1e-5
NUM_CLASSES = 2

# Tile budget (bf16 operands).  Largest blocks in this net:
#   A 256x1152 bf16 + B 1152x512 bf16 + acc 256x512 f32 ~= 2.3 MiB, double buffered < 5 MiB
# -> far under the 32 MiB scoped default on every generation (v5e/v6e 128 MiB, v7x 64 MiB).
TM_MAX = 256
TK_MAX = 2048      # single K step for every conv (max Kp = 1152)
TN_MAX = 512       # single N tile for every conv (max Np = 512, trans3)
ROW_UNIT = 16      # bf16 sublane packing: row (second-minor) dims multiples of 16


def _round_up(x, m):
    return (x + m - 1) // m * m


def _pick_tile(p, cap):
    """Largest multiple of 128 <= cap that divides p (p is a multiple of 128)."""
    if p <= cap:
        return p
    t = (cap // 128) * 128
    while p % t:
        t -= 128
    return t


def _tile_m(m):
    """(tm, padded_m): tm multiple of 16; >= 2 row tiles whenever m allows (v7x megacore)."""
    mp = _round_up(m, ROW_UNIT)
    if mp <= ROW_UNIT:
        return ROW_UNIT, ROW_UNIT
    tm = min(TM_MAX, _round_up(mp, 2 * ROW_UNIT) // 2)
    return tm, _round_up(mp, tm)


# ----------------------------------------------------------------------------
# Pallas kernels
# ----------------------------------------------------------------------------
def _matmul_kernel(*refs, apply_pre, apply_post):
    """Tiled MXU matmul, f32 VMEM accumulator, optional fused eval-BN+ReLU prologue
    (per K column, applied to the A tile) and epilogue (per N column, before the store)."""
    a_ref, b_ref = refs[0], refs[1]
    n_in = 2 + 2 * int(apply_pre) + 2 * int(apply_post)
    o_ref, acc_ref = refs[n_in], refs[n_in + 1]
    k = pl.program_id(2)

    @pl.when(k == 0)
    def _init():
        acc_ref[...] = jnp.zeros_like(acc_ref)

    a = a_ref[...]
    if apply_pre:
        pre_s, pre_b = refs[2], refs[3]
        # eval-mode BN folded to scale/shift, then ReLU (f32 elementwise; v5e VPU has no bf16)
        a = jnp.maximum(a.astype(jnp.float32) * pre_s[...] + pre_b[...], 0.0
                        ).astype(jnp.bfloat16)
    acc_ref[...] += jnp.dot(a, b_ref[...], preferred_element_type=jnp.float32)

    @pl.when(k == pl.num_programs(2) - 1)
    def _store():
        out = acc_ref[...]
        if apply_post:
            ps, pb = refs[2 + 2 * int(apply_pre)], refs[3 + 2 * int(apply_pre)]
            out = jnp.maximum(out * ps[...] + pb[...], 0.0)
        o_ref[...] = out.astype(o_ref.dtype)


def _matmul_call(a, b, cp, *, apply_pre, apply_post, tm, tk, tn):
    m, kdim = a.shape
    _, n = b.shape
    kernel = functools.partial(_matmul_kernel, apply_pre=apply_pre, apply_post=apply_post)
    in_specs = [pl.BlockSpec((tm, tk), lambda i, j, k: (i, k)),
                pl.BlockSpec((tk, tn), lambda i, j, k: (k, j))]
    args = [a, b]
    if apply_pre:                                     # only DMA scale/shift when actually fused
        in_specs += [pl.BlockSpec((1, tk), lambda i, j, k: (0, k)),
                     pl.BlockSpec((1, tk), lambda i, j, k: (0, k))]
        args += [cp['pre_s'], cp['pre_b']]
    if apply_post:
        in_specs += [pl.BlockSpec((1, tn), lambda i, j, k: (0, j)),
                     pl.BlockSpec((1, tn), lambda i, j, k: (0, j))]
        args += [cp['post_s'], cp['post_b']]
    return pl.pallas_call(
        kernel,
        out_shape=jax.ShapeDtypeStruct((m, n), jnp.bfloat16),
        grid=(m // tm, n // tn, kdim // tk),
        in_specs=in_specs,
        out_specs=pl.BlockSpec((tm, tn), lambda i, j, k: (i, j)),
        scratch_shapes=[pltpu.VMEM((tm, tn), jnp.float32)],
        compiler_params=pltpu.CompilerParams(
            dimension_semantics=("parallel", "parallel", "arbitrary")),
    )(*args)


def _norm5_gap_kernel(x_ref, s_ref, b_ref, o_ref, *, inv_hw):
    # Fused norm5 (eval BN) + ReLU + global average pool: (nb, hw, c) -> (nb, c) f32.
    y = jnp.maximum(x_ref[...].astype(jnp.float32) * s_ref[...] + b_ref[...], 0.0)
    o_ref[...] = jnp.sum(y, axis=1) * inv_hw


def _norm5_gap_call(x3, s, b):
    nb, hw, c = x3.shape
    kernel = functools.partial(_norm5_gap_kernel, inv_hw=1.0 / hw)
    return pl.pallas_call(
        kernel, out_shape=jax.ShapeDtypeStruct((nb, c), jnp.float32))(x3, s, b)


def _head_kernel(x_ref, w1_ref, b1_ref, w2_ref, b2_ref, o_ref):
    # Linear(1024,512) -> ReLU -> (Dropout = identity in eval) -> Linear(512, num_classes)
    h = jnp.dot(x_ref[...], w1_ref[...], preferred_element_type=jnp.float32) + b1_ref[...]
    h = jnp.maximum(h, 0.0)
    o_ref[...] = (jnp.dot(h.astype(jnp.bfloat16), w2_ref[...],
                          preferred_element_type=jnp.float32) + b2_ref[...])


# ----------------------------------------------------------------------------
# Thin traced wrappers (whole forward is under one jax.jit; all shapes static at trace time)
# ----------------------------------------------------------------------------
def _apply_conv(x2d, cp, n_real=None):
    m, k = x2d.shape
    Kp, Np = cp['w'].shape
    tm, mp = _tile_m(m)
    tk = _pick_tile(Kp, TK_MAX)
    tn = _pick_tile(Np, TN_MAX)
    a = x2d.astype(jnp.bfloat16)
    if mp != m or Kp != k:
        a = jnp.pad(a, ((0, mp - m), (0, Kp - k)))
    out = _matmul_call(a, cp['w'], cp,
                       apply_pre=('pre_s' in cp), apply_post=('post_s' in cp),
                       tm=tm, tk=tk, tn=tn)
    if mp != m:
        out = out[:m]          # padded rows see relu(pre_b) garbage -> must be sliced off
    if n_real is not None and n_real != Np:
        out = out[:, :n_real]
    return out


def _apply_head(feats, hp):
    nb = feats.shape[0]
    bp = _round_up(nb, ROW_UNIT)
    x = feats.astype(jnp.bfloat16)
    if bp != nb:
        x = jnp.pad(x, ((0, bp - nb), (0, 0)))
    out = pl.pallas_call(
        _head_kernel,
        out_shape=jax.ShapeDtypeStruct((bp, hp['w2'].shape[1]), jnp.float32),
    )(x, hp['w1'], hp['b1'], hp['w2'], hp['b2'])
    return out[:nb, :NUM_CLASSES]


# ----------------------------------------------------------------------------
# Glue: im2col (3x3 / 7x7 only), pooling
# ----------------------------------------------------------------------------
# TODO(synk): im2col still materializes a k*k-expanded bf16 copy; in-kernel shifted-window
# K accumulation would remove it.
def _im2col(x_nhwc, kh, kw, stride, pad):
    n, h, w, c = x_nhwc.shape
    xp = jnp.pad(x_nhwc, ((0, 0), (pad, pad), (pad, pad), (0, 0)))
    ho = (h + 2 * pad - kh) // stride + 1
    wo = (w + 2 * pad - kw) // stride + 1
    cols = [xp[:, i:i + stride * ho:stride, j:j + stride * wo:stride, :]
            for i in range(kh) for j in range(kw)]
    col = jnp.concatenate(cols, axis=-1)               # column order: (kh, kw, Cin)
    return col.reshape(n * ho * wo, kh * kw * c), ho, wo


# TODO(synk): pooling is XLA glue, not a dedicated Pallas kernel (bf16 in/out, no f32 copies).
def _max_pool(x, k, s, p):
    return lax.reduce_window(x, jnp.asarray(-jnp.inf, x.dtype), lax.max,
                             (1, k, k, 1), (1, s, s, 1),
                             ((0, 0), (p, p), (p, p), (0, 0)))


def _avg_pool2(x):
    nb, h, w, c = x.shape
    y = x.reshape(nb, h // 2, 2, w // 2, 2, c).astype(jnp.float32)
    return jnp.mean(y, axis=(2, 4)).astype(jnp.bfloat16)


# ----------------------------------------------------------------------------
# Deterministic synthetic parameters (shapes follow torchvision densenet121)
# ----------------------------------------------------------------------------
def _conv_w(key, cout, cin, kh, kw):
    fan_in = cin * kh * kw
    return jax.random.normal(key, (cout, cin, kh, kw), jnp.float32) * math.sqrt(2.0 / fan_in)


def _bn_p(c):
    return dict(gamma=jnp.ones((c,), jnp.float32), beta=jnp.zeros((c,), jnp.float32),
                mean=jnp.zeros((c,), jnp.float32), var=jnp.ones((c,), jnp.float32))


def init_params(key, num_classes=NUM_CLASSES):
    keys = iter(jax.random.split(key, 256))
    params = {'conv0': _conv_w(next(keys), NUM_INIT_FEATURES, 3, 7, 7),
              'norm0': _bn_p(NUM_INIT_FEATURES)}
    ch = NUM_INIT_FEATURES
    for bi, nlayers in enumerate(BLOCK_CONFIG):
        layers = []
        for _ in range(nlayers):
            layers.append(dict(
                norm1=_bn_p(ch),
                conv1=_conv_w(next(keys), BN_SIZE * GROWTH, ch, 1, 1),
                norm2=_bn_p(BN_SIZE * GROWTH),
                conv2=_conv_w(next(keys), GROWTH, BN_SIZE * GROWTH, 3, 3),
            ))
            ch += GROWTH
        params[f'block{bi + 1}'] = layers
        if bi != len(BLOCK_CONFIG) - 1:
            params[f'trans{bi + 1}'] = dict(norm=_bn_p(ch),
                                            conv=_conv_w(next(keys), ch // 2, ch, 1, 1))
            ch //= 2
    params['norm5'] = _bn_p(ch)          # ch == 1024
    # Custom classifier head: Linear(1024,512) -> ReLU -> Dropout(0.3) -> Linear(512, num_classes)
    params['fc1_w'] = jax.random.normal(next(keys), (1024, 512), jnp.float32) * math.sqrt(1.0 / 1024)
    params['fc1_b'] = jnp.zeros((512,), jnp.float32)
    params['fc2_w'] = jax.random.normal(next(keys), (512, num_classes), jnp.float32) * math.sqrt(1.0 / 512)
    params['fc2_b'] = jnp.zeros((num_classes,), jnp.float32)
    return params


def _fold_bn(bn):
    scale = bn['gamma'] / jnp.sqrt(bn['var'] + BN_EPS)
    shift = bn['beta'] - bn['mean'] * scale
    return scale, shift


def _prep_conv(w_oihw, pre_bn=None, post_bn=None, k_pad=None):
    """One-time: transpose / zero-pad / cast conv weight to a (Kp, Np) bf16 matrix; fold the
    optional pre-activation BN (per input column) and epilogue BN (per output column).
    Only arrays are stored (flags encoded by key presence) so the dict can be a jit argument."""
    cout, cin, kh, kw = w_oihw.shape
    K, N = kh * kw * cin, cout
    Kp = _round_up(K, 128) if k_pad is None else k_pad
    Np = _round_up(N, 128)
    wmat = jnp.transpose(w_oihw, (2, 3, 1, 0)).reshape(K, N)     # rows ordered (kh, kw, Cin)
    wmat = jnp.pad(wmat, ((0, Kp - K), (0, Np - N))).astype(jnp.bfloat16)
    cp = {'w': wmat}
    if pre_bn is not None:
        s, b = _fold_bn(pre_bn)
        s, b = jnp.tile(s, kh * kw), jnp.tile(b, kh * kw)
        cp['pre_s'] = jnp.pad(s, (0, Kp - K)).reshape(1, Kp)
        cp['pre_b'] = jnp.pad(b, (0, Kp - K)).reshape(1, Kp)
    if post_bn is not None:
        s, b = _fold_bn(post_bn)
        cp['post_s'] = jnp.pad(s, (0, Np - N)).reshape(1, Np)
        cp['post_b'] = jnp.pad(b, (0, Np - N)).reshape(1, Np)
    return cp


def prepare_params(params):
    prep = {'conv0': _prep_conv(params['conv0'], post_bn=params['norm0'])}
    ch = NUM_INIT_FEATURES
    for bi, nlayers in enumerate(BLOCK_CONFIG):
        cf = ch + GROWTH * nlayers
        # All 1x1 bottlenecks in a block are K-padded to cf: the feature buffer's zero tail is
        # the K padding (no per-layer activation slicing) and every conv1 shares one kernel shape.
        prep[f'block{bi + 1}'] = [
            dict(conv1=_prep_conv(p['conv1'], pre_bn=p['norm1'], post_bn=p['norm2'], k_pad=cf),
                 conv2=_prep_conv(p['conv2']))
            for p in params[f'block{bi + 1}']]
        ch = cf
        if bi != len(BLOCK_CONFIG) - 1:
            t = params[f'trans{bi + 1}']
            prep[f'trans{bi + 1}'] = _prep_conv(t['conv'], pre_bn=t['norm'])
            ch //= 2
    s5, b5 = _fold_bn(params['norm5'])
    prep['norm5_s'] = s5.reshape(1, 1, -1)
    prep['norm5_b'] = b5.reshape(1, 1, -1)
    cpad = _round_up(NUM_CLASSES, 128) - NUM_CLASSES
    prep['head'] = dict(
        w1=params['fc1_w'].astype(jnp.bfloat16),
        b1=params['fc1_b'].reshape(1, -1),
        w2=jnp.pad(params['fc2_w'], ((0, 0), (0, cpad))).astype(jnp.bfloat16),
        b2=jnp.pad(params['fc2_b'], (0, cpad)).reshape(1, -1))
    return prep


# ----------------------------------------------------------------------------
# Forward pass (== XrayAnalyzer.forward in eval mode) — wrap in ONE jax.jit
# ----------------------------------------------------------------------------
def _dense_block(x_nhwc, layers):
    nb, h, w, c0 = x_nhwc.shape
    m = nb * h * w
    cf = c0 + GROWTH * len(layers)       # block's final channel count (multiple of 128)
    # Preallocated, channel-padded feature buffer: zero tail doubles as the K padding of every
    # layer's (cf-wide) 1x1 bottleneck; each layer writes only its 32 new channels (no concat).
    buf = jnp.zeros((m, cf), jnp.bfloat16)
    buf = lax.dynamic_update_slice(buf, x_nhwc.reshape(m, c0).astype(jnp.bfloat16), (0, 0))
    ch = c0
    for lp in layers:
        hbot = _apply_conv(buf, lp['conv1'])            # norm1+relu -> 1x1 conv -> norm2+relu
        cols, _, _ = _im2col(hbot.reshape(nb, h, w, BN_SIZE * GROWTH), 3, 3, 1, 1)
        newf = _apply_conv(cols, lp['conv2'], n_real=GROWTH)   # 3x3 conv -> 32 new channels
        buf = lax.dynamic_update_slice(buf, newf, (0, ch))
        ch += GROWTH
    return buf.reshape(nb, h, w, cf)


def _transition(x_nhwc, tp):
    nb, h, w, c = x_nhwc.shape
    y = _apply_conv(x_nhwc.reshape(nb * h * w, c), tp)      # norm+relu -> 1x1 conv (fused)
    return _avg_pool2(y.reshape(nb, h, w, c // 2))


def xray_analyzer_forward(prep, x_nchw):
    x = jnp.transpose(x_nchw, (0, 2, 3, 1)).astype(jnp.bfloat16)   # NCHW -> NHWC
    nb = x.shape[0]
    # Stem: conv0 (7x7 / stride 2) with fused norm0+relu0 epilogue, then 3x3/2 max pool (bf16)
    cols, ho, wo = _im2col(x, 7, 7, 2, 3)
    y = _apply_conv(cols, prep['conv0'], n_real=NUM_INIT_FEATURES)
    y = y.reshape(nb, ho, wo, NUM_INIT_FEATURES)
    y = _max_pool(y, 3, 2, 1)
    # Dense blocks + transitions
    for bi in range(len(BLOCK_CONFIG)):
        y = _dense_block(y, prep[f'block{bi + 1}'])
        if bi != len(BLOCK_CONFIG) - 1:
            y = _transition(y, prep[f'trans{bi + 1}'])
    # norm5 + ReLU + global average pool fused into one kernel -> (nb, 1024) f32 features
    nb2, h, w, c = y.shape
    feats = _norm5_gap_call(y.reshape(nb2, h * w, c), prep['norm5_s'], prep['norm5_b'])
    # Classifier head (Dropout is identity in eval mode)
    return _apply_head(feats, prep['head'])


# ----------------------------------------------------------------------------
if __name__ == "__main__":
    key = jax.random.PRNGKey(0)
    pkey, xkey = jax.random.split(key)
    params = init_params(pkey, num_classes=NUM_CLASSES)
    prep = prepare_params(params)
    # Minimum spatial size that survives DenseNet121's 5 downsamples is 32.
    x = jax.random.normal(xkey, (2, 3, 32, 32), jnp.float32)       # NCHW, like the PyTorch module
    fwd = jax.jit(xray_analyzer_forward)
    out = jax.block_until_ready(fwd(prep, x))
    assert out.shape == (2, NUM_CLASSES), out.shape
    assert bool(jnp.all(jnp.isfinite(out)))
    print("KERNEL_OK")
</pallas_src>

<mosaic_0001>
module attributes {stable_mosaic.version = 11 : i64} {
  func.func @_matmul_kernel(%arg0: i32, %arg1: i32, %arg2: i32, %arg3: memref<256x256xbf16, #tpu.memory_space<vmem>>, %arg4: memref<256x128xbf16, #tpu.memory_space<vmem>>, %arg5: memref<1x128xf32, #tpu.memory_space<vmem>>, %arg6: memref<1x128xf32, #tpu.memory_space<vmem>>, %arg7: memref<256x128xbf16, #tpu.memory_space<vmem>>, %arg8: memref<256x128xf32, #tpu.memory_space<vmem>>) attributes {dimension_semantics = [#tpu.dimension_semantics<parallel>, #tpu.dimension_semantics<parallel>, #tpu.dimension_semantics<arbitrary>], iteration_bounds = array<i64: 2, 1, 1>, scalar_prefetch = 0 : i64, scratch_operands = 1 : i64, tpu.core_type = #tpu.core_type<tc>, window_params = [{transform_indices = @transform_0, window_bounds = array<i64: 256, 256>}, {transform_indices = @transform_1, window_bounds = array<i64: 256, 128>}, {transform_indices = @transform_2, window_bounds = array<i64: 1, 128>}, {transform_indices = @transform_3, window_bounds = array<i64: 1, 128>}, {transform_indices = @transform_4, window_bounds = array<i64: 256, 128>}]} {
    %c0_i32 = arith.constant 0 : i32
    %0 = arith.cmpi eq, %arg2, %c0_i32 : i32
    %1 = arith.extui %0 : i1 to i32
    %c0_i32_0 = arith.constant 0 : i32
    %2 = arith.cmpi ne, %1, %c0_i32_0 : i32
    scf.if %2 {
      %cst_10 = arith.constant 0.000000e+00 : f32
      %12 = vector.broadcast %cst_10 : f32 to vector<256x128xf32>
      %c0_11 = arith.constant 0 : index
      %c0_12 = arith.constant 0 : index
      %13 = vector.load %arg8[%c0_11, %c0_12] : memref<256x128xf32, #tpu.memory_space<vmem>>, vector<256x128xf32>
      tpu.vector_store %arg8[%c0_11, %c0_12], %12 {strides = array<i32>} : memref<256x128xf32, #tpu.memory_space<vmem>>, vector<256x128xf32>,
    } else {
    }
    %c0 = arith.constant 0 : index
    %c0_1 = arith.constant 0 : index
    %3 = vector.load %arg3[%c0, %c0_1] : memref<256x256xbf16, #tpu.memory_space<vmem>>, vector<256x256xbf16>
    %c0_2 = arith.constant 0 : index
    %c0_3 = arith.constant 0 : index
    %4 = vector.load %arg8[%c0_2, %c0_3] : memref<256x128xf32, #tpu.memory_space<vmem>>, vector<256x128xf32>
    %c0_4 = arith.constant 0 : index
    %c0_5 = arith.constant 0 : index
    %5 = vector.load %arg4[%c0_4, %c0_5] : memref<256x128xbf16, #tpu.memory_space<vmem>>, vector<256x128xbf16>
    %cst = arith.constant dense<0.000000e+00> : vector<256x128xf32>
    %6 = tpu.matmul %3, %5, %cst {dimension_numbers = #tpu.dot_dimension_numbers<[1], [0], [0], [1], [0, 0, 1, 1], [], []>} : vector<256x256xbf16>, vector<256x128xbf16>, vector<256x128xf32> -> vector<256x128xf32>
    %7 = arith.addf %4, %6 : vector<256x128xf32>
    %c0_6 = arith.constant 0 : index
    %c0_7 = arith.constant 0 : index
    %8 = vector.load %arg8[%c0_6, %c0_7] : memref<256x128xf32, #tpu.memory_space<vmem>>, vector<256x128xf32>
    tpu.vector_store %arg8[%c0_6, %c0_7], %7 {strides = array<i32>} : memref<256x128xf32, #tpu.memory_space<vmem>>, vector<256x128xf32>,
    %c0_i32_8 = arith.constant 0 : i32
    %9 = arith.cmpi eq, %arg2, %c0_i32_8 : i32
    %10 = arith.extui %9 : i1 to i32
    %c0_i32_9 = arith.constant 0 : i32
    %11 = arith.cmpi ne, %10, %c0_i32_9 : i32
    scf.if %11 {
      %c0_10 = arith.constant 0 : index
      %c0_11 = arith.constant 0 : index
      %12 = vector.load %arg8[%c0_10, %c0_11] : memref<256x128xf32, #tpu.memory_space<vmem>>, vector<256x128xf32>
      %c0_12 = arith.constant 0 : index
      %c0_13 = arith.constant 0 : index
      %13 = vector.load %arg5[%c0_12, %c0_13] : memref<1x128xf32, #tpu.memory_space<vmem>>, vector<1x128xf32>
      %14 = vector.broadcast %13 : vector<1x128xf32> to vector<256x128xf32>
      %15 = arith.mulf %12, %14 : vector<256x128xf32>
      %c0_14 = arith.constant 0 : index
      %c0_15 = arith.constant 0 : index
      %16 = vector.load %arg6[%c0_14, %c0_15] : memref<1x128xf32, #tpu.memory_space<vmem>>, vector<1x128xf32>
      %17 = vector.broadcast %16 : vector<1x128xf32> to vector<256x128xf32>
      %18 = arith.addf %15, %17 : vector<256x128xf32>
      %cst_16 = arith.constant 0.000000e+00 : f32
      %19 = vector.broadcast %cst_16 : f32 to vector<256x128xf32>
      %20 = arith.maximumf %18, %19 : vector<256x128xf32>
      %21 = arith.truncf %20 : vector<256x128xf32> to vector<256x128xbf16>
      %c0_17 = arith.constant 0 : index
      %c0_18 = arith.constant 0 : index
      %22 = vector.load %arg7[%c0_17, %c0_18] : memref<256x128xbf16, #tpu.memory_space<vmem>>, vector<256x128xbf16>
      tpu.vector_store %arg7[%c0_17, %c0_18], %21 {strides = array<i32>} : memref<256x128xbf16, #tpu.memory_space<vmem>>, vector<256x128xbf16>,
    } else {
    }
    return
  }
  func.func @transform_0(%arg0: i32, %arg1: i32, %arg2: i32) -> (i32, i32) {
    %c0_i32 = arith.constant 0 : i32
    return %arg0, %arg2 : i32, i32
  }
  func.func @transform_1(%arg0: i32, %arg1: i32, %arg2: i32) -> (i32, i32) {
    %c0_i32 = arith.constant 0 : i32
    return %arg2, %arg1 : i32, i32
  }
  func.func @transform_2(%arg0: i32, %arg1: i32, %arg2: i32) -> (i32, i32) {
    %c0_i32 = arith.constant 0 : i32
    %c0_i32_0 = arith.constant 0 : i32
    return %c0_i32, %arg1 : i32, i32
  }
  func.func @transform_3(%arg0: i32, %arg1: i32, %arg2: i32) -> (i32, i32) {
    %c0_i32 = arith.constant 0 : i32
    %c0_i32_0 = arith.constant 0 : i32
    return %c0_i32, %arg1 : i32, i32
  }
  func.func @transform_4(%arg0: i32, %arg1: i32, %arg2: i32) -> (i32, i32) {
    %c0_i32 = arith.constant 0 : i32
    return %arg0, %arg1 : i32, i32
  }
}

module attributes {stable_mosaic.version = 11 : i64} {
  func.func @_matmul_kernel(%arg0: i32, %arg1: i32, %arg2: i32, %arg3: memref<64x256xbf16, #tpu.memory_space<vmem>>, %arg4: memref<256x128xbf16, #tpu.memory_space<vmem>>, %arg5: memref<1x256xf32, #tpu.memory_space<vmem>>, %arg6: memref<1x256xf32, #tpu.memory_space<vmem>>, %arg7: memref<1x128xf32, #tpu.memory_space<vmem>>, %arg8: memref<1x128xf32, #tpu.memory_space<vmem>>, %arg9: memref<64x128xbf16, #tpu.memory_space<vmem>>, %arg10: memref<64x128xf32, #tpu.memory_space<vmem>>) attributes {dimension_semantics = [#tpu.dimension_semantics<parallel>, #tpu.dimension_semantics<parallel>, #tpu.dimension_semantics<arbitrary>], iteration_bounds = array<i64: 2, 1, 1>, scalar_prefetch = 0 : i64, scratch_operands = 1 : i64, tpu.core_type = #tpu.core_type<tc>, window_params = [{transform_indices = @transform_0, window_bounds = array<i64: 64, 256>}, {transform_indices = @transform_1, window_bounds = array<i64: 256, 128>}, {transform_indices = @transform_2, window_bounds = array<i64: 1, 256>}, {transform_indices = @transform_3, window_bounds = array<i64: 1, 256>}, {transform_indices = @transform_4, window_bounds = array<i64: 1, 128>}, {transform_indices = @transform_5, window_bounds = array<i64: 1, 128>}, {transform_indices = @transform_6, window_bounds = array<i64: 64, 128>}]} {
    %c0_i32 = arith.constant 0 : i32
    %0 = arith.cmpi eq, %arg2, %c0_i32 : i32
    %1 = arith.extui %0 : i1 to i32
    %c0_i32_0 = arith.constant 0 : i32
    %2 = arith.cmpi ne, %1, %c0_i32_0 : i32
    scf.if %2 {
      %cst_15 = arith.constant 0.000000e+00 : f32
      %22 = vector.broadcast %cst_15 : f32 to vector<64x128xf32>
      %c0_16 = arith.constant 0 : index
      %c0_17 = arith.constant 0 : index
      %23 = vector.load %arg10[%c0_16, %c0_17] : memref<64x128xf32, #tpu.memory_space<vmem>>, vector<64x128xf32>
      tpu.vector_store %arg10[%c0_16, %c0_17], %22 {strides = array<i32>} : memref<64x128xf32, #tpu.memory_space<vmem>>, vector<64x128xf32>,
    } else {
    }
    %c0 = arith.constant 0 : index
    %c0_1 = arith.constant 0 : index
    %3 = vector.load %arg3[%c0, %c0_1] : memref<64x256xbf16, #tpu.memory_space<vmem>>, vector<64x256xbf16>
    %4 = arith.extf %3 : vector<64x256xbf16> to vector<64x256xf32>
    %c0_2 = arith.constant 0 : index
    %c0_3 = arith.constant 0 : index
    %5 = vector.load %arg5[%c0_2, %c0_3] : memref<1x256xf32, #tpu.memory_space<vmem>>, vector<1x256xf32>
    %6 = vector.broadcast %5 : vector<1x256xf32> to vector<64x256xf32>
    %7 = arith.mulf %4, %6 : vector<64x256xf32>
    %c0_4 = arith.constant 0 : index
    %c0_5 = arith.constant 0 : index
    %8 = vector.load %arg6[%c0_4, %c0_5] : memref<1x256xf32, #tpu.memory_space<vmem>>, vector<1x256xf32>
    %9 = vector.broadcast %8 : vector<1x256xf32> to vector<64x256xf32>
    %10 = arith.addf %7, %9 : vector<64x256xf32>
    %cst = arith.constant 0.000000e+00 : f32
    %11 = vector.broadcast %cst : f32 to vector<64x256xf32>
    %12 = arith.maximumf %10, %11 : vector<64x256xf32>
    %13 = arith.truncf %12 : vector<64x256xf32> to vector<64x256xbf16>
    %c0_6 = arith.constant 0 : index
    %c0_7 = arith.constant 0 : index
    %14 = vector.load %arg10[%c0_6, %c0_7] : memref<64x128xf32, #tpu.memory_space<vmem>>, vector<64x128xf32>
    %c0_8 = arith.constant 0 : index
    %c0_9 = arith.constant 0 : index
    %15 = vector.load %arg4[%c0_8, %c0_9] : memref<256x128xbf16, #tpu.memory_space<vmem>>, vector<256x128xbf16>
    %cst_10 = arith.constant dense<0.000000e+00> : vector<64x128xf32>
    %16 = tpu.matmul %13, %15, %cst_10 {dimension_numbers = #tpu.dot_dimension_numbers<[1], [0], [0], [1], [0, 0, 1, 1], [], []>} : vector<64x256xbf16>, vector<256x128xbf16>, vector<64x128xf32> -> vector<64x128xf32>
    %17 = arith.addf %14, %16 : vector<64x128xf32>
    %c0_11 = arith.constant 0 : index
    %c0_12 = arith.constant 0 : index
    %18 = vector.load %arg10[%c0_11, %c0_12] : memref<64x128xf32, #tpu.memory_space<vmem>>, vector<64x128xf32>
    tpu.vector_store %arg10[%c0_11, %c0_12], %17 {strides = array<i32>} : memref<64x128xf32, #tpu.memory_space<vmem>>, vector<64x128xf32>,
    %c0_i32_13 = arith.constant 0 : i32
    %19 = arith.cmpi eq, %arg2, %c0_i32_13 : i32
    %20 = arith.extui %19 : i1 to i32
    %c0_i32_14 = arith.constant 0 : i32
    %21 = arith.cmpi ne, %20, %c0_i32_14 : i32
    scf.if %21 {
      %c0_15 = arith.constant 0 : index
      %c0_16 = arith.constant 0 : index
      %22 = vector.load %arg10[%c0_15, %c0_16] : memref<64x128xf32, #tpu.memory_space<vmem>>, vector<64x128xf32>
      %c0_17 = arith.constant 0 : index
      %c0_18 = arith.constant 0 : index
      %23 = vector.load %arg7[%c0_17, %c0_18] : memref<1x128xf32, #tpu.memory_space<vmem>>, vector<1x128xf32>
      %24 = vector.broadcast %23 : vector<1x128xf32> to vector<64x128xf32>
      %25 = arith.mulf %22, %24 : vector<64x128xf32>
      %c0_19 = arith.constant 0 : index
      %c0_20 = arith.constant 0 : index
      %26 = vector.load %arg8[%c0_19, %c0_20] : memref<1x128xf32, #tpu.memory_space<vmem>>, vector<1x128xf32>
      %27 = vector.broadcast %26 : vector<1x128xf32> to vector<64x128xf32>
      %28 = arith.addf %25, %27 : vector<64x128xf32>
      %cst_21 = arith.constant 0.000000e+00 : f32
      %29 = vector.broadcast %cst_21 : f32 to vector<64x128xf32>
      %30 = arith.maximumf %28, %29 : vector<64x128xf32>
      %31 = arith.truncf %30 : vector<64x128xf32> to vector<64x128xbf16>
      %c0_22 = arith.constant 0 : index
      %c0_23 = arith.constant 0 : index
      %32 = vector.load %arg9[%c0_22, %c0_23] : memref<64x128xbf16, #tpu.memory_space<vmem>>, vector<64x128xbf16>
      tpu.vector_store %arg9[%c0_22, %c0_23], %31 {strides = array<i32>} : memref<64x128xbf16, #tpu.memory_space<vmem>>, vector<64x128xbf16>,
    } else {
    }
    return
  }
  func.func @transform_0(%arg0: i32, %arg1: i32, %arg2: i32) -> (i32, i32) {
    %c0_i32 = arith.constant 0 : i32
    return %arg0, %arg2 : i32, i32
  }
  func.func @transform_1(%arg0: i32, %arg1: i32, %arg2: i32) -> (i32, i32) {
    %c0_i32 = arith.constant 0 : i32
    return %arg2, %arg1 : i32, i32
  }
  func.func @transform_2(%arg0: i32, %arg1: i32, %arg2: i32) -> (i32, i32) {
    %c0_i32 = arith.constant 0 : i32
    %c0_i32_0 = arith.constant 0 : i32
    return %c0_i32, %arg2 : i32, i32
  }
  func.func @transform_3(%arg0: i32, %arg1: i32, %arg2: i32) -> (i32, i32) {
    %c0_i32 = arith.constant 0 : i32
    %c0_i32_0 = arith.constant 0 : i32
    return %c0_i32, %arg2 : i32, i32
  }
  func.func @transform_4(%arg0: i32, %arg1: i32, %arg2: i32) -> (i32, i32) {
    %c0_i32 = arith.constant 0 : i32
    %c0_i32_0 = arith.constant 0 : i32
    return %c0_i32, %arg1 : i32, i32
  }
  func.func @transform_5(%arg0: i32, %arg1: i32, %arg2: i32) -> (i32, i32) {
    %c0_i32 = arith.constant 0 : i32
    %c0_i32_0 = arith.constant 0 : i32
    return %c0_i32, %arg1 : i32, i32
  }
  func.func @transform_6(%arg0: i32, %arg1: i32, %arg2: i32) -> (i32, i32) {
    %c0_i32 = arith.constant 0 : i32
    return %arg0, %arg1 : i32, i32
  }
}

module attributes {stable_mosaic.version = 11 : i64} {
  func.func @_matmul_kernel(%arg0: i32, %arg1: i32, %arg2: i32, %arg3: memref<64x1152xbf16, #tpu.memory_space<vmem>>, %arg4: memref<1152x128xbf16, #tpu.memory_space<vmem>>, %arg5: memref<64x128xbf16, #tpu.memory_space<vmem>>, %arg6: memref<64x128xf32, #tpu.memory_space<vmem>>) attributes {dimension_semantics = [#tpu.dimension_semantics<parallel>, #tpu.dimension_semantics<parallel>, #tpu.dimension_semantics<arbitrary>], iteration_bounds = array<i64: 2, 1, 1>, scalar_prefetch = 0 : i64, scratch_operands = 1 : i64, tpu.core_type = #tpu.core_type<tc>, window_params = [{transform_indices = @transform_0, window_bounds = array<i64: 64, 1152>}, {transform_indices = @transform_1, window_bounds = array<i64: 1152, 128>}, {transform_indices = @transform_2, window_bounds = array<i64: 64, 128>}]} {
    %c0_i32 = arith.constant 0 : i32
    %0 = arith.cmpi eq, %arg2, %c0_i32 : i32
    %1 = arith.extui %0 : i1 to i32
    %c0_i32_0 = arith.constant 0 : i32
    %2 = arith.cmpi ne, %1, %c0_i32_0 : i32
    scf.if %2 {
      %cst_10 = arith.constant 0.000000e+00 : f32
      %12 = vector.broadcast %cst_10 : f32 to vector<64x128xf32>
      %c0_11 = arith.constant 0 : index
      %c0_12 = arith.constant 0 : index
      %13 = vector.load %arg6[%c0_11, %c0_12] : memref<64x128xf32, #tpu.memory_space<vmem>>, vector<64x128xf32>
      tpu.vector_store %arg6[%c0_11, %c0_12], %12 {strides = array<i32>} : memref<64x128xf32, #tpu.memory_space<vmem>>, vector<64x128xf32>,
    } else {
    }
    %c0 = arith.constant 0 : index
    %c0_1 = arith.constant 0 : index
    %3 = vector.load %arg3[%c0, %c0_1] : memref<64x1152xbf16, #tpu.memory_space<vmem>>, vector<64x1152xbf16>
    %c0_2 = arith.constant 0 : index
    %c0_3 = arith.constant 0 : index
    %4 = vector.load %arg6[%c0_2, %c0_3] : memref<64x128xf32, #tpu.memory_space<vmem>>, vector<64x128xf32>
    %c0_4 = arith.constant 0 : index
    %c0_5 = arith.constant 0 : index
    %5 = vector.load %arg4[%c0_4, %c0_5] : memref<1152x128xbf16, #tpu.memory_space<vmem>>, vector<1152x128xbf16>
    %cst = arith.constant dense<0.000000e+00> : vector<64x128xf32>
    %6 = tpu.matmul %3, %5, %cst {dimension_numbers = #tpu.dot_dimension_numbers<[1], [0], [0], [1], [0, 0, 1, 1], [], []>} : vector<64x1152xbf16>, vector<1152x128xbf16>, vector<64x128xf32> -> vector<64x128xf32>
    %7 = arith.addf %4, %6 : vector<64x128xf32>
    %c0_6 = arith.constant 0 : index
    %c0_7 = arith.constant 0 : index
    %8 = vector.load %arg6[%c0_6, %c0_7] : memref<64x128xf32, #tpu.memory_space<vmem>>, vector<64x128xf32>
    tpu.vector_store %arg6[%c0_6, %c0_7], %7 {strides = array<i32>} : memref<64x128xf32, #tpu.memory_space<vmem>>, vector<64x128xf32>,
    %c0_i32_8 = arith.constant 0 : i32
    %9 = arith.cmpi eq, %arg2, %c0_i32_8 : i32
    %10 = arith.extui %9 : i1 to i32
    %c0_i32_9 = arith.constant 0 : i32
    %11 = arith.cmpi ne, %10, %c0_i32_9 : i32
    scf.if %11 {
      %c0_10 = arith.constant 0 : index
      %c0_11 = arith.constant 0 : index
      %12 = vector.load %arg6[%c0_10, %c0_11] : memref<64x128xf32, #tpu.memory_space<vmem>>, vector<64x128xf32>
      %13 = arith.truncf %12 : vector<64x128xf32> to vector<64x128xbf16>
      %c0_12 = arith.constant 0 : index
      %c0_13 = arith.constant 0 : index
      %14 = vector.load %arg5[%c0_12, %c0_13] : memref<64x128xbf16, #tpu.memory_space<vmem>>, vector<64x128xbf16>
      tpu.vector_store %arg5[%c0_12, %c0_13], %13 {strides = array<i32>} : memref<64x128xbf16, #tpu.memory_space<vmem>>, vector<64x128xbf16>,
    } else {
    }
    return
  }
  func.func @transform_0(%arg0: i32, %arg1: i32, %arg2: i32) -> (i32, i32) {
    %c0_i32 = arith.constant 0 : i32
    return %arg0, %arg2 : i32, i32
  }
  func.func @transform_1(%arg0: i32, %arg1: i32, %arg2: i32) -> (i32, i32) {
    %c0_i32 = arith.constant 0 : i32
    return %arg2, %arg1 : i32, i32
  }
  func.func @transform_2(%arg0: i32, %arg1: i32, %arg2: i32) -> (i32, i32) {
    %c0_i32 = arith.constant 0 : i32
    return %arg0, %arg1 : i32, i32
  }
}

module attributes {stable_mosaic.version = 11 : i64} {
  func.func @_matmul_kernel(%arg0: i32, %arg1: i32, %arg2: i32, %arg3: memref<64x256xbf16, #tpu.memory_space<vmem>>, %arg4: memref<256x128xbf16, #tpu.memory_space<vmem>>, %arg5: memref<1x256xf32, #tpu.memory_space<vmem>>, %arg6: memref<1x256xf32, #tpu.memory_space<vmem>>, %arg7: memref<64x128xbf16, #tpu.memory_space<vmem>>, %arg8: memref<64x128xf32, #tpu.memory_space<vmem>>) attributes {dimension_semantics = [#tpu.dimension_semantics<parallel>, #tpu.dimension_semantics<parallel>, #tpu.dimension_semantics<arbitrary>], iteration_bounds = array<i64: 2, 1, 1>, scalar_prefetch = 0 : i64, scratch_operands = 1 : i64, tpu.core_type = #tpu.core_type<tc>, window_params = [{transform_indices = @transform_0, window_bounds = array<i64: 64, 256>}, {transform_indices = @transform_1, window_bounds = array<i64: 256, 128>}, {transform_indices = @transform_2, window_bounds = array<i64: 1, 256>}, {transform_indices = @transform_3, window_bounds = array<i64: 1, 256>}, {transform_indices = @transform_4, window_bounds = array<i64: 64, 128>}]} {
    %c0_i32 = arith.constant 0 : i32
    %0 = arith.cmpi eq, %arg2, %c0_i32 : i32
    %1 = arith.extui %0 : i1 to i32
    %c0_i32_0 = arith.constant 0 : i32
    %2 = arith.cmpi ne, %1, %c0_i32_0 : i32
    scf.if %2 {
      %cst_15 = arith.constant 0.000000e+00 : f32
      %22 = vector.broadcast %cst_15 : f32 to vector<64x128xf32>
      %c0_16 = arith.constant 0 : index
      %c0_17 = arith.constant 0 : index
      %23 = vector.load %arg8[%c0_16, %c0_17] : memref<64x128xf32, #tpu.memory_space<vmem>>, vector<64x128xf32>
      tpu.vector_store %arg8[%c0_16, %c0_17], %22 {strides = array<i32>} : memref<64x128xf32, #tpu.memory_space<vmem>>, vector<64x128xf32>,
    } else {
    }
    %c0 = arith.constant 0 : index
    %c0_1 = arith.constant 0 : index
    %3 = vector.load %arg3[%c0, %c0_1] : memref<64x256xbf16, #tpu.memory_space<vmem>>, vector<64x256xbf16>
    %4 = arith.extf %3 : vector<64x256xbf16> to vector<64x256xf32>
    %c0_2 = arith.constant 0 : index
    %c0_3 = arith.constant 0 : index
    %5 = vector.load %arg5[%c0_2, %c0_3] : memref<1x256xf32, #tpu.memory_space<vmem>>, vector<1x256xf32>
    %6 = vector.broadcast %5 : vector<1x256xf32> to vector<64x256xf32>
    %7 = arith.mulf %4, %6 : vector<64x256xf32>
    %c0_4 = arith.constant 0 : index
    %c0_5 = arith.constant 0 : index
    %8 = vector.load %arg6[%c0_4, %c0_5] : memref<1x256xf32, #tpu.memory_space<vmem>>, vector<1x256xf32>
    %9 = vector.broadcast %8 : vector<1x256xf32> to vector<64x256xf32>
    %10 = arith.addf %7, %9 : vector<64x256xf32>
    %cst = arith.constant 0.000000e+00 : f32
    %11 = vector.broadcast %cst : f32 to vector<64x256xf32>
    %12 = arith.maximumf %10, %11 : vector<64x256xf32>
    %13 = arith.truncf %12 : vector<64x256xf32> to vector<64x256xbf16>
    %c0_6 = arith.constant 0 : index
    %c0_7 = arith.constant 0 : index
    %14 = vector.load %arg8[%c0_6, %c0_7] : memref<64x128xf32, #tpu.memory_space<vmem>>, vector<64x128xf32>
    %c0_8 = arith.constant 0 : index
    %c0_9 = arith.constant 0 : index
    %15 = vector.load %arg4[%c0_8, %c0_9] : memref<256x128xbf16, #tpu.memory_space<vmem>>, vector<256x128xbf16>
    %cst_10 = arith.constant dense<0.000000e+00> : vector<64x128xf32>
    %16 = tpu.matmul %13, %15, %cst_10 {dimension_numbers = #tpu.dot_dimension_numbers<[1], [0], [0], [1], [0, 0, 1, 1], [], []>} : vector<64x256xbf16>, vector<256x128xbf16>, vector<64x128xf32> -> vector<64x128xf32>
    %17 = arith.addf %14, %16 : vector<64x128xf32>
    %c0_11 = arith.constant 0 : index
    %c0_12 = arith.constant 0 : index
    %18 = vector.load %arg8[%c0_11, %c0_12] : memref<64x128xf32, #tpu.memory_space<vmem>>, vector<64x128xf32>
    tpu.vector_store %arg8[%c0_11, %c0_12], %17 {strides = array<i32>} : memref<64x128xf32, #tpu.memory_space<vmem>>, vector<64x128xf32>,
    %c0_i32_13 = arith.constant 0 : i32
    %19 = arith.cmpi eq, %arg2, %c0_i32_13 : i32
    %20 = arith.extui %19 : i1 to i32
    %c0_i32_14 = arith.constant 0 : i32
    %21 = arith.cmpi ne, %20, %c0_i32_14 : i32
    scf.if %21 {
      %c0_15 = arith.constant 0 : index
      %c0_16 = arith.constant 0 : index
      %22 = vector.load %arg8[%c0_15, %c0_16] : memref<64x128xf32, #tpu.memory_space<vmem>>, vector<64x128xf32>
      %23 = arith.truncf %22 : vector<64x128xf32> to vector<64x128xbf16>
      %c0_17 = arith.constant 0 : index
      %c0_18 = arith.constant 0 : index
      %24 = vector.load %arg7[%c0_17, %c0_18] : memref<64x128xbf16, #tpu.memory_space<vmem>>, vector<64x128xbf16>
      tpu.vector_store %arg7[%c0_17, %c0_18], %23 {strides = array<i32>} : memref<64x128xbf16, #tpu.memory_space<vmem>>, vector<64x128xbf16>,
    } else {
    }
    return
  }
  func.func @transform_0(%arg0: i32, %arg1: i32, %arg2: i32) -> (i32, i32) {
    %c0_i32 = arith.constant 0 : i32
    return %arg0, %arg2 : i32, i32
  }
  func.func @transform_1(%arg0: i32, %arg1: i32, %arg2: i32) -> (i32, i32) {
    %c0_i32 = arith.constant 0 : i32
    return %arg2, %arg1 : i32, i32
  }
  func.func @transform_2(%arg0: i32, %arg1: i32, %arg2: i32) -> (i32, i32) {
    %c0_i32 = arith.constant 0 : i32
    %c0_i32_0 = arith.constant 0 : i32
    return %c0_i32, %arg2 : i32, i32
  }
  func.func @transform_3(%arg0: i32, %arg1: i32, %arg2: i32) -> (i32, i32) {
    %c0_i32 = arith.constant 0 : i32
    %c0_i32_0 = arith.constant 0 : i32
    return %c0_i32, %arg2 : i32, i32
  }
  func.func @transform_4(%arg0: i32, %arg1: i32, %arg2: i32) -> (i32, i32) {
    %c0_i32 = arith.constant 0 : i32
    return %arg0, %arg1 : i32, i32
  }
}

module attributes {stable_mosaic.version = 11 : i64} {
  func.func @_matmul_kernel(%arg0: i32, %arg1: i32, %arg2: i32, %arg3: memref<16x512xbf16, #tpu.memory_space<vmem>>, %arg4: memref<512x128xbf16, #tpu.memory_space<vmem>>, %arg5: memref<1x512xf32, #tpu.memory_space<vmem>>, %arg6: memref<1x512xf32, #tpu.memory_space<vmem>>, %arg7: memref<1x128xf32, #tpu.memory_space<vmem>>, %arg8: memref<1x128xf32, #tpu.memory_space<vmem>>, %arg9: memref<16x128xbf16, #tpu.memory_space<vmem>>, %arg10: memref<16x128xf32, #tpu.memory_space<vmem>>) attributes {dimension_semantics = [#tpu.dimension_semantics<parallel>, #tpu.dimension_semantics<parallel>, #tpu.dimension_semantics<arbitrary>], iteration_bounds = array<i64: 2, 1, 1>, scalar_prefetch = 0 : i64, scratch_operands = 1 : i64, tpu.core_type = #tpu.core_type<tc>, window_params = [{transform_indices = @transform_0, window_bounds = array<i64: 16, 512>}, {transform_indices = @transform_1, window_bounds = array<i64: 512, 128>}, {transform_indices = @transform_2, window_bounds = array<i64: 1, 512>}, {transform_indices = @transform_3, window_bounds = array<i64: 1, 512>}, {transform_indices = @transform_4, window_bounds = array<i64: 1, 128>}, {transform_indices = @transform_5, window_bounds = array<i64: 1, 128>}, {transform_indices = @transform_6, window_bounds = array<i64: 16, 128>}]} {
    %c0_i32 = arith.constant 0 : i32
    %0 = arith.cmpi eq, %arg2, %c0_i32 : i32
    %1 = arith.extui %0 : i1 to i32
    %c0_i32_0 = arith.constant 0 : i32
    %2 = arith.cmpi ne, %1, %c0_i32_0 : i32
    scf.if %2 {
      %cst_15 = arith.constant 0.000000e+00 : f32
      %22 = vector.broadcast %cst_15 : f32 to vector<16x128xf32>
      %c0_16 = arith.constant 0 : index
      %c0_17 = arith.constant 0 : index
      %23 = vector.load %arg10[%c0_16, %c0_17] : memref<16x128xf32, #tpu.memory_space<vmem>>, vector<16x128xf32>
      tpu.vector_store %arg10[%c0_16, %c0_17], %22 {strides = array<i32>} : memref<16x128xf32, #tpu.memory_space<vmem>>, vector<16x128xf32>,
    } else {
    }
    %c0 = arith.constant 0 : index
    %c0_1 = arith.constant 0 : index
    %3 = vector.load %arg3[%c0, %c0_1] : memref<16x512xbf16, #tpu.memory_space<vmem>>, vector<16x512xbf16>
    %4 = arith.extf %3 : vector<16x512xbf16> to vector<16x512xf32>
    %c0_2 = arith.constant 0 : index
    %c0_3 = arith.constant 0 : index
    %5 = vector.load %arg5[%c0_2, %c0_3] : memref<1x512xf32, #tpu.memory_space<vmem>>, vector<1x512xf32>
    %6 = vector.broadcast %5 : vector<1x512xf32> to vector<16x512xf32>
    %7 = arith.mulf %4, %6 : vector<16x512xf32>
    %c0_4 = arith.constant 0 : index
    %c0_5 = arith.constant 0 : index
    %8 = vector.load %arg6[%c0_4, %c0_5] : memref<1x512xf32, #tpu.memory_space<vmem>>, vector<1x512xf32>
    %9 = vector.broadcast %8 : vector<1x512xf32> to vector<16x512xf32>
    %10 = arith.addf %7, %9 : vector<16x512xf32>
    %cst = arith.constant 0.000000e+00 : f32
    %11 = vector.broadcast %cst : f32 to vector<16x512xf32>
    %12 = arith.maximumf %10, %11 : vector<16x512xf32>
    %13 = arith.truncf %12 : vector<16x512xf32> to vector<16x512xbf16>
    %c0_6 = arith.constant 0 : index
    %c0_7 = arith.constant 0 : index
    %14 = vector.load %arg10[%c0_6, %c0_7] : memref<16x128xf32, #tpu.memory_space<vmem>>, vector<16x128xf32>
    %c0_8 = arith.constant 0 : index
    %c0_9 = arith.constant 0 : index
    %15 = vector.load %arg4[%c0_8, %c0_9] : memref<512x128xbf16, #tpu.memory_space<vmem>>, vector<512x128xbf16>
    %cst_10 = arith.constant dense<0.000000e+00> : vector<16x128xf32>
    %16 = tpu.matmul %13, %15, %cst_10 {dimension_numbers = #tpu.dot_dimension_numbers<[1], [0], [0], [1], [0, 0, 1, 1], [], []>} : vector<16x512xbf16>, vector<512x128xbf16>, vector<16x128xf32> -> vector<16x128xf32>
    %17 = arith.addf %14, %16 : vector<16x128xf32>
    %c0_11 = arith.constant 0 : index
    %c0_12 = arith.constant 0 : index
    %18 = vector.load %arg10[%c0_11, %c0_12] : memref<16x128xf32, #tpu.memory_space<vmem>>, vector<16x128xf32>
    tpu.vector_store %arg10[%c0_11, %c0_12], %17 {strides = array<i32>} : memref<16x128xf32, #tpu.memory_space<vmem>>, vector<16x128xf32>,
    %c0_i32_13 = arith.constant 0 : i32
    %19 = arith.cmpi eq, %arg2, %c0_i32_13 : i32
    %20 = arith.extui %19 : i1 to i32
    %c0_i32_14 = arith.constant 0 : i32
    %21 = arith.cmpi ne, %20, %c0_i32_14 : i32
    scf.if %21 {
      %c0_15 = arith.constant 0 : index
      %c0_16 = arith.constant 0 : index
      %22 = vector.load %arg10[%c0_15, %c0_16] : memref<16x128xf32, #tpu.memory_space<vmem>>, vector<16x128xf32>
      %c0_17 = arith.constant 0 : index
      %c0_18 = arith.constant 0 : index
      %23 = vector.load %arg7[%c0_17, %c0_18] : memref<1x128xf32, #tpu.memory_space<vmem>>, vector<1x128xf32>
      %24 = vector.broadcast %23 : vector<1x128xf32> to vector<16x128xf32>
      %25 = arith.mulf %22, %24 : vector<16x128xf32>
      %c0_19 = arith.constant 0 : index
      %c0_20 = arith.constant 0 : index
      %26 = vector.load %arg8[%c0_19, %c0_20] : memref<1x128xf32, #tpu.memory_space<vmem>>, vector<1x128xf32>
      %27 = vector.broadcast %26 : vector<1x128xf32> to vector<16x128xf32>
      %28 = arith.addf %25, %27 : vector<16x128xf32>
      %cst_21 = arith.constant 0.000000e+00 : f32
      %29 = vector.broadcast %cst_21 : f32 to vector<16x128xf32>
      %30 = arith.maximumf %28, %29 : vector<16x128xf32>
      %31 = arith.truncf %30 : vector<16x128xf32> to vector<16x128xbf16>
      %c0_22 = arith.constant 0 : index
      %c0_23 = arith.constant 0 : index
      %32 = vector.load %arg9[%c0_22, %c0_23] : memref<16x128xbf16, #tpu.memory_space<vmem>>, vector<16x128xbf16>
      tpu.vector_store %arg9[%c0_22, %c0_23], %31 {strides = array<i32>} : memref<16x128xbf16, #tpu.memory_space<vmem>>, vector<16x128xbf16>,
    } else {
    }
    return
  }
  func.func @transform_0(%arg0: i32, %arg1: i32, %arg2: i32) -> (i32, i32) {
    %c0_i32 = arith.constant 0 : i32
    return %arg0, %arg2 : i32, i32
  }
  func.func @transform_1(%arg0: i32, %arg1: i32, %arg2: i32) -> (i32, i32) {
    %c0_i32 = arith.constant 0 : i32
    return %arg2, %arg1 : i32, i32
  }
  func.func @transform_2(%arg0: i32, %arg1: i32, %arg2: i32) -> (i32, i32) {
    %c0_i32 = arith.constant 0 : i32
    %c0_i32_0 = arith.constant 0 : i32
    return %c0_i32, %arg2 : i32, i32
  }
  func.func @transform_3(%arg0: i32, %arg1: i32, %arg2: i32) -> (i32, i32) {
    %c0_i32 = arith.constant 0 : i32
    %c0_i32_0 = arith.constant 0 : i32
    return %c0_i32, %arg2 : i32, i32
  }
  func.func @transform_4(%arg0: i32, %arg1: i32, %arg2: i32) -> (i32, i32) {
    %c0_i32 = arith.constant 0 : i32
    %c0_i32_0 = arith.constant 0 : i32
    return %c0_i32, %arg1 : i32, i32
  }
  func.func @transform_5(%arg0: i32, %arg1: i32, %arg2: i32) -> (i32, i32) {
    %c0_i32 = arith.constant 0 : i32
    %c0_i32_0 = arith.constant 0 : i32
    return %c0_i32, %arg1 : i32, i32
  }
  func.func @transform_6(%arg0: i32, %arg1: i32, %arg2: i32) -> (i32, i32) {
    %c0_i32 = arith.constant 0 : i32
    return %arg0, %arg1 : i32, i32
  }
}

module attributes {stable_mosaic.version = 11 : i64} {
  func.func @_matmul_kernel(%arg0: i32, %arg1: i32, %arg2: i32, %arg3: memref<16x1152xbf16, #tpu.memory_space<vmem>>, %arg4: memref<1152x128xbf16, #tpu.memory_space<vmem>>, %arg5: memref<16x128xbf16, #tpu.memory_space<vmem>>, %arg6: memref<16x128xf32, #tpu.memory_space<vmem>>) attributes {dimension_semantics = [#tpu.dimension_semantics<parallel>, #tpu.dimension_semantics<parallel>, #tpu.dimension_semantics<arbitrary>], iteration_bounds = array<i64: 2, 1, 1>, scalar_prefetch = 0 : i64, scratch_operands = 1 : i64, tpu.core_type = #tpu.core_type<tc>, window_params = [{transform_indices = @transform_0, window_bounds = array<i64: 16, 1152>}, {transform_indices = @transform_1, window_bounds = array<i64: 1152, 128>}, {transform_indices = @transform_2, window_bounds = array<i64: 16, 128>}]} {
    %c0_i32 = arith.constant 0 : i32
    %0 = arith.cmpi eq, %arg2, %c0_i32 : i32
    %1 = arith.extui %0 : i1 to i32
    %c0_i32_0 = arith.constant 0 : i32
    %2 = arith.cmpi ne, %1, %c0_i32_0 : i32
    scf.if %2 {
      %cst_10 = arith.constant 0.000000e+00 : f32
      %12 = vector.broadcast %cst_10 : f32 to vector<16x128xf32>
      %c0_11 = arith.constant 0 : index
      %c0_12 = arith.constant 0 : index
      %13 = vector.load %arg6[%c0_11, %c0_12] : memref<16x128xf32, #tpu.memory_space<vmem>>, vector<16x128xf32>
      tpu.vector_store %arg6[%c0_11, %c0_12], %12 {strides = array<i32>} : memref<16x128xf32, #tpu.memory_space<vmem>>, vector<16x128xf32>,
    } else {
    }
    %c0 = arith.constant 0 : index
    %c0_1 = arith.constant 0 : index
    %3 = vector.load %arg3[%c0, %c0_1] : memref<16x1152xbf16, #tpu.memory_space<vmem>>, vector<16x1152xbf16>
    %c0_2 = arith.constant 0 : index
    %c0_3 = arith.constant 0 : index
    %4 = vector.load %arg6[%c0_2, %c0_3] : memref<16x128xf32, #tpu.memory_space<vmem>>, vector<16x128xf32>
    %c0_4 = arith.constant 0 : index
    %c0_5 = arith.constant 0 : index
    %5 = vector.load %arg4[%c0_4, %c0_5] : memref<1152x128xbf16, #tpu.memory_space<vmem>>, vector<1152x128xbf16>
    %cst = arith.constant dense<0.000000e+00> : vector<16x128xf32>
    %6 = tpu.matmul %3, %5, %cst {dimension_numbers = #tpu.dot_dimension_numbers<[1], [0], [0], [1], [0, 0, 1, 1], [], []>} : vector<16x1152xbf16>, vector<1152x128xbf16>, vector<16x128xf32> -> vector<16x128xf32>
    %7 = arith.addf %4, %6 : vector<16x128xf32>
    %c0_6 = arith.constant 0 : index
    %c0_7 = arith.constant 0 : index
    %8 = vector.load %arg6[%c0_6, %c0_7] : memref<16x128xf32, #tpu.memory_space<vmem>>, vector<16x128xf32>
    tpu.vector_store %arg6[%c0_6, %c0_7], %7 {strides = array<i32>} : memref<16x128xf32, #tpu.memory_space<vmem>>, vector<16x128xf32>,
    %c0_i32_8 = arith.constant 0 : i32
    %9 = arith.cmpi eq, %arg2, %c0_i32_8 : i32
    %10 = arith.extui %9 : i1 to i32
    %c0_i32_9 = arith.constant 0 : i32
    %11 = arith.cmpi ne, %10, %c0_i32_9 : i32
    scf.if %11 {
      %c0_10 = arith.constant 0 : index
      %c0_11 = arith.constant 0 : index
      %12 = vector.load %arg6[%c0_10, %c0_11] : memref<16x128xf32, #tpu.memory_space<vmem>>, vector<16x128xf32>
      %13 = arith.truncf %12 : vector<16x128xf32> to vector<16x128xbf16>
      %c0_12 = arith.constant 0 : index
      %c0_13 = arith.constant 0 : index
      %14 = vector.load %arg5[%c0_12, %c0_13] : memref<16x128xbf16, #tpu.memory_space<vmem>>, vector<16x128xbf16>
      tpu.vector_store %arg5[%c0_12, %c0_13], %13 {strides = array<i32>} : memref<16x128xbf16, #tpu.memory_space<vmem>>, vector<16x128xbf16>,
    } else {
    }
    return
  }
  func.func @transform_0(%arg0: i32, %arg1: i32, %arg2: i32) -> (i32, i32) {
    %c0_i32 = arith.constant 0 : i32
    return %arg0, %arg2 : i32, i32
  }
  func.func @transform_1(%arg0: i32, %arg1: i32, %arg2: i32) -> (i32, i32) {
    %c0_i32 = arith.constant 0 : i32
    return %arg2, %arg1 : i32, i32
  }
  func.func @transform_2(%arg0: i32, %arg1: i32, %arg2: i32) -> (i32, i32) {
    %c0_i32 = arith.constant 0 : i32
    return %arg0, %arg1 : i32, i32
  }
}

module attributes {stable_mosaic.version = 11 : i64} {
  func.func @_matmul_kernel(%arg0: i32, %arg1: i32, %arg2: i32, %arg3: memref<16x512xbf16, #tpu.memory_space<vmem>>, %arg4: memref<512x256xbf16, #tpu.memory_space<vmem>>, %arg5: memref<1x512xf32, #tpu.memory_space<vmem>>, %arg6: memref<1x512xf32, #tpu.memory_space<vmem>>, %arg7: memref<16x256xbf16, #tpu.memory_space<vmem>>, %arg8: memref<16x256xf32, #tpu.memory_space<vmem>>) attributes {dimension_semantics = [#tpu.dimension_semantics<parallel>, #tpu.dimension_semantics<parallel>, #tpu.dimension_semantics<arbitrary>], iteration_bounds = array<i64: 2, 1, 1>, scalar_prefetch = 0 : i64, scratch_operands = 1 : i64, tpu.core_type = #tpu.core_type<tc>, window_params = [{transform_indices = @transform_0, window_bounds = array<i64: 16, 512>}, {transform_indices = @transform_1, window_bounds = array<i64: 512, 256>}, {transform_indices = @transform_2, window_bounds = array<i64: 1, 512>}, {transform_indices = @transform_3, window_bounds = array<i64: 1, 512>}, {transform_indices = @transform_4, window_bounds = array<i64: 16, 256>}]} {
    %c0_i32 = arith.constant 0 : i32
    %0 = arith.cmpi eq, %arg2, %c0_i32 : i32
    %1 = arith.extui %0 : i1 to i32
    %c0_i32_0 = arith.constant 0 : i32
    %2 = arith.cmpi ne, %1, %c0_i32_0 : i32
    scf.if %2 {
      %cst_15 = arith.constant 0.000000e+00 : f32
      %22 = vector.broadcast %cst_15 : f32 to vector<16x256xf32>
      %c0_16 = arith.constant 0 : index
      %c0_17 = arith.constant 0 : index
      %23 = vector.load %arg8[%c0_16, %c0_17] : memref<16x256xf32, #tpu.memory_space<vmem>>, vector<16x256xf32>
      tpu.vector_store %arg8[%c0_16, %c0_17], %22 {strides = array<i32>} : memref<16x256xf32, #tpu.memory_space<vmem>>, vector<16x256xf32>,
    } else {
    }
    %c0 = arith.constant 0 : index
    %c0_1 = arith.constant 0 : index
    %3 = vector.load %arg3[%c0, %c0_1] : memref<16x512xbf16, #tpu.memory_space<vmem>>, vector<16x512xbf16>
    %4 = arith.extf %3 : vector<16x512xbf16> to vector<16x512xf32>
    %c0_2 = arith.constant 0 : index
    %c0_3 = arith.constant 0 : index
    %5 = vector.load %arg5[%c0_2, %c0_3] : memref<1x512xf32, #tpu.memory_space<vmem>>, vector<1x512xf32>
    %6 = vector.broadcast %5 : vector<1x512xf32> to vector<16x512xf32>
    %7 = arith.mulf %4, %6 : vector<16x512xf32>
    %c0_4 = arith.constant 0 : index
    %c0_5 = arith.constant 0 : index
    %8 = vector.load %arg6[%c0_4, %c0_5] : memref<1x512xf32, #tpu.memory_space<vmem>>, vector<1x512xf32>
    %9 = vector.broadcast %8 : vector<1x512xf32> to vector<16x512xf32>
    %10 = arith.addf %7, %9 : vector<16x512xf32>
    %cst = arith.constant 0.000000e+00 : f32
    %11 = vector.broadcast %cst : f32 to vector<16x512xf32>
    %12 = arith.maximumf %10, %11 : vector<16x512xf32>
    %13 = arith.truncf %12 : vector<16x512xf32> to vector<16x512xbf16>
    %c0_6 = arith.constant 0 : index
    %c0_7 = arith.constant 0 : index
    %14 = vector.load %arg8[%c0_6, %c0_7] : memref<16x256xf32, #tpu.memory_space<vmem>>, vector<16x256xf32>
    %c0_8 = arith.constant 0 : index
    %c0_9 = arith.constant 0 : index
    %15 = vector.load %arg4[%c0_8, %c0_9] : memref<512x256xbf16, #tpu.memory_space<vmem>>, vector<512x256xbf16>
    %cst_10 = arith.constant dense<0.000000e+00> : vector<16x256xf32>
    %16 = tpu.matmul %13, %15, %cst_10 {dimension_numbers = #tpu.dot_dimension_numbers<[1], [0], [0], [1], [0, 0, 1, 1], [], []>} : vector<16x512xbf16>, vector<512x256xbf16>, vector<16x256xf32> -> vector<16x256xf32>
    %17 = arith.addf %14, %16 : vector<16x256xf32>
    %c0_11 = arith.constant 0 : index
    %c0_12 = arith.constant 0 : index
    %18 = vector.load %arg8[%c0_11, %c0_12] : memref<16x256xf32, #tpu.memory_space<vmem>>, vector<16x256xf32>
    tpu.vector_store %arg8[%c0_11, %c0_12], %17 {strides = array<i32>} : memref<16x256xf32, #tpu.memory_space<vmem>>, vector<16x256xf32>,
    %c0_i32_13 = arith.constant 0 : i32
    %19 = arith.cmpi eq, %arg2, %c0_i32_13 : i32
    %20 = arith.extui %19 : i1 to i32
    %c0_i32_14 = arith.constant 0 : i32
    %21 = arith.cmpi ne, %20, %c0_i32_14 : i32
    scf.if %21 {
      %c0_15 = arith.constant 0 : index
      %c0_16 = arith.constant 0 : index
      %22 = vector.load %arg8[%c0_15, %c0_16] : memref<16x256xf32, #tpu.memory_space<vmem>>, vector<16x256xf32>
      %23 = arith.truncf %22 : vector<16x256xf32> to vector<16x256xbf16>
      %c0_17 = arith.constant 0 : index
      %c0_18 = arith.constant 0 : index
      %24 = vector.load %arg7[%c0_17, %c0_18] : memref<16x256xbf16, #tpu.memory_space<vmem>>, vector<16x256xbf16>
      tpu.vector_store %arg7[%c0_17, %c0_18], %23 {strides = array<i32>} : memref<16x256xbf16, #tpu.memory_space<vmem>>, vector<16x256xbf16>,
    } else {
    }
    return
  }
  func.func @transform_0(%arg0: i32, %arg1: i32, %arg2: i32) -> (i32, i32) {
    %c0_i32 = arith.constant 0 : i32
    return %arg0, %arg2 : i32, i32
  }
  func.func @transform_1(%arg0: i32, %arg1: i32, %arg2: i32) -> (i32, i32) {
    %c0_i32 = arith.constant 0 : i32
    return %arg2, %arg1 : i32, i32
  }
  func.func @transform_2(%arg0: i32, %arg1: i32, %arg2: i32) -> (i32, i32) {
    %c0_i32 = arith.constant 0 : i32
    %c0_i32_0 = arith.constant 0 : i32
    return %c0_i32, %arg2 : i32, i32
  }
  func.func @transform_3(%arg0: i32, %arg1: i32, %arg2: i32) -> (i32, i32) {
    %c0_i32 = arith.constant 0 : i32
    %c0_i32_0 = arith.constant 0 : i32
    return %c0_i32, %arg2 : i32, i32
  }
  func.func @transform_4(%arg0: i32, %arg1: i32, %arg2: i32) -> (i32, i32) {
    %c0_i32 = arith.constant 0 : i32
    return %arg0, %arg1 : i32, i32
  }
}

module attributes {stable_mosaic.version = 11 : i64} {
  func.func @_matmul_kernel(%arg0: i32, %arg1: i32, %arg2: i32, %arg3: memref<16x1024xbf16, #tpu.memory_space<vmem>>, %arg4: memref<1024x128xbf16, #tpu.memory_space<vmem>>, %arg5: memref<1x1024xf32, #tpu.memory_space<vmem>>, %arg6: memref<1x1024xf32, #tpu.memory_space<vmem>>, %arg7: memref<1x128xf32, #tpu.memory_space<vmem>>, %arg8: memref<1x128xf32, #tpu.memory_space<vmem>>, %arg9: memref<16x128xbf16, #tpu.memory_space<vmem>>, %arg10: memref<16x128xf32, #tpu.memory_space<vmem>>) attributes {dimension_semantics = [#tpu.dimension_semantics<parallel>, #tpu.dimension_semantics<parallel>, #tpu.dimension_semantics<arbitrary>], iteration_bounds = array<i64: 1, 1, 1>, scalar_prefetch = 0 : i64, scratch_operands = 1 : i64, tpu.core_type = #tpu.core_type<tc>, window_params = [{transform_indices = @transform_0, window_bounds = array<i64: 16, 1024>}, {transform_indices = @transform_1, window_bounds = array<i64: 1024, 128>}, {transform_indices = @transform_2, window_bounds = array<i64: 1, 1024>}, {transform_indices = @transform_3, window_bounds = array<i64: 1, 1024>}, {transform_indices = @transform_4, window_bounds = array<i64: 1, 128>}, {transform_indices = @transform_5, window_bounds = array<i64: 1, 128>}, {transform_indices = @transform_6, window_bounds = array<i64: 16, 128>}]} {
    %c0_i32 = arith.constant 0 : i32
    %0 = arith.cmpi eq, %arg2, %c0_i32 : i32
    %1 = arith.extui %0 : i1 to i32
    %c0_i32_0 = arith.constant 0 : i32
    %2 = arith.cmpi ne, %1, %c0_i32_0 : i32
    scf.if %2 {
      %cst_15 = arith.constant 0.000000e+00 : f32
      %22 = vector.broadcast %cst_15 : f32 to vector<16x128xf32>
      %c0_16 = arith.constant 0 : index
      %c0_17 = arith.constant 0 : index
      %23 = vector.load %arg10[%c0_16, %c0_17] : memref<16x128xf32, #tpu.memory_space<vmem>>, vector<16x128xf32>
      tpu.vector_store %arg10[%c0_16, %c0_17], %22 {strides = array<i32>} : memref<16x128xf32, #tpu.memory_space<vmem>>, vector<16x128xf32>,
    } else {
    }
    %c0 = arith.constant 0 : index
    %c0_1 = arith.constant 0 : index
    %3 = vector.load %arg3[%c0, %c0_1] : memref<16x1024xbf16, #tpu.memory_space<vmem>>, vector<16x1024xbf16>
    %4 = arith.extf %3 : vector<16x1024xbf16> to vector<16x1024xf32>
    %c0_2 = arith.constant 0 : index
    %c0_3 = arith.constant 0 : index
    %5 = vector.load %arg5[%c0_2, %c0_3] : memref<1x1024xf32, #tpu.memory_space<vmem>>, vector<1x1024xf32>
    %6 = vector.broadcast %5 : vector<1x1024xf32> to vector<16x1024xf32>
    %7 = arith.mulf %4, %6 : vector<16x1024xf32>
    %c0_4 = arith.constant 0 : index
    %c0_5 = arith.constant 0 : index
    %8 = vector.load %arg6[%c0_4, %c0_5] : memref<1x1024xf32, #tpu.memory_space<vmem>>, vector<1x1024xf32>
    %9 = vector.broadcast %8 : vector<1x1024xf32> to vector<16x1024xf32>
    %10 = arith.addf %7, %9 : vector<16x1024xf32>
    %cst = arith.constant 0.000000e+00 : f32
    %11 = vector.broadcast %cst : f32 to vector<16x1024xf32>
    %12 = arith.maximumf %10, %11 : vector<16x1024xf32>
    %13 = arith.truncf %12 : vector<16x1024xf32> to vector<16x1024xbf16>
    %c0_6 = arith.constant 0 : index
    %c0_7 = arith.constant 0 : index
    %14 = vector.load %arg10[%c0_6, %c0_7] : memref<16x128xf32, #tpu.memory_space<vmem>>, vector<16x128xf32>
    %c0_8 = arith.constant 0 : index
    %c0_9 = arith.constant 0 : index
    %15 = vector.load %arg4[%c0_8, %c0_9] : memref<1024x128xbf16, #tpu.memory_space<vmem>>, vector<1024x128xbf16>
    %cst_10 = arith.constant dense<0.000000e+00> : vector<16x128xf32>
    %16 = tpu.matmul %13, %15, %cst_10 {dimension_numbers = #tpu.dot_dimension_numbers<[1], [0], [0], [1], [0, 0, 1, 1], [], []>} : vector<16x1024xbf16>, vector<1024x128xbf16>, vector<16x128xf32> -> vector<16x128xf32>
    %17 = arith.addf %14, %16 : vector<16x128xf32>
    %c0_11 = arith.constant 0 : index
    %c0_12 = arith.constant 0 : index
    %18 = vector.load %arg10[%c0_11, %c0_12] : memref<16x128xf32, #tpu.memory_space<vmem>>, vector<16x128xf32>
    tpu.vector_store %arg10[%c0_11, %c0_12], %17 {strides = array<i32>} : memref<16x128xf32, #tpu.memory_space<vmem>>, vector<16x128xf32>,
    %c0_i32_13 = arith.constant 0 : i32
    %19 = arith.cmpi eq, %arg2, %c0_i32_13 : i32
    %20 = arith.extui %19 : i1 to i32
    %c0_i32_14 = arith.constant 0 : i32
    %21 = arith.cmpi ne, %20, %c0_i32_14 : i32
    scf.if %21 {
      %c0_15 = arith.constant 0 : index
      %c0_16 = arith.constant 0 : index
      %22 = vector.load %arg10[%c0_15, %c0_16] : memref<16x128xf32, #tpu.memory_space<vmem>>, vector<16x128xf32>
      %c0_17 = arith.constant 0 : index
      %c0_18 = arith.constant 0 : index
      %23 = vector.load %arg7[%c0_17, %c0_18] : memref<1x128xf32, #tpu.memory_space<vmem>>, vector<1x128xf32>
      %24 = vector.broadcast %23 : vector<1x128xf32> to vector<16x128xf32>
      %25 = arith.mulf %22, %24 : vector<16x128xf32>
      %c0_19 = arith.constant 0 : index
      %c0_20 = arith.constant 0 : index
      %26 = vector.load %arg8[%c0_19, %c0_20] : memref<1x128xf32, #tpu.memory_space<vmem>>, vector<1x128xf32>
      %27 = vector.broadcast %26 : vector<1x128xf32> to vector<16x128xf32>
      %28 = arith.addf %25, %27 : vector<16x128xf32>
      %cst_21 = arith.constant 0.000000e+00 : f32
      %29 = vector.broadcast %cst_21 : f32 to vector<16x128xf32>
      %30 = arith.maximumf %28, %29 : vector<16x128xf32>
      %31 = arith.truncf %30 : vector<16x128xf32> to vector<16x128xbf16>
      %c0_22 = arith.constant 0 : index
      %c0_23 = arith.constant 0 : index
      %32 = vector.load %arg9[%c0_22, %c0_23] : memref<16x128xbf16, #tpu.memory_space<vmem>>, vector<16x128xbf16>
      tpu.vector_store %arg9[%c0_22, %c0_23], %31 {strides = array<i32>} : memref<16x128xbf16, #tpu.memory_space<vmem>>, vector<16x128xbf16>,
    } else {
    }
    return
  }
  func.func @transform_0(%arg0: i32, %arg1: i32, %arg2: i32) -> (i32, i32) {
    %c0_i32 = arith.constant 0 : i32
    return %arg0, %arg2 : i32, i32
  }
  func.func @transform_1(%arg0: i32, %arg1: i32, %arg2: i32) -> (i32, i32) {
    %c0_i32 = arith.constant 0 : i32
    return %arg2, %arg1 : i32, i32
  }
  func.func @transform_2(%arg0: i32, %arg1: i32, %arg2: i32) -> (i32, i32) {
    %c0_i32 = arith.constant 0 : i32
    %c0_i32_0 = arith.constant 0 : i32
    return %c0_i32, %arg2 : i32, i32
  }
  func.func @transform_3(%arg0: i32, %arg1: i32, %arg2: i32) -> (i32, i32) {
    %c0_i32 = arith.constant 0 : i32
    %c0_i32_0 = arith.constant 0 : i32
    return %c0_i32, %arg2 : i32, i32
  }
  func.func @transform_4(%arg0: i32, %arg1: i32, %arg2: i32) -> (i32, i32) {
    %c0_i32 = arith.constant 0 : i32
    %c0_i32_0 = arith.constant 0 : i32
    return %c0_i32, %arg1 : i32, i32
  }
  func.func @transform_5(%arg0: i32, %arg1: i32, %arg2: i32) -> (i32, i32) {
    %c0_i32 = arith.constant 0 : i32
    %c0_i32_0 = arith.constant 0 : i32
    return %c0_i32, %arg1 : i32, i32
  }
  func.func @transform_6(%arg0: i32, %arg1: i32, %arg2: i32) -> (i32, i32) {
    %c0_i32 = arith.constant 0 : i32
    return %arg0, %arg1 : i32, i32
  }
}

module attributes {stable_mosaic.version = 11 : i64} {
  func.func @_matmul_kernel(%arg0: i32, %arg1: i32, %arg2: i32, %arg3: memref<16x1152xbf16, #tpu.memory_space<vmem>>, %arg4: memref<1152x128xbf16, #tpu.memory_space<vmem>>, %arg5: memref<16x128xbf16, #tpu.memory_space<vmem>>, %arg6: memref<16x128xf32, #tpu.memory_space<vmem>>) attributes {dimension_semantics = [#tpu.dimension_semantics<parallel>, #tpu.dimension_semantics<parallel>, #tpu.dimension_semantics<arbitrary>], iteration_bounds = array<i64: 1, 1, 1>, scalar_prefetch = 0 : i64, scratch_operands = 1 : i64, tpu.core_type = #tpu.core_type<tc>, window_params = [{transform_indices = @transform_0, window_bounds = array<i64: 16, 1152>}, {transform_indices = @transform_1, window_bounds = array<i64: 1152, 128>}, {transform_indices = @transform_2, window_bounds = array<i64: 16, 128>}]} {
    %c0_i32 = arith.constant 0 : i32
    %0 = arith.cmpi eq, %arg2, %c0_i32 : i32
    %1 = arith.extui %0 : i1 to i32
    %c0_i32_0 = arith.constant 0 : i32
    %2 = arith.cmpi ne, %1, %c0_i32_0 : i32
    scf.if %2 {
      %cst_10 = arith.constant 0.000000e+00 : f32
      %12 = vector.broadcast %cst_10 : f32 to vector<16x128xf32>
      %c0_11 = arith.constant 0 : index
      %c0_12 = arith.constant 0 : index
      %13 = vector.load %arg6[%c0_11, %c0_12] : memref<16x128xf32, #tpu.memory_space<vmem>>, vector<16x128xf32>
      tpu.vector_store %arg6[%c0_11, %c0_12], %12 {strides = array<i32>} : memref<16x128xf32, #tpu.memory_space<vmem>>, vector<16x128xf32>,
    } else {
    }
    %c0 = arith.constant 0 : index
    %c0_1 = arith.constant 0 : index
    %3 = vector.load %arg3[%c0, %c0_1] : memref<16x1152xbf16, #tpu.memory_space<vmem>>, vector<16x1152xbf16>
    %c0_2 = arith.constant 0 : index
    %c0_3 = arith.constant 0 : index
    %4 = vector.load %arg6[%c0_2, %c0_3] : memref<16x128xf32, #tpu.memory_space<vmem>>, vector<16x128xf32>
    %c0_4 = arith.constant 0 : index
    %c0_5 = arith.constant 0 : index
    %5 = vector.load %arg4[%c0_4, %c0_5] : memref<1152x128xbf16, #tpu.memory_space<vmem>>, vector<1152x128xbf16>
    %cst = arith.constant dense<0.000000e+00> : vector<16x128xf32>
    %6 = tpu.matmul %3, %5, %cst {dimension_numbers = #tpu.dot_dimension_numbers<[1], [0], [0], [1], [0, 0, 1, 1], [], []>} : vector<16x1152xbf16>, vector<1152x128xbf16>, vector<16x128xf32> -> vector<16x128xf32>
    %7 = arith.addf %4, %6 : vector<16x128xf32>
    %c0_6 = arith.constant 0 : index
    %c0_7 = arith.constant 0 : index
    %8 = vector.load %arg6[%c0_6, %c0_7] : memref<16x128xf32, #tpu.memory_space<vmem>>, vector<16x128xf32>
    tpu.vector_store %arg6[%c0_6, %c0_7], %7 {strides = array<i32>} : memref<16x128xf32, #tpu.memory_space<vmem>>, vector<16x128xf32>,
    %c0_i32_8 = arith.constant 0 : i32
    %9 = arith.cmpi eq, %arg2, %c0_i32_8 : i32
    %10 = arith.extui %9 : i1 to i32
    %c0_i32_9 = arith.constant 0 : i32
    %11 = arith.cmpi ne, %10, %c0_i32_9 : i32
    scf.if %11 {
      %c0_10 = arith.constant 0 : index
      %c0_11 = arith.constant 0 : index
      %12 = vector.load %arg6[%c0_10, %c0_11] : memref<16x128xf32, #tpu.memory_space<vmem>>, vector<16x128xf32>
      %13 = arith.truncf %12 : vector<16x128xf32> to vector<16x128xbf16>
      %c0_12 = arith.constant 0 : index
      %c0_13 = arith.constant 0 : index
      %14 = vector.load %arg5[%c0_12, %c0_13] : memref<16x128xbf16, #tpu.memory_space<vmem>>, vector<16x128xbf16>
      tpu.vector_store %arg5[%c0_12, %c0_13], %13 {strides = array<i32>} : memref<16x128xbf16, #tpu.memory_space<vmem>>, vector<16x128xbf16>,
    } else {
    }
    return
  }
  func.func @transform_0(%arg0: i32, %arg1: i32, %arg2: i32) -> (i32, i32) {
    %c0_i32 = arith.constant 0 : i32
    return %arg0, %arg2 : i32, i32
  }
  func.func @transform_1(%arg0: i32, %arg1: i32, %arg2: i32) -> (i32, i32) {
    %c0_i32 = arith.constant 0 : i32
    return %arg2, %arg1 : i32, i32
  }
  func.func @transform_2(%arg0: i32, %arg1: i32, %arg2: i32) -> (i32, i32) {
    %c0_i32 = arith.constant 0 : i32
    return %arg0, %arg1 : i32, i32
  }
}

module attributes {stable_mosaic.version = 11 : i64} {
  func.func @_matmul_kernel(%arg0: i32, %arg1: i32, %arg2: i32, %arg3: memref<16x1024xbf16, #tpu.memory_space<vmem>>, %arg4: memref<1024x512xbf16, #tpu.memory_space<vmem>>, %arg5: memref<1x1024xf32, #tpu.memory_space<vmem>>, %arg6: memref<1x1024xf32, #tpu.memory_space<vmem>>, %arg7: memref<16x512xbf16, #tpu.memory_space<vmem>>, %arg8: memref<16x512xf32, #tpu.memory_space<vmem>>) attributes {dimension_semantics = [#tpu.dimension_semantics<parallel>, #tpu.dimension_semantics<parallel>, #tpu.dimension_semantics<arbitrary>], iteration_bounds = array<i64: 1, 1, 1>, scalar_prefetch = 0 : i64, scratch_operands = 1 : i64, tpu.core_type = #tpu.core_type<tc>, window_params = [{transform_indices = @transform_0, window_bounds = array<i64: 16, 1024>}, {transform_indices = @transform_1, window_bounds = array<i64: 1024, 512>}, {transform_indices = @transform_2, window_bounds = array<i64: 1, 1024>}, {transform_indices = @transform_3, window_bounds = array<i64: 1, 1024>}, {transform_indices = @transform_4, window_bounds = array<i64: 16, 512>}]} {
    %c0_i32 = arith.constant 0 : i32
    %0 = arith.cmpi eq, %arg2, %c0_i32 : i32
    %1 = arith.extui %0 : i1 to i32
    %c0_i32_0 = arith.constant 0 : i32
    %2 = arith.cmpi ne, %1, %c0_i32_0 : i32
    scf.if %2 {
      %cst_15 = arith.constant 0.000000e+00 : f32
      %22 = vector.broadcast %cst_15 : f32 to vector<16x512xf32>
      %c0_16 = arith.constant 0 : index
      %c0_17 = arith.constant 0 : index
      %23 = vector.load %arg8[%c0_16, %c0_17] : memref<16x512xf32, #tpu.memory_space<vmem>>, vector<16x512xf32>
      tpu.vector_store %arg8[%c0_16, %c0_17], %22 {strides = array<i32>} : memref<16x512xf32, #tpu.memory_space<vmem>>, vector<16x512xf32>,
    } else {
    }
    %c0 = arith.constant 0 : index
    %c0_1 = arith.constant 0 : index
    %3 = vector.load %arg3[%c0, %c0_1] : memref<16x1024xbf16, #tpu.memory_space<vmem>>, vector<16x1024xbf16>
    %4 = arith.extf %3 : vector<16x1024xbf16> to vector<16x1024xf32>
    %c0_2 = arith.constant 0 : index
    %c0_3 = arith.constant 0 : index
    %5 = vector.load %arg5[%c0_2, %c0_3] : memref<1x1024xf32, #tpu.memory_space<vmem>>, vector<1x1024xf32>
    %6 = vector.broadcast %5 : vector<1x1024xf32> to vector<16x1024xf32>
    %7 = arith.mulf %4, %6 : vector<16x1024xf32>
    %c0_4 = arith.constant 0 : index
    %c0_5 = arith.constant 0 : index
    %8 = vector.load %arg6[%c0_4, %c0_5] : memref<1x1024xf32, #tpu.memory_space<vmem>>, vector<1x1024xf32>
    %9 = vector.broadcast %8 : vector<1x1024xf32> to vector<16x1024xf32>
    %10 = arith.addf %7, %9 : vector<16x1024xf32>
    %cst = arith.constant 0.000000e+00 : f32
    %11 = vector.broadcast %cst : f32 to vector<16x1024xf32>
    %12 = arith.maximumf %10, %11 : vector<16x1024xf32>
    %13 = arith.truncf %12 : vector<16x1024xf32> to vector<16x1024xbf16>
    %c0_6 = arith.constant 0 : index
    %c0_7 = arith.constant 0 : index
    %14 = vector.load %arg8[%c0_6, %c0_7] : memref<16x512xf32, #tpu.memory_space<vmem>>, vector<16x512xf32>
    %c0_8 = arith.constant 0 : index
    %c0_9 = arith.constant 0 : index
    %15 = vector.load %arg4[%c0_8, %c0_9] : memref<1024x512xbf16, #tpu.memory_space<vmem>>, vector<1024x512xbf16>
    %cst_10 = arith.constant dense<0.000000e+00> : vector<16x512xf32>
    %16 = tpu.matmul %13, %15, %cst_10 {dimension_numbers = #tpu.dot_dimension_numbers<[1], [0], [0], [1], [0, 0, 1, 1], [], []>} : vector<16x1024xbf16>, vector<1024x512xbf16>, vector<16x512xf32> -> vector<16x512xf32>
    %17 = arith.addf %14, %16 : vector<16x512xf32>
    %c0_11 = arith.constant 0 : index
    %c0_12 = arith.constant 0 : index
    %18 = vector.load %arg8[%c0_11, %c0_12] : memref<16x512xf32, #tpu.memory_space<vmem>>, vector<16x512xf32>
    tpu.vector_store %arg8[%c0_11, %c0_12], %17 {strides = array<i32>} : memref<16x512xf32, #tpu.memory_space<vmem>>, vector<16x512xf32>,
    %c0_i32_13 = arith.constant 0 : i32
    %19 = arith.cmpi eq, %arg2, %c0_i32_13 : i32
    %20 = arith.extui %19 : i1 to i32
    %c0_i32_14 = arith.constant 0 : i32
    %21 = arith.cmpi ne, %20, %c0_i32_14 : i32
    scf.if %21 {
      %c0_15 = arith.constant 0 : index
      %c0_16 = arith.constant 0 : index
      %22 = vector.load %arg8[%c0_15, %c0_16] : memref<16x512xf32, #tpu.memory_space<vmem>>, vector<16x512xf32>
      %23 = arith.truncf %22 : vector<16x512xf32> to vector<16x512xbf16>
      %c0_17 = arith.constant 0 : index
      %c0_18 = arith.constant 0 : index
      %24 = vector.load %arg7[%c0_17, %c0_18] : memref<16x512xbf16, #tpu.memory_space<vmem>>, vector<16x512xbf16>
      tpu.vector_store %arg7[%c0_17, %c0_18], %23 {strides = array<i32>} : memref<16x512xbf16, #tpu.memory_space<vmem>>, vector<16x512xbf16>,
    } else {
    }
    return
  }
  func.func @transform_0(%arg0: i32, %arg1: i32, %arg2: i32) -> (i32, i32) {
    %c0_i32 = arith.constant 0 : i32
    return %arg0, %arg2 : i32, i32
  }
  func.func @transform_1(%arg0: i32, %arg1: i32, %arg2: i32) -> (i32, i32) {
    %c0_i32 = arith.constant 0 : i32
    return %arg2, %arg1 : i32, i32
  }
  func.func @transform_2(%arg0: i32, %arg1: i32, %arg2: i32) -> (i32, i32) {
    %c0_i32 = arith.constant 0 : i32
    %c0_i32_0 = arith.constant 0 : i32
    return %c0_i32, %arg2 : i32, i32
  }
  func.func @transform_3(%arg0: i32, %arg1: i32, %arg2: i32) -> (i32, i32) {
    %c0_i32 = arith.constant 0 : i32
    %c0_i32_0 = arith.constant 0 : i32
    return %c0_i32, %arg2 : i32, i32
  }
  func.func @transform_4(%arg0: i32, %arg1: i32, %arg2: i32) -> (i32, i32) {
    %c0_i32 = arith.constant 0 : i32
    return %arg0, %arg1 : i32, i32
  }
}

module attributes {stable_mosaic.version = 11 : i64} {
  func.func @_norm5_gap_kernel(%arg0: memref<2x1x1024xbf16, #tpu.memory_space<vmem>>, %arg1: memref<1x1x1024xf32, #tpu.memory_space<vmem>>, %arg2: memref<1x1x1024xf32, #tpu.memory_space<vmem>>, %arg3: memref<2x1024xf32, #tpu.memory_space<vmem>>) attributes {dimension_semantics = [], scalar_prefetch = 0 : i64, scratch_operands = 0 : i64, tpu.core_type = #tpu.core_type<tc>} {
    %c0 = arith.constant 0 : index
    %c0_0 = arith.constant 0 : index
    %c0_1 = arith.constant 0 : index
    %0 = vector.load %arg0[%c0, %c0_0, %c0_1] : memref<2x1x1024xbf16, #tpu.memory_space<vmem>>, vector<2x1x1024xbf16>
    %1 = arith.extf %0 : vector<2x1x1024xbf16> to vector<2x1x1024xf32>
    %c0_2 = arith.constant 0 : index
    %c0_3 = arith.constant 0 : index
    %c0_4 = arith.constant 0 : index
    %2 = vector.load %arg1[%c0_2, %c0_3, %c0_4] : memref<1x1x1024xf32, #tpu.memory_space<vmem>>, vector<1x1x1024xf32>
    %3 = vector.broadcast %2 : vector<1x1x1024xf32> to vector<2x1x1024xf32>
    %4 = arith.mulf %1, %3 : vector<2x1x1024xf32>
    %c0_5 = arith.constant 0 : index
    %c0_6 = arith.constant 0 : index
    %c0_7 = arith.constant 0 : index
    %5 = vector.load %arg2[%c0_5, %c0_6, %c0_7] : memref<1x1x1024xf32, #tpu.memory_space<vmem>>, vector<1x1x1024xf32>
    %6 = vector.broadcast %5 : vector<1x1x1024xf32> to vector<2x1x1024xf32>
    %7 = arith.addf %4, %6 : vector<2x1x1024xf32>
    %cst = arith.constant 0.000000e+00 : f32
    %8 = vector.broadcast %cst : f32 to vector<2x1x1024xf32>
    %9 = arith.maximumf %7, %8 : vector<2x1x1024xf32>
    %cst_8 = arith.constant dense<0.000000e+00> : vector<2x1024xf32>
    %10 = vector.multi_reduction <add>, %9, %cst_8 [1] : vector<2x1x1024xf32> to vector<2x1024xf32>
    %cst_9 = arith.constant 1.000000e+00 : f32
    %11 = vector.broadcast %cst_9 : f32 to vector<2x1024xf32>
    %12 = arith.mulf %10, %11 : vector<2x1024xf32>
    %c0_10 = arith.constant 0 : index
    %c0_11 = arith.constant 0 : index
    %13 = vector.load %arg3[%c0_10, %c0_11] : memref<2x1024xf32, #tpu.memory_space<vmem>>, vector<2x1024xf32>
    tpu.vector_store %arg3[%c0_10, %c0_11], %12 {strides = array<i32>} : memref<2x1024xf32, #tpu.memory_space<vmem>>, vector<2x1024xf32>,
    return
  }
}

module attributes {stable_mosaic.version = 11 : i64} {
  func.func @_head_kernel(%arg0: memref<16x1024xbf16, #tpu.memory_space<vmem>>, %arg1: memref<1024x512xbf16, #tpu.memory_space<vmem>>, %arg2: memref<1x512xf32, #tpu.memory_space<vmem>>, %arg3: memref<512x128xbf16, #tpu.memory_space<vmem>>, %arg4: memref<1x128xf32, #tpu.memory_space<vmem>>, %arg5: memref<16x128xf32, #tpu.memory_space<vmem>>) attributes {dimension_semantics = [], scalar_prefetch = 0 : i64, scratch_operands = 0 : i64, tpu.core_type = #tpu.core_type<tc>} {
    %c0 = arith.constant 0 : index
    %c0_0 = arith.constant 0 : index
    %0 = vector.load %arg0[%c0, %c0_0] : memref<16x1024xbf16, #tpu.memory_space<vmem>>, vector<16x1024xbf16>
    %c0_1 = arith.constant 0 : index
    %c0_2 = arith.constant 0 : index
    %1 = vector.load %arg1[%c0_1, %c0_2] : memref<1024x512xbf16, #tpu.memory_space<vmem>>, vector<1024x512xbf16>
    %cst = arith.constant dense<0.000000e+00> : vector<16x512xf32>
    %2 = tpu.matmul %0, %1, %cst {dimension_numbers = #tpu.dot_dimension_numbers<[1], [0], [0], [1], [0, 0, 1, 1], [], []>} : vector<16x1024xbf16>, vector<1024x512xbf16>, vector<16x512xf32> -> vector<16x512xf32>
    %c0_3 = arith.constant 0 : index
    %c0_4 = arith.constant 0 : index
    %3 = vector.load %arg2[%c0_3, %c0_4] : memref<1x512xf32, #tpu.memory_space<vmem>>, vector<1x512xf32>
    %4 = vector.broadcast %3 : vector<1x512xf32> to vector<16x512xf32>
    %5 = arith.addf %2, %4 : vector<16x512xf32>
    %cst_5 = arith.constant 0.000000e+00 : f32
    %6 = vector.broadcast %cst_5 : f32 to vector<16x512xf32>
    %7 = arith.maximumf %5, %6 : vector<16x512xf32>
    %8 = arith.truncf %7 : vector<16x512xf32> to vector<16x512xbf16>
    %c0_6 = arith.constant 0 : index
    %c0_7 = arith.constant 0 : index
    %9 = vector.load %arg3[%c0_6, %c0_7] : memref<512x128xbf16, #tpu.memory_space<vmem>>, vector<512x128xbf16>
    %cst_8 = arith.constant dense<0.000000e+00> : vector<16x128xf32>
    %10 = tpu.matmul %8, %9, %cst_8 {dimension_numbers = #tpu.dot_dimension_numbers<[1], [0], [0], [1], [0, 0, 1, 1], [], []>} : vector<16x512xbf16>, vector<512x128xbf16>, vector<16x128xf32> -> vector<16x128xf32>
    %c0_9 = arith.constant 0 : index
    %c0_10 = arith.constant 0 : index
    %11 = vector.load %arg4[%c0_9, %c0_10] : memref<1x128xf32, #tpu.memory_space<vmem>>, vector<1x128xf32>
    %12 = vector.broadcast %11 : vector<1x128xf32> to vector<16x128xf32>
    %13 = arith.addf %10, %12 : vector<16x128xf32>
    %c0_11 = arith.constant 0 : index
    %c0_12 = arith.constant 0 : index
    %14 = vector.load %arg5[%c0_11, %c0_12] : memref<16x128xf32, #tpu.memory_space<vmem>>, vector<16x128xf32>
    tpu.vector_store %arg5[%c0_11, %c0_12], %13 {strides = array<i32>} : memref<16x128xf32, #tpu.memory_space<vmem>>, vector<16x128xf32>,
    return
  }
}

</mosaic_0001>

<bundles_post_ra>
// kernel: xray_analyzer_forward.122
= control target key start
LH: loop header
LB: loop body
LE: loop exit
PB: predicated region body
PF: predicated region fallthrough
CT: control target
= control target key end

     0   :  { %s1843_s15 = smov 0   ;;  %s1845_s16 = smov 0   ;;  %s2054_s0 = inlined_call_operand.vmem [shape: bf16[512,256], index: 0, kind: input, shape index: {}]   ;;  %s2055_s1 = inlined_call_operand.vmem [shape: bf16[256,128], index: 1, kind: input, shape index: {}]   ;;  %s2056_s2 = inlined_call_operand.vmem [shape: f32[1,128], index: 2, kind: input, shape index: {}]   ;;  %s2057_s3 = inlined_call_operand.vmem [shape: f32[1,128], index: 3, kind: input, shape index: {}]   ;;  %s2058_s4 = inlined_call_operand.vmem [shape: bf16[512,128], index: 4, kind: output, shape index: {}]  }
   0x1   :  { %s1847_s17 = smov 0  }
   0x2 LB: > { %s33_s18 = sadd.s32 1, %s1812_s16  ;;  %p1360_p0 = scmp.ge.s32.totalorder %s1816_s17, 1  ;;  %s1816_s17 = sphi %s1847_s17, %s14_s17   ;;  %s1812_s16 = sphi %s1845_s16, %s2060_s16   ;;  %s1808_s15 = sphi %s1843_s15, %s2059_s15  }
   0x3   : > { %p35_p1 = scmp.ge.s32.totalorder %s33_s18, 2  ;;  %p224_p2 = scmp.lt.s32.totalorder %s1816_s17, 3 }
   0x5   : > { %s2062_s18 = smov (%p35_p1, %s33_s18), 0  ;;  %p225_p3 = pnand %p1360_p0, %p224_p2 }
   0x6   : > { %v1730_v0 = vld [vmem:[%s2055_s1 + $0x40] sm:$0xff] (!%p225_p3)   ;;  %s1361_s21 = sshll.u32 (!%p225_p3), %s1808_s15, 5  ;;  %v1732_v2 = vld [vmem:[%s2055_s1 + $0x48] sm:$0xff] (!%p225_p3)   ;;  %v1734_v4 = vld [vmem:[%s2055_s1 + $0x50] sm:$0xff] (!%p225_p3)  }
   0x7   : > { %228 = sbr.rel (%p225_p3) target bundleno = 322 (0x142), region = 36  ;;  %v1731_v1 = vld [vmem:[%s2055_s1] sm:$0xff] (!%p225_p3)   ;;  %1578 = vmatprep.subr.bf16.mxu0 (!%p225_p3), %v1730_v0  ;;  %1690 = vmatprep.subr.bf16.mxu1 (!%p225_p3), %v1730_v0  ;;  %v1733_v3 = vld [vmem:[%s2055_s1 + $0x8] sm:$0xff] (!%p225_p3)   ;;  %p274_p4 = scmp.lt.s32.totalorder (!%p225_p3), %s1361_s21, 63  ;;  %v1735_v5 = vld [vmem:[%s2055_s1 + $0x10] sm:$0xff] (!%p225_p3)  }
   0x8   : > { %1579 = vmatpush3.bf16.msra.mxu0 (!%p225_p3), %v1731_v1  ;;  %1698 = vmatpush3.bf16.msra.mxu1 (!%p225_p3), %v1731_v1  ;;  %v1736_v6 = vld [vmem:[%s2055_s1 + $0x58] sm:$0xff] (!%p225_p3)   ;;  %v1738_v8 = vld [vmem:[%s2055_s1 + $0x60] sm:$0xff] (!%p225_p3)   ;;  %v1740_v10 = vld [vmem:[%s2055_s1 + $0x68] sm:$0xff] (!%p225_p3)  }
   0x9   : > { %1580 = vmatprep.subr.bf16.mxu0 (!%p225_p3), %v1732_v2  ;;  %1691 = vmatprep.subr.bf16.mxu1 (!%p225_p3), %v1732_v2  ;;  %v1737_v7 = vld [vmem:[%s2055_s1 + $0x18] sm:$0xff] (!%p225_p3)   ;;  %v1739_v9 = vld [vmem:[%s2055_s1 + $0x20] sm:$0xff] (!%p225_p3)   ;;  %v1741_v13 = vld [vmem:[%s2055_s1 + $0x28] sm:$0xff] (!%p225_p3)  }
   0xa   : > { %v1742_v14 = vld [vmem:[%s2055_s1 + $0x70] sm:$0xff] (!%p225_p3)   ;;  %v1744_v16 = vld [vmem:[%s2055_s1 + $0x78] sm:$0xff] (!%p225_p3)   ;;  %v1952_v51 = vld [vmem:[%s2056_s2] ss:$0 sm:$0xff] (!%p225_p3) }
   0xb   : > { %v1743_v15 = vld [vmem:[%s2055_s1 + $0x30] sm:$0xff] (!%p225_p3)   ;;  %v1745_v17 = vld [vmem:[%s2055_s1 + $0x38] sm:$0xff] (!%p225_p3)   ;;  %v1957_v57 = vld [vmem:[%s2057_s3] ss:$0 sm:$0xff] (!%p225_p3) }
   0xc   : > { %1581 = vmatpush3.bf16.msra.mxu0 (!%p225_p3), %v1733_v3  ;;  %1699 = vmatpush3.bf16.msra.mxu1 (!%p225_p3), %v1733_v3 }
   0xd   : > { %1582 = vmatprep.subr.bf16.mxu0 (!%p225_p3), %v1734_v4  ;;  %1692 = vmatprep.subr.bf16.mxu1 (!%p225_p3), %v1734_v4 }
   0xe   : > { %s2064_s21 = smov (!%p274_p4, %s1361_s21), 63 }
   0xf   : > { %s1450_s10 = sshll.u32 %s2064_s21, 3  ;;  %s1365_s12 = sshll.u32 %s2064_s21, 2 }
  0x10   : > { %1583 = vmatpush3.bf16.msra.mxu0 %v1735_v5  ;;  %1700 = vmatpush3.bf16.msra.mxu1 %v1735_v5  ;;  %s1894_s15 = scalar_lea.vmem %s2054_s0, %s1450_s10  ;;  %s1971_s21 = scalar_lea.vmem %s2058_s4, %s1365_s12 }
  0x11   : > { %1584 = vmatprep.subr.bf16.mxu0 %v1736_v6  ;;  %1693 = vmatprep.subr.bf16.mxu1 %v1736_v6  ;;  %v1748_v11 = vld [vmem:[%s1894_s15 + $0x4] ss:$8 sps:$4 sm:$0xff]   ;;  %v1746_v18 = vld [vmem:[%s1894_s15] ss:$8 sps:$4 sm:$0xff]   ;;  %v1752_v20 = vld [vmem:[%s1894_s15 + $0x14] ss:$8 sps:$4 sm:$0xff]  }
  0x12   : > { %v1751_v12 = vld [vmem:[%s1894_s15 + $0x84] ss:$8 sps:$4 sm:$0xff]   ;;  %729 = vmatprep.mubr.bf16.mxu0 %v1748_v11  ;;  %v1749_v19 = vld [vmem:[%s1894_s15 + $0x80] ss:$8 sps:$4 sm:$0xff]   ;;  %v1754_v21 = vld [vmem:[%s1894_s15 + $0x94] ss:$8 sps:$4 sm:$0xff]  }
  0x13   : > { %793 = vmatprep.mubr.bf16.mxu1 %v1751_v12  ;;  %v1756_v22 = vld [vmem:[%s1894_s15 + $0x10] ss:$8 sps:$4 sm:$0xff]   ;;  %v1758_v24 = vld [vmem:[%s1894_s15 + $0x24] ss:$8 sps:$4 sm:$0xff]   ;;  %v1762_v26 = vld [vmem:[%s1894_s15 + $0x20] ss:$8 sps:$4 sm:$0xff]  }
  0x14   : > { %1585 = vmatpush3.bf16.msra.mxu0 %v1737_v7  ;;  %1701 = vmatpush3.bf16.msra.mxu1 %v1737_v7  ;;  %v1757_v23 = vld [vmem:[%s1894_s15 + $0x90] ss:$8 sps:$4 sm:$0xff]   ;;  %v1760_v25 = vld [vmem:[%s1894_s15 + $0xa4] ss:$8 sps:$4 sm:$0xff]   ;;  %v1763_v27 = vld [vmem:[%s1894_s15 + $0xa0] ss:$8 sps:$4 sm:$0xff]  }
  0x15   : > { %1586 = vmatprep.subr.bf16.mxu0 %v1738_v8  ;;  %1694 = vmatprep.subr.bf16.mxu1 %v1738_v8  ;;  %v1764_v28 = vld [vmem:[%s1894_s15 + $0x34] ss:$8 sps:$4 sm:$0xff]   ;;  %v1768_v30 = vld [vmem:[%s1894_s15 + $0x30] ss:$8 sps:$4 sm:$0xff]   ;;  %v1770_v32 = vld [vmem:[%s1894_s15 + $0x44] ss:$8 sps:$4 sm:$0xff]  }
  0x16   : > { %v1766_v29 = vld [vmem:[%s1894_s15 + $0xb4] ss:$8 sps:$4 sm:$0xff]   ;;  %v1769_v31 = vld [vmem:[%s1894_s15 + $0xb0] ss:$8 sps:$4 sm:$0xff]   ;;  %v1772_v33 = vld [vmem:[%s1894_s15 + $0xc4] ss:$8 sps:$4 sm:$0xff]  }
  0x17   : > { %v1774_v34 = vld [vmem:[%s1894_s15 + $0x40] ss:$8 sps:$4 sm:$0xff]   ;;  %v1776_v36 = vld [vmem:[%s1894_s15 + $0x54] ss:$8 sps:$4 sm:$0xff]   ;;  %v1780_v38 = vld [vmem:[%s1894_s15 + $0x50] ss:$8 sps:$4 sm:$0xff]  }
  0x18   : > { %1587 = vmatpush3.bf16.msra.mxu0 %v1739_v9  ;;  %1702 = vmatpush3.bf16.msra.mxu1 %v1739_v9  ;;  %v1775_v35 = vld [vmem:[%s1894_s15 + $0xc0] ss:$8 sps:$4 sm:$0xff]   ;;  %v1778_v37 = vld [vmem:[%s1894_s15 + $0xd4] ss:$8 sps:$4 sm:$0xff]   ;;  %v1781_v39 = vld [vmem:[%s1894_s15 + $0xd0] ss:$8 sps:$4 sm:$0xff]  }
  0x19   : > { %1588 = vmatprep.subr.bf16.mxu0 %v1740_v10  ;;  %1695 = vmatprep.subr.bf16.mxu1 %v1740_v10  ;;  %v1782_v40 = vld [vmem:[%s1894_s15 + $0x64] ss:$8 sps:$4 sm:$0xff]   ;;  %v1786_v42 = vld [vmem:[%s1894_s15 + $0x60] ss:$8 sps:$4 sm:$0xff]   ;;  %v1788_v44 = vld [vmem:[%s1894_s15 + $0x74] ss:$8 sps:$4 sm:$0xff]  }
  0x1a   : > { %v1784_v41 = vld [vmem:[%s1894_s15 + $0xe4] ss:$8 sps:$4 sm:$0xff]   ;;  %v1787_v43 = vld [vmem:[%s1894_s15 + $0xe0] ss:$8 sps:$4 sm:$0xff]   ;;  %v1790_v45 = vld [vmem:[%s1894_s15 + $0xf4] ss:$8 sps:$4 sm:$0xff]  }
  0x1b   : > { %v1792_v46 = vld [vmem:[%s1894_s15 + $0x70] ss:$8 sps:$4 sm:$0xff]  }
  0x1c   : > { %1589 = vmatpush3.bf16.msra.mxu0 %v1741_v13  ;;  %1703 = vmatpush3.bf16.msra.mxu1 %v1741_v13  ;;  %v1793_v47 = vld [vmem:[%s1894_s15 + $0xf0] ss:$8 sps:$4 sm:$0xff]  }
  0x1d   : > { %1590 = vmatprep.subr.bf16.mxu0 %v1742_v14  ;;  %1696 = vmatprep.subr.bf16.mxu1 %v1742_v14 }
  0x20   : > { %1591 = vmatpush3.bf16.msra.mxu0 %v1743_v15  ;;  %1704 = vmatpush3.bf16.msra.mxu1 %v1743_v15 }
  0x21   : > { %1592 = vmatprep.subr.bf16.mxu0 %v1744_v16  ;;  %1697 = vmatprep.subr.bf16.mxu1 %v1744_v16 }
  0x24   : > { %1593 = vmatpush3.bf16.msra.mxu0 %v1745_v17  ;;  %1705 = vmatpush3.bf16.msra.mxu1 %v1745_v17 }
  0x27   : > { %730 = vmatmul.mubr.bf16.vlgmr.msra.gmra.mrb[0].mxu0 %v1746_v18  ;;  %794 = vmatmul.mubr.bf16.vlgmr.msra.gmra.mrb[0].mxu1 %v1749_v19 }
  0x28   : > { %737 = vmatprep.mubr.bf16.mxu0 %v1752_v20  ;;  %801 = vmatprep.mubr.bf16.mxu1 %v1754_v21 }
  0x2f   : > { %738 = vmatmul.mubr.bf16.gmra.mrb[4].mxu0 %v1756_v22  ;;  %802 = vmatmul.mubr.bf16.gmra.mrb[4].mxu1 %v1757_v23 }
  0x30   : > { %745 = vmatprep.mubr.bf16.mxu0 %v1758_v24  ;;  %809 = vmatprep.mubr.bf16.mxu1 %v1760_v25 }
  0x37   : > { %746 = vmatmul.mubr.bf16.gmra.mrb[8].mxu0 %v1762_v26  ;;  %810 = vmatmul.mubr.bf16.gmra.mrb[8].mxu1 %v1763_v27 }
  0x38   : > { %753 = vmatprep.mubr.bf16.mxu0 %v1764_v28  ;;  %817 = vmatprep.mubr.bf16.mxu1 %v1766_v29 }
  0x3f   : > { %754 = vmatmul.mubr.bf16.gmra.mrb[12].mxu0 %v1768_v30  ;;  %818 = vmatmul.mubr.bf16.gmra.mrb[12].mxu1 %v1769_v31 }
  0x40   : > { %761 = vmatprep.mubr.bf16.mxu0 %v1770_v32  ;;  %825 = vmatprep.mubr.bf16.mxu1 %v1772_v33 }
  0x47   : > { %762 = vmatmul.mubr.bf16.gmra.mrb[16].mxu0 %v1774_v34  ;;  %826 = vmatmul.mubr.bf16.gmra.mrb[16].mxu1 %v1775_v35 }
  0x48   : > { %769 = vmatprep.mubr.bf16.mxu0 %v1776_v36  ;;  %833 = vmatprep.mubr.bf16.mxu1 %v1778_v37 }
  0x4f   : > { %770 = vmatmul.mubr.bf16.gmra.mrb[20].mxu0 %v1780_v38  ;;  %834 = vmatmul.mubr.bf16.gmra.mrb[20].mxu1 %v1781_v39 }
  0x50   : > { %777 = vmatprep.mubr.bf16.mxu0 %v1782_v40  ;;  %841 = vmatprep.mubr.bf16.mxu1 %v1784_v41 }
  0x57   : > { %778 = vmatmul.mubr.bf16.gmra.mrb[24].mxu0 %v1786_v42  ;;  %842 = vmatmul.mubr.bf16.gmra.mrb[24].mxu1 %v1787_v43 }
  0x58   : > { %785 = vmatprep.mubr.bf16.mxu0 %v1788_v44  ;;  %849 = vmatprep.mubr.bf16.mxu1 %v1790_v45 }
  0x5f   : > { %786 = vmatmul.mubr.bf16.gmra.mrb[28].mxu0 %v1792_v46  ;;  %850 = vmatmul.mubr.bf16.gmra.mrb[28].mxu1 %v1793_v47 }
  0xfa   : > { %v1594_v48 = vpop.f32.mrb[0].mxu0  ;;  %v1642_v49 = vpop.f32.mrb[0].mxu1 }
  0xfb   : > { %v1595_v50 = vpop.f32.mrb[1].mxu0  ;;  %v1643_v52 = vpop.f32.mrb[1].mxu1 }
  0xfc   : > { %v1596_v53 = vadd.f32 %v1595_v50, %v1594_v48  ;;  %v1644_v54 = vadd.f32 %v1643_v52, %v1642_v49  ;;  %v1597_v55 = vpop.f32.mrb[2].mxu0  ;;  %v1645_v56 = vpop.f32.mrb[2].mxu1 }
  0xfd   : > { %v1598_v58 = vpop.f32.mrb[3].mxu0  ;;  %v1646_v59 = vpop.f32.mrb[3].mxu1 }
  0xfe   : > { %v964_v60 = vmul.f32 %v1596_v53, %v1952_v51  ;;  %v980_v61 = vmul.f32 %v1644_v54, %v1952_v51  ;;  %v1599_v62 = vadd.f32 %v1598_v58, %v1597_v55  ;;  %v1647_v63 = vadd.f32 %v1646_v59, %v1645_v56 }
 0x100   : > { %v1003_v0 = vadd.f32 %v1957_v57, %v964_v60  ;;  %v1019_v1 = vadd.f32 %v1957_v57, %v980_v61  ;;  %v965_v2 = vmul.f32 %v1599_v62, %v1952_v51  ;;  %v981_v3 = vmul.f32 %v1647_v63, %v1952_v51 }
 0x102   : > { %v1004_v4 = vadd.f32 %v1957_v57, %v965_v2  ;;  %v1020_v5 = vadd.f32 %v1957_v57, %v981_v3  ;;  %v1600_v6 = vpop.f32.mrb[4].mxu0  ;;  %v1648_v7 = vpop.f32.mrb[4].mxu1  ;;  %v1035_v8 = vmax.f32 %v1003_v0, 0.0  ;;  %v1051_v9 = vmax.f32 %v1019_v1, 0.0 }
 0x103   : > { %v1601_v10 = vpop.f32.mrb[5].mxu0  ;;  %v1649_v11 = vpop.f32.mrb[5].mxu1 }
 0x104   : > { %v1036_v12 = vmax.f32 %v1004_v4, 0.0  ;;  %v1052_v13 = vmax.f32 %v1020_v5, 0.0  ;;  %v1602_v14 = vadd.f32 %v1601_v10, %v1600_v6  ;;  %v1650_v15 = vadd.f32 %v1649_v11, %v1648_v7  ;;  %v1603_v16 = vpop.f32.mrb[6].mxu0  ;;  %v1651_v17 = vpop.f32.mrb[6].mxu1 }
 0x105   : > { %v1604_v18 = vpop.f32.mrb[7].mxu0  ;;  %v1652_v19 = vpop.f32.mrb[7].mxu1 }
 0x106   : > { %v1486_v20 = vpack.c.bf16 %v1036_v12, %v1035_v8  ;;  %v1526_v21 = vpack.c.bf16 %v1052_v13, %v1051_v9  ;;  %v966_v22 = vmul.f32 %v1602_v14, %v1952_v51  ;;  %v982_v23 = vmul.f32 %v1650_v15, %v1952_v51 }
 0x107   : > { %v1605_v24 = vadd.f32 %v1604_v18, %v1603_v16  ;;  %v1653_v25 = vadd.f32 %v1652_v19, %v1651_v17 }
 0x108   : > { %1487 = vst [vmem:[%s1971_s21] sm:$0xff] %v1486_v20   ;;  %1570 = vst [vmem:[%s1971_s21 + $0x40] sm:$0xff] %v1526_v21   ;;  %v1005_v26 = vadd.f32 %v1957_v57, %v966_v22  ;;  %v1021_v27 = vadd.f32 %v1957_v57, %v982_v23 }
 0x109   : > { %v967_v28 = vmul.f32 %v1605_v24, %v1952_v51  ;;  %v983_v29 = vmul.f32 %v1653_v25, %v1952_v51 }
 0x10a   : > { %v1606_v30 = vpop.f32.mrb[8].mxu0  ;;  %v1654_v31 = vpop.f32.mrb[8].mxu1  ;;  %v1037_v40 = vmax.f32 %v1005_v26, 0.0  ;;  %v1053_v41 = vmax.f32 %v1021_v27, 0.0 }
 0x10b   : > { %v1006_v32 = vadd.f32 %v1957_v57, %v967_v28  ;;  %v1022_v33 = vadd.f32 %v1957_v57, %v983_v29  ;;  %v1607_v34 = vpop.f32.mrb[9].mxu0  ;;  %v1655_v35 = vpop.f32.mrb[9].mxu1 }
 0x10c   : > { %v1608_v36 = vadd.f32 %v1607_v34, %v1606_v30  ;;  %v1656_v37 = vadd.f32 %v1655_v35, %v1654_v31  ;;  %v1609_v38 = vpop.f32.mrb[10].mxu0  ;;  %v1657_v39 = vpop.f32.mrb[10].mxu1 }
 0x10d   : > { %v1038_v42 = vmax.f32 %v1006_v32, 0.0  ;;  %v1054_v43 = vmax.f32 %v1022_v33, 0.0  ;;  %v1610_v44 = vpop.f32.mrb[11].mxu0  ;;  %v1658_v45 = vpop.f32.mrb[11].mxu1 }
 0x10e   : > { %v968_v46 = vmul.f32 %v1608_v36, %v1952_v51  ;;  %v984_v47 = vmul.f32 %v1656_v37, %v1952_v51  ;;  %v1611_v48 = vadd.f32 %v1610_v44, %v1609_v38  ;;  %v1659_v49 = vadd.f32 %v1658_v45, %v1657_v39 }
 0x10f   : > { %v1491_v50 = vpack.c.bf16 %v1038_v42, %v1037_v40  ;;  %v1531_v52 = vpack.c.bf16 %v1054_v43, %v1053_v41 }
 0x110   : > { %v1007_v53 = vadd.f32 %v1957_v57, %v968_v46  ;;  %v1023_v54 = vadd.f32 %v1957_v57, %v984_v47  ;;  %v969_v55 = vmul.f32 %v1611_v48, %v1952_v51  ;;  %v985_v56 = vmul.f32 %v1659_v49, %v1952_v51 }
 0x111   : > { %1563 = vst [vmem:[%s1971_s21 + $0x8] sm:$0xff] %v1491_v50   ;;  %1571 = vst [vmem:[%s1971_s21 + $0x48] sm:$0xff] %v1531_v52  }
 0x112   : > { %v1008_v58 = vadd.f32 %v1957_v57, %v969_v55  ;;  %v1024_v59 = vadd.f32 %v1957_v57, %v985_v56  ;;  %v1612_v60 = vpop.f32.mrb[12].mxu0  ;;  %v1660_v61 = vpop.f32.mrb[12].mxu1  ;;  %v1039_v62 = vmax.f32 %v1007_v53, 0.0  ;;  %v1055_v63 = vmax.f32 %v1023_v54, 0.0 }
 0x113   : > { %v1613_v0 = vpop.f32.mrb[13].mxu0  ;;  %v1661_v1 = vpop.f32.mrb[13].mxu1 }
 0x114   : > { %v1040_v2 = vmax.f32 %v1008_v58, 0.0  ;;  %v1056_v3 = vmax.f32 %v1024_v59, 0.0  ;;  %v1614_v4 = vadd.f32 %v1613_v0, %v1612_v60  ;;  %v1662_v5 = vadd.f32 %v1661_v1, %v1660_v61  ;;  %v1615_v6 = vpop.f32.mrb[14].mxu0  ;;  %v1663_v7 = vpop.f32.mrb[14].mxu1 }
 0x115   : > { %v1616_v8 = vpop.f32.mrb[15].mxu0  ;;  %v1664_v9 = vpop.f32.mrb[15].mxu1 }
 0x116   : > { %v1496_v10 = vpack.c.bf16 %v1040_v2, %v1039_v62  ;;  %v1536_v11 = vpack.c.bf16 %v1056_v3, %v1055_v63  ;;  %v970_v12 = vmul.f32 %v1614_v4, %v1952_v51  ;;  %v986_v13 = vmul.f32 %v1662_v5, %v1952_v51 }
 0x117   : > { %v1617_v14 = vadd.f32 %v1616_v8, %v1615_v6  ;;  %v1665_v15 = vadd.f32 %v1664_v9, %v1663_v7 }
 0x118   : > { %1564 = vst [vmem:[%s1971_s21 + $0x10] sm:$0xff] %v1496_v10   ;;  %1572 = vst [vmem:[%s1971_s21 + $0x50] sm:$0xff] %v1536_v11   ;;  %v1009_v16 = vadd.f32 %v1957_v57, %v970_v12  ;;  %v1025_v17 = vadd.f32 %v1957_v57, %v986_v13 }
 0x119   : > { %v971_v18 = vmul.f32 %v1617_v14, %v1952_v51  ;;  %v987_v19 = vmul.f32 %v1665_v15, %v1952_v51 }
 0x11a   : > { %v1618_v20 = vpop.f32.mrb[16].mxu0  ;;  %v1666_v21 = vpop.f32.mrb[16].mxu1  ;;  %v1041_v30 = vmax.f32 %v1009_v16, 0.0  ;;  %v1057_v31 = vmax.f32 %v1025_v17, 0.0 }
 0x11b   : > { %v1010_v22 = vadd.f32 %v1957_v57, %v971_v18  ;;  %v1026_v23 = vadd.f32 %v1957_v57, %v987_v19  ;;  %v1619_v24 = vpop.f32.mrb[17].mxu0  ;;  %v1667_v25 = vpop.f32.mrb[17].mxu1 }
 0x11c   : > { %v1620_v26 = vadd.f32 %v1619_v24, %v1618_v20  ;;  %v1668_v27 = vadd.f32 %v1667_v25, %v1666_v21  ;;  %v1621_v28 = vpop.f32.mrb[18].mxu0  ;;  %v1669_v29 = vpop.f32.mrb[18].mxu1 }
 0x11d   : > { %v1042_v32 = vmax.f32 %v1010_v22, 0.0  ;;  %v1058_v33 = vmax.f32 %v1026_v23, 0.0  ;;  %v1622_v34 = vpop.f32.mrb[19].mxu0  ;;  %v1670_v35 = vpop.f32.mrb[19].mxu1 }
 0x11e   : > { %v972_v36 = vmul.f32 %v1620_v26, %v1952_v51  ;;  %v988_v37 = vmul.f32 %v1668_v27, %v1952_v51  ;;  %v1623_v38 = vadd.f32 %v1622_v34, %v1621_v28  ;;  %v1671_v39 = vadd.f32 %v1670_v35, %v1669_v29 }
 0x11f   : > { %v1501_v40 = vpack.c.bf16 %v1042_v32, %v1041_v30  ;;  %v1541_v41 = vpack.c.bf16 %v1058_v33, %v1057_v31 }
 0x120   : > { %v1011_v42 = vadd.f32 %v1957_v57, %v972_v36  ;;  %v1027_v43 = vadd.f32 %v1957_v57, %v988_v37  ;;  %v973_v44 = vmul.f32 %v1623_v38, %v1952_v51  ;;  %v989_v45 = vmul.f32 %v1671_v39, %v1952_v51 }
 0x121   : > { %1565 = vst [vmem:[%s1971_s21 + $0x18] sm:$0xff] %v1501_v40   ;;  %1573 = vst [vmem:[%s1971_s21 + $0x58] sm:$0xff] %v1541_v41  }
 0x122   : > { %v1012_v46 = vadd.f32 %v1957_v57, %v973_v44  ;;  %v1028_v47 = vadd.f32 %v1957_v57, %v989_v45  ;;  %v1624_v48 = vpop.f32.mrb[20].mxu0  ;;  %v1672_v49 = vpop.f32.mrb[20].mxu1  ;;  %v1043_v50 = vmax.f32 %v1011_v42, 0.0  ;;  %v1059_v52 = vmax.f32 %v1027_v43, 0.0 }
 0x123   : > { %v1625_v53 = vpop.f32.mrb[21].mxu0  ;;  %v1673_v54 = vpop.f32.mrb[21].mxu1 }
 0x124   : > { %v1044_v55 = vmax.f32 %v1012_v46, 0.0  ;;  %v1060_v56 = vmax.f32 %v1028_v47, 0.0  ;;  %v1626_v58 = vadd.f32 %v1625_v53, %v1624_v48  ;;  %v1674_v59 = vadd.f32 %v1673_v54, %v1672_v49  ;;  %v1627_v60 = vpop.f32.mrb[22].mxu0  ;;  %v1675_v61 = vpop.f32.mrb[22].mxu1 }
 0x125   : > { %v1628_v62 = vpop.f32.mrb[23].mxu0  ;;  %v1676_v63 = vpop.f32.mrb[23].mxu1 }
 0x126   : > { %v1506_v0 = vpack.c.bf16 %v1044_v55, %v1043_v50  ;;  %v1546_v1 = vpack.c.bf16 %v1060_v56, %v1059_v52  ;;  %v974_v2 = vmul.f32 %v1626_v58, %v1952_v51  ;;  %v990_v3 = vmul.f32 %v1674_v59, %v1952_v51 }
 0x127   : > { %v1629_v4 = vadd.f32 %v1628_v62, %v1627_v60  ;;  %v1677_v5 = vadd.f32 %v1676_v63, %v1675_v61 }
 0x128   : > { %1566 = vst [vmem:[%s1971_s21 + $0x20] sm:$0xff] %v1506_v0   ;;  %1574 = vst [vmem:[%s1971_s21 + $0x60] sm:$0xff] %v1546_v1   ;;  %v1013_v6 = vadd.f32 %v1957_v57, %v974_v2  ;;  %v1029_v7 = vadd.f32 %v1957_v57, %v990_v3 }
 0x129   : > { %v975_v8 = vmul.f32 %v1629_v4, %v1952_v51  ;;  %v991_v9 = vmul.f32 %v1677_v5, %v1952_v51 }
 0x12a   : > { %v1630_v10 = vpop.f32.mrb[24].mxu0  ;;  %v1678_v11 = vpop.f32.mrb[24].mxu1  ;;  %v1045_v20 = vmax.f32 %v1013_v6, 0.0  ;;  %v1061_v21 = vmax.f32 %v1029_v7, 0.0 }
 0x12b   : > { %v1014_v12 = vadd.f32 %v1957_v57, %v975_v8  ;;  %v1030_v13 = vadd.f32 %v1957_v57, %v991_v9  ;;  %v1631_v14 = vpop.f32.mrb[25].mxu0  ;;  %v1679_v15 = vpop.f32.mrb[25].mxu1 }
 0x12c   : > { %v1632_v16 = vadd.f32 %v1631_v14, %v1630_v10  ;;  %v1680_v17 = vadd.f32 %v1679_v15, %v1678_v11  ;;  %v1633_v18 = vpop.f32.mrb[26].mxu0  ;;  %v1681_v19 = vpop.f32.mrb[26].mxu1 }
 0x12d   : > { %v1046_v22 = vmax.f32 %v1014_v12, 0.0  ;;  %v1062_v23 = vmax.f32 %v1030_v13, 0.0  ;;  %v1634_v24 = vpop.f32.mrb[27].mxu0  ;;  %v1682_v25 = vpop.f32.mrb[27].mxu1 }
 0x12e   : > { %v976_v26 = vmul.f32 %v1632_v16, %v1952_v51  ;;  %v992_v27 = vmul.f32 %v1680_v17, %v1952_v51  ;;  %v1635_v28 = vadd.f32 %v1634_v24, %v1633_v18  ;;  %v1683_v29 = vadd.f32 %v1682_v25, %v1681_v19 }
 0x12f   : > { %v1511_v30 = vpack.c.bf16 %v1046_v22, %v1045_v20  ;;  %v1551_v31 = vpack.c.bf16 %v1062_v23, %v1061_v21 }
 0x130   : > { %v1015_v32 = vadd.f32 %v1957_v57, %v976_v26  ;;  %v1031_v33 = vadd.f32 %v1957_v57, %v992_v27  ;;  %v977_v34 = vmul.f32 %v1635_v28, %v1952_v51  ;;  %v993_v35 = vmul.f32 %v1683_v29, %v1952_v51 }
 0x131   : > { %1567 = vst [vmem:[%s1971_s21 + $0x28] sm:$0xff] %v1511_v30   ;;  %1575 = vst [vmem:[%s1971_s21 + $0x68] sm:$0xff] %v1551_v31  }
 0x132   : > { %v1016_v36 = vadd.f32 %v1957_v57, %v977_v34  ;;  %v1032_v37 = vadd.f32 %v1957_v57, %v993_v35  ;;  %v1636_v38 = vpop.f32.mrb[28].mxu0  ;;  %v1684_v39 = vpop.f32.mrb[28].mxu1  ;;  %v1047_v40 = vmax.f32 %v1015_v32, 0.0  ;;  %v1063_v41 = vmax.f32 %v1031_v33, 0.0 }
 0x133   : > { %v1637_v42 = vpop.f32.mrb[29].mxu0  ;;  %v1685_v43 = vpop.f32.mrb[29].mxu1 }
 0x134   : > { %v1048_v44 = vmax.f32 %v1016_v36, 0.0  ;;  %v1064_v45 = vmax.f32 %v1032_v37, 0.0  ;;  %v1638_v46 = vadd.f32 %v1637_v42, %v1636_v38  ;;  %v1686_v47 = vadd.f32 %v1685_v43, %v1684_v39  ;;  %v1639_v48 = vpop.f32.mrb[30].mxu0  ;;  %v1687_v49 = vpop.f32.mrb[30].mxu1 }
 0x135   : > { %v1640_v50 = vpop.f32.mrb[31].mxu0  ;;  %v1688_v52 = vpop.f32.mrb[31].mxu1 }
 0x136   : > { %v1516_v53 = vpack.c.bf16 %v1048_v44, %v1047_v40  ;;  %v1556_v54 = vpack.c.bf16 %v1064_v45, %v1063_v41  ;;  %v978_v55 = vmul.f32 %v1638_v46, %v1952_v51  ;;  %v994_v56 = vmul.f32 %v1686_v47, %v1952_v51 }
 0x137   : > { %v1641_v58 = vadd.f32 %v1640_v50, %v1639_v48  ;;  %v1689_v59 = vadd.f32 %v1688_v52, %v1687_v49 }
 0x138   : > { %1568 = vst [vmem:[%s1971_s21 + $0x30] sm:$0xff] %v1516_v53   ;;  %1576 = vst [vmem:[%s1971_s21 + $0x70] sm:$0xff] %v1556_v54   ;;  %v1017_v60 = vadd.f32 %v1957_v57, %v978_v55  ;;  %v1033_v61 = vadd.f32 %v1957_v57, %v994_v56 }
 0x139   : > { %v979_v62 = vmul.f32 %v1641_v58, %v1952_v51  ;;  %v995_v63 = vmul.f32 %v1689_v59, %v1952_v51 }
 0x13a   : > { %v1049_v2 = vmax.f32 %v1017_v60, 0.0  ;;  %v1065_v3 = vmax.f32 %v1033_v61, 0.0 }
 0x13b   : > { %v1018_v0 = vadd.f32 %v1957_v57, %v979_v62  ;;  %v1034_v1 = vadd.f32 %v1957_v57, %v995_v63 }
 0x13d   : > { %v1050_v4 = vmax.f32 %v1018_v0, 0.0  ;;  %v1066_v5 = vmax.f32 %v1034_v1, 0.0 }
 0x13f   : > { %v1521_v6 = vpack.c.bf16 %v1050_v4, %v1049_v2  ;;  %v1561_v7 = vpack.c.bf16 %v1066_v5, %v1065_v3 }
 0x141   : > { %1569 = vst [vmem:[%s1971_s21 + $0x38] sm:$0xff] %v1521_v6   ;;  %1577 = vst [vmem:[%s1971_s21 + $0x78] sm:$0xff] %v1561_v7  }
 0x142 PF: > { %s14_s17 = sadd.s32 1, %s1816_s17   ;;  %s2059_s15 = smov %s1812_s16 }
 0x143   : > { %p11_p5 = scmp.ge.s32.totalorder %s14_s17, 4   ;;  %s2060_s16 = smov %s2062_s18 }
 0x145   :  { %13 = sbr.rel (!%p11_p5) target bundleno = 2 (0x2), region = 83 }

// kernel: xray_analyzer_forward.123
= control target key start
LH: loop header
LB: loop body
LE: loop exit
PB: predicated region body
PF: predicated region fallthrough
CT: control target
= control target key end

     0   :  { %s1203_s21 = smov 0   ;;  %s1205_s22 = smov 0   ;;  %s1354_s0 = inlined_call_operand.vmem [shape: bf16[128,256], index: 0, kind: input, shape index: {}]   ;;  %s1355_s1 = inlined_call_operand.vmem [shape: bf16[256,128], index: 1, kind: input, shape index: {}]   ;;  %s1356_s2 = inlined_call_operand.vmem [shape: f32[1,256], index: 2, kind: input, shape index: {}]   ;;  %s1357_s3 = inlined_call_operand.vmem [shape: f32[1,256], index: 3, kind: input, shape index: {}]   ;;  %s1358_s4 = inlined_call_operand.vmem [shape: f32[1,128], index: 4, kind: input, shape index: {}]   ;;  %s1359_s5 = inlined_call_operand.vmem [shape: f32[1,128], index: 5, kind: input, shape index: {}]   ;;  %s1360_s6 = inlined_call_operand.vmem [shape: bf16[128,128], index: 6, kind: output, shape index: {}]  }
   0x1   :  { %s1207_s23 = smov 0  }
   0x2 LB: > { %s35_s24 = sadd.s32 1, %s1162_s22  ;;  %p982_p0 = scmp.ge.s32.totalorder %s1166_s23, 1  ;;  %s1166_s23 = sphi %s1207_s23, %s16_s23   ;;  %s1162_s22 = sphi %s1205_s22, %s1362_s22   ;;  %s1158_s21 = sphi %s1203_s21, %s1361_s21  }
   0x3   : > { %p37_p1 = scmp.ge.s32.totalorder %s35_s24, 2  ;;  %p294_p2 = scmp.lt.s32.totalorder %s1166_s23, 3 }
   0x5   : > { %s1364_s24 = smov (%p37_p1, %s35_s24), 0  ;;  %p295_p3 = pnand %p982_p0, %p294_p2 }
   0x6   : > { %v1128_v0 = vld [vmem:[%s1355_s1 + $0x40] sm:$0xff] (!%p295_p3)   ;;  %s983_s27 = sshll.u32 (!%p295_p3), %s1158_s21, 3  ;;  %v1130_v2 = vld [vmem:[%s1355_s1 + $0x48] sm:$0xff] (!%p295_p3)   ;;  %v1132_v4 = vld [vmem:[%s1355_s1 + $0x50] sm:$0xff] (!%p295_p3)   ;;  %v439_v5 = vlaneseq (!%p295_p3) }
   0x7   : > { %298 = sbr.rel (%p295_p3) target bundleno = 274 (0x112), region = 44  ;;  %v1129_v1 = vld [vmem:[%s1355_s1] sm:$0xff] (!%p295_p3)   ;;  %1048 = vmatprep.subr.bf16.mxu0 (!%p295_p3), %v1128_v0  ;;  %1088 = vmatprep.subr.bf16.mxu1 (!%p295_p3), %v1128_v0  ;;  %p356_p4 = scmp.lt.s32.totalorder (!%p295_p3), %s983_s27, 15  ;;  %v1131_v3 = vld [vmem:[%s1355_s1 + $0x8] sm:$0xff] (!%p295_p3)   ;;  %v1133_v6 = vld [vmem:[%s1355_s1 + $0x10] sm:$0xff] (!%p295_p3)  }
   0x8   : > { %1049 = vmatpush3.bf16.msra.mxu0 (!%p295_p3), %v1129_v1  ;;  %1096 = vmatpush3.bf16.msra.mxu1 (!%p295_p3), %v1129_v1  ;;  %v1134_v7 = vld [vmem:[%s1355_s1 + $0x58] sm:$0xff] (!%p295_p3)   ;;  %v440_v8 = vshrl.u32 (!%p295_p3), %v439_v5, 7  ;;  %v1136_v10 = vld [vmem:[%s1355_s1 + $0x60] sm:$0xff] (!%p295_p3)   ;;  %v1138_v14 = vld [vmem:[%s1355_s1 + $0x68] sm:$0xff] (!%p295_p3)  }
   0x9   : > { %1050 = vmatprep.subr.bf16.mxu0 (!%p295_p3), %v1130_v2  ;;  %1089 = vmatprep.subr.bf16.mxu1 (!%p295_p3), %v1130_v2  ;;  %v1135_v9 = vld [vmem:[%s1355_s1 + $0x18] sm:$0xff] (!%p295_p3)   ;;  %v1137_v12 = vld [vmem:[%s1355_s1 + $0x20] sm:$0xff] (!%p295_p3)   ;;  %v1139_v30 = vld [vmem:[%s1355_s1 + $0x28] sm:$0xff] (!%p295_p3)  }
   0xa   : > { %v441_v11 = vsub.s32 (!%p295_p3), 0, %v440_v8  ;;  %v445_v13 = vsub.s32 (!%p295_p3), 1, %v440_v8  ;;  %v437_v17 = vld [vmem:[%s1356_s2] sm:$0x3] (!%p295_p3)  ;;  %v1140_v35 = vld [vmem:[%s1355_s1 + $0x70] sm:$0xff] (!%p295_p3)   ;;  %v1142_v54 = vld [vmem:[%s1355_s1 + $0x78] sm:$0xff] (!%p295_p3)  }
   0xb   : > { %v465_v22 = vld [vmem:[%s1357_s3] sm:$0x3] (!%p295_p3)  ;;  %v1141_v49 = vld [vmem:[%s1355_s1 + $0x30] sm:$0xff] (!%p295_p3)   ;;  %v1143_v5 = vld [vmem:[%s1355_s1 + $0x38] sm:$0xff] (!%p295_p3)  }
   0xc   : > { %1051 = vmatpush3.bf16.msra.mxu0 (!%p295_p3), %v1131_v3  ;;  %1097 = vmatpush3.bf16.msra.mxu1 (!%p295_p3), %v1131_v3  ;;  %v1272_v25 = vrot.slane (!%p295_p3), %v437_v17, %v441_v11  ;;  %v1274_v26 = vrot.slane (!%p295_p3), %v437_v17, %v445_v13  ;;  %v1276_v27 = vrot.slane (!%p295_p3), %v465_v22, %v441_v11 }
   0xd   : > { %1052 = vmatprep.subr.bf16.mxu0 (!%p295_p3), %v1132_v4  ;;  %1090 = vmatprep.subr.bf16.mxu1 (!%p295_p3), %v1132_v4  ;;  %v1278_v28 = vrot.slane (!%p295_p3), %v465_v22, %v445_v13 }
   0xe   : > { %s1366_s27 = smov (!%p356_p4, %s983_s27), 15 }
   0xf   : > { %s1016_s16 = sshll.u32 %s1366_s27, 3  ;;  %s987_s30 = sshll.u32 %s1366_s27, 2 }
  0x10   : > { %1053 = vmatpush3.bf16.msra.mxu0 %v1133_v6  ;;  %1098 = vmatpush3.bf16.msra.mxu1 %v1133_v6  ;;  %s1254_s26 = scalar_lea.vmem %s1354_s0, %s1016_s16  ;;  %s398_s9 = scalar_lea.vmem %s1360_s6, %s987_s30 }
  0x11   : > { %1054 = vmatprep.subr.bf16.mxu0 %v1134_v7  ;;  %1091 = vmatprep.subr.bf16.mxu1 %v1134_v7  ;;  %v413_v15 = vld [vmem:[%s1254_s26] sm:$0xff]  ;;  %v414_v16 = vld [vmem:[%s1254_s26 + $0x8] sm:$0xff]  ;;  %v1281_v29 = vld [vmem:[%s1254_s26 + $0x10] sm:$0xff] }
  0x12   : > { %v421_v18 = vunpack.c.l.bf16 %v413_v15  ;;  %v422_v19 = vunpack.c.h.bf16 %v413_v15  ;;  %v423_v20 = vunpack.c.l.bf16 %v414_v16  ;;  %v424_v21 = vunpack.c.h.bf16 %v414_v16  ;;  %v417_v23 = vld [vmem:[%s1254_s26 + $0x20] sm:$0xff]  ;;  %v418_v24 = vld [vmem:[%s1254_s26 + $0x28] sm:$0xff]  ;;  %v416_v39 = vld [vmem:[%s1254_s26 + $0x18] sm:$0xff] }
  0x13   : > { %v429_v31 = vunpack.c.l.bf16 %v417_v23  ;;  %v430_v32 = vunpack.c.h.bf16 %v417_v23  ;;  %v431_v33 = vunpack.c.l.bf16 %v418_v24  ;;  %v432_v34 = vunpack.c.h.bf16 %v418_v24  ;;  %v419_v59 = vld [vmem:[%s1254_s26 + $0x30] sm:$0xff]  ;;  %v420_v0 = vld [vmem:[%s1254_s26 + $0x38] sm:$0xff] }
  0x14   : > { %1055 = vmatpush3.bf16.msra.mxu0 %v1135_v9  ;;  %1099 = vmatpush3.bf16.msra.mxu1 %v1135_v9  ;;  %v450_v36 = vmul.f32 %v1274_v26, %v422_v19  ;;  %v452_v37 = vmul.f32 %v1274_v26, %v424_v21  ;;  %v449_v38 = vmul.f32 %v1272_v25, %v421_v18  ;;  %v426_v40 = vunpack.c.h.bf16 %v1281_v29 }
  0x15   : > { %1056 = vmatprep.subr.bf16.mxu0 %v1136_v10  ;;  %1092 = vmatprep.subr.bf16.mxu1 %v1136_v10  ;;  %v458_v41 = vmul.f32 %v1274_v26, %v430_v32  ;;  %v460_v42 = vmul.f32 %v1274_v26, %v432_v34  ;;  %v451_v43 = vmul.f32 %v1272_v25, %v423_v20  ;;  %v428_v53 = vunpack.c.h.bf16 %v416_v39 }
  0x16   : > { %v457_v44 = vmul.f32 %v1272_v25, %v429_v31  ;;  %v478_v45 = vadd.f32 %v1278_v28, %v450_v36  ;;  %v480_v46 = vadd.f32 %v1278_v28, %v452_v37  ;;  %v477_v47 = vadd.f32 %v1276_v27, %v449_v38 }
  0x17   : > { %v459_v48 = vmul.f32 %v1272_v25, %v431_v33  ;;  %v486_v50 = vadd.f32 %v1278_v28, %v458_v41  ;;  %v488_v51 = vadd.f32 %v1278_v28, %v460_v42  ;;  %v479_v52 = vadd.f32 %v1276_v27, %v451_v43 }
  0x18   : > { %1057 = vmatpush3.bf16.msra.mxu0 %v1137_v12  ;;  %1100 = vmatpush3.bf16.msra.mxu1 %v1137_v12  ;;  %v494_v55 = vmax.f32 %v478_v45, 0.0  ;;  %v496_v56 = vmax.f32 %v480_v46, 0.0  ;;  %v493_v57 = vmax.f32 %v477_v47, 0.0  ;;  %v485_v58 = vadd.f32 %v1276_v27, %v457_v44  ;;  %v1004_v46 = vld [vmem:[%s1358_s4] ss:$0 sm:$0xff] }
  0x19   : > { %1058 = vmatprep.subr.bf16.mxu0 %v1138_v14  ;;  %1093 = vmatprep.subr.bf16.mxu1 %v1138_v14  ;;  %v502_v60 = vmax.f32 %v486_v50, 0.0  ;;  %v504_v61 = vmax.f32 %v488_v51, 0.0  ;;  %v495_v62 = vmax.f32 %v479_v52, 0.0  ;;  %v487_v63 = vadd.f32 %v1276_v27, %v459_v48  ;;  %v1005_v51 = vld [vmem:[%s1359_s5] ss:$0 sm:$0xff] }
  0x1a   : > { %v510_v1 = vpack.c.bf16 %v496_v56, %v494_v55  ;;  %v501_v2 = vmax.f32 %v485_v58, 0.0  ;;  %v454_v3 = vmul.f32 %v1274_v26, %v426_v40  ;;  %v456_v4 = vmul.f32 %v1274_v26, %v428_v53 }
  0x1b   : > { %v514_v6 = vpack.c.bf16 %v504_v61, %v502_v60  ;;  %v509_v7 = vpack.c.bf16 %v495_v62, %v493_v57  ;;  %v503_v8 = vmax.f32 %v487_v63, 0.0  ;;  %v434_v9 = vunpack.c.h.bf16 %v419_v59 }
  0x1c   : > { %1059 = vmatpush3.bf16.msra.mxu0 %v1139_v30  ;;  %1101 = vmatpush3.bf16.msra.mxu1 %v1139_v30  ;;  %v482_v10 = vadd.f32 %v1278_v28, %v454_v3  ;;  %v484_v11 = vadd.f32 %v1278_v28, %v456_v4  ;;  %v436_v12 = vunpack.c.h.bf16 %v420_v0  ;;  %v425_v13 = vunpack.c.l.bf16 %v1281_v29 }
  0x1d   : > { %1060 = vmatprep.subr.bf16.mxu0 %v1140_v35  ;;  %1094 = vmatprep.subr.bf16.mxu1 %v1140_v35  ;;  %v513_v14 = vpack.c.bf16 %v503_v8, %v501_v2  ;;  %v462_v15 = vmul.f32 %v1274_v26, %v434_v9  ;;  %v427_v16 = vunpack.c.l.bf16 %v416_v39  ;;  %v433_v17 = vunpack.c.l.bf16 %v419_v59 }
  0x1e   : > { %685 = vmatprep.mubr.bf16.mxu0 %v510_v1  ;;  %701 = vmatprep.mubr.bf16.mxu1 %v514_v6  ;;  %v498_v18 = vmax.f32 %v482_v10, 0.0  ;;  %v500_v19 = vmax.f32 %v484_v11, 0.0  ;;  %v464_v20 = vmul.f32 %v1274_v26, %v436_v12  ;;  %v453_v21 = vmul.f32 %v1272_v25, %v425_v13 }
  0x1f   : > { %v490_v22 = vadd.f32 %v1278_v28, %v462_v15  ;;  %v455_v23 = vmul.f32 %v1272_v25, %v427_v16  ;;  %v435_v24 = vunpack.c.l.bf16 %v420_v0  ;;  %v461_v29 = vmul.f32 %v1272_v25, %v433_v17 }
  0x20   : > { %1061 = vmatpush3.bf16.msra.mxu0 %v1141_v49  ;;  %1102 = vmatpush3.bf16.msra.mxu1 %v1141_v49  ;;  %v512_v30 = vpack.c.bf16 %v500_v19, %v498_v18  ;;  %v492_v31 = vadd.f32 %v1278_v28, %v464_v20  ;;  %v481_v32 = vadd.f32 %v1276_v27, %v453_v21 }
  0x21   : > { %1062 = vmatprep.subr.bf16.mxu0 %v1142_v54  ;;  %1095 = vmatprep.subr.bf16.mxu1 %v1142_v54  ;;  %v506_v33 = vmax.f32 %v490_v22, 0.0  ;;  %v483_v34 = vadd.f32 %v1276_v27, %v455_v23  ;;  %v463_v26 = vmul.f32 %v1272_v25, %v435_v24  ;;  %v489_v35 = vadd.f32 %v1276_v27, %v461_v29 }
  0x22   : > { %v508_v36 = vmax.f32 %v492_v31, 0.0  ;;  %v497_v37 = vmax.f32 %v481_v32, 0.0 }
  0x23   : > { %v499_v38 = vmax.f32 %v483_v34, 0.0  ;;  %v491_v39 = vadd.f32 %v1276_v27, %v463_v26  ;;  %v505_v40 = vmax.f32 %v489_v35, 0.0 }
  0x24   : > { %1063 = vmatpush3.bf16.msra.mxu0 %v1143_v5  ;;  %1103 = vmatpush3.bf16.msra.mxu1 %v1143_v5  ;;  %v516_v41 = vpack.c.bf16 %v508_v36, %v506_v33 }
  0x25   : > { %v507_v28 = vmax.f32 %v491_v39, 0.0  ;;  %v511_v42 = vpack.c.bf16 %v499_v38, %v497_v37 }
  0x27   : > { %686 = vmatmul.mubr.bf16.vlgmr.msra.gmra.mrb[0].mxu0 %v509_v7  ;;  %702 = vmatmul.mubr.bf16.vlgmr.msra.gmra.mrb[0].mxu1 %v513_v14  ;;  %v515_v43 = vpack.c.bf16 %v507_v28, %v505_v40 }
  0x28   : > { %693 = vmatprep.mubr.bf16.mxu0 %v512_v30  ;;  %709 = vmatprep.mubr.bf16.mxu1 %v516_v41 }
  0x2f   : > { %694 = vmatmul.mubr.bf16.gmra.mrb[4].mxu0 %v511_v42  ;;  %710 = vmatmul.mubr.bf16.gmra.mrb[4].mxu1 %v515_v43 }
  0xfa   : > { %v1064_v44 = vpop.f32.mrb[0].mxu0  ;;  %v1076_v25 = vpop.f32.mrb[0].mxu1 }
  0xfb   : > { %v1065_v45 = vpop.f32.mrb[1].mxu0  ;;  %v1077_v47 = vpop.f32.mrb[1].mxu1 }
  0xfc   : > { %v1066_v48 = vadd.f32 %v1065_v45, %v1064_v44  ;;  %v1078_v49 = vadd.f32 %v1077_v47, %v1076_v25  ;;  %v1067_v27 = vpop.f32.mrb[2].mxu0  ;;  %v1079_v50 = vpop.f32.mrb[2].mxu1 }
  0xfd   : > { %v1068_v52 = vpop.f32.mrb[3].mxu0  ;;  %v1080_v53 = vpop.f32.mrb[3].mxu1 }
  0xfe   : > { %v752_v54 = vmul.f32 %v1066_v48, %v1004_v46  ;;  %v756_v55 = vmul.f32 %v1078_v49, %v1004_v46  ;;  %v1069_v56 = vadd.f32 %v1068_v52, %v1067_v27  ;;  %v1081_v57 = vadd.f32 %v1080_v53, %v1079_v50 }
 0x100   : > { %v767_v58 = vadd.f32 %v1005_v51, %v752_v54  ;;  %v771_v59 = vadd.f32 %v1005_v51, %v756_v55  ;;  %v753_v60 = vmul.f32 %v1069_v56, %v1004_v46  ;;  %v757_v61 = vmul.f32 %v1081_v57, %v1004_v46 }
 0x102   : > { %v768_v62 = vadd.f32 %v1005_v51, %v753_v60  ;;  %v772_v63 = vadd.f32 %v1005_v51, %v757_v61  ;;  %v1070_v0 = vpop.f32.mrb[4].mxu0  ;;  %v1082_v1 = vpop.f32.mrb[4].mxu1  ;;  %v775_v2 = vmax.f32 %v767_v58, 0.0  ;;  %v779_v3 = vmax.f32 %v771_v59, 0.0 }
 0x103   : > { %v1071_v4 = vpop.f32.mrb[5].mxu0  ;;  %v1083_v5 = vpop.f32.mrb[5].mxu1 }
 0x104   : > { %v776_v6 = vmax.f32 %v768_v62, 0.0  ;;  %v780_v7 = vmax.f32 %v772_v63, 0.0  ;;  %v1072_v8 = vadd.f32 %v1071_v4, %v1070_v0  ;;  %v1084_v9 = vadd.f32 %v1083_v5, %v1082_v1  ;;  %v1073_v10 = vpop.f32.mrb[6].mxu0  ;;  %v1085_v11 = vpop.f32.mrb[6].mxu1 }
 0x105   : > { %v1074_v12 = vpop.f32.mrb[7].mxu0  ;;  %v1086_v13 = vpop.f32.mrb[7].mxu1 }
 0x106   : > { %v1028_v14 = vpack.c.bf16 %v776_v6, %v775_v2  ;;  %v1038_v15 = vpack.c.bf16 %v780_v7, %v779_v3  ;;  %v754_v16 = vmul.f32 %v1072_v8, %v1004_v46  ;;  %v758_v17 = vmul.f32 %v1084_v9, %v1004_v46 }
 0x107   : > { %v1075_v18 = vadd.f32 %v1074_v12, %v1073_v10  ;;  %v1087_v19 = vadd.f32 %v1086_v13, %v1085_v11 }
 0x108   : > { %1029 = vst [vmem:[%s398_s9] sm:$0xff] %v1028_v14   ;;  %1046 = vst [vmem:[%s398_s9 + $0x10] sm:$0xff] %v1038_v15   ;;  %v769_v20 = vadd.f32 %v1005_v51, %v754_v16  ;;  %v773_v21 = vadd.f32 %v1005_v51, %v758_v17 }
 0x109   : > { %v755_v22 = vmul.f32 %v1075_v18, %v1004_v46  ;;  %v759_v23 = vmul.f32 %v1087_v19, %v1004_v46 }
 0x10a   : > { %v777_v30 = vmax.f32 %v769_v20, 0.0  ;;  %v781_v31 = vmax.f32 %v773_v21, 0.0 }
 0x10b   : > { %v770_v24 = vadd.f32 %v1005_v51, %v755_v22  ;;  %v774_v29 = vadd.f32 %v1005_v51, %v759_v23 }
 0x10d   : > { %v778_v32 = vmax.f32 %v770_v24, 0.0  ;;  %v782_v33 = vmax.f32 %v774_v29, 0.0 }
 0x10f   : > { %v1033_v34 = vpack.c.bf16 %v778_v32, %v777_v30  ;;  %v1043_v26 = vpack.c.bf16 %v782_v33, %v781_v31 }
 0x111   : > { %1045 = vst [vmem:[%s398_s9 + $0x8] sm:$0xff] %v1033_v34   ;;  %1047 = vst [vmem:[%s398_s9 + $0x18] sm:$0xff] %v1043_v26  }
 0x112 PF: > { %s16_s23 = sadd.s32 1, %s1166_s23   ;;  %s1361_s21 = smov %s1162_s22 }
 0x113   : > { %p13_p5 = scmp.ge.s32.totalorder %s16_s23, 4   ;;  %s1362_s22 = smov %s1364_s24 }
 0x115   :  { %15 = sbr.rel (!%p13_p5) target bundleno = 2 (0x2), region = 97 }

// kernel: xray_analyzer_forward.124
= control target key start
LH: loop header
LB: loop body
LE: loop exit
PB: predicated region body
PF: predicated region fallthrough
CT: control target
= control target key end

     0   :  { %7 = vsyncpa [#allocation4], 0  ;;  %s2588_s0 = inlined_call_operand.hbm [shape: bf16[128,1152], index: 0, kind: input, shape index: {}]   ;;  %s2589_s1 = inlined_call_operand.vmem [shape: bf16[1152,128], index: 1, kind: input, shape index: {}]   ;;  %s2590_s2 = inlined_call_operand.vmem [shape: bf16[128,128], index: 2, kind: output, shape index: {}]  }
   0x1   :  { %9 = vsyncpa [#allocation4 + $0x1], 0  ;;  %s2211_s9 = smov 0   ;;  %s2213_s10 = smov 0  }
   0x2   :  { %s2215_s11 = smov 0   ;;  %s2217_s12 = smov 0  }
   0x3   :  { %s2219_s13 = smov 0   ;;  %s2221_s14 = smov 0  }
   0x4 LB: > { %s1555_s15 = sadd.s32 4294967295, %s2191_s14   ;;  %s34_s16 = sadd.s32 1, %s2187_s13  ;;  %s2191_s14 = sphi %s2221_s14, %s15_s14   ;;  %s2187_s13 = sphi %s2219_s13, %s2597_s13   ;;  %s2183_s12 = sphi %s2217_s12, %s2596_s12   ;;  %s2179_s11 = sphi %s2215_s11, %s2595_s11   ;;  %s2175_s10 = sphi %s2213_s10, %s2594_s10   ;;  %s2171_s9 = sphi %s2211_s9, %s2593_s9  }
   0x5   : > { %p36_p0 = scmp.ge.s32.totalorder %s34_s16, 2  ;;  %s43_s17 = sadd.s32 1, %s2179_s11 }
   0x6   : > { %p50_p1 = scmp.ne.s32.totalorder %s2179_s11, %s2175_s10  ;;  %p51_p2 = scmp.eq.s32.totalorder %s2191_s14, 0 }
   0x7   : > { %s2599_s16 = smov (%p36_p0, %s34_s16), 0  ;;  %p56_p4 = scmp.ne.s32.totalorder %s2175_s10, %s2171_s9 }
   0x8   : > { %p52_p3 = por %p51_p2, %p50_p1  ;;  %s38_s18 = ssub.s32 %s2187_s13, %s2599_s16 }
   0x9   : > { %p57_p5 = scmp.eq.s32.totalorder %s1555_s15, 0  ;;  %p41_p6 = scmp.eq.s32.totalorder %s38_s18, 0 }
   0xa   : > { %p1936_p8 = scmp.lt.s32.totalorder %s2191_s14, 2  ;;  %s148_s21 = sand.u32 1, %s2179_s11  }
   0xb   : > { %p2250_p7 = por %p57_p5, %p56_p4  ;;  %s1928_s22 = smul.u32 4608, %s2187_s13 }
   0xc   : > { %s2256_s20 = scalar_select %p41_p6, %s2179_s11, %s43_s17  }
   0xd   : > { %s1927_s23 = smul.u32 288, %s148_s21  ;;  %s2263_s26 = scalar_lea.hbm %s2588_s0, %s1928_s22 }
   0xe   : > { %p2265_p9 = pnand %p1936_p8, %p52_p3  ;;  %s2271_s30 = scalar_lea.sflag [#allocation4], %s148_s21 }
   0xf   : > { %s152_s28 = scalar_lea.vmem [#allocation3], %s1927_s23  ;;  %s2111_s3 = scalar_lea.hbm %s2263_s26, 4608 }
  0x10   : > { %s162_s29 = sshll.u32 %s152_s28, 4  ;;  %p2112_p10 = scmp.ne.s32.totalorder %s2263_s26, %s2111_s3  ;;  %s2269_s29 = int_to_ptr.vmem [resolvable:$true] %s162_s29 }
  0x11   : > { %p2113_p11 = pneg %p2265_p9  ;;  %s2116_s6 = scalar_lea.hbm %s2588_s0, 9216 }
  0x12   : > { %p2117_p0 = scmp.lt.u32.totalorder %s2263_s26, %s2588_s0  ;;  %p2118_p1 = scmp.lt.u32.totalorder %s2116_s6, %s2111_s3 }
  0x13   : > { %p2114_p12 = pnand %p2113_p11, %p2112_p10  ;;  %p2120_p3 = scmp.lt.u32.totalorder %s2111_s3, %s2263_s26 }
  0x14   : > { %p2119_p2 = por %p2118_p1, %p2117_p0 }
  0x15   : > { %p2115_p13 = pneg %p2114_p12 }
  0x16   : > { %p2121_p4 = por %p2120_p3, %p2119_p2 }
  0x18   : > { %p2122_p5 = pnand %p2121_p4, %p2115_p13 }
  0x1a   : > { %2125 = shalt.err (!%p2122_p5)
}
  0x1b   : > { %s2126_s9 = scalar_lea.vmem %s2269_s29, 4608  ;;  %s2193_s15 = smov [#allocation3]  }
  0x1c   : > { %p2127_p6 = scmp.ne.s32.totalorder %s2269_s29, %s2126_s9  ;;  %s2131_s17 = sshll.u32 %s2193_s15, 4  ;;  %s2132_s17 = int_to_ptr.vmem [resolvable:$false] %s2131_s17 }
  0x1d   : > { %s2133_s18 = scalar_lea.vmem %s2132_s17, 9216  ;;  %p2134_p12 = scmp.lt.s32.totalorder %s2269_s29, %s2132_s17 }
  0x1e   : > { %p2129_p8 = pnand %p2127_p6, %p2113_p11  ;;  %p2135_p0 = scmp.lt.s32.totalorder %s2133_s18, %s2126_s9 }
  0x20   : > { %p2130_p10 = pneg %p2129_p8  ;;  %p2136_p1 = por %p2135_p0, %p2134_p12 }
  0x22   : > { %p2137_p2 = pnand %p2136_p1, %p2130_p10 }
  0x24   : > { %2140 = shalt.err (!%p2137_p2)
}
  0x25   : > { %s2194_s21 = smov 576   ;;  %s2195_s22 = smov 36  }
  0x26   : > { %1935 = dma.hbm_to_vmem [thread:$0]  (!%p2265_p9), %s2263_s26, 4608, %s2269_s29, %s2271_s30, %s2194_s21, %s2194_s21, %s2195_s22  }
  0x27   : > { %p1563_p11 = scmp.ge.s32.totalorder %s2191_s14, 1  ;;  %p170_p13 = scmp.lt.s32.totalorder %s2191_s14, 3 }
  0x29   : > { %p171_p3 = pnand %p1563_p11, %p170_p13 }
  0x2a   : > { %s176_s23 = sand.u32 (!%p171_p3), 1, %s2175_s10  }
  0x2b   : > { %174 = sbr.rel (%p171_p3) target bundleno = 371 (0x173), region = 28  ;;  %s177_s25 = scalar_lea.sflag (!%p171_p3), [#allocation4], %s176_s23 }
  0x2c   : > { %s1929_s24 = smul.u32 (!%p171_p3), 288, %s176_s23 }
  0x2e   : > { %s2302_s28 = scalar_lea.vmem (!%p171_p3), [#allocation3], %s1929_s24 }
  0x32   : > { %2166 = dma.done.wait (%p2250_p7), %s177_s25, 4608  }
  0x33   : > { %2168 = vsyncadd (%p2250_p7), %s177_s25, 4294962688  ;;  %v1987_v0 = vld [vmem:[%s2589_s1 + $0x40] sm:$0xff]   ;;  %v1991_v4 = vld [vmem:[%s2589_s1 + $0x48] sm:$0xff]  }
  0x34   : > { %v1988_v1 = vld [vmem:[%s2589_s1 + $0xc0] sm:$0xff]   ;;  %1715 = vmatprep.subr.bf16.mxu0 %v1987_v0  ;;  %v1992_v5 = vld [vmem:[%s2589_s1 + $0xc8] sm:$0xff]   ;;  %v1995_v8 = vld [vmem:[%s2589_s1 + $0x50] sm:$0xff]  }
  0x35   : > { %v1989_v2 = vld [vmem:[%s2589_s1] sm:$0xff]   ;;  %1755 = vmatprep.subr.bf16.mxu1 %v1988_v1  ;;  %v1993_v6 = vld [vmem:[%s2589_s1 + $0x8] sm:$0xff]   ;;  %v1996_v9 = vld [vmem:[%s2589_s1 + $0xd0] sm:$0xff]  }
  0x36   : > { %v1990_v3 = vld [vmem:[%s2589_s1 + $0x80] sm:$0xff]   ;;  %1716 = vmatpush3.bf16.msra.mxu0 %v1989_v2  ;;  %v1994_v7 = vld [vmem:[%s2589_s1 + $0x88] sm:$0xff]   ;;  %v1997_v10 = vld [vmem:[%s2589_s1 + $0x10] sm:$0xff]  }
  0x37   : > { %1756 = vmatpush3.bf16.msra.mxu1 %v1990_v3  ;;  %1717 = vmatprep.subr.bf16.mxu0 %v1991_v4  ;;  %v1998_v11 = vld [vmem:[%s2589_s1 + $0x90] sm:$0xff]   ;;  %v1999_v12 = vld [vmem:[%s2589_s1 + $0x58] sm:$0xff]   ;;  %v2003_v16 = vld [vmem:[%s2589_s1 + $0x60] sm:$0xff]  }
  0x38   : > { %1757 = vmatprep.subr.bf16.mxu1 %v1992_v5  ;;  %v2000_v13 = vld [vmem:[%s2589_s1 + $0xd8] sm:$0xff]   ;;  %v2004_v17 = vld [vmem:[%s2589_s1 + $0xe0] sm:$0xff]   ;;  %v2007_v20 = vld [vmem:[%s2589_s1 + $0x68] sm:$0xff]  }
  0x39   : > { %v2001_v14 = vld [vmem:[%s2589_s1 + $0x18] sm:$0xff]   ;;  %v2005_v18 = vld [vmem:[%s2589_s1 + $0x20] sm:$0xff]   ;;  %v2008_v21 = vld [vmem:[%s2589_s1 + $0xe8] sm:$0xff]  }
  0x3a   : > { %1718 = vmatpush3.bf16.msra.mxu0 %v1993_v6  ;;  %v2002_v15 = vld [vmem:[%s2589_s1 + $0x98] sm:$0xff]   ;;  %v2006_v19 = vld [vmem:[%s2589_s1 + $0xa0] sm:$0xff]   ;;  %v2009_v22 = vld [vmem:[%s2589_s1 + $0x28] sm:$0xff]  }
  0x3b   : > { %1758 = vmatpush3.bf16.msra.mxu1 %v1994_v7  ;;  %1719 = vmatprep.subr.bf16.mxu0 %v1995_v8  ;;  %v2010_v23 = vld [vmem:[%s2589_s1 + $0xa8] sm:$0xff]   ;;  %v2011_v24 = vld [vmem:[%s2589_s1 + $0x70] sm:$0xff]   ;;  %v2015_v28 = vld [vmem:[%s2589_s1 + $0x78] sm:$0xff]  }
  0x3c   : > { %1759 = vmatprep.subr.bf16.mxu1 %v1996_v9  ;;  %v2012_v25 = vld [vmem:[%s2589_s1 + $0xf0] sm:$0xff]   ;;  %v2016_v29 = vld [vmem:[%s2589_s1 + $0xf8] sm:$0xff]   ;;  %v2019_v32 = vld [vmem:[%s2302_s28] ss:$36 sps:$4 sm:$0xff]  }
  0x3d   : > { %v2013_v26 = vld [vmem:[%s2589_s1 + $0x30] sm:$0xff]   ;;  %v2017_v30 = vld [vmem:[%s2589_s1 + $0x38] sm:$0xff]   ;;  %v2021_v33 = vld [vmem:[%s2302_s28 + $0x4] ss:$36 sps:$4 sm:$0xff]  }
  0x3e   : > { %1720 = vmatpush3.bf16.msra.mxu0 %v1997_v10  ;;  %v2014_v27 = vld [vmem:[%s2589_s1 + $0xb0] sm:$0xff]   ;;  %v2018_v31 = vld [vmem:[%s2589_s1 + $0xb8] sm:$0xff]   ;;  %v2022_v34 = vld [vmem:[%s2302_s28 + $0x8] ss:$36 sps:$4 sm:$0xff]   ;;  %1085 = vmatprep.mubr.bf16.mxu0 %v2021_v33 }
  0x3f   : > { %1760 = vmatpush3.bf16.msra.mxu1 %v1998_v11  ;;  %1721 = vmatprep.subr.bf16.mxu0 %v1999_v12  ;;  %v2024_v35 = vld [vmem:[%s2302_s28 + $0xc] ss:$36 sps:$4 sm:$0xff]   ;;  %v2025_v36 = vld [vmem:[%s2589_s1 + $0x140] sm:$0xff]   ;;  %v2035_v45 = vld [vmem:[%s2302_s28 + $0x54] ss:$36 sps:$4 sm:$0xff]  }
  0x40   : > { %1761 = vmatprep.subr.bf16.mxu1 %v2000_v13  ;;  %1150 = vmatprep.mubr.bf16.mxu1 %v2024_v35  ;;  %v2026_v37 = vld [vmem:[%s2589_s1 + $0x1c0] sm:$0xff]   ;;  %v2029_v40 = vld [vmem:[%s2589_s1 + $0x148] sm:$0xff]   ;;  %v2038_v47 = vld [vmem:[%s2302_s28 + $0x50] ss:$36 sps:$4 sm:$0xff]  }
  0x41   : > { %v2027_v38 = vld [vmem:[%s2589_s1 + $0x100] sm:$0xff]   ;;  %v2030_v41 = vld [vmem:[%s2589_s1 + $0x1c8] sm:$0xff]   ;;  %v2039_v48 = vld [vmem:[%s2589_s1 + $0x150] sm:$0xff]  }
  0x42   : > { %1722 = vmatpush3.bf16.msra.mxu0 %v2001_v14  ;;  %v2028_v39 = vld [vmem:[%s2589_s1 + $0x180] sm:$0xff]   ;;  %v2031_v42 = vld [vmem:[%s2589_s1 + $0x108] sm:$0xff]   ;;  %v2040_v49 = vld [vmem:[%s2589_s1 + $0x1d0] sm:$0xff]  }
  0x43   : > { %1762 = vmatpush3.bf16.msra.mxu1 %v2002_v15  ;;  %1723 = vmatprep.subr.bf16.mxu0 %v2003_v16  ;;  %v2032_v43 = vld [vmem:[%s2589_s1 + $0x188] sm:$0xff]   ;;  %v2041_v50 = vld [vmem:[%s2589_s1 + $0x110] sm:$0xff]   ;;  %v2043_v52 = vld [vmem:[%s2589_s1 + $0x158] sm:$0xff]  }
  0x44   : > { %1763 = vmatprep.subr.bf16.mxu1 %v2004_v17  ;;  %v2033_v44 = vld [vmem:[%s2302_s28 + $0x4c] ss:$36 sps:$4 sm:$0xff]   ;;  %v2044_v53 = vld [vmem:[%s2589_s1 + $0x1d8] sm:$0xff]   ;;  %v2053_v60 = vld [vmem:[%s2589_s1 + $0x160] sm:$0xff]  }
  0x45   : > { %v2037_v46 = vld [vmem:[%s2302_s28 + $0x48] ss:$36 sps:$4 sm:$0xff]   ;;  %v2042_v51 = vld [vmem:[%s2589_s1 + $0x190] sm:$0xff]   ;;  %v2045_v54 = vld [vmem:[%s2589_s1 + $0x118] sm:$0xff]  }
  0x46   : > { %1724 = vmatpush3.bf16.msra.mxu0 %v2005_v18  ;;  %v2046_v55 = vld [vmem:[%s2589_s1 + $0x198] sm:$0xff]   ;;  %v2051_v58 = vld [vmem:[%s2302_s28 + $0x90] ss:$36 sps:$4 sm:$0xff]   ;;  %v2054_v61 = vld [vmem:[%s2589_s1 + $0x1e0] sm:$0xff]  }
  0x47   : > { %1764 = vmatpush3.bf16.msra.mxu1 %v2006_v19  ;;  %1725 = vmatprep.subr.bf16.mxu0 %v2007_v20  ;;  %v2047_v56 = vld [vmem:[%s2302_s28 + $0x94] ss:$36 sps:$4 sm:$0xff]   ;;  %v2049_v57 = vld [vmem:[%s2302_s28 + $0x9c] ss:$36 sps:$4 sm:$0xff]   ;;  %v2057_v0 = vld [vmem:[%s2589_s1 + $0x168] sm:$0xff]  }
  0x48   : > { %1765 = vmatprep.subr.bf16.mxu1 %v2008_v21  ;;  %v2052_v59 = vld [vmem:[%s2302_s28 + $0x98] ss:$36 sps:$4 sm:$0xff]   ;;  %v2055_v62 = vld [vmem:[%s2589_s1 + $0x120] sm:$0xff]   ;;  %v2058_v1 = vld [vmem:[%s2589_s1 + $0x1e8] sm:$0xff]  }
  0x49   : > { %v2056_v63 = vld [vmem:[%s2589_s1 + $0x1a0] sm:$0xff]   ;;  %v2059_v2 = vld [vmem:[%s2589_s1 + $0x128] sm:$0xff]   ;;  %v2065_v6 = vld [vmem:[%s2302_s28 + $0xd8] ss:$36 sps:$4 sm:$0xff]  }
  0x4a   : > { %1726 = vmatpush3.bf16.msra.mxu0 %v2009_v22  ;;  %v2060_v3 = vld [vmem:[%s2589_s1 + $0x1a8] sm:$0xff]   ;;  %v2061_v4 = vld [vmem:[%s2302_s28 + $0xdc] ss:$36 sps:$4 sm:$0xff]   ;;  %v2067_v8 = vld [vmem:[%s2589_s1 + $0x170] sm:$0xff]  }
  0x4b   : > { %1766 = vmatpush3.bf16.msra.mxu1 %v2010_v23  ;;  %1727 = vmatprep.subr.bf16.mxu0 %v2011_v24  ;;  %v2063_v5 = vld [vmem:[%s2302_s28 + $0xe4] ss:$36 sps:$4 sm:$0xff]   ;;  %v2068_v9 = vld [vmem:[%s2589_s1 + $0x1f0] sm:$0xff]   ;;  %v2071_v12 = vld [vmem:[%s2589_s1 + $0x178] sm:$0xff]  }
  0x4c   : > { %1767 = vmatprep.subr.bf16.mxu1 %v2012_v25  ;;  %v2066_v7 = vld [vmem:[%s2302_s28 + $0xe0] ss:$36 sps:$4 sm:$0xff]   ;;  %v2069_v10 = vld [vmem:[%s2589_s1 + $0x130] sm:$0xff]   ;;  %v2072_v13 = vld [vmem:[%s2589_s1 + $0x1f8] sm:$0xff]  }
  0x4d   : > { %v2070_v11 = vld [vmem:[%s2589_s1 + $0x1b0] sm:$0xff]   ;;  %v2073_v14 = vld [vmem:[%s2589_s1 + $0x138] sm:$0xff]   ;;  %v2081_v20 = vld [vmem:[%s2589_s1 + $0x200] sm:$0xff]  }
  0x4e   : > { %1728 = vmatpush3.bf16.msra.mxu0 %v2013_v26  ;;  %v2074_v15 = vld [vmem:[%s2589_s1 + $0x1b8] sm:$0xff]   ;;  %v2075_v16 = vld [vmem:[%s2302_s28 + $0x10] ss:$36 sps:$4 sm:$0xff]   ;;  %v2082_v21 = vld [vmem:[%s2589_s1 + $0x208] sm:$0xff]  }
  0x4f   : > { %1768 = vmatpush3.bf16.msra.mxu1 %v2014_v27  ;;  %1729 = vmatprep.subr.bf16.mxu0 %v2015_v28  ;;  %v2077_v17 = vld [vmem:[%s2302_s28 + $0x14] ss:$36 sps:$4 sm:$0xff]   ;;  %v2080_v19 = vld [vmem:[%s2302_s28 + $0x1c] ss:$36 sps:$4 sm:$0xff]   ;;  %v2085_v23 = vld [vmem:[%s2302_s28 + $0x64] ss:$36 sps:$4 sm:$0xff]  }
  0x50   : > { %1769 = vmatprep.subr.bf16.mxu1 %v2016_v29  ;;  %v2078_v18 = vld [vmem:[%s2302_s28 + $0x18] ss:$36 sps:$4 sm:$0xff]   ;;  %v2088_v25 = vld [vmem:[%s2302_s28 + $0x60] ss:$36 sps:$4 sm:$0xff]   ;;  %v2089_v26 = vld [vmem:[%s2589_s1 + $0x210] sm:$0xff]  }
  0x51   : > { %v2083_v22 = vld [vmem:[%s2302_s28 + $0x5c] ss:$36 sps:$4 sm:$0xff]   ;;  %v2091_v27 = vld [vmem:[%s2302_s28 + $0xa4] ss:$36 sps:$4 sm:$0xff]   ;;  %v2093_v28 = vld [vmem:[%s2302_s28 + $0xac] ss:$36 sps:$4 sm:$0xff]  }
  0x52   : > { %1730 = vmatpush3.bf16.msra.mxu0 %v2017_v30  ;;  %v2087_v24 = vld [vmem:[%s2302_s28 + $0x58] ss:$36 sps:$4 sm:$0xff]   ;;  %v2095_v30 = vld [vmem:[%s2302_s28 + $0xa0] ss:$36 sps:$4 sm:$0xff]   ;;  %v2099_v33 = vld [vmem:[%s2302_s28 + $0xec] ss:$36 sps:$4 sm:$0xff]  }
  0x53   : > { %1770 = vmatpush3.bf16.msra.mxu1 %v2018_v31  ;;  %1795 = vmatprep.subr.bf16.mxu0 %v2025_v36  ;;  %v2090_v29 = vld [vmem:[%s2589_s1 + $0x218] sm:$0xff]   ;;  %v2096_v31 = vld [vmem:[%s2302_s28 + $0xa8] ss:$36 sps:$4 sm:$0xff]  }
  0x54   : > { %1835 = vmatprep.subr.bf16.mxu1 %v2026_v37  ;;  %v2098_v35 = vld [vmem:[%s2589_s1 + $0x228] sm:$0xff]   ;;  %v2105_v37 = vld [vmem:[%s2589_s1 + $0x230] sm:$0xff]  }
  0x55   : > { %1086 = vmatmul.mubr.bf16.vlgmr.msra.gmra.mrb[0].mxu0 %v2019_v32  ;;  %v2097_v32 = vld [vmem:[%s2589_s1 + $0x220] sm:$0xff]   ;;  %v2103_v36 = vld [vmem:[%s2302_s28 + $0xe8] ss:$36 sps:$4 sm:$0xff]  }
  0x56   : > { %1151 = vmatmul.mubr.bf16.vlgmr.msra.gmra.mrb[0].mxu1 %v2022_v34  ;;  %1796 = vmatpush3.bf16.msra.mxu0 %v2027_v38  ;;  %v2101_v34 = vld [vmem:[%s2302_s28 + $0xf4] ss:$36 sps:$4 sm:$0xff]  }
  0x57   : > { %1836 = vmatpush3.bf16.msra.mxu1 %v2028_v39  ;;  %1797 = vmatprep.subr.bf16.mxu0 %v2029_v40  ;;  %v2104_v38 = vld [vmem:[%s2302_s28 + $0xf0] ss:$36 sps:$4 sm:$0xff]   ;;  %v2107_v39 = vld [vmem:[%s2302_s28 + $0x20] ss:$36 sps:$4 sm:$0xff]  }
  0x58   : > { %1837 = vmatprep.subr.bf16.mxu1 %v2030_v41  ;;  %1093 = vmatprep.mubr.bf16.mxu0 %v2033_v44  ;;  %v2108_v40 = vld [vmem:[%s2302_s28 + $0xb0] ss:$36 sps:$4 sm:$0xff]   ;;  %v2106_v41 = vld [vmem:[%s2589_s1 + $0x238] sm:$0xff]  }
  0x59   : > { %1158 = vmatprep.mubr.bf16.mxu1 %v2035_v45 }
  0x5a   : > { %1798 = vmatpush3.bf16.msra.mxu0 %v2031_v42  ;;  %v2109_v42 = vld [vmem:[%s2302_s28 + $0x68] ss:$36 sps:$4 sm:$0xff]  }
  0x5b   : > { %1838 = vmatpush3.bf16.msra.mxu1 %v2032_v43  ;;  %1799 = vmatprep.subr.bf16.mxu0 %v2039_v48  ;;  %v2110_v43 = vld [vmem:[%s2302_s28 + $0xf8] ss:$36 sps:$4 sm:$0xff]   ;;  %s1564_s28 = sshll.u32 %s2183_s12, 3 }
  0x5c   : > { %1839 = vmatprep.subr.bf16.mxu1 %v2040_v49  ;;  %p224_p7 = scmp.lt.s32.totalorder %s1564_s28, 15 }
  0x5d   : > { %1094 = vmatmul.mubr.bf16.gmra.mrb[4].mxu0 %v2037_v46 }
  0x5e   : > { %1159 = vmatmul.mubr.bf16.gmra.mrb[4].mxu1 %v2038_v47  ;;  %1800 = vmatpush3.bf16.msra.mxu0 %v2041_v50  ;;  %s2601_s28 = smov (!%p224_p7, %s1564_s28), 15 }
  0x5f   : > { %1840 = vmatpush3.bf16.msra.mxu1 %v2042_v51  ;;  %1801 = vmatprep.subr.bf16.mxu0 %v2043_v52  ;;  %s1565_s12 = sshll.u32 %s2601_s28, 2 }
  0x60   : > { %1841 = vmatprep.subr.bf16.mxu1 %v2044_v53  ;;  %1101 = vmatprep.mubr.bf16.mxu0 %v2047_v56  ;;  %s230_s5 = scalar_lea.vmem %s2590_s2, %s1565_s12 }
  0x61   : > { %1166 = vmatprep.mubr.bf16.mxu1 %v2049_v57 }
  0x62   : > { %1802 = vmatpush3.bf16.msra.mxu0 %v2045_v54 }
  0x63   : > { %1842 = vmatpush3.bf16.msra.mxu1 %v2046_v55  ;;  %1803 = vmatprep.subr.bf16.mxu0 %v2053_v60 }
  0x64   : > { %1843 = vmatprep.subr.bf16.mxu1 %v2054_v61 }
  0x65   : > { %1102 = vmatmul.mubr.bf16.gmra.mrb[8].mxu0 %v2051_v58 }
  0x66   : > { %1167 = vmatmul.mubr.bf16.gmra.mrb[8].mxu1 %v2052_v59  ;;  %1804 = vmatpush3.bf16.msra.mxu0 %v2055_v62 }
  0x67   : > { %1844 = vmatpush3.bf16.msra.mxu1 %v2056_v63  ;;  %1805 = vmatprep.subr.bf16.mxu0 %v2057_v0 }
  0x68   : > { %1845 = vmatprep.subr.bf16.mxu1 %v2058_v1  ;;  %1109 = vmatprep.mubr.bf16.mxu0 %v2061_v4 }
  0x69   : > { %1174 = vmatprep.mubr.bf16.mxu1 %v2063_v5 }
  0x6a   : > { %1806 = vmatpush3.bf16.msra.mxu0 %v2059_v2 }
  0x6b   : > { %1846 = vmatpush3.bf16.msra.mxu1 %v2060_v3  ;;  %1807 = vmatprep.subr.bf16.mxu0 %v2067_v8 }
  0x6c   : > { %1847 = vmatprep.subr.bf16.mxu1 %v2068_v9 }
  0x6d   : > { %1110 = vmatmul.mubr.bf16.gmra.mrb[12].mxu0 %v2065_v6 }
  0x6e   : > { %1175 = vmatmul.mubr.bf16.gmra.mrb[12].mxu1 %v2066_v7  ;;  %1808 = vmatpush3.bf16.msra.mxu0 %v2069_v10 }
  0x6f   : > { %1848 = vmatpush3.bf16.msra.mxu1 %v2070_v11  ;;  %1809 = vmatprep.subr.bf16.mxu0 %v2071_v12 }
  0x70   : > { %1849 = vmatprep.subr.bf16.mxu1 %v2072_v13  ;;  %1215 = vmatprep.mubr.bf16.mxu0 %v2077_v17 }
  0x71   : > { %1280 = vmatprep.mubr.bf16.mxu1 %v2080_v19 }
  0x72   : > { %1810 = vmatpush3.bf16.msra.mxu0 %v2073_v14 }
  0x73   : > { %1850 = vmatpush3.bf16.msra.mxu1 %v2074_v15  ;;  %1887 = vmatprep.subr.bf16.mxu0 %v2081_v20 }
  0x74   : > { %1911 = vmatprep.subr.bf16.mxu1 %v2081_v20 }
  0x75   : > { %1216 = vmatmul.mubr.bf16.vlgmr.msra.gmra.mrb[16].mxu0 %v2075_v16 }
  0x76   : > { %1281 = vmatmul.mubr.bf16.vlgmr.msra.gmra.mrb[16].mxu1 %v2078_v18  ;;  %1888 = vmatpush3.bf16.msra.mxu0 %v2081_v20 }
  0x77   : > { %1919 = vmatpush3.bf16.msra.mxu1 %v2081_v20  ;;  %1889 = vmatprep.subr.bf16.mxu0 %v2082_v21 }
  0x78   : > { %1912 = vmatprep.subr.bf16.mxu1 %v2082_v21  ;;  %1223 = vmatprep.mubr.bf16.mxu0 %v2083_v22 }
  0x79   : > { %1288 = vmatprep.mubr.bf16.mxu1 %v2085_v23 }
  0x7a   : > { %1890 = vmatpush3.bf16.msra.mxu0 %v2082_v21 }
  0x7b   : > { %1920 = vmatpush3.bf16.msra.mxu1 %v2082_v21  ;;  %1891 = vmatprep.subr.bf16.mxu0 %v2089_v26 }
  0x7c   : > { %1913 = vmatprep.subr.bf16.mxu1 %v2089_v26 }
  0x7d   : > { %1224 = vmatmul.mubr.bf16.gmra.mrb[20].mxu0 %v2087_v24 }
  0x7e   : > { %1289 = vmatmul.mubr.bf16.gmra.mrb[20].mxu1 %v2088_v25  ;;  %1231 = vmatprep.mubr.bf16.mxu0 %v2091_v27 }
  0x7f   : > { %1892 = vmatpush3.bf16.msra.mxu0 %v2089_v26  ;;  %1296 = vmatprep.mubr.bf16.mxu1 %v2093_v28 }
  0x80   : > { %1921 = vmatpush3.bf16.msra.mxu1 %v2089_v26  ;;  %1893 = vmatprep.subr.bf16.mxu0 %v2090_v29 }
  0x81   : > { %1914 = vmatprep.subr.bf16.mxu1 %v2090_v29 }
  0x83   : > { %1894 = vmatpush3.bf16.msra.mxu0 %v2090_v29 }
  0x84   : > { %1922 = vmatpush3.bf16.msra.mxu1 %v2090_v29  ;;  %1895 = vmatprep.subr.bf16.mxu0 %v2097_v32 }
  0x85   : > { %1232 = vmatmul.mubr.bf16.gmra.mrb[24].mxu0 %v2095_v30  ;;  %1915 = vmatprep.subr.bf16.mxu1 %v2097_v32 }
  0x86   : > { %1297 = vmatmul.mubr.bf16.gmra.mrb[24].mxu1 %v2096_v31  ;;  %1239 = vmatprep.mubr.bf16.mxu0 %v2099_v33 }
  0x87   : > { %1896 = vmatpush3.bf16.msra.mxu0 %v2097_v32  ;;  %1304 = vmatprep.mubr.bf16.mxu1 %v2101_v34 }
  0x88   : > { %1923 = vmatpush3.bf16.msra.mxu1 %v2097_v32  ;;  %1897 = vmatprep.subr.bf16.mxu0 %v2098_v35 }
  0x89   : > { %1916 = vmatprep.subr.bf16.mxu1 %v2098_v35 }
  0x8b   : > { %1898 = vmatpush3.bf16.msra.mxu0 %v2098_v35 }
  0x8c   : > { %1924 = vmatpush3.bf16.msra.mxu1 %v2098_v35  ;;  %1899 = vmatprep.subr.bf16.mxu0 %v2105_v37 }
  0x8d   : > { %1240 = vmatmul.mubr.bf16.gmra.mrb[28].mxu0 %v2103_v36  ;;  %1917 = vmatprep.subr.bf16.mxu1 %v2105_v37 }
  0x8e   : > { %1305 = vmatmul.mubr.bf16.gmra.mrb[28].mxu1 %v2104_v38  ;;  %1903 = vmatprep.mubr.bf16.mxu0 %v2107_v39 }
  0x8f   : > { %1900 = vmatpush3.bf16.msra.mxu0 %v2105_v37  ;;  %1907 = vmatprep.mubr.bf16.mxu1 %v2108_v40 }
  0x90   : > { %1925 = vmatpush3.bf16.msra.mxu1 %v2105_v37  ;;  %1901 = vmatprep.subr.bf16.mxu0 %v2106_v41 }
  0x91   : > { %1918 = vmatprep.subr.bf16.mxu1 %v2106_v41 }
  0x93   : > { %1902 = vmatpush3.bf16.msra.mxu0 %v2106_v41 }
  0x94   : > { %1926 = vmatpush3.bf16.msra.mxu1 %v2106_v41 }
  0x96   : > { %1904 = vmatmul.mubr.bf16.vlgmr.msra.gmra.mrb[32].mxu0 %v2109_v42 }
  0x97   : > { %1908 = vmatmul.mubr.bf16.vlgmr.msra.gmra.mrb[32].mxu1 %v2110_v43 }
 0x128   : > { %v1731_v44 = vpop.f32.mrb[0].mxu0 }
 0x129   : > { %v1771_v45 = vpop.f32.mrb[0].mxu1  ;;  %v1732_v46 = vpop.f32.mrb[1].mxu0 }
 0x12a   : > { %v1733_v47 = vadd.f32 %v1732_v46, %v1731_v44  ;;  %v1772_v48 = vpop.f32.mrb[1].mxu1  ;;  %v1734_v49 = vpop.f32.mrb[2].mxu0 }
 0x12b   : > { %v1773_v50 = vadd.f32 %v1772_v48, %v1771_v45  ;;  %v1774_v51 = vpop.f32.mrb[2].mxu1  ;;  %v1735_v52 = vpop.f32.mrb[3].mxu0 }
 0x12c   : > { %v1736_v53 = vadd.f32 %v1735_v52, %v1734_v49  ;;  %v1775_v54 = vpop.f32.mrb[3].mxu1 }
 0x12d   : > { %v1153_v55 = vadd.f32 %v1773_v50, %v1733_v47  ;;  %v1776_v56 = vadd.f32 %v1775_v54, %v1774_v51 }
 0x12f   : > { %v1156_v57 = vadd.f32 %v1776_v56, %v1736_v53 }
 0x130   : > { %v1737_v58 = vpop.f32.mrb[4].mxu0 }
 0x131   : > { %v1777_v59 = vpop.f32.mrb[4].mxu1  ;;  %v1738_v60 = vpop.f32.mrb[5].mxu0 }
 0x132   : > { %v1739_v61 = vadd.f32 %v1738_v60, %v1737_v58  ;;  %v1778_v62 = vpop.f32.mrb[5].mxu1  ;;  %v1740_v63 = vpop.f32.mrb[6].mxu0 }
 0x133   : > { %v1779_v0 = vadd.f32 %v1778_v62, %v1777_v59  ;;  %v1780_v1 = vpop.f32.mrb[6].mxu1  ;;  %v1741_v2 = vpop.f32.mrb[7].mxu0 }
 0x134   : > { %v1742_v3 = vadd.f32 %v1741_v2, %v1740_v63  ;;  %v1781_v4 = vpop.f32.mrb[7].mxu1 }
 0x135   : > { %v1161_v5 = vadd.f32 %v1779_v0, %v1739_v61  ;;  %v1782_v6 = vadd.f32 %v1781_v4, %v1780_v1 }
 0x137   : > { %v1164_v7 = vadd.f32 %v1782_v6, %v1742_v3 }
 0x138   : > { %v1743_v8 = vpop.f32.mrb[8].mxu0 }
 0x139   : > { %v1783_v9 = vpop.f32.mrb[8].mxu1  ;;  %v1744_v10 = vpop.f32.mrb[9].mxu0 }
 0x13a   : > { %v1745_v11 = vadd.f32 %v1744_v10, %v1743_v8  ;;  %v1784_v12 = vpop.f32.mrb[9].mxu1  ;;  %v1746_v13 = vpop.f32.mrb[10].mxu0 }
 0x13b   : > { %v1785_v14 = vadd.f32 %v1784_v12, %v1783_v9  ;;  %v1786_v15 = vpop.f32.mrb[10].mxu1  ;;  %v1747_v16 = vpop.f32.mrb[11].mxu0 }
 0x13c   : > { %v1748_v17 = vadd.f32 %v1747_v16, %v1746_v13  ;;  %v1787_v18 = vpop.f32.mrb[11].mxu1 }
 0x13d   : > { %v1169_v19 = vadd.f32 %v1785_v14, %v1745_v11  ;;  %v1788_v20 = vadd.f32 %v1787_v18, %v1786_v15 }
 0x13f   : > { %v1172_v21 = vadd.f32 %v1788_v20, %v1748_v17 }
 0x140   : > { %v1749_v22 = vpop.f32.mrb[12].mxu0 }
 0x141   : > { %v1789_v23 = vpop.f32.mrb[12].mxu1  ;;  %v1750_v24 = vpop.f32.mrb[13].mxu0 }
 0x142   : > { %v1790_v25 = vpop.f32.mrb[13].mxu1  ;;  %v1751_v26 = vadd.f32 %v1750_v24, %v1749_v22  ;;  %v1752_v28 = vpop.f32.mrb[14].mxu0 }
 0x143   : > { %v1791_v27 = vadd.f32 %v1790_v25, %v1789_v23  ;;  %v1792_v29 = vpop.f32.mrb[14].mxu1  ;;  %v1753_v30 = vpop.f32.mrb[15].mxu0 }
 0x144   : > { %v1793_v31 = vpop.f32.mrb[15].mxu1  ;;  %v1754_v33 = vadd.f32 %v1753_v30, %v1752_v28 }
 0x145   : > { %v1177_v32 = vadd.f32 %v1791_v27, %v1751_v26  ;;  %v1794_v34 = vadd.f32 %v1793_v31, %v1792_v29 }
 0x147   : > { %v2560_v35 = vadd.f32 %v1794_v34, %v1754_v33 }
 0x148   : > { %v1811_v36 = vpop.f32.mrb[16].mxu0 }
 0x149   : > { %v1812_v37 = vpop.f32.mrb[17].mxu0  ;;  %v1851_v38 = vpop.f32.mrb[16].mxu1 }
 0x14a   : > { %v1813_v39 = vadd.f32 %v1812_v37, %v1811_v36  ;;  %v1814_v40 = vpop.f32.mrb[18].mxu0  ;;  %v1852_v41 = vpop.f32.mrb[17].mxu1 }
 0x14b   : > { %v1815_v42 = vpop.f32.mrb[19].mxu0  ;;  %v1853_v44 = vadd.f32 %v1852_v41, %v1851_v38  ;;  %v1854_v45 = vpop.f32.mrb[18].mxu1 }
 0x14c   : > { %v1218_v43 = vadd.f32 %v1813_v39, %v1153_v55  ;;  %v1816_v46 = vadd.f32 %v1815_v42, %v1814_v40  ;;  %v1855_v47 = vpop.f32.mrb[19].mxu1 }
 0x14d   : > { %v1856_v49 = vadd.f32 %v1855_v47, %v1854_v45 }
 0x14e   : > { %v1221_v48 = vadd.f32 %v1816_v46, %v1156_v57  ;;  %v1283_v50 = vadd.f32 %v1853_v44, %v1218_v43 }
 0x150   : > { %v1817_v51 = vpop.f32.mrb[20].mxu0  ;;  %v2562_v52 = vadd.f32 %v1856_v49, %v1221_v48 }
 0x151   : > { %v1818_v53 = vpop.f32.mrb[21].mxu0  ;;  %v1857_v54 = vpop.f32.mrb[20].mxu1 }
 0x152   : > { %v1819_v56 = vadd.f32 %v1818_v53, %v1817_v51  ;;  %v1820_v58 = vpop.f32.mrb[22].mxu0  ;;  %v1858_v59 = vpop.f32.mrb[21].mxu1 }
 0x153   : > { %v1821_v60 = vpop.f32.mrb[23].mxu0  ;;  %v1859_v62 = vadd.f32 %v1858_v59, %v1857_v54  ;;  %v1860_v63 = vpop.f32.mrb[22].mxu1 }
 0x154   : > { %v1226_v61 = vadd.f32 %v1819_v56, %v1161_v5  ;;  %v1822_v55 = vadd.f32 %v1821_v60, %v1820_v58  ;;  %v1861_v0 = vpop.f32.mrb[23].mxu1 }
 0x155   : > { %v1862_v2 = vadd.f32 %v1861_v0, %v1860_v63 }
 0x156   : > { %v1229_v1 = vadd.f32 %v1822_v55, %v1164_v7  ;;  %v1291_v3 = vadd.f32 %v1859_v62, %v1226_v61 }
 0x158   : > { %v1823_v57 = vpop.f32.mrb[24].mxu0  ;;  %v1294_v4 = vadd.f32 %v1862_v2, %v1229_v1 }
 0x159   : > { %v1824_v6 = vpop.f32.mrb[25].mxu0  ;;  %v1863_v8 = vpop.f32.mrb[24].mxu1 }
 0x15a   : > { %v1825_v9 = vadd.f32 %v1824_v6, %v1823_v57  ;;  %v1826_v10 = vpop.f32.mrb[26].mxu0  ;;  %v1864_v11 = vpop.f32.mrb[25].mxu1 }
 0x15b   : > { %v1827_v12 = vpop.f32.mrb[27].mxu0  ;;  %v1865_v14 = vadd.f32 %v1864_v11, %v1863_v8  ;;  %v1866_v15 = vpop.f32.mrb[26].mxu1 }
 0x15c   : > { %v1234_v13 = vadd.f32 %v1825_v9, %v1169_v19  ;;  %v1828_v5 = vadd.f32 %v1827_v12, %v1826_v10  ;;  %v1867_v16 = vpop.f32.mrb[27].mxu1 }
 0x15d   : > { %v1868_v18 = vadd.f32 %v1867_v16, %v1866_v15 }
 0x15e   : > { %v1237_v17 = vadd.f32 %v1828_v5, %v1172_v21  ;;  %v1299_v20 = vadd.f32 %v1865_v14, %v1234_v13 }
 0x160   : > { %v1829_v7 = vpop.f32.mrb[28].mxu0  ;;  %v1302_v22 = vadd.f32 %v1868_v18, %v1237_v17 }
 0x161   : > { %v1830_v23 = vpop.f32.mrb[29].mxu0  ;;  %v1869_v24 = vpop.f32.mrb[28].mxu1 }
 0x162   : > { %v1831_v25 = vadd.f32 %v1830_v23, %v1829_v7  ;;  %v1832_v26 = vpop.f32.mrb[30].mxu0  ;;  %v1870_v27 = vpop.f32.mrb[29].mxu1 }
 0x163   : > { %v1833_v28 = vpop.f32.mrb[31].mxu0  ;;  %v1871_v30 = vadd.f32 %v1870_v27, %v1869_v24  ;;  %v1872_v19 = vpop.f32.mrb[30].mxu1 }
 0x164   : > { %v1242_v29 = vadd.f32 %v1831_v25, %v1177_v32  ;;  %v1834_v31 = vadd.f32 %v1833_v28, %v1832_v26  ;;  %v1873_v33 = vpop.f32.mrb[31].mxu1 }
 0x165   : > { %v1874_v21 = vadd.f32 %v1873_v33, %v1872_v19 }
 0x166   : > { %v1245_v34 = vadd.f32 %v1834_v31, %v2560_v35  ;;  %v1307_v36 = vadd.f32 %v1871_v30, %v1242_v29 }
 0x168   : > { %v1310_v37 = vadd.f32 %v1874_v21, %v1245_v34 }
 0x169   : > { %v1905_v38 = vpop.f32.mrb[32].mxu0 }
 0x16a   : > { %v1356_v39 = vadd.f32 %v1905_v38, %v1291_v3  ;;  %v1909_v40 = vpop.f32.mrb[32].mxu1  ;;  %v1347_v41 = vpop.f32.mrb[33].mxu0 }
 0x16b   : > { %v1372_v42 = vadd.f32 %v1909_v40, %v1307_v36  ;;  %v1348_v43 = vadd.f32 %v1347_v41, %v1283_v50  ;;  %v1363_v44 = vpop.f32.mrb[33].mxu1  ;;  %v1906_v45 = vpop.f32.mrb[34].mxu0 }
 0x16c   : > { %v1364_v32 = vadd.f32 %v1363_v44, %v1299_v20  ;;  %v1359_v46 = vadd.f32 %v1906_v45, %v1294_v4  ;;  %v1910_v47 = vpop.f32.mrb[34].mxu1  ;;  %v1350_v48 = vpop.f32.mrb[35].mxu0 }
 0x16d   : > { %v1375_v35 = vadd.f32 %v1910_v47, %v1310_v37  ;;  %v1351_v49 = vadd.f32 %v1350_v48, %v2562_v52  ;;  %v1366_v51 = vpop.f32.mrb[35].mxu1 }
 0x16e   : > { %v1700_v53 = vpack.c.bf16 %v1359_v46, %v1356_v39  ;;  %v1367_v54 = vadd.f32 %v1366_v51, %v1302_v22 }
 0x16f   : > { %v1710_v56 = vpack.c.bf16 %v1375_v35, %v1372_v42  ;;  %v1695_v58 = vpack.c.bf16 %v1351_v49, %v1348_v43 }
 0x170   : > { %1712 = vst [vmem:[%s230_s5 + $0x8] sm:$0xff] %v1700_v53   ;;  %v1705_v50 = vpack.c.bf16 %v1367_v54, %v1364_v32 }
 0x171   : > { %1714 = vst [vmem:[%s230_s5 + $0x18] sm:$0xff] %v1710_v56   ;;  %1696 = vst [vmem:[%s230_s5] sm:$0xff] %v1695_v58  }
 0x172   : > { %1713 = vst [vmem:[%s230_s5 + $0x10] sm:$0xff] %v1705_v50  }
 0x173 PF: > { %s15_s14 = sadd.s32 1, %s2191_s14   ;;  %s2593_s9 = smov %s2175_s10 }
 0x174   : > { %p12_p9 = scmp.ge.s32.totalorder %s15_s14, 4   ;;  %s2594_s10 = smov %s2179_s11 }
 0x175   : > { %s2595_s11 = smov %s2256_s20  ;;  %s2596_s12 = smov %s2187_s13 }
 0x176   : > { %s2597_s13 = smov %s2599_s16  ;;  %14 = sbr.rel (!%p12_p9) target bundleno = 4 (0x4), region = 79 }
 0x17d   :  { %1473 = vsyncpa [#allocation4], 1 }
 0x17e   :  { %1475 = vsyncpa [#allocation4 + $0x1], 1 }

// kernel: xray_analyzer_forward.135
= control target key start
LH: loop header
LB: loop body
LE: loop exit
PB: predicated region body
PF: predicated region fallthrough
CT: control target
= control target key end

     0   :  { %s1045_s15 = smov 0   ;;  %s1047_s16 = smov 0   ;;  %s1190_s0 = inlined_call_operand.vmem [shape: bf16[128,256], index: 0, kind: input, shape index: {}]   ;;  %s1191_s1 = inlined_call_operand.vmem [shape: bf16[256,128], index: 1, kind: input, shape index: {}]   ;;  %s1192_s2 = inlined_call_operand.vmem [shape: f32[1,256], index: 2, kind: input, shape index: {}]   ;;  %s1193_s3 = inlined_call_operand.vmem [shape: f32[1,256], index: 3, kind: input, shape index: {}]   ;;  %s1194_s4 = inlined_call_operand.vmem [shape: bf16[128,128], index: 4, kind: output, shape index: {}]  }
   0x1   :  { %s1049_s17 = smov 0  }
   0x2 LB: > { %s33_s18 = sadd.s32 1, %s1014_s16  ;;  %p836_p0 = scmp.ge.s32.totalorder %s1018_s17, 1  ;;  %s1018_s17 = sphi %s1049_s17, %s14_s17   ;;  %s1014_s16 = sphi %s1047_s16, %s1196_s16   ;;  %s1010_s15 = sphi %s1045_s15, %s1195_s15  }
   0x3   : > { %p35_p1 = scmp.ge.s32.totalorder %s33_s18, 2  ;;  %p228_p2 = scmp.lt.s32.totalorder %s1018_s17, 3 }
   0x5   : > { %s1198_s18 = smov (%p35_p1, %s33_s18), 0  ;;  %p229_p3 = pnand %p836_p0, %p228_p2 }
   0x6   : > { %v980_v0 = vld [vmem:[%s1191_s1 + $0x40] sm:$0xff] (!%p229_p3)   ;;  %s837_s21 = sshll.u32 (!%p229_p3), %s1010_s15, 3  ;;  %v982_v2 = vld [vmem:[%s1191_s1 + $0x48] sm:$0xff] (!%p229_p3)   ;;  %v984_v4 = vld [vmem:[%s1191_s1 + $0x50] sm:$0xff] (!%p229_p3)   ;;  %v357_v5 = vlaneseq (!%p229_p3) }
   0x7   : > { %232 = sbr.rel (%p229_p3) target bundleno = 267 (0x10b), region = 36  ;;  %v981_v1 = vld [vmem:[%s1191_s1] sm:$0xff] (!%p229_p3)   ;;  %900 = vmatprep.subr.bf16.mxu0 (!%p229_p3), %v980_v0  ;;  %940 = vmatprep.subr.bf16.mxu1 (!%p229_p3), %v980_v0  ;;  %p280_p4 = scmp.lt.s32.totalorder (!%p229_p3), %s837_s21, 15  ;;  %v983_v3 = vld [vmem:[%s1191_s1 + $0x8] sm:$0xff] (!%p229_p3)   ;;  %v985_v6 = vld [vmem:[%s1191_s1 + $0x10] sm:$0xff] (!%p229_p3)  }
   0x8   : > { %901 = vmatpush3.bf16.msra.mxu0 (!%p229_p3), %v981_v1  ;;  %948 = vmatpush3.bf16.msra.mxu1 (!%p229_p3), %v981_v1  ;;  %v986_v7 = vld [vmem:[%s1191_s1 + $0x58] sm:$0xff] (!%p229_p3)   ;;  %v358_v8 = vshrl.u32 (!%p229_p3), %v357_v5, 7  ;;  %v988_v10 = vld [vmem:[%s1191_s1 + $0x60] sm:$0xff] (!%p229_p3)   ;;  %v990_v14 = vld [vmem:[%s1191_s1 + $0x68] sm:$0xff] (!%p229_p3)  }
   0x9   : > { %902 = vmatprep.subr.bf16.mxu0 (!%p229_p3), %v982_v2  ;;  %941 = vmatprep.subr.bf16.mxu1 (!%p229_p3), %v982_v2  ;;  %v987_v9 = vld [vmem:[%s1191_s1 + $0x18] sm:$0xff] (!%p229_p3)   ;;  %v989_v12 = vld [vmem:[%s1191_s1 + $0x20] sm:$0xff] (!%p229_p3)   ;;  %v991_v30 = vld [vmem:[%s1191_s1 + $0x28] sm:$0xff] (!%p229_p3)  }
   0xa   : > { %v359_v11 = vsub.s32 (!%p229_p3), 0, %v358_v8  ;;  %v363_v13 = vsub.s32 (!%p229_p3), 1, %v358_v8  ;;  %v355_v17 = vld [vmem:[%s1192_s2] sm:$0x3] (!%p229_p3)  ;;  %v992_v35 = vld [vmem:[%s1191_s1 + $0x70] sm:$0xff] (!%p229_p3)   ;;  %v994_v54 = vld [vmem:[%s1191_s1 + $0x78] sm:$0xff] (!%p229_p3)  }
   0xb   : > { %v383_v22 = vld [vmem:[%s1193_s3] sm:$0x3] (!%p229_p3)  ;;  %v993_v49 = vld [vmem:[%s1191_s1 + $0x30] sm:$0xff] (!%p229_p3)   ;;  %v995_v5 = vld [vmem:[%s1191_s1 + $0x38] sm:$0xff] (!%p229_p3)  }
   0xc   : > { %903 = vmatpush3.bf16.msra.mxu0 (!%p229_p3), %v983_v3  ;;  %949 = vmatpush3.bf16.msra.mxu1 (!%p229_p3), %v983_v3  ;;  %v1114_v25 = vrot.slane (!%p229_p3), %v355_v17, %v359_v11  ;;  %v1116_v26 = vrot.slane (!%p229_p3), %v355_v17, %v363_v13  ;;  %v1118_v27 = vrot.slane (!%p229_p3), %v383_v22, %v359_v11 }
   0xd   : > { %904 = vmatprep.subr.bf16.mxu0 (!%p229_p3), %v984_v4  ;;  %942 = vmatprep.subr.bf16.mxu1 (!%p229_p3), %v984_v4  ;;  %v1120_v28 = vrot.slane (!%p229_p3), %v383_v22, %v363_v13 }
   0xe   : > { %s1200_s21 = smov (!%p280_p4, %s837_s21), 15 }
   0xf   : > { %s868_s8 = sshll.u32 %s1200_s21, 3  ;;  %s841_s12 = sshll.u32 %s1200_s21, 2 }
  0x10   : > { %905 = vmatpush3.bf16.msra.mxu0 %v985_v6  ;;  %950 = vmatpush3.bf16.msra.mxu1 %v985_v6  ;;  %s1096_s15 = scalar_lea.vmem %s1190_s0, %s868_s8 }
  0x11   : > { %906 = vmatprep.subr.bf16.mxu0 %v986_v7  ;;  %943 = vmatprep.subr.bf16.mxu1 %v986_v7  ;;  %v331_v15 = vld [vmem:[%s1096_s15] sm:$0xff]  ;;  %v332_v16 = vld [vmem:[%s1096_s15 + $0x8] sm:$0xff]  ;;  %v1123_v29 = vld [vmem:[%s1096_s15 + $0x10] sm:$0xff] }
  0x12   : > { %v339_v18 = vunpack.c.l.bf16 %v331_v15  ;;  %v340_v19 = vunpack.c.h.bf16 %v331_v15  ;;  %v341_v20 = vunpack.c.l.bf16 %v332_v16  ;;  %v342_v21 = vunpack.c.h.bf16 %v332_v16  ;;  %v335_v23 = vld [vmem:[%s1096_s15 + $0x20] sm:$0xff]  ;;  %v336_v24 = vld [vmem:[%s1096_s15 + $0x28] sm:$0xff]  ;;  %v334_v39 = vld [vmem:[%s1096_s15 + $0x18] sm:$0xff] }
  0x13   : > { %v347_v31 = vunpack.c.l.bf16 %v335_v23  ;;  %v348_v32 = vunpack.c.h.bf16 %v335_v23  ;;  %v349_v33 = vunpack.c.l.bf16 %v336_v24  ;;  %v350_v34 = vunpack.c.h.bf16 %v336_v24  ;;  %v337_v59 = vld [vmem:[%s1096_s15 + $0x30] sm:$0xff]  ;;  %v338_v0 = vld [vmem:[%s1096_s15 + $0x38] sm:$0xff]  ;;  %s316_s15 = scalar_lea.vmem %s1194_s4, %s841_s12 }
  0x14   : > { %907 = vmatpush3.bf16.msra.mxu0 %v987_v9  ;;  %951 = vmatpush3.bf16.msra.mxu1 %v987_v9  ;;  %v368_v36 = vmul.f32 %v1116_v26, %v340_v19  ;;  %v370_v37 = vmul.f32 %v1116_v26, %v342_v21  ;;  %v367_v38 = vmul.f32 %v1114_v25, %v339_v18  ;;  %v344_v40 = vunpack.c.h.bf16 %v1123_v29 }
  0x15   : > { %908 = vmatprep.subr.bf16.mxu0 %v988_v10  ;;  %944 = vmatprep.subr.bf16.mxu1 %v988_v10  ;;  %v376_v41 = vmul.f32 %v1116_v26, %v348_v32  ;;  %v378_v42 = vmul.f32 %v1116_v26, %v350_v34  ;;  %v369_v43 = vmul.f32 %v1114_v25, %v341_v20  ;;  %v346_v53 = vunpack.c.h.bf16 %v334_v39 }
  0x16   : > { %v375_v44 = vmul.f32 %v1114_v25, %v347_v31  ;;  %v396_v45 = vadd.f32 %v1120_v28, %v368_v36  ;;  %v398_v46 = vadd.f32 %v1120_v28, %v370_v37  ;;  %v395_v47 = vadd.f32 %v1118_v27, %v367_v38 }
  0x17   : > { %v377_v48 = vmul.f32 %v1114_v25, %v349_v33  ;;  %v404_v50 = vadd.f32 %v1120_v28, %v376_v41  ;;  %v406_v51 = vadd.f32 %v1120_v28, %v378_v42  ;;  %v397_v52 = vadd.f32 %v1118_v27, %v369_v43 }
  0x18   : > { %909 = vmatpush3.bf16.msra.mxu0 %v989_v12  ;;  %952 = vmatpush3.bf16.msra.mxu1 %v989_v12  ;;  %v412_v55 = vmax.f32 %v396_v45, 0.0  ;;  %v414_v56 = vmax.f32 %v398_v46, 0.0  ;;  %v411_v57 = vmax.f32 %v395_v47, 0.0  ;;  %v403_v58 = vadd.f32 %v1118_v27, %v375_v44 }
  0x19   : > { %910 = vmatprep.subr.bf16.mxu0 %v990_v14  ;;  %945 = vmatprep.subr.bf16.mxu1 %v990_v14  ;;  %v420_v60 = vmax.f32 %v404_v50, 0.0  ;;  %v422_v61 = vmax.f32 %v406_v51, 0.0  ;;  %v413_v62 = vmax.f32 %v397_v52, 0.0  ;;  %v405_v63 = vadd.f32 %v1118_v27, %v377_v48 }
  0x1a   : > { %v428_v1 = vpack.c.bf16 %v414_v56, %v412_v55  ;;  %v419_v2 = vmax.f32 %v403_v58, 0.0  ;;  %v372_v3 = vmul.f32 %v1116_v26, %v344_v40  ;;  %v374_v4 = vmul.f32 %v1116_v26, %v346_v53 }
  0x1b   : > { %v432_v6 = vpack.c.bf16 %v422_v61, %v420_v60  ;;  %v427_v7 = vpack.c.bf16 %v413_v62, %v411_v57  ;;  %v421_v8 = vmax.f32 %v405_v63, 0.0  ;;  %v352_v9 = vunpack.c.h.bf16 %v337_v59 }
  0x1c   : > { %911 = vmatpush3.bf16.msra.mxu0 %v991_v30  ;;  %953 = vmatpush3.bf16.msra.mxu1 %v991_v30  ;;  %v400_v10 = vadd.f32 %v1120_v28, %v372_v3  ;;  %v402_v11 = vadd.f32 %v1120_v28, %v374_v4  ;;  %v354_v12 = vunpack.c.h.bf16 %v338_v0  ;;  %v343_v13 = vunpack.c.l.bf16 %v1123_v29 }
  0x1d   : > { %912 = vmatprep.subr.bf16.mxu0 %v992_v35  ;;  %946 = vmatprep.subr.bf16.mxu1 %v992_v35  ;;  %v431_v14 = vpack.c.bf16 %v421_v8, %v419_v2  ;;  %v380_v15 = vmul.f32 %v1116_v26, %v352_v9  ;;  %v345_v16 = vunpack.c.l.bf16 %v334_v39  ;;  %v351_v17 = vunpack.c.l.bf16 %v337_v59 }
  0x1e   : > { %603 = vmatprep.mubr.bf16.mxu0 %v428_v1  ;;  %619 = vmatprep.mubr.bf16.mxu1 %v432_v6  ;;  %v416_v18 = vmax.f32 %v400_v10, 0.0  ;;  %v418_v19 = vmax.f32 %v402_v11, 0.0  ;;  %v382_v20 = vmul.f32 %v1116_v26, %v354_v12  ;;  %v371_v21 = vmul.f32 %v1114_v25, %v343_v13 }
  0x1f   : > { %v408_v22 = vadd.f32 %v1120_v28, %v380_v15  ;;  %v373_v23 = vmul.f32 %v1114_v25, %v345_v16  ;;  %v353_v24 = vunpack.c.l.bf16 %v338_v0  ;;  %v379_v29 = vmul.f32 %v1114_v25, %v351_v17 }
  0x20   : > { %913 = vmatpush3.bf16.msra.mxu0 %v993_v49  ;;  %954 = vmatpush3.bf16.msra.mxu1 %v993_v49  ;;  %v430_v30 = vpack.c.bf16 %v418_v19, %v416_v18  ;;  %v410_v31 = vadd.f32 %v1120_v28, %v382_v20  ;;  %v399_v32 = vadd.f32 %v1118_v27, %v371_v21 }
  0x21   : > { %914 = vmatprep.subr.bf16.mxu0 %v994_v54  ;;  %947 = vmatprep.subr.bf16.mxu1 %v994_v54  ;;  %v424_v33 = vmax.f32 %v408_v22, 0.0  ;;  %v401_v34 = vadd.f32 %v1118_v27, %v373_v23  ;;  %v381_v26 = vmul.f32 %v1114_v25, %v353_v24  ;;  %v407_v35 = vadd.f32 %v1118_v27, %v379_v29 }
  0x22   : > { %v426_v36 = vmax.f32 %v410_v31, 0.0  ;;  %v415_v37 = vmax.f32 %v399_v32, 0.0 }
  0x23   : > { %v417_v38 = vmax.f32 %v401_v34, 0.0  ;;  %v409_v39 = vadd.f32 %v1118_v27, %v381_v26  ;;  %v423_v40 = vmax.f32 %v407_v35, 0.0 }
  0x24   : > { %915 = vmatpush3.bf16.msra.mxu0 %v995_v5  ;;  %955 = vmatpush3.bf16.msra.mxu1 %v995_v5  ;;  %v434_v28 = vpack.c.bf16 %v426_v36, %v424_v33 }
  0x25   : > { %v425_v41 = vmax.f32 %v409_v39, 0.0  ;;  %v429_v42 = vpack.c.bf16 %v417_v38, %v415_v37 }
  0x27   : > { %604 = vmatmul.mubr.bf16.vlgmr.msra.gmra.mrb[0].mxu0 %v427_v7  ;;  %620 = vmatmul.mubr.bf16.vlgmr.msra.gmra.mrb[0].mxu1 %v431_v14  ;;  %v433_v43 = vpack.c.bf16 %v425_v41, %v423_v40 }
  0x28   : > { %611 = vmatprep.mubr.bf16.mxu0 %v430_v30  ;;  %627 = vmatprep.mubr.bf16.mxu1 %v434_v28 }
  0x2f   : > { %612 = vmatmul.mubr.bf16.gmra.mrb[4].mxu0 %v429_v42  ;;  %628 = vmatmul.mubr.bf16.gmra.mrb[4].mxu1 %v433_v43 }
  0xfa   : > { %v916_v25 = vpop.f32.mrb[0].mxu0  ;;  %v928_v44 = vpop.f32.mrb[0].mxu1 }
  0xfb   : > { %v917_v45 = vpop.f32.mrb[1].mxu0  ;;  %v929_v46 = vpop.f32.mrb[1].mxu1 }
  0xfc   : > { %v918_v47 = vadd.f32 %v917_v45, %v916_v25  ;;  %v930_v48 = vadd.f32 %v929_v46, %v928_v44  ;;  %v919_v49 = vpop.f32.mrb[2].mxu0  ;;  %v931_v50 = vpop.f32.mrb[2].mxu1 }
  0xfd   : > { %v920_v51 = vpop.f32.mrb[3].mxu0  ;;  %v932_v27 = vpop.f32.mrb[3].mxu1 }
  0xfe   : > { %v921_v52 = vadd.f32 %v920_v51, %v919_v49  ;;  %v933_v53 = vadd.f32 %v932_v27, %v931_v50 }
 0x100   : > { %v880_v54 = vpack.c.bf16 %v921_v52, %v918_v47  ;;  %v890_v55 = vpack.c.bf16 %v933_v53, %v930_v48 }
 0x102   : > { %881 = vst [vmem:[%s316_s15] sm:$0xff] %v880_v54   ;;  %898 = vst [vmem:[%s316_s15 + $0x10] sm:$0xff] %v890_v55   ;;  %v922_v56 = vpop.f32.mrb[4].mxu0  ;;  %v934_v57 = vpop.f32.mrb[4].mxu1 }
 0x103   : > { %v923_v58 = vpop.f32.mrb[5].mxu0  ;;  %v935_v59 = vpop.f32.mrb[5].mxu1 }
 0x104   : > { %v924_v60 = vadd.f32 %v923_v58, %v922_v56  ;;  %v936_v61 = vadd.f32 %v935_v59, %v934_v57  ;;  %v925_v62 = vpop.f32.mrb[6].mxu0  ;;  %v937_v63 = vpop.f32.mrb[6].mxu1 }
 0x105   : > { %v926_v0 = vpop.f32.mrb[7].mxu0  ;;  %v938_v1 = vpop.f32.mrb[7].mxu1 }
 0x106   : > { %v927_v2 = vadd.f32 %v926_v0, %v925_v62  ;;  %v939_v3 = vadd.f32 %v938_v1, %v937_v63 }
 0x108   : > { %v885_v4 = vpack.c.bf16 %v927_v2, %v924_v60  ;;  %v895_v5 = vpack.c.bf16 %v939_v3, %v936_v61 }
 0x10a   : > { %897 = vst [vmem:[%s316_s15 + $0x8] sm:$0xff] %v885_v4   ;;  %899 = vst [vmem:[%s316_s15 + $0x18] sm:$0xff] %v895_v5  }
 0x10b PF: > { %s14_s17 = sadd.s32 1, %s1018_s17   ;;  %s1195_s15 = smov %s1014_s16 }
 0x10c   : > { %p11_p5 = scmp.ge.s32.totalorder %s14_s17, 4   ;;  %s1196_s16 = smov %s1198_s18 }
 0x10e   :  { %13 = sbr.rel (!%p11_p5) target bundleno = 2 (0x2), region = 83 }

// kernel: xray_analyzer_forward.136
= control target key start
LH: loop header
LB: loop body
LE: loop exit
PB: predicated region body
PF: predicated region fallthrough
CT: control target
= control target key end

     0   :  { %s1240_s21 = smov 0   ;;  %s1242_s22 = smov 0   ;;  %s1388_s0 = inlined_call_operand.vmem [shape: bf16[32,512], index: 0, kind: input, shape index: {}]   ;;  %s1389_s1 = inlined_call_operand.vmem [shape: bf16[512,128], index: 1, kind: input, shape index: {}]   ;;  %s1390_s2 = inlined_call_operand.vmem [shape: f32[1,512], index: 2, kind: input, shape index: {}]   ;;  %s1391_s3 = inlined_call_operand.vmem [shape: f32[1,512], index: 3, kind: input, shape index: {}]   ;;  %s1392_s4 = inlined_call_operand.vmem [shape: f32[1,128], index: 4, kind: input, shape index: {}]   ;;  %s1393_s5 = inlined_call_operand.vmem [shape: f32[1,128], index: 5, kind: input, shape index: {}]   ;;  %s1394_s6 = inlined_call_operand.vmem [shape: bf16[32,128], index: 6, kind: output, shape index: {}]  }
   0x1   :  { %s1244_s23 = smov 0  }
   0x2 LB: > { %s35_s24 = sadd.s32 1, %s1199_s22  ;;  %p1029_p0 = scmp.ge.s32.totalorder %s1203_s23, 1  ;;  %s1203_s23 = sphi %s1244_s23, %s16_s23   ;;  %s1199_s22 = sphi %s1242_s22, %s1396_s22   ;;  %s1195_s21 = sphi %s1240_s21, %s1395_s21  }
   0x3   : > { %p37_p1 = scmp.ge.s32.totalorder %s35_s24, 2  ;;  %p294_p2 = scmp.lt.s32.totalorder %s1203_s23, 3 }
   0x5   : > { %s1398_s24 = smov (%p37_p1, %s35_s24), 0  ;;  %p295_p3 = pnand %p1029_p0, %p294_p2 }
   0x6   : > { %v1149_v0 = vld [vmem:[%s1389_s1 + $0x40] sm:$0xff] (!%p295_p3)   ;;  %v1153_v4 = vld [vmem:[%s1389_s1 + $0x48] sm:$0xff] (!%p295_p3)   ;;  %v1157_v8 = vld [vmem:[%s1389_s1 + $0x50] sm:$0xff] (!%p295_p3)   ;;  %s1030_s13 = sshll.u32 (!%p295_p3), %s1195_s21, 1  ;;  %v421_v22 = vlaneseq (!%p295_p3) }
   0x7   : > { %298 = sbr.rel (%p295_p3) target bundleno = 269 (0x10d), region = 44  ;;  %v1150_v1 = vld [vmem:[%s1389_s1 + $0xc0] sm:$0xff] (!%p295_p3)   ;;  %1081 = vmatprep.subr.bf16.mxu0 (!%p295_p3), %v1149_v0  ;;  %v1154_v5 = vld [vmem:[%s1389_s1 + $0xc8] sm:$0xff] (!%p295_p3)   ;;  %v1158_v9 = vld [vmem:[%s1389_s1 + $0xd0] sm:$0xff] (!%p295_p3)   ;;  %p356_p4 = scmp.lt.s32.totalorder (!%p295_p3), %s1030_s13, 3 }
   0x8   : > { %v1151_v2 = vld [vmem:[%s1389_s1] sm:$0xff] (!%p295_p3)   ;;  %1103 = vmatprep.subr.bf16.mxu1 (!%p295_p3), %v1150_v1  ;;  %v1155_v6 = vld [vmem:[%s1389_s1 + $0x8] sm:$0xff] (!%p295_p3)   ;;  %v1159_v10 = vld [vmem:[%s1389_s1 + $0x10] sm:$0xff] (!%p295_p3)   ;;  %v422_v27 = vshrl.u32 (!%p295_p3), %v421_v22, 7 }
   0x9   : > { %v1152_v3 = vld [vmem:[%s1389_s1 + $0x80] sm:$0xff] (!%p295_p3)   ;;  %1082 = vmatpush3.bf16.msra.mxu0 (!%p295_p3), %v1151_v2  ;;  %v1156_v7 = vld [vmem:[%s1389_s1 + $0x88] sm:$0xff] (!%p295_p3)   ;;  %v1160_v11 = vld [vmem:[%s1389_s1 + $0x90] sm:$0xff] (!%p295_p3)  }
   0xa   : > { %1104 = vmatpush3.bf16.msra.mxu1 (!%p295_p3), %v1152_v3  ;;  %1083 = vmatprep.subr.bf16.mxu0 (!%p295_p3), %v1153_v4  ;;  %v1161_v12 = vld [vmem:[%s1389_s1 + $0x58] sm:$0xff] (!%p295_p3)   ;;  %v1165_v16 = vld [vmem:[%s1389_s1 + $0x60] sm:$0xff] (!%p295_p3)   ;;  %v1169_v20 = vld [vmem:[%s1389_s1 + $0x68] sm:$0xff] (!%p295_p3)   ;;  %v427_v33 = vsub.s32 (!%p295_p3), 1, %v422_v27  ;;  %v435_v35 = vsub.s32 (!%p295_p3), 3, %v422_v27  ;;  %v423_v39 = vsub.s32 (!%p295_p3), 0, %v422_v27 }
   0xb   : > { %1105 = vmatprep.subr.bf16.mxu1 (!%p295_p3), %v1154_v5  ;;  %v1162_v13 = vld [vmem:[%s1389_s1 + $0xd8] sm:$0xff] (!%p295_p3)   ;;  %v1166_v17 = vld [vmem:[%s1389_s1 + $0xe0] sm:$0xff] (!%p295_p3)   ;;  %v1170_v21 = vld [vmem:[%s1389_s1 + $0xe8] sm:$0xff] (!%p295_p3)   ;;  %v431_v40 = vsub.s32 (!%p295_p3), 2, %v422_v27 }
   0xc   : > { %v1163_v14 = vld [vmem:[%s1389_s1 + $0x18] sm:$0xff] (!%p295_p3)   ;;  %v1167_v18 = vld [vmem:[%s1389_s1 + $0x20] sm:$0xff] (!%p295_p3)   ;;  %v1171_v23 = vld [vmem:[%s1389_s1 + $0x28] sm:$0xff] (!%p295_p3)  }
   0xd   : > { %1084 = vmatpush3.bf16.msra.mxu0 (!%p295_p3), %v1155_v6  ;;  %v1164_v15 = vld [vmem:[%s1389_s1 + $0x98] sm:$0xff] (!%p295_p3)   ;;  %v1168_v19 = vld [vmem:[%s1389_s1 + $0xa0] sm:$0xff] (!%p295_p3)   ;;  %v1172_v24 = vld [vmem:[%s1389_s1 + $0xa8] sm:$0xff] (!%p295_p3)  }
   0xe   : > { %1106 = vmatpush3.bf16.msra.mxu1 %v1156_v7  ;;  %1085 = vmatprep.subr.bf16.mxu0 %v1157_v8  ;;  %s1400_s13 = smov (!%p356_p4, %s1030_s13), 3  ;;  %v1173_v25 = vld [vmem:[%s1389_s1 + $0x70] sm:$0xff]   ;;  %v1177_v30 = vld [vmem:[%s1389_s1 + $0x78] sm:$0xff]   ;;  %v419_v38 = vld [vmem:[%s1390_s2] sm:$0xf] }
   0xf   : > { %1107 = vmatprep.subr.bf16.mxu1 %v1158_v9  ;;  %v1174_v26 = vld [vmem:[%s1389_s1 + $0xf0] sm:$0xff]   ;;  %s1073_s16 = sshll.u32 %s1400_s13, 4  ;;  %v1178_v31 = vld [vmem:[%s1389_s1 + $0xf8] sm:$0xff]   ;;  %v449_v45 = vld [vmem:[%s1391_s3] sm:$0xf]  ;;  %v428_v48 = vrot.slane %v419_v38, %v427_v33  ;;  %v436_v54 = vrot.slane %v419_v38, %v435_v35  ;;  %v424_v58 = vrot.slane %v419_v38, %v423_v39  ;;  %v432_v62 = vrot.slane %v419_v38, %v431_v40  ;;  %s1034_s18 = sshll.u32 %s1400_s13, 2 }
  0x10   : > { %v1175_v28 = vld [vmem:[%s1389_s1 + $0x30] sm:$0xff]   ;;  %s363_s28 = scalar_lea.vmem %s1388_s0, %s1073_s16  ;;  %v1179_v32 = vld [vmem:[%s1389_s1 + $0x38] sm:$0xff]   ;;  %v458_v49 = vrot.slane %v449_v45, %v427_v33  ;;  %v466_v55 = vrot.slane %v449_v45, %v435_v35  ;;  %v454_v59 = vrot.slane %v449_v45, %v423_v39  ;;  %v462_v63 = vrot.slane %v449_v45, %v431_v40  ;;  %v1067_v33 = vld [vmem:[%s1392_s4] ss:$0 sm:$0xff]  ;;  %s398_s25 = scalar_lea.vmem %s1394_s6, %s1034_s18 }
  0x11   : > { %1086 = vmatpush3.bf16.msra.mxu0 %v1159_v10  ;;  %v1176_v29 = vld [vmem:[%s1389_s1 + $0xb0] sm:$0xff]   ;;  %v1180_v34 = vld [vmem:[%s1389_s1 + $0xb8] sm:$0xff]   ;;  %v407_v36 = vld [vmem:[%s363_s28] sm:$0xff] }
  0x12   : > { %1108 = vmatpush3.bf16.msra.mxu1 %v1160_v11  ;;  %1087 = vmatprep.subr.bf16.mxu0 %v1161_v12  ;;  %v409_v37 = vld [vmem:[%s363_s28 + $0x10] sm:$0xff]  ;;  %v411_v41 = vunpack.c.l.bf16 %v407_v36  ;;  %v412_v42 = vunpack.c.h.bf16 %v407_v36  ;;  %v408_v46 = vld [vmem:[%s363_s28 + $0x8] sm:$0xff]  ;;  %v410_v47 = vld [vmem:[%s363_s28 + $0x18] sm:$0xff] }
  0x13   : > { %1109 = vmatprep.subr.bf16.mxu1 %v1162_v13  ;;  %v415_v43 = vunpack.c.l.bf16 %v409_v37  ;;  %v416_v44 = vunpack.c.h.bf16 %v409_v37  ;;  %v413_v50 = vunpack.c.l.bf16 %v408_v46  ;;  %v414_v51 = vunpack.c.h.bf16 %v408_v46  ;;  %v1068_v38 = vld [vmem:[%s1393_s5] ss:$0 sm:$0xff] }
  0x14   : > { %v417_v52 = vunpack.c.l.bf16 %v410_v47  ;;  %v418_v53 = vunpack.c.h.bf16 %v410_v47  ;;  %v442_v56 = vmul.f32 %v428_v48, %v412_v42  ;;  %v441_v2 = vmul.f32 %v424_v58, %v411_v41 }
  0x15   : > { %1088 = vmatpush3.bf16.msra.mxu0 %v1163_v14  ;;  %v446_v57 = vmul.f32 %v428_v48, %v416_v44  ;;  %v444_v60 = vmul.f32 %v436_v54, %v414_v51  ;;  %v445_v3 = vmul.f32 %v424_v58, %v415_v43  ;;  %v443_v6 = vmul.f32 %v432_v62, %v413_v50 }
  0x16   : > { %1110 = vmatpush3.bf16.msra.mxu1 %v1164_v15  ;;  %1089 = vmatprep.subr.bf16.mxu0 %v1165_v16  ;;  %v448_v61 = vmul.f32 %v436_v54, %v418_v53  ;;  %v472_v0 = vadd.f32 %v458_v49, %v442_v56  ;;  %v447_v7 = vmul.f32 %v432_v62, %v417_v52 }
  0x17   : > { %1111 = vmatprep.subr.bf16.mxu1 %v1166_v17  ;;  %v476_v1 = vadd.f32 %v458_v49, %v446_v57  ;;  %v474_v4 = vadd.f32 %v466_v55, %v444_v60  ;;  %v471_v10 = vadd.f32 %v454_v59, %v441_v2  ;;  %v475_v11 = vadd.f32 %v454_v59, %v445_v3 }
  0x18   : > { %v478_v5 = vadd.f32 %v466_v55, %v448_v61  ;;  %v480_v8 = vmax.f32 %v472_v0, 0.0  ;;  %v473_v14 = vadd.f32 %v462_v63, %v443_v6  ;;  %v477_v15 = vadd.f32 %v462_v63, %v447_v7 }
  0x19   : > { %1090 = vmatpush3.bf16.msra.mxu0 %v1167_v18  ;;  %v484_v9 = vmax.f32 %v476_v1, 0.0  ;;  %v482_v12 = vmax.f32 %v474_v4, 0.0  ;;  %v479_v17 = vmax.f32 %v471_v10, 0.0  ;;  %v483_v18 = vmax.f32 %v475_v11, 0.0 }
  0x1a   : > { %1112 = vmatpush3.bf16.msra.mxu1 %v1168_v19  ;;  %1091 = vmatprep.subr.bf16.mxu0 %v1169_v20  ;;  %v486_v13 = vmax.f32 %v478_v5, 0.0  ;;  %v481_v20 = vmax.f32 %v473_v14, 0.0 }
  0x1b   : > { %1113 = vmatprep.subr.bf16.mxu1 %v1170_v21  ;;  %v488_v16 = vpack.c.bf16 %v484_v9, %v480_v8  ;;  %v485_v21 = vmax.f32 %v477_v15, 0.0  ;;  %v487_v22 = vpack.c.bf16 %v483_v18, %v479_v17 }
  0x1c   : > { %v490_v19 = vpack.c.bf16 %v486_v13, %v482_v12 }
  0x1d   : > { %1092 = vmatpush3.bf16.msra.mxu0 %v1171_v23  ;;  %781 = vmatprep.mubr.bf16.mxu0 %v488_v16  ;;  %v489_v23 = vpack.c.bf16 %v485_v21, %v481_v20 }
  0x1e   : > { %1114 = vmatpush3.bf16.msra.mxu1 %v1172_v24  ;;  %1093 = vmatprep.subr.bf16.mxu0 %v1173_v25 }
  0x1f   : > { %1115 = vmatprep.subr.bf16.mxu1 %v1174_v26  ;;  %822 = vmatprep.mubr.bf16.mxu1 %v490_v19 }
  0x21   : > { %1094 = vmatpush3.bf16.msra.mxu0 %v1175_v28 }
  0x22   : > { %1116 = vmatpush3.bf16.msra.mxu1 %v1176_v29  ;;  %1095 = vmatprep.subr.bf16.mxu0 %v1177_v30 }
  0x23   : > { %1117 = vmatprep.subr.bf16.mxu1 %v1178_v31 }
  0x25   : > { %1096 = vmatpush3.bf16.msra.mxu0 %v1179_v32 }
  0x26   : > { %1118 = vmatpush3.bf16.msra.mxu1 %v1180_v34 }
  0x28   : > { %782 = vmatmul.mubr.bf16.vlgmr.msra.gmra.mrb[0].mxu0 %v487_v22 }
  0x29   : > { %823 = vmatmul.mubr.bf16.vlgmr.msra.gmra.mrb[0].mxu1 %v489_v23 }
  0xfb   : > { %v1097_v24 = vpop.f32.mrb[0].mxu0 }
  0xfc   : > { %v1119_v25 = vpop.f32.mrb[0].mxu1  ;;  %v1098_v26 = vpop.f32.mrb[1].mxu0 }
  0xfd   : > { %v1099_v27 = vadd.f32 %v1098_v26, %v1097_v24  ;;  %v1120_v28 = vpop.f32.mrb[1].mxu1  ;;  %v1100_v29 = vpop.f32.mrb[2].mxu0 }
  0xfe   : > { %v1121_v30 = vadd.f32 %v1120_v28, %v1119_v25  ;;  %v1122_v31 = vpop.f32.mrb[2].mxu1  ;;  %v1101_v32 = vpop.f32.mrb[3].mxu0 }
  0xff   : > { %v1102_v34 = vadd.f32 %v1101_v32, %v1100_v29  ;;  %v1123_v35 = vpop.f32.mrb[3].mxu1 }
 0x100   : > { %v825_v36 = vadd.f32 %v1121_v30, %v1099_v27  ;;  %v1124_v37 = vadd.f32 %v1123_v35, %v1122_v31 }
 0x102   : > { %v847_v39 = vmul.f32 %v1067_v33, %v825_v36  ;;  %v828_v40 = vadd.f32 %v1124_v37, %v1102_v34 }
 0x104   : > { %v856_v41 = vadd.f32 %v1068_v38, %v847_v39  ;;  %v848_v42 = vmul.f32 %v1067_v33, %v828_v40 }
 0x106   : > { %v857_v43 = vadd.f32 %v1068_v38, %v848_v42  ;;  %v858_v44 = vmax.f32 %v856_v41, 0.0 }
 0x108   : > { %v859_v45 = vmax.f32 %v857_v43, 0.0 }
 0x10a   : > { %v1079_v46 = vpack.c.bf16 %v859_v45, %v858_v44 }
 0x10c   : > { %1080 = vst [vmem:[%s398_s25] sm:$0xff] %v1079_v46  }
 0x10d PF: > { %s16_s23 = sadd.s32 1, %s1203_s23   ;;  %s1395_s21 = smov %s1199_s22 }
 0x10e   : > { %p13_p5 = scmp.ge.s32.totalorder %s16_s23, 4   ;;  %s1396_s22 = smov %s1398_s24 }
 0x110   :  { %15 = sbr.rel (!%p13_p5) target bundleno = 2 (0x2), region = 97 }

// kernel: xray_analyzer_forward.137
= control target key start
LH: loop header
LB: loop body
LE: loop exit
PB: predicated region body
PF: predicated region fallthrough
CT: control target
= control target key end

     0   :  { %7 = vsyncpa [#allocation4], 0  ;;  %s2020_s0 = inlined_call_operand.hbm [shape: bf16[32,1152], index: 0, kind: input, shape index: {}]   ;;  %s2021_s1 = inlined_call_operand.vmem [shape: bf16[1152,128], index: 1, kind: input, shape index: {}]   ;;  %s2022_s2 = inlined_call_operand.vmem [shape: bf16[32,128], index: 2, kind: output, shape index: {}]  }
   0x1   :  { %9 = vsyncpa [#allocation4 + $0x1], 0  ;;  %s1676_s9 = smov 0   ;;  %s1678_s10 = smov 0  }
   0x2   :  { %s1680_s11 = smov 0   ;;  %s1682_s12 = smov 0  }
   0x3   :  { %s1684_s13 = smov 0   ;;  %s1686_s14 = smov 0  }
   0x4 LB: > { %s1207_s15 = sadd.s32 4294967295, %s1654_s14   ;;  %s34_s16 = sadd.s32 1, %s1650_s13  ;;  %s1654_s14 = sphi %s1686_s14, %s15_s14   ;;  %s1650_s13 = sphi %s1684_s13, %s2029_s13   ;;  %s1646_s12 = sphi %s1682_s12, %s2028_s12   ;;  %s1642_s11 = sphi %s1680_s11, %s2027_s11   ;;  %s1638_s10 = sphi %s1678_s10, %s2026_s10   ;;  %s1634_s9 = sphi %s1676_s9, %s2025_s9  }
   0x5   : > { %p36_p0 = scmp.ge.s32.totalorder %s34_s16, 2  ;;  %s43_s17 = sadd.s32 1, %s1642_s11 }
   0x6   : > { %p50_p1 = scmp.ne.s32.totalorder %s1642_s11, %s1638_s10  ;;  %p51_p2 = scmp.eq.s32.totalorder %s1654_s14, 0 }
   0x7   : > { %s2031_s16 = smov (%p36_p0, %s34_s16), 0  ;;  %p56_p4 = scmp.ne.s32.totalorder %s1638_s10, %s1634_s9 }
   0x8   : > { %p52_p3 = por %p51_p2, %p50_p1  ;;  %s38_s18 = ssub.s32 %s1650_s13, %s2031_s16 }
   0x9   : > { %p57_p5 = scmp.eq.s32.totalorder %s1207_s15, 0  ;;  %p41_p6 = scmp.eq.s32.totalorder %s38_s18, 0 }
   0xa   : > { %p1436_p8 = scmp.lt.s32.totalorder %s1654_s14, 2  ;;  %s148_s21 = sand.u32 1, %s1642_s11  }
   0xb   : > { %p1715_p7 = por %p57_p5, %p56_p4  ;;  %s1428_s22 = smul.u32 1152, %s1650_s13 }
   0xc   : > { %s1721_s20 = scalar_select %p41_p6, %s1642_s11, %s43_s17  }
   0xd   : > { %s1427_s23 = smul.u32 72, %s148_s21  ;;  %s1728_s26 = scalar_lea.hbm %s2020_s0, %s1428_s22 }
   0xe   : > { %p1730_p9 = pnand %p1436_p8, %p52_p3  ;;  %s1736_s30 = scalar_lea.sflag [#allocation4], %s148_s21 }
   0xf   : > { %s152_s28 = scalar_lea.vmem [#allocation3], %s1427_s23  ;;  %s1574_s3 = scalar_lea.hbm %s1728_s26, 1152 }
  0x10   : > { %s162_s29 = sshll.u32 %s152_s28, 4  ;;  %p1575_p10 = scmp.ne.s32.totalorder %s1728_s26, %s1574_s3  ;;  %s1734_s29 = int_to_ptr.vmem [resolvable:$true] %s162_s29 }
  0x11   : > { %p1576_p11 = pneg %p1730_p9  ;;  %s1579_s6 = scalar_lea.hbm %s2020_s0, 2304 }
  0x12   : > { %p1580_p0 = scmp.lt.u32.totalorder %s1728_s26, %s2020_s0  ;;  %p1581_p1 = scmp.lt.u32.totalorder %s1579_s6, %s1574_s3 }
  0x13   : > { %p1577_p12 = pnand %p1576_p11, %p1575_p10  ;;  %p1583_p3 = scmp.lt.u32.totalorder %s1574_s3, %s1728_s26 }
  0x14   : > { %p1582_p2 = por %p1581_p1, %p1580_p0 }
  0x15   : > { %p1578_p13 = pneg %p1577_p12 }
  0x16   : > { %p1584_p4 = por %p1583_p3, %p1582_p2 }
  0x18   : > { %p1585_p5 = pnand %p1584_p4, %p1578_p13 }
  0x1a   : > { %1588 = shalt.err (!%p1585_p5)
}
  0x1b   : > { %s1589_s9 = scalar_lea.vmem %s1734_s29, 1152  ;;  %s1656_s15 = smov [#allocation3]  }
  0x1c   : > { %p1590_p6 = scmp.ne.s32.totalorder %s1734_s29, %s1589_s9  ;;  %s1594_s17 = sshll.u32 %s1656_s15, 4  ;;  %s1595_s17 = int_to_ptr.vmem [resolvable:$false] %s1594_s17 }
  0x1d   : > { %s1596_s18 = scalar_lea.vmem %s1595_s17, 2304  ;;  %p1597_p12 = scmp.lt.s32.totalorder %s1734_s29, %s1595_s17 }
  0x1e   : > { %p1592_p8 = pnand %p1590_p6, %p1576_p11  ;;  %p1598_p0 = scmp.lt.s32.totalorder %s1596_s18, %s1589_s9 }
  0x20   : > { %p1593_p10 = pneg %p1592_p8  ;;  %p1599_p1 = por %p1598_p0, %p1597_p12 }
  0x22   : > { %p1600_p2 = pnand %p1599_p1, %p1593_p10 }
  0x24   : > { %1603 = shalt.err (!%p1600_p2)
}
  0x25   : > { %s1657_s21 = smov 576   ;;  %s1658_s22 = smov 36  }
  0x26   : > { %1435 = dma.hbm_to_vmem [thread:$0]  (!%p1730_p9), %s1728_s26, 1152, %s1734_s29, %s1736_s30, %s1657_s21, %s1657_s21, %s1658_s22  }
  0x27   : > { %p1215_p11 = scmp.ge.s32.totalorder %s1654_s14, 1  ;;  %p170_p13 = scmp.lt.s32.totalorder %s1654_s14, 3 }
  0x29   : > { %p171_p3 = pnand %p1215_p11, %p170_p13 }
  0x2a   : > { %s176_s23 = sand.u32 (!%p171_p3), 1, %s1638_s10  }
  0x2b   : > { %174 = sbr.rel (%p171_p3) target bundleno = 368 (0x170), region = 28  ;;  %s177_s25 = scalar_lea.sflag (!%p171_p3), [#allocation4], %s176_s23 }
  0x2c   : > { %s1429_s24 = smul.u32 (!%p171_p3), 72, %s176_s23 }
  0x2e   : > { %s1767_s28 = scalar_lea.vmem (!%p171_p3), [#allocation3], %s1429_s24 }
  0x32   : > { %1629 = dma.done.wait (%p1715_p7), %s177_s25, 1152  }
  0x33   : > { %1631 = vsyncadd (%p1715_p7), %s177_s25, 4294966144  ;;  %v1489_v0 = vld [vmem:[%s2021_s1 + $0x40] sm:$0xff]   ;;  %v1493_v4 = vld [vmem:[%s2021_s1 + $0x48] sm:$0xff]   ;;  %vm1660_vm0 = vmmov 0  }
  0x34   : > { %v1490_v1 = vld [vmem:[%s2021_s1 + $0xc0] sm:$0xff]   ;;  %1310 = vmatprep.subr.bf16.mxu0 %v1489_v0  ;;  %v1494_v5 = vld [vmem:[%s2021_s1 + $0xc8] sm:$0xff]   ;;  %v1497_v8 = vld [vmem:[%s2021_s1 + $0x50] sm:$0xff]  }
  0x35   : > { %v1491_v2 = vld [vmem:[%s2021_s1] sm:$0xff]   ;;  %1332 = vmatprep.subr.bf16.mxu1 %v1490_v1  ;;  %v1495_v6 = vld [vmem:[%s2021_s1 + $0x8] sm:$0xff]   ;;  %v1498_v9 = vld [vmem:[%s2021_s1 + $0xd0] sm:$0xff]  }
  0x36   : > { %v1492_v3 = vld [vmem:[%s2021_s1 + $0x80] sm:$0xff]   ;;  %1311 = vmatpush3.bf16.msra.mxu0 %v1491_v2  ;;  %v1496_v7 = vld [vmem:[%s2021_s1 + $0x88] sm:$0xff]   ;;  %v1499_v10 = vld [vmem:[%s2021_s1 + $0x10] sm:$0xff]  }
  0x37   : > { %1333 = vmatpush3.bf16.msra.mxu1 %v1492_v3  ;;  %1312 = vmatprep.subr.bf16.mxu0 %v1493_v4  ;;  %v1500_v11 = vld [vmem:[%s2021_s1 + $0x90] sm:$0xff]   ;;  %v1501_v12 = vld [vmem:[%s2021_s1 + $0x58] sm:$0xff]   ;;  %v1505_v16 = vld [vmem:[%s2021_s1 + $0x60] sm:$0xff]  }
  0x38   : > { %1334 = vmatprep.subr.bf16.mxu1 %v1494_v5  ;;  %v1502_v13 = vld [vmem:[%s2021_s1 + $0xd8] sm:$0xff]   ;;  %v1506_v17 = vld [vmem:[%s2021_s1 + $0xe0] sm:$0xff]   ;;  %v1509_v20 = vld [vmem:[%s2021_s1 + $0x68] sm:$0xff]  }
  0x39   : > { %v1503_v14 = vld [vmem:[%s2021_s1 + $0x18] sm:$0xff]   ;;  %v1507_v18 = vld [vmem:[%s2021_s1 + $0x20] sm:$0xff]   ;;  %v1510_v21 = vld [vmem:[%s2021_s1 + $0xe8] sm:$0xff]  }
  0x3a   : > { %1313 = vmatpush3.bf16.msra.mxu0 %v1495_v6  ;;  %v1504_v15 = vld [vmem:[%s2021_s1 + $0x98] sm:$0xff]   ;;  %v1508_v19 = vld [vmem:[%s2021_s1 + $0xa0] sm:$0xff]   ;;  %v1511_v22 = vld [vmem:[%s2021_s1 + $0x28] sm:$0xff]   ;;  %v1659_v6 = vmov 0.0  }
  0x3b   : > { %1335 = vmatpush3.bf16.msra.mxu1 %v1496_v7  ;;  %1314 = vmatprep.subr.bf16.mxu0 %v1497_v8  ;;  %v1512_v23 = vld [vmem:[%s2021_s1 + $0xa8] sm:$0xff]   ;;  %v1513_v24 = vld [vmem:[%s2021_s1 + $0x70] sm:$0xff]   ;;  %v1517_v28 = vld [vmem:[%s2021_s1 + $0x78] sm:$0xff]  }
  0x3c   : > { %1336 = vmatprep.subr.bf16.mxu1 %v1498_v9  ;;  %v1514_v25 = vld [vmem:[%s2021_s1 + $0xf0] sm:$0xff]   ;;  %v1518_v29 = vld [vmem:[%s2021_s1 + $0xf8] sm:$0xff]   ;;  %v1521_v32 = vld [vmem:[%s1767_s28] ss:$36 sps:$4 sm:$0xff]  }
  0x3d   : > { %v1515_v26 = vld [vmem:[%s2021_s1 + $0x30] sm:$0xff]   ;;  %v1519_v30 = vld [vmem:[%s2021_s1 + $0x38] sm:$0xff]   ;;  %v1527_v36 = vld [vmem:[%s2021_s1 + $0x140] sm:$0xff]  }
  0x3e   : > { %1315 = vmatpush3.bf16.msra.mxu0 %v1499_v10  ;;  %v1516_v27 = vld [vmem:[%s2021_s1 + $0xb0] sm:$0xff]   ;;  %v1520_v31 = vld [vmem:[%s2021_s1 + $0xb8] sm:$0xff]   ;;  %v1528_v37 = vld [vmem:[%s2021_s1 + $0x100] sm:$0xff]  }
  0x3f   : > { %1337 = vmatpush3.bf16.msra.mxu1 %v1500_v11  ;;  %1316 = vmatprep.subr.bf16.mxu0 %v1501_v12  ;;  %v1523_v33 = vld [vmem:[%s1767_s28 + $0x4] ss:$36 sps:$4 sm:$0xff]   ;;  %v1526_v35 = vld [vmem:[%s1767_s28 + $0xc] ss:$36 sps:$4 sm:$0xff]   ;;  %v1560_v4 = vld [vmem:[%s1767_s28 + $0x14] ss:$36 sps:$4 sm:$0xff]  }
  0x40   : > { %1338 = vmatprep.subr.bf16.mxu1 %v1502_v13  ;;  %v1524_v34 = vld [vmem:[%s1767_s28 + $0x8] ss:$36 sps:$4 sm:$0xff]   ;;  %905 = vmatprep.mubr.bf16.mxu0 %v1523_v33  ;;  %v1529_v38 = vld [vmem:[%s2021_s1 + $0x1c0] sm:$0xff]   ;;  %v1539_v48 = vld [vmem:[%s2021_s1 + $0x158] sm:$0xff]  }
  0x41   : > { %946 = vmatprep.mubr.bf16.mxu1 %v1526_v35  ;;  %v1530_v39 = vld [vmem:[%s2021_s1 + $0x180] sm:$0xff]   ;;  %v1531_v40 = vld [vmem:[%s2021_s1 + $0x148] sm:$0xff]   ;;  %v1535_v44 = vld [vmem:[%s2021_s1 + $0x150] sm:$0xff]  }
  0x42   : > { %1317 = vmatpush3.bf16.msra.mxu0 %v1503_v14  ;;  %v1532_v41 = vld [vmem:[%s2021_s1 + $0x108] sm:$0xff]   ;;  %v1536_v45 = vld [vmem:[%s2021_s1 + $0x110] sm:$0xff]   ;;  %v1540_v49 = vld [vmem:[%s2021_s1 + $0x118] sm:$0xff]  }
  0x43   : > { %1339 = vmatpush3.bf16.msra.mxu1 %v1504_v15  ;;  %1318 = vmatprep.subr.bf16.mxu0 %v1505_v16  ;;  %v1533_v42 = vld [vmem:[%s2021_s1 + $0x1c8] sm:$0xff]   ;;  %v1537_v46 = vld [vmem:[%s2021_s1 + $0x1d0] sm:$0xff]   ;;  %v1541_v50 = vld [vmem:[%s2021_s1 + $0x1d8] sm:$0xff]  }
  0x44   : > { %1340 = vmatprep.subr.bf16.mxu1 %v1506_v17  ;;  %v1534_v43 = vld [vmem:[%s2021_s1 + $0x188] sm:$0xff]   ;;  %v1538_v47 = vld [vmem:[%s2021_s1 + $0x190] sm:$0xff]   ;;  %v1542_v51 = vld [vmem:[%s2021_s1 + $0x198] sm:$0xff]  }
  0x45   : > { %v1543_v52 = vld [vmem:[%s2021_s1 + $0x160] sm:$0xff]   ;;  %v1547_v56 = vld [vmem:[%s2021_s1 + $0x168] sm:$0xff]   ;;  %v1551_v60 = vld [vmem:[%s2021_s1 + $0x170] sm:$0xff]  }
  0x46   : > { %1319 = vmatpush3.bf16.msra.mxu0 %v1507_v18  ;;  %v1544_v53 = vld [vmem:[%s2021_s1 + $0x120] sm:$0xff]   ;;  %v1548_v57 = vld [vmem:[%s2021_s1 + $0x128] sm:$0xff]   ;;  %v1552_v61 = vld [vmem:[%s2021_s1 + $0x130] sm:$0xff]  }
  0x47   : > { %1341 = vmatpush3.bf16.msra.mxu1 %v1508_v19  ;;  %1320 = vmatprep.subr.bf16.mxu0 %v1509_v20  ;;  %v1545_v54 = vld [vmem:[%s2021_s1 + $0x1e0] sm:$0xff]   ;;  %v1549_v58 = vld [vmem:[%s2021_s1 + $0x1e8] sm:$0xff]   ;;  %v1553_v62 = vld [vmem:[%s2021_s1 + $0x1f0] sm:$0xff]  }
  0x48   : > { %1342 = vmatprep.subr.bf16.mxu1 %v1510_v21  ;;  %v1546_v55 = vld [vmem:[%s2021_s1 + $0x1a0] sm:$0xff]   ;;  %v1550_v59 = vld [vmem:[%s2021_s1 + $0x1a8] sm:$0xff]   ;;  %v1554_v63 = vld [vmem:[%s2021_s1 + $0x1b0] sm:$0xff]  }
  0x49   : > { %v1555_v0 = vld [vmem:[%s2021_s1 + $0x178] sm:$0xff]   ;;  %v1565_v9 = vld [vmem:[%s2021_s1 + $0x200] sm:$0xff]   ;;  %v1566_v10 = vld [vmem:[%s2021_s1 + $0x208] sm:$0xff]  }
  0x4a   : > { %1321 = vmatpush3.bf16.msra.mxu0 %v1511_v22  ;;  %v1556_v1 = vld [vmem:[%s2021_s1 + $0x138] sm:$0xff]   ;;  %v1567_v11 = vld [vmem:[%s2021_s1 + $0x210] sm:$0xff]   ;;  %v1569_v13 = vld [vmem:[%s2021_s1 + $0x220] sm:$0xff]  }
  0x4b   : > { %1343 = vmatpush3.bf16.msra.mxu1 %v1512_v23  ;;  %1322 = vmatprep.subr.bf16.mxu0 %v1513_v24  ;;  %v1557_v2 = vld [vmem:[%s2021_s1 + $0x1f8] sm:$0xff]   ;;  %v1570_v14 = vld [vmem:[%s2021_s1 + $0x228] sm:$0xff]   ;;  %v1571_v15 = vld [vmem:[%s2021_s1 + $0x230] sm:$0xff]  }
  0x4c   : > { %1344 = vmatprep.subr.bf16.mxu1 %v1514_v25  ;;  %v1558_v3 = vld [vmem:[%s1767_s28 + $0x10] ss:$36 sps:$4 sm:$0xff]   ;;  %v1562_v7 = vld [vmem:[%s1767_s28 + $0x18] ss:$36 sps:$4 sm:$0xff]   ;;  %v1573_v17 = vld [vmem:[%s1767_s28 + $0x20] ss:$36 sps:$4 sm:$0xff]  }
  0x4d   : > { %v1561_v5 = vld [vmem:[%s2021_s1 + $0x1b8] sm:$0xff]  }
  0x4e   : > { %1323 = vmatpush3.bf16.msra.mxu0 %v1515_v26  ;;  %v1564_v8 = vld [vmem:[%s1767_s28 + $0x1c] ss:$36 sps:$4 sm:$0xff]   ;;  %s1216_s28 = sshll.u32 %s1646_s12, 1 }
  0x4f   : > { %1345 = vmatpush3.bf16.msra.mxu1 %v1516_v27  ;;  %1324 = vmatprep.subr.bf16.mxu0 %v1517_v28  ;;  %v1568_v12 = vld [vmem:[%s2021_s1 + $0x218] sm:$0xff]   ;;  %p224_p7 = scmp.lt.s32.totalorder %s1216_s28, 3 }
  0x50   : > { %1346 = vmatprep.subr.bf16.mxu1 %v1518_v29  ;;  %v1572_v16 = vld [vmem:[%s2021_s1 + $0x238] sm:$0xff]  }
  0x51   : > { %s2033_s28 = smov (!%p224_p7, %s1216_s28), 3 }
  0x52   : > { %1325 = vmatpush3.bf16.msra.mxu0 %v1519_v30  ;;  %s1217_s29 = sshll.u32 %s2033_s28, 2 }
  0x53   : > { %1347 = vmatpush3.bf16.msra.mxu1 %v1520_v31  ;;  %1354 = vmatprep.subr.bf16.mxu0 %v1527_v36  ;;  %s230_s6 = scalar_lea.vmem %s2022_s2, %s1217_s29 }
  0x54   : > { %1376 = vmatprep.subr.bf16.mxu1 %v1529_v38 }
  0x55   : > { %906 = vmatmul.mubr.bf16.vlgmr.msra.gmra.mrb[0].mxu0 %v1521_v32 }
  0x56   : > { %947 = vmatmul.mubr.bf16.vlgmr.msra.gmra.mrb[0].mxu1 %v1524_v34  ;;  %1355 = vmatpush3.bf16.msra.mxu0 %v1528_v37 }
  0x57   : > { %1377 = vmatpush3.bf16.msra.mxu1 %v1530_v39  ;;  %1356 = vmatprep.subr.bf16.mxu0 %v1531_v40 }
  0x58   : > { %1378 = vmatprep.subr.bf16.mxu1 %v1533_v42  ;;  %987 = vmatprep.mubr.bf16.mxu0 %v1560_v4 }
  0x59   : > { %1028 = vmatprep.mubr.bf16.mxu1 %v1564_v8 }
  0x5a   : > { %1357 = vmatpush3.bf16.msra.mxu0 %v1532_v41 }
  0x5b   : > { %1379 = vmatpush3.bf16.msra.mxu1 %v1534_v43  ;;  %1358 = vmatprep.subr.bf16.mxu0 %v1535_v44 }
  0x5c   : > { %1380 = vmatprep.subr.bf16.mxu1 %v1537_v46 }
  0x5e   : > { %1359 = vmatpush3.bf16.msra.mxu0 %v1536_v45 }
  0x5f   : > { %1381 = vmatpush3.bf16.msra.mxu1 %v1538_v47  ;;  %1360 = vmatprep.subr.bf16.mxu0 %v1539_v48 }
  0x60   : > { %1382 = vmatprep.subr.bf16.mxu1 %v1541_v50 }
  0x62   : > { %1361 = vmatpush3.bf16.msra.mxu0 %v1540_v49 }
  0x63   : > { %1383 = vmatpush3.bf16.msra.mxu1 %v1542_v51  ;;  %1362 = vmatprep.subr.bf16.mxu0 %v1543_v52 }
  0x64   : > { %1384 = vmatprep.subr.bf16.mxu1 %v1545_v54 }
  0x66   : > { %1363 = vmatpush3.bf16.msra.mxu0 %v1544_v53 }
  0x67   : > { %1385 = vmatpush3.bf16.msra.mxu1 %v1546_v55  ;;  %1364 = vmatprep.subr.bf16.mxu0 %v1547_v56 }
  0x68   : > { %1386 = vmatprep.subr.bf16.mxu1 %v1549_v58 }
  0x6a   : > { %1365 = vmatpush3.bf16.msra.mxu0 %v1548_v57 }
  0x6b   : > { %1387 = vmatpush3.bf16.msra.mxu1 %v1550_v59  ;;  %1366 = vmatprep.subr.bf16.mxu0 %v1551_v60 }
  0x6c   : > { %1388 = vmatprep.subr.bf16.mxu1 %v1553_v62 }
  0x6e   : > { %1367 = vmatpush3.bf16.msra.mxu0 %v1552_v61 }
  0x6f   : > { %1389 = vmatpush3.bf16.msra.mxu1 %v1554_v63  ;;  %1368 = vmatprep.subr.bf16.mxu0 %v1555_v0 }
  0x70   : > { %1390 = vmatprep.subr.bf16.mxu1 %v1557_v2 }
  0x72   : > { %1369 = vmatpush3.bf16.msra.mxu0 %v1556_v1 }
  0x73   : > { %1407 = vmatprep.subr.bf16.mxu0 %v1659_v6  ;;  %1391 = vmatpush3.bf16.msra.mxu1 %v1561_v5 }
  0x75   : > { %988 = vmatmul.mubr.bf16.vlgmr.msra.gmra.mrb[4].mxu0 %v1558_v3 }
  0x76   : > { %1423 = vmatprep.mubr.msk.bf16.mxu0 %vm1660_vm0, %v1659_v6  ;;  %1408 = vmatpush3.bf16.msra.mxu0 %v1565_v9 }
  0x77   : > { %1029 = vmatmul.mubr.bf16.vlgmr.msra.gmra.mrb[4].mxu1 %v1562_v7  ;;  %1409 = vmatprep.subr.bf16.mxu0 %v1659_v6 }
  0x7a   : > { %1410 = vmatpush3.bf16.msra.mxu0 %v1566_v10 }
  0x7b   : > { %1411 = vmatprep.subr.bf16.mxu0 %v1659_v6 }
  0x7e   : > { %1412 = vmatpush3.bf16.msra.mxu0 %v1567_v11 }
  0x7f   : > { %1413 = vmatprep.subr.bf16.mxu0 %v1659_v6 }
  0x82   : > { %1414 = vmatpush3.bf16.msra.mxu0 %v1568_v12 }
  0x83   : > { %1415 = vmatprep.subr.bf16.mxu0 %v1659_v6 }
  0x86   : > { %1416 = vmatpush3.bf16.msra.mxu0 %v1569_v13 }
  0x87   : > { %1417 = vmatprep.subr.bf16.mxu0 %v1659_v6 }
  0x8a   : > { %1418 = vmatpush3.bf16.msra.mxu0 %v1570_v14 }
  0x8b   : > { %1419 = vmatprep.subr.bf16.mxu0 %v1659_v6 }
  0x8e   : > { %1420 = vmatpush3.bf16.msra.mxu0 %v1571_v15 }
  0x8f   : > { %1421 = vmatprep.subr.bf16.mxu0 %v1659_v6 }
  0x92   : > { %1422 = vmatpush3.bf16.msra.mxu0 %v1572_v16 }
  0x95   : > { %1424 = vmatmul.mubr.bf16.vlgmr.msra.gmra.mrb[8].mxu0 %v1573_v17 }
 0x128   : > { %v1326_v18 = vpop.f32.mrb[0].mxu0 }
 0x129   : > { %v1348_v19 = vpop.f32.mrb[0].mxu1  ;;  %v1327_v20 = vpop.f32.mrb[1].mxu0 }
 0x12a   : > { %v1328_v21 = vadd.f32 %v1327_v20, %v1326_v18  ;;  %v1349_v22 = vpop.f32.mrb[1].mxu1  ;;  %v1329_v23 = vpop.f32.mrb[2].mxu0 }
 0x12b   : > { %v1350_v24 = vadd.f32 %v1349_v22, %v1348_v19  ;;  %v1351_v25 = vpop.f32.mrb[2].mxu1  ;;  %v1330_v26 = vpop.f32.mrb[3].mxu0 }
 0x12c   : > { %v1331_v27 = vadd.f32 %v1330_v26, %v1329_v23  ;;  %v1352_v28 = vpop.f32.mrb[3].mxu1 }
 0x12d   : > { %v949_v29 = vadd.f32 %v1350_v24, %v1328_v21  ;;  %v1353_v30 = vadd.f32 %v1352_v28, %v1351_v25 }
 0x12f   : > { %v952_v31 = vadd.f32 %v1353_v30, %v1331_v27 }
 0x148   : > { %v1370_v32 = vpop.f32.mrb[4].mxu0 }
 0x149   : > { %v1371_v33 = vpop.f32.mrb[5].mxu0 }
 0x14a   : > { %v1372_v34 = vadd.f32 %v1371_v33, %v1370_v32  ;;  %v1373_v35 = vpop.f32.mrb[6].mxu0  ;;  %v1392_v36 = vpop.f32.mrb[4].mxu1 }
 0x14b   : > { %v1374_v37 = vpop.f32.mrb[7].mxu0  ;;  %v1393_v40 = vpop.f32.mrb[5].mxu1 }
 0x14c   : > { %v990_v38 = vadd.f32 %v1372_v34, %v949_v29  ;;  %v1375_v39 = vadd.f32 %v1374_v37, %v1373_v35  ;;  %v1394_v41 = vadd.f32 %v1393_v40, %v1392_v36  ;;  %v1395_v42 = vpop.f32.mrb[6].mxu1 }
 0x14d   : > { %v1396_v44 = vpop.f32.mrb[7].mxu1 }
 0x14e   : > { %v993_v43 = vadd.f32 %v1375_v39, %v952_v31  ;;  %v1397_v45 = vadd.f32 %v1396_v44, %v1395_v42  ;;  %v1031_v46 = vadd.f32 %v1394_v41, %v990_v38 }
 0x150   : > { %v1034_v47 = vadd.f32 %v1397_v45, %v993_v43 }
 0x168   : > { %v1071_v48 = vpop.f32.mrb[8].mxu0 }
 0x169   : > { %v1072_v49 = vadd.f32 %v1071_v48, %v1031_v46  ;;  %v1425_v50 = vpop.f32.mrb[9].mxu0 }
 0x16a   : > { %v1074_v51 = vpop.f32.mrb[10].mxu0 }
 0x16b   : > { %v1075_v52 = vadd.f32 %v1074_v51, %v1034_v47  ;;  %v1426_v53 = vpop.f32.mrb[11].mxu0 }
 0x16d   : > { %v1308_v54 = vpack.c.bf16 %v1075_v52, %v1072_v49 }
 0x16f   : > { %1309 = vst [vmem:[%s230_s6] sm:$0xff] %v1308_v54  }
 0x170 PF: > { %s15_s14 = sadd.s32 1, %s1654_s14   ;;  %s2025_s9 = smov %s1638_s10 }
 0x171   : > { %p12_p9 = scmp.ge.s32.totalorder %s15_s14, 4   ;;  %s2026_s10 = smov %s1642_s11 }
 0x172   : > { %s2027_s11 = smov %s1721_s20  ;;  %s2028_s12 = smov %s1650_s13 }
 0x173   : > { %s2029_s13 = smov %s2031_s16  ;;  %14 = sbr.rel (!%p12_p9) target bundleno = 4 (0x4), region = 79 }
 0x17a   :  { %1125 = vsyncpa [#allocation4], 1 }
 0x17b   :  { %1127 = vsyncpa [#allocation4 + $0x1], 1 }

// kernel: xray_analyzer_forward.160
= control target key start
LH: loop header
LB: loop body
LE: loop exit
PB: predicated region body
PF: predicated region fallthrough
CT: control target
= control target key end

     0   :  { %s1323_s15 = smov 0   ;;  %s1325_s16 = smov 0   ;;  %s1567_s0 = inlined_call_operand.vmem [shape: bf16[32,512], index: 0, kind: input, shape index: {}]   ;;  %s1568_s1 = inlined_call_operand.vmem [shape: bf16[512,256], index: 1, kind: input, shape index: {}]   ;;  %s1569_s2 = inlined_call_operand.vmem [shape: f32[1,512], index: 2, kind: input, shape index: {}]   ;;  %s1570_s3 = inlined_call_operand.vmem [shape: f32[1,512], index: 3, kind: input, shape index: {}]   ;;  %s1571_s4 = inlined_call_operand.vmem [shape: bf16[32,256], index: 4, kind: output, shape index: {}]  }
   0x1   :  { %s1327_s17 = smov 0  }
   0x2 LB: > { %s33_s18 = sadd.s32 1, %s1292_s16  ;;  %p1071_p0 = scmp.ge.s32.totalorder %s1296_s17, 1  ;;  %s1296_s17 = sphi %s1327_s17, %s14_s17   ;;  %s1292_s16 = sphi %s1325_s16, %s1573_s16   ;;  %s1288_s15 = sphi %s1323_s15, %s1572_s15  }
   0x3   : > { %p35_p1 = scmp.ge.s32.totalorder %s33_s18, 2  ;;  %p231_p2 = scmp.lt.s32.totalorder %s1296_s17, 3 }
   0x5   : > { %s1575_s18 = smov (%p35_p1, %s33_s18), 0  ;;  %p232_p3 = pnand %p1071_p0, %p231_p2 }
   0x6   : > { %v1178_v0 = vld [vmem:[%s1568_s1 + $0x4] ss:$8 sps:$4 sm:$0xff] (!%p232_p3)   ;;  %v1182_v2 = vld [vmem:[%s1568_s1] ss:$8 sps:$4 sm:$0xff] (!%p232_p3)   ;;  %v1184_v4 = vld [vmem:[%s1568_s1 + $0x14] ss:$8 sps:$4 sm:$0xff] (!%p232_p3)   ;;  %v353_v36 = vlaneseq (!%p232_p3) }
   0x7   : > { %235 = sbr.rel (%p232_p3) target bundleno = 292 (0x124), region = 36  ;;  %v1180_v1 = vld [vmem:[%s1568_s1 + $0x104] ss:$8 sps:$4 sm:$0xff] (!%p232_p3)   ;;  %811 = vmatprep.subr.bf16.mxu1 (!%p232_p3), %v1178_v0  ;;  %v1183_v3 = vld [vmem:[%s1568_s1 + $0x100] ss:$8 sps:$4 sm:$0xff] (!%p232_p3)   ;;  %s1072_s9 = sshll.u32 (!%p232_p3), %s1288_s15, 1 }
   0x8   : > { %854 = vmatprep.subr.bf16.mxu0 (!%p232_p3), %v1180_v1  ;;  %812 = vmatpush1.bf16.msra.mxu1 (!%p232_p3), %v1182_v2  ;;  %v1186_v5 = vld [vmem:[%s1568_s1 + $0x114] ss:$8 sps:$4 sm:$0xff] (!%p232_p3)   ;;  %v1188_v6 = vld [vmem:[%s1568_s1 + $0x10] ss:$8 sps:$4 sm:$0xff] (!%p232_p3)   ;;  %v1190_v8 = vld [vmem:[%s1568_s1 + $0x24] ss:$8 sps:$4 sm:$0xff] (!%p232_p3)  }
   0x9   : > { %855 = vmatpush1.bf16.msra.mxu0 (!%p232_p3), %v1183_v3  ;;  %813 = vmatprep.subr.bf16.mxu1 (!%p232_p3), %v1184_v4  ;;  %v1189_v7 = vld [vmem:[%s1568_s1 + $0x110] ss:$8 sps:$4 sm:$0xff] (!%p232_p3)   ;;  %v1192_v9 = vld [vmem:[%s1568_s1 + $0x124] ss:$8 sps:$4 sm:$0xff] (!%p232_p3)   ;;  %v1194_v10 = vld [vmem:[%s1568_s1 + $0x20] ss:$8 sps:$4 sm:$0xff] (!%p232_p3)  }
   0xa   : > { %856 = vmatprep.subr.bf16.mxu0 (!%p232_p3), %v1186_v5  ;;  %v1195_v11 = vld [vmem:[%s1568_s1 + $0x120] ss:$8 sps:$4 sm:$0xff] (!%p232_p3)   ;;  %v1196_v12 = vld [vmem:[%s1568_s1 + $0x34] ss:$8 sps:$4 sm:$0xff] (!%p232_p3)   ;;  %v1200_v14 = vld [vmem:[%s1568_s1 + $0x30] ss:$8 sps:$4 sm:$0xff] (!%p232_p3)  }
   0xb   : > { %v1198_v13 = vld [vmem:[%s1568_s1 + $0x134] ss:$8 sps:$4 sm:$0xff] (!%p232_p3)   ;;  %v1201_v15 = vld [vmem:[%s1568_s1 + $0x130] ss:$8 sps:$4 sm:$0xff] (!%p232_p3)   ;;  %v1202_v16 = vld [vmem:[%s1568_s1 + $0x44] ss:$8 sps:$4 sm:$0xff] (!%p232_p3)  }
   0xc   : > { %814 = vmatpush1.bf16.msra.mxu1 (!%p232_p3), %v1188_v6  ;;  %v1204_v17 = vld [vmem:[%s1568_s1 + $0x144] ss:$8 sps:$4 sm:$0xff] (!%p232_p3)   ;;  %v1206_v18 = vld [vmem:[%s1568_s1 + $0x40] ss:$8 sps:$4 sm:$0xff] (!%p232_p3)   ;;  %v1208_v20 = vld [vmem:[%s1568_s1 + $0x54] ss:$8 sps:$4 sm:$0xff] (!%p232_p3)  }
   0xd   : > { %857 = vmatpush1.bf16.msra.mxu0 (!%p232_p3), %v1189_v7  ;;  %815 = vmatprep.subr.bf16.mxu1 (!%p232_p3), %v1190_v8  ;;  %v1207_v19 = vld [vmem:[%s1568_s1 + $0x140] ss:$8 sps:$4 sm:$0xff] (!%p232_p3)   ;;  %v1210_v21 = vld [vmem:[%s1568_s1 + $0x154] ss:$8 sps:$4 sm:$0xff] (!%p232_p3)   ;;  %v1212_v22 = vld [vmem:[%s1568_s1 + $0x50] ss:$8 sps:$4 sm:$0xff] (!%p232_p3)  }
   0xe   : > { %858 = vmatprep.subr.bf16.mxu0 %v1192_v9  ;;  %v1213_v23 = vld [vmem:[%s1568_s1 + $0x150] ss:$8 sps:$4 sm:$0xff]   ;;  %v1214_v24 = vld [vmem:[%s1568_s1 + $0x64] ss:$8 sps:$4 sm:$0xff]   ;;  %v1218_v26 = vld [vmem:[%s1568_s1 + $0x60] ss:$8 sps:$4 sm:$0xff]  }
   0xf   : > { %v1216_v25 = vld [vmem:[%s1568_s1 + $0x164] ss:$8 sps:$4 sm:$0xff]   ;;  %v1219_v27 = vld [vmem:[%s1568_s1 + $0x160] ss:$8 sps:$4 sm:$0xff]   ;;  %v1220_v28 = vld [vmem:[%s1568_s1 + $0x74] ss:$8 sps:$4 sm:$0xff]  }
  0x10   : > { %816 = vmatpush1.bf16.msra.mxu1 %v1194_v10  ;;  %v1222_v29 = vld [vmem:[%s1568_s1 + $0x174] ss:$8 sps:$4 sm:$0xff]   ;;  %v1224_v30 = vld [vmem:[%s1568_s1 + $0x70] ss:$8 sps:$4 sm:$0xff]   ;;  %v1226_v32 = vld [vmem:[%s1568_s1 + $0x84] ss:$8 sps:$4 sm:$0xff]  }
  0x11   : > { %859 = vmatpush1.bf16.msra.mxu0 %v1195_v11  ;;  %817 = vmatprep.subr.bf16.mxu1 %v1196_v12  ;;  %v1225_v31 = vld [vmem:[%s1568_s1 + $0x170] ss:$8 sps:$4 sm:$0xff]   ;;  %p287_p4 = scmp.lt.s32.totalorder %s1072_s9, 3  ;;  %v1228_v33 = vld [vmem:[%s1568_s1 + $0x184] ss:$8 sps:$4 sm:$0xff]   ;;  %v1463_v40 = vshrl.u32 %v353_v36, 7 }
  0x12   : > { %860 = vmatprep.subr.bf16.mxu0 %v1198_v13  ;;  %v1230_v34 = vld [vmem:[%s1568_s1 + $0x80] ss:$8 sps:$4 sm:$0xff]   ;;  %v1232_v37 = vld [vmem:[%s1568_s1 + $0x94] ss:$8 sps:$4 sm:$0xff]   ;;  %v1236_v39 = vld [vmem:[%s1568_s1 + $0x90] ss:$8 sps:$4 sm:$0xff]  }
  0x13   : > { %v1231_v35 = vld [vmem:[%s1568_s1 + $0x180] ss:$8 sps:$4 sm:$0xff]   ;;  %s1577_s9 = smov (!%p287_p4, %s1072_s9), 3  ;;  %v1234_v38 = vld [vmem:[%s1568_s1 + $0x194] ss:$8 sps:$4 sm:$0xff]   ;;  %v359_v47 = vsub.s32 1, %v1463_v40 }
  0x14   : > { %818 = vmatpush1.bf16.msra.mxu1 %v1200_v14  ;;  %v1237_v41 = vld [vmem:[%s1568_s1 + $0x190] ss:$8 sps:$4 sm:$0xff]   ;;  %v1238_v42 = vld [vmem:[%s1568_s1 + $0xa4] ss:$8 sps:$4 sm:$0xff]   ;;  %s1146_s10 = sshll.u32 %s1577_s9, 4  ;;  %v367_v51 = vsub.s32 3, %v1463_v40 }
  0x15   : > { %861 = vmatpush1.bf16.msra.mxu0 %v1201_v15  ;;  %819 = vmatprep.subr.bf16.mxu1 %v1202_v16  ;;  %v1240_v43 = vld [vmem:[%s1568_s1 + $0x1a4] ss:$8 sps:$4 sm:$0xff]   ;;  %v1242_v44 = vld [vmem:[%s1568_s1 + $0xa0] ss:$8 sps:$4 sm:$0xff]   ;;  %s294_s22 = scalar_lea.vmem %s1567_s0, %s1146_s10  ;;  %v1244_v46 = vld [vmem:[%s1568_s1 + $0xb4] ss:$8 sps:$4 sm:$0xff]  }
  0x16   : > { %862 = vmatprep.subr.bf16.mxu0 %v1204_v17  ;;  %v1243_v45 = vld [vmem:[%s1568_s1 + $0x1a0] ss:$8 sps:$4 sm:$0xff]   ;;  %v1246_v48 = vld [vmem:[%s1568_s1 + $0x1b4] ss:$8 sps:$4 sm:$0xff]   ;;  %v1248_v49 = vld [vmem:[%s1568_s1 + $0xb0] ss:$8 sps:$4 sm:$0xff]  }
  0x17   : > { %v339_v50 = vld [vmem:[%s294_s22] sm:$0xff]  ;;  %v355_v52 = vsub.s32 0, %v1463_v40  ;;  %v341_v53 = vld [vmem:[%s294_s22 + $0x10] sm:$0xff]  ;;  %v363_v57 = vsub.s32 2, %v1463_v40  ;;  %v340_v62 = vld [vmem:[%s294_s22 + $0x8] sm:$0xff]  ;;  %s1147_s23 = sshll.u32 %s1577_s9, 3 }
  0x18   : > { %820 = vmatpush1.bf16.msra.mxu1 %v1206_v18  ;;  %v344_v54 = vunpack.c.h.bf16 %v339_v50  ;;  %v351_v55 = vld [vmem:[%s1569_s2] sm:$0xf]  ;;  %v1249_v58 = vld [vmem:[%s1568_s1 + $0x1b0] ss:$8 sps:$4 sm:$0xff]   ;;  %v348_v59 = vunpack.c.h.bf16 %v341_v53  ;;  %v1250_v0 = vld [vmem:[%s1568_s1 + $0xc4] ss:$8 sps:$4 sm:$0xff]   ;;  %v343_v2 = vunpack.c.l.bf16 %v339_v50  ;;  %v347_v3 = vunpack.c.l.bf16 %v341_v53  ;;  %s328_s26 = scalar_lea.vmem %s1571_s4, %s1147_s23 }
  0x19   : > { %863 = vmatpush1.bf16.msra.mxu0 %v1207_v19  ;;  %821 = vmatprep.subr.bf16.mxu1 %v1208_v20  ;;  %v381_v56 = vld [vmem:[%s1570_s3] sm:$0xf]  ;;  %v360_v60 = vrot.slane %v351_v55, %v359_v47  ;;  %v342_v63 = vld [vmem:[%s294_s22 + $0x18] sm:$0xff]  ;;  %v1252_v1 = vld [vmem:[%s1568_s1 + $0x1c4] ss:$8 sps:$4 sm:$0xff]   ;;  %v346_v4 = vunpack.c.h.bf16 %v340_v62  ;;  %v368_v8 = vrot.slane %v351_v55, %v367_v51  ;;  %v345_v10 = vunpack.c.l.bf16 %v340_v62 }
  0x1a   : > { %864 = vmatprep.subr.bf16.mxu0 %v1210_v21  ;;  %v390_v61 = vrot.slane %v381_v56, %v359_v47  ;;  %v350_v5 = vunpack.c.h.bf16 %v342_v63  ;;  %v398_v9 = vrot.slane %v381_v56, %v367_v51  ;;  %v349_v11 = vunpack.c.l.bf16 %v342_v63  ;;  %v1254_v14 = vld [vmem:[%s1568_s1 + $0xc0] ss:$8 sps:$4 sm:$0xff]   ;;  %v1256_v19 = vld [vmem:[%s1568_s1 + $0xd4] ss:$8 sps:$4 sm:$0xff]   ;;  %v1262_v36 = vld [vmem:[%s1568_s1 + $0xe4] ss:$8 sps:$4 sm:$0xff]  }
  0x1b   : > { %v374_v6 = vmul.f32 %v360_v60, %v344_v54  ;;  %v378_v7 = vmul.f32 %v360_v60, %v348_v59  ;;  %v356_v12 = vrot.slane %v351_v55, %v355_v52  ;;  %v364_v13 = vrot.slane %v351_v55, %v363_v57  ;;  %v1255_v15 = vld [vmem:[%s1568_s1 + $0x1c0] ss:$8 sps:$4 sm:$0xff]   ;;  %v1258_v20 = vld [vmem:[%s1568_s1 + $0x1d4] ss:$8 sps:$4 sm:$0xff]   ;;  %v1273_v53 = vld [vmem:[%s1568_s1 + $0x1f0] ss:$8 sps:$4 sm:$0xff]  }
  0x1c   : > { %822 = vmatpush1.bf16.msra.mxu1 %v1212_v22  ;;  %v376_v18 = vmul.f32 %v368_v8, %v346_v4  ;;  %v380_v21 = vmul.f32 %v368_v8, %v350_v5  ;;  %v386_v22 = vrot.slane %v381_v56, %v355_v52  ;;  %v1270_v47 = vld [vmem:[%s1568_s1 + $0x1f4] ss:$8 sps:$4 sm:$0xff]   ;;  %v1272_v52 = vld [vmem:[%s1568_s1 + $0xf0] ss:$8 sps:$4 sm:$0xff]  }
  0x1d   : > { %865 = vmatpush1.bf16.msra.mxu0 %v1213_v23  ;;  %823 = vmatprep.subr.bf16.mxu1 %v1214_v24  ;;  %v404_v16 = vadd.f32 %v390_v61, %v374_v6  ;;  %v408_v17 = vadd.f32 %v390_v61, %v378_v7  ;;  %v394_v23 = vrot.slane %v381_v56, %v363_v57 }
  0x1e   : > { %866 = vmatprep.subr.bf16.mxu0 %v1216_v25 }
  0x1f   : > { %v412_v24 = vmax.f32 %v404_v16, 0.0  ;;  %v416_v25 = vmax.f32 %v408_v17, 0.0 }
  0x20   : > { %824 = vmatpush1.bf16.msra.mxu1 %v1218_v26  ;;  %v406_v26 = vadd.f32 %v398_v9, %v376_v18 }
  0x21   : > { %867 = vmatpush1.bf16.msra.mxu0 %v1219_v27  ;;  %825 = vmatprep.subr.bf16.mxu1 %v1220_v28  ;;  %v373_v27 = vmul.f32 %v356_v12, %v343_v2  ;;  %v410_v28 = vadd.f32 %v398_v9, %v380_v21 }
  0x22   : > { %868 = vmatprep.subr.bf16.mxu0 %v1222_v29  ;;  %v377_v29 = vmul.f32 %v356_v12, %v347_v3 }
  0x24   : > { %826 = vmatpush1.bf16.msra.mxu1 %v1224_v30  ;;  %v375_v30 = vmul.f32 %v364_v13, %v345_v10 }
  0x25   : > { %869 = vmatpush1.bf16.msra.mxu0 %v1225_v31  ;;  %827 = vmatprep.subr.bf16.mxu1 %v1226_v32  ;;  %v379_v31 = vmul.f32 %v364_v13, %v349_v11  ;;  %v1260_v32 = vld [vmem:[%s1568_s1 + $0xd0] ss:$8 sps:$4 sm:$0xff]  }
  0x26   : > { %870 = vmatprep.subr.bf16.mxu0 %v1228_v33  ;;  %v1261_v33 = vld [vmem:[%s1568_s1 + $0x1d0] ss:$8 sps:$4 sm:$0xff]  }
  0x28   : > { %828 = vmatpush1.bf16.msra.mxu1 %v1230_v34  ;;  %v420_v34 = vpack.c.bf16 %v416_v25, %v412_v24 }
  0x29   : > { %871 = vmatpush1.bf16.msra.mxu0 %v1231_v35  ;;  %829 = vmatprep.subr.bf16.mxu1 %v1232_v37  ;;  %v414_v35 = vmax.f32 %v406_v26, 0.0  ;;  %v1264_v37 = vld [vmem:[%s1568_s1 + $0x1e4] ss:$8 sps:$4 sm:$0xff]  }
  0x2a   : > { %872 = vmatprep.subr.bf16.mxu0 %v1234_v38  ;;  %v418_v38 = vmax.f32 %v410_v28, 0.0  ;;  %843 = vmatprep.mubr.bf16.mxu1 %v420_v34 }
  0x2c   : > { %830 = vmatpush1.bf16.msra.mxu1 %v1236_v39  ;;  %v403_v39 = vadd.f32 %v386_v22, %v373_v27  ;;  %v422_v40 = vpack.c.bf16 %v418_v38, %v414_v35 }
  0x2d   : > { %873 = vmatpush1.bf16.msra.mxu0 %v1237_v41  ;;  %831 = vmatprep.subr.bf16.mxu1 %v1238_v42  ;;  %v407_v41 = vadd.f32 %v386_v22, %v377_v29  ;;  %v405_v42 = vadd.f32 %v394_v23, %v375_v30 }
  0x2e   : > { %874 = vmatprep.subr.bf16.mxu0 %v1240_v43  ;;  %v409_v43 = vadd.f32 %v394_v23, %v379_v31  ;;  %886 = vmatprep.mubr.bf16.mxu0 %v422_v40 }
  0x2f   : > { %v413_v50 = vmax.f32 %v405_v42, 0.0 }
  0x30   : > { %832 = vmatpush1.bf16.msra.mxu1 %v1242_v44  ;;  %v1266_v44 = vld [vmem:[%s1568_s1 + $0xe0] ss:$8 sps:$4 sm:$0xff]   ;;  %v417_v51 = vmax.f32 %v409_v43, 0.0 }
  0x31   : > { %875 = vmatpush1.bf16.msra.mxu0 %v1243_v45  ;;  %833 = vmatprep.subr.bf16.mxu1 %v1244_v46  ;;  %v1267_v45 = vld [vmem:[%s1568_s1 + $0x1e0] ss:$8 sps:$4 sm:$0xff]   ;;  %v1268_v46 = vld [vmem:[%s1568_s1 + $0xf4] ss:$8 sps:$4 sm:$0xff]  }
  0x32   : > { %876 = vmatprep.subr.bf16.mxu0 %v1246_v48  ;;  %v411_v48 = vmax.f32 %v403_v39, 0.0  ;;  %v421_v55 = vpack.c.bf16 %v417_v51, %v413_v50 }
  0x34   : > { %834 = vmatpush1.bf16.msra.mxu1 %v1248_v49  ;;  %v415_v49 = vmax.f32 %v407_v41, 0.0 }
  0x35   : > { %877 = vmatpush1.bf16.msra.mxu0 %v1249_v58  ;;  %835 = vmatprep.subr.bf16.mxu1 %v1250_v0 }
  0x36   : > { %878 = vmatprep.subr.bf16.mxu0 %v1252_v1  ;;  %v419_v54 = vpack.c.bf16 %v415_v49, %v411_v48 }
  0x38   : > { %836 = vmatpush1.bf16.msra.mxu1 %v1254_v14 }
  0x39   : > { %879 = vmatpush1.bf16.msra.mxu0 %v1255_v15  ;;  %837 = vmatprep.subr.bf16.mxu1 %v1256_v19 }
  0x3a   : > { %880 = vmatprep.subr.bf16.mxu0 %v1258_v20 }
  0x3c   : > { %838 = vmatpush1.bf16.msra.mxu1 %v1260_v32 }
  0x3d   : > { %881 = vmatpush1.bf16.msra.mxu0 %v1261_v33  ;;  %839 = vmatprep.subr.bf16.mxu1 %v1262_v36 }
  0x3e   : > { %882 = vmatprep.subr.bf16.mxu0 %v1264_v37 }
  0x40   : > { %840 = vmatpush1.bf16.msra.mxu1 %v1266_v44 }
  0x41   : > { %883 = vmatpush1.bf16.msra.mxu0 %v1267_v45  ;;  %841 = vmatprep.subr.bf16.mxu1 %v1268_v46 }
  0x42   : > { %884 = vmatprep.subr.bf16.mxu0 %v1270_v47 }
  0x44   : > { %842 = vmatpush1.bf16.msra.mxu1 %v1272_v52 }
  0x45   : > { %885 = vmatpush1.bf16.msra.mxu0 %v1273_v53 }
  0x47   : > { %844 = vmatmul.mubr.bf16.vlgmr.msra.gmra.mrb[0].mxu1 %v419_v54 }
  0x48   : > { %887 = vmatmul.mubr.bf16.vlgmr.msra.gmra.mrb[0].mxu0 %v421_v55 }
 0x11a   : > { %v845_v56 = vpop.f32.mrb[0].mxu1 }
 0x11b   : > { %v888_v57 = vpop.f32.mrb[0].mxu0  ;;  %v847_v59 = vpop.f32.mrb[1].mxu1 }
 0x11c   : > { %v889_v58 = vadd.f32 %v888_v57, %v845_v56  ;;  %v890_v60 = vpop.f32.mrb[1].mxu0  ;;  %v849_v62 = vpop.f32.mrb[2].mxu1 }
 0x11d   : > { %v891_v61 = vadd.f32 %v890_v60, %v847_v59  ;;  %v892_v63 = vpop.f32.mrb[2].mxu0  ;;  %v851_v1 = vpop.f32.mrb[3].mxu1 }
 0x11e   : > { %v893_v0 = vadd.f32 %v892_v63, %v849_v62  ;;  %v894_v2 = vpop.f32.mrb[3].mxu0 }
 0x11f   : > { %v1148_v3 = vpack.c.bf16 %v891_v61, %v889_v58  ;;  %v895_v4 = vadd.f32 %v894_v2, %v851_v1 }
 0x121   : > { %924 = vst [vmem:[%s328_s26] sm:$0xff] %v1148_v3  ;;  %v1149_v5 = vpack.c.bf16 %v895_v4, %v893_v0 }
 0x123   : > { %925 = vst [vmem:[%s328_s26 + $0x8] sm:$0xff] %v1149_v5 }
 0x124 PF: > { %s14_s17 = sadd.s32 1, %s1296_s17   ;;  %s1572_s15 = smov %s1292_s16 }
 0x125   : > { %p11_p5 = scmp.ge.s32.totalorder %s14_s17, 4   ;;  %s1573_s16 = smov %s1575_s18 }
 0x127   :  { %13 = sbr.rel (!%p11_p5) target bundleno = 2 (0x2), region = 83 }

// kernel: xray_analyzer_forward.161
= control target key start
LH: loop header
LB: loop body
LE: loop exit
PB: predicated region body
PF: predicated region fallthrough
CT: control target
= control target key end

     0   :  { %v56_v23 = vlaneseq  ;;  %s1438_s1 = inlined_call_operand.vmem [shape: bf16[1024,128], index: 1, kind: input, shape index: {}]   ;;  %s1439_s0 = inlined_call_operand.vmem [shape: bf16[16,1024], index: 0, kind: input, shape index: {}]   ;;  %s1440_s2 = inlined_call_operand.vmem [shape: f32[1,1024], index: 2, kind: input, shape index: {}]   ;;  %s1441_s3 = inlined_call_operand.vmem [shape: f32[1,1024], index: 3, kind: input, shape index: {}]   ;;  %s1442_s4 = inlined_call_operand.vmem [shape: f32[1,128], index: 4, kind: input, shape index: {}]   ;;  %s1443_s5 = inlined_call_operand.vmem [shape: f32[1,128], index: 5, kind: input, shape index: {}]   ;;  %s1444_s6 = inlined_call_operand.vmem [shape: bf16[16,128], index: 6, kind: output, shape index: {}]  }
   0x1   :  { %v1078_v0 = vld [vmem:[%s1438_s1 + $0x40] sm:$0xff]   ;;  %v1082_v4 = vld [vmem:[%s1438_s1 + $0x48] sm:$0xff]   ;;  %v1086_v8 = vld [vmem:[%s1438_s1 + $0x50] sm:$0xff]  }
   0x2   :  { %v1079_v1 = vld [vmem:[%s1438_s1 + $0xc0] sm:$0xff]   ;;  %990 = vmatprep.subr.bf16.mxu0 %v1078_v0  ;;  %v1083_v5 = vld [vmem:[%s1438_s1 + $0xc8] sm:$0xff]   ;;  %v1087_v9 = vld [vmem:[%s1438_s1 + $0xd0] sm:$0xff]   ;;  %v1258_v28 = vshrl.u32 %v56_v23, 7 }
   0x3   :  { %v1080_v2 = vld [vmem:[%s1438_s1] sm:$0xff]   ;;  %1012 = vmatprep.subr.bf16.mxu1 %v1079_v1  ;;  %v1084_v6 = vld [vmem:[%s1438_s1 + $0x8] sm:$0xff]   ;;  %v1088_v10 = vld [vmem:[%s1438_s1 + $0x10] sm:$0xff]  }
   0x4   :  { %v1081_v3 = vld [vmem:[%s1438_s1 + $0x80] sm:$0xff]   ;;  %991 = vmatpush3.bf16.msra.mxu0 %v1080_v2  ;;  %v1085_v7 = vld [vmem:[%s1438_s1 + $0x88] sm:$0xff]   ;;  %v1089_v11 = vld [vmem:[%s1438_s1 + $0x90] sm:$0xff]   ;;  %v62_v33 = vsub.s32 1, %v1258_v28  ;;  %v70_v35 = vsub.s32 3, %v1258_v28  ;;  %v58_v39 = vsub.s32 0, %v1258_v28 }
   0x5   :  { %1013 = vmatpush3.bf16.msra.mxu1 %v1081_v3  ;;  %992 = vmatprep.subr.bf16.mxu0 %v1082_v4  ;;  %v1090_v12 = vld [vmem:[%s1438_s1 + $0x58] sm:$0xff]   ;;  %v1094_v16 = vld [vmem:[%s1438_s1 + $0x60] sm:$0xff]   ;;  %v1098_v20 = vld [vmem:[%s1438_s1 + $0x68] sm:$0xff]   ;;  %v66_v40 = vsub.s32 2, %v1258_v28 }
   0x6   :  { %1014 = vmatprep.subr.bf16.mxu1 %v1083_v5  ;;  %v1091_v13 = vld [vmem:[%s1438_s1 + $0xd8] sm:$0xff]   ;;  %v1095_v17 = vld [vmem:[%s1438_s1 + $0xe0] sm:$0xff]   ;;  %v1099_v21 = vld [vmem:[%s1438_s1 + $0xe8] sm:$0xff]  }
   0x7   :  { %v1092_v14 = vld [vmem:[%s1438_s1 + $0x18] sm:$0xff]   ;;  %v1096_v18 = vld [vmem:[%s1438_s1 + $0x20] sm:$0xff]   ;;  %v1100_v22 = vld [vmem:[%s1438_s1 + $0x28] sm:$0xff]  }
   0x8   :  { %993 = vmatpush3.bf16.msra.mxu0 %v1084_v6  ;;  %v1093_v15 = vld [vmem:[%s1438_s1 + $0x98] sm:$0xff]   ;;  %v1097_v19 = vld [vmem:[%s1438_s1 + $0xa0] sm:$0xff]   ;;  %v1101_v24 = vld [vmem:[%s1438_s1 + $0xa8] sm:$0xff]  }
   0x9   :  { %1015 = vmatpush3.bf16.msra.mxu1 %v1085_v7  ;;  %994 = vmatprep.subr.bf16.mxu0 %v1086_v8  ;;  %v1102_v25 = vld [vmem:[%s1438_s1 + $0x70] sm:$0xff]   ;;  %v1106_v30 = vld [vmem:[%s1438_s1 + $0x78] sm:$0xff]   ;;  %v30_v36 = vld [vmem:[%s1439_s0] sm:$0xff] }
   0xa   :  { %1016 = vmatprep.subr.bf16.mxu1 %v1087_v9  ;;  %v1103_v26 = vld [vmem:[%s1438_s1 + $0xf0] sm:$0xff]   ;;  %v1107_v31 = vld [vmem:[%s1438_s1 + $0xf8] sm:$0xff]   ;;  %v34_v37 = vld [vmem:[%s1439_s0 + $0x20] sm:$0xff]  ;;  %v38_v41 = vunpack.c.l.bf16 %v30_v36  ;;  %v39_v42 = vunpack.c.h.bf16 %v30_v36 }
   0xb   :  { %v1104_v27 = vld [vmem:[%s1438_s1 + $0x30] sm:$0xff]   ;;  %v1108_v32 = vld [vmem:[%s1438_s1 + $0x38] sm:$0xff]   ;;  %v1286_v38 = vld [vmem:[%s1440_s2] sm:$0xff]  ;;  %v46_v43 = vunpack.c.l.bf16 %v34_v37  ;;  %v47_v44 = vunpack.c.h.bf16 %v34_v37 }
   0xc   :  { %995 = vmatpush3.bf16.msra.mxu0 %v1088_v10  ;;  %v1105_v29 = vld [vmem:[%s1438_s1 + $0xb0] sm:$0xff]   ;;  %v1109_v34 = vld [vmem:[%s1438_s1 + $0xb8] sm:$0xff]   ;;  %v1293_v45 = vld [vmem:[%s1441_s3] sm:$0xff]  ;;  %v63_v48 = vrot.slane %v1286_v38, %v62_v33  ;;  %v71_v55 = vrot.slane %v1286_v38, %v70_v35  ;;  %v59_v60 = vrot.slane %v1286_v38, %v58_v39  ;;  %v67_v0 = vrot.slane %v1286_v38, %v66_v40 }
   0xd   :  { %1017 = vmatpush3.bf16.msra.mxu1 %v1089_v11  ;;  %996 = vmatprep.subr.bf16.mxu0 %v1090_v12  ;;  %v31_v46 = vld [vmem:[%s1439_s0 + $0x8] sm:$0xff]  ;;  %v121_v49 = vrot.slane %v1293_v45, %v62_v33  ;;  %v1110_v52 = vld [vmem:[%s1438_s1 + $0x140] sm:$0xff]   ;;  %v129_v56 = vrot.slane %v1293_v45, %v70_v35  ;;  %v117_v61 = vrot.slane %v1293_v45, %v58_v39  ;;  %v1118_v33 = vld [vmem:[%s1438_s1 + $0x150] sm:$0xff]  }
   0xe   :  { %1018 = vmatprep.subr.bf16.mxu1 %v1091_v13  ;;  %v35_v47 = vld [vmem:[%s1439_s0 + $0x28] sm:$0xff]  ;;  %v40_v50 = vunpack.c.l.bf16 %v31_v46  ;;  %v41_v51 = vunpack.c.h.bf16 %v31_v46  ;;  %v1111_v57 = vld [vmem:[%s1438_s1 + $0x1c0] sm:$0xff]   ;;  %v97_v58 = vmul.f32 %v63_v48, %v39_v42  ;;  %v105_v59 = vmul.f32 %v63_v48, %v47_v44  ;;  %v1120_v35 = vld [vmem:[%s1438_s1 + $0x110] sm:$0xff]  }
   0xf   :  { %v48_v53 = vunpack.c.l.bf16 %v35_v47  ;;  %v49_v54 = vunpack.c.h.bf16 %v35_v47  ;;  %v125_v1 = vrot.slane %v1293_v45, %v66_v40  ;;  %v96_v4 = vmul.f32 %v59_v60, %v38_v41  ;;  %v1121_v36 = vld [vmem:[%s1438_s1 + $0x190] sm:$0xff]   ;;  %v1122_v37 = vld [vmem:[%s1438_s1 + $0x158] sm:$0xff]   ;;  %v1126_v42 = vld [vmem:[%s1438_s1 + $0x160] sm:$0xff]  }
  0x10   :  { %997 = vmatpush3.bf16.msra.mxu0 %v1092_v14  ;;  %v99_v62 = vmul.f32 %v71_v55, %v41_v51  ;;  %v155_v2 = vadd.f32 %v121_v49, %v97_v58  ;;  %v163_v3 = vadd.f32 %v121_v49, %v105_v59  ;;  %v104_v5 = vmul.f32 %v59_v60, %v46_v43  ;;  %v1123_v39 = vld [vmem:[%s1438_s1 + $0x1d8] sm:$0xff]   ;;  %v1127_v43 = vld [vmem:[%s1438_s1 + $0x1e0] sm:$0xff]   ;;  %v1130_v48 = vld [vmem:[%s1438_s1 + $0x168] sm:$0xff]  }
  0x11   :  { %1019 = vmatpush3.bf16.msra.mxu1 %v1093_v15  ;;  %998 = vmatprep.subr.bf16.mxu0 %v1094_v16  ;;  %v107_v63 = vmul.f32 %v71_v55, %v49_v54  ;;  %v98_v8 = vmul.f32 %v67_v0, %v40_v50  ;;  %v106_v9 = vmul.f32 %v67_v0, %v48_v53  ;;  %v1124_v40 = vld [vmem:[%s1438_s1 + $0x118] sm:$0xff]   ;;  %v1128_v44 = vld [vmem:[%s1438_s1 + $0x120] sm:$0xff]   ;;  %v78_v47 = vsub.s32 5, %v1258_v28  ;;  %v1131_v50 = vld [vmem:[%s1438_s1 + $0x1e8] sm:$0xff]  }
  0x12   :  { %1020 = vmatprep.subr.bf16.mxu1 %v1095_v17  ;;  %v157_v6 = vadd.f32 %v129_v56, %v99_v62  ;;  %v171_v10 = vmax.f32 %v155_v2, 0.0  ;;  %v179_v11 = vmax.f32 %v163_v3, 0.0  ;;  %v154_v12 = vadd.f32 %v117_v61, %v96_v4  ;;  %v1125_v41 = vld [vmem:[%s1438_s1 + $0x198] sm:$0xff]   ;;  %v1129_v46 = vld [vmem:[%s1438_s1 + $0x1a0] sm:$0xff]   ;;  %v1133_v54 = vld [vmem:[%s1438_s1 + $0x1a8] sm:$0xff]  }
  0x13   :  { %v165_v7 = vadd.f32 %v129_v56, %v107_v63  ;;  %v162_v13 = vadd.f32 %v117_v61, %v104_v5  ;;  %v156_v16 = vadd.f32 %v125_v1, %v98_v8  ;;  %v164_v17 = vadd.f32 %v125_v1, %v106_v9  ;;  %v1134_v55 = vld [vmem:[%s1438_s1 + $0x170] sm:$0xff]   ;;  %v33_v3 = vld [vmem:[%s1439_s0 + $0x18] sm:$0xff] }
  0x14   :  { %999 = vmatpush3.bf16.msra.mxu0 %v1096_v18  ;;  %v173_v14 = vmax.f32 %v157_v6, 0.0  ;;  %v1112_v18 = vld [vmem:[%s1438_s1 + $0x100] sm:$0xff]   ;;  %v86_v49 = vsub.s32 7, %v1258_v28  ;;  %v74_v51 = vsub.s32 4, %v1258_v28  ;;  %v82_v53 = vsub.s32 6, %v1258_v28  ;;  %v1135_v56 = vld [vmem:[%s1438_s1 + $0x1f0] sm:$0xff]  }
  0x15   :  { %1021 = vmatpush3.bf16.msra.mxu1 %v1097_v19  ;;  %1000 = vmatprep.subr.bf16.mxu0 %v1098_v20  ;;  %v181_v15 = vmax.f32 %v165_v7, 0.0  ;;  %v187_v19 = vpack.c.bf16 %v179_v11, %v171_v10  ;;  %v170_v20 = vmax.f32 %v154_v12, 0.0  ;;  %v172_v23 = vmax.f32 %v156_v16, 0.0  ;;  %v1136_v58 = vld [vmem:[%s1438_s1 + $0x130] sm:$0xff]   ;;  %v37_v4 = vld [vmem:[%s1439_s0 + $0x38] sm:$0xff] }
  0x16   :  { %1022 = vmatprep.subr.bf16.mxu1 %v1099_v21  ;;  %v178_v21 = vmax.f32 %v162_v13, 0.0  ;;  %v75_v28 = vrot.slane %v1286_v38, %v74_v51  ;;  %v32_v59 = vld [vmem:[%s1439_s0 + $0x10] sm:$0xff]  ;;  %v137_v60 = vrot.slane %v1293_v45, %v78_v47  ;;  %v87_v61 = vrot.slane %v1286_v38, %v86_v49  ;;  %v1138_v7 = vld [vmem:[%s1438_s1 + $0x178] sm:$0xff]  }
  0x17   :  { %740 = vmatprep.mubr.bf16.mxu0 %v187_v19  ;;  %v145_v62 = vrot.slane %v1293_v45, %v86_v49  ;;  %v83_v63 = vrot.slane %v1286_v38, %v82_v53  ;;  %v36_v0 = vld [vmem:[%s1439_s0 + $0x30] sm:$0xff]  ;;  %v42_v1 = vunpack.c.l.bf16 %v32_v59  ;;  %v43_v2 = vunpack.c.h.bf16 %v32_v59  ;;  %v1139_v12 = vld [vmem:[%s1438_s1 + $0x1f8] sm:$0xff]  }
  0x18   :  { %1001 = vmatpush3.bf16.msra.mxu0 %v1100_v22  ;;  %v189_v22 = vpack.c.bf16 %v181_v15, %v173_v14  ;;  %v133_v5 = vrot.slane %v1293_v45, %v74_v51  ;;  %v141_v6 = vrot.slane %v1293_v45, %v82_v53  ;;  %v50_v8 = vunpack.c.l.bf16 %v36_v0 }
  0x19   :  { %1023 = vmatpush3.bf16.msra.mxu1 %v1101_v24  ;;  %1002 = vmatprep.subr.bf16.mxu0 %v1102_v25  ;;  %v180_v24 = vmax.f32 %v164_v17, 0.0  ;;  %v1113_v25 = vld [vmem:[%s1438_s1 + $0x180] sm:$0xff]   ;;  %v51_v9 = vunpack.c.h.bf16 %v36_v0  ;;  %v44_v10 = vunpack.c.l.bf16 %v33_v3  ;;  %v45_v11 = vunpack.c.h.bf16 %v33_v3 }
  0x1a   :  { %1024 = vmatprep.subr.bf16.mxu1 %v1103_v26  ;;  %v1114_v26 = vld [vmem:[%s1438_s1 + $0x148] sm:$0xff]   ;;  %781 = vmatprep.mubr.bf16.mxu1 %v189_v22  ;;  %v52_v13 = vunpack.c.l.bf16 %v37_v4  ;;  %v53_v14 = vunpack.c.h.bf16 %v37_v4  ;;  %v100_v15 = vmul.f32 %v75_v28, %v42_v1 }
  0x1b   :  { %v103_v17 = vmul.f32 %v87_v61, %v45_v11  ;;  %v102_v19 = vmul.f32 %v83_v63, %v44_v10  ;;  %v980_v11 = vld [vmem:[%s1443_s5] ss:$0 sm:$0xff] }
  0x1c   :  { %1003 = vmatpush3.bf16.msra.mxu0 %v1104_v27  ;;  %v186_v27 = vpack.c.bf16 %v178_v21, %v170_v20  ;;  %v1140_v20 = vld [vmem:[%s1438_s1 + $0x138] sm:$0xff]   ;;  %v111_v22 = vmul.f32 %v87_v61, %v53_v14 }
  0x1d   :  { %1025 = vmatpush3.bf16.msra.mxu1 %v1105_v29  ;;  %1004 = vmatprep.subr.bf16.mxu0 %v1106_v30  ;;  %v188_v29 = vpack.c.bf16 %v180_v24, %v172_v23  ;;  %v1115_v30 = vld [vmem:[%s1438_s1 + $0x1c8] sm:$0xff]   ;;  %v158_v23 = vadd.f32 %v133_v5, %v100_v15  ;;  %v110_v24 = vmul.f32 %v83_v63, %v52_v13 }
  0x1e   :  { %1026 = vmatprep.subr.bf16.mxu1 %v1107_v31  ;;  %v1116_v31 = vld [vmem:[%s1438_s1 + $0x108] sm:$0xff]  }
  0x20   :  { %1005 = vmatpush3.bf16.msra.mxu0 %v1108_v32  ;;  %v1117_v32 = vld [vmem:[%s1438_s1 + $0x188] sm:$0xff]  }
  0x21   :  { %1027 = vmatpush3.bf16.msra.mxu1 %v1109_v34  ;;  %1034 = vmatprep.subr.bf16.mxu0 %v1110_v52  ;;  %v1119_v34 = vld [vmem:[%s1438_s1 + $0x1d0] sm:$0xff]   ;;  %v1132_v52 = vld [vmem:[%s1438_s1 + $0x128] sm:$0xff]  }
  0x22   :  { %1056 = vmatprep.subr.bf16.mxu1 %v1111_v57  ;;  %v79_v57 = vrot.slane %v1286_v38, %v78_v47  ;;  %v1137_v38 = vld [vmem:[%s1438_s1 + $0x1b0] sm:$0xff]  }
  0x23   :  { %741 = vmatmul.mubr.bf16.vlgmr.msra.gmra.mrb[0].mxu0 %v186_v27  ;;  %v161_v27 = vadd.f32 %v145_v62, %v103_v17 }
  0x24   :  { %782 = vmatmul.mubr.bf16.vlgmr.msra.gmra.mrb[0].mxu1 %v188_v29  ;;  %1035 = vmatpush3.bf16.msra.mxu0 %v1112_v18  ;;  %v101_v45 = vmul.f32 %v79_v57, %v43_v2  ;;  %v109_v16 = vmul.f32 %v79_v57, %v51_v9  ;;  %v108_v18 = vmul.f32 %v75_v28, %v50_v8 }
  0x25   :  { %1057 = vmatpush3.bf16.msra.mxu1 %v1113_v25  ;;  %1036 = vmatprep.subr.bf16.mxu0 %v1114_v26  ;;  %v1141_v25 = vld [vmem:[%s1438_s1 + $0x1b8] sm:$0xff]  }
  0x26   :  { %1058 = vmatprep.subr.bf16.mxu1 %v1115_v30  ;;  %v159_v21 = vadd.f32 %v137_v60, %v101_v45  ;;  %v167_v26 = vadd.f32 %v137_v60, %v109_v16  ;;  %v166_v29 = vadd.f32 %v133_v5, %v108_v18 }
  0x28   :  { %1037 = vmatpush3.bf16.msra.mxu0 %v1116_v31  ;;  %v175_v30 = vmax.f32 %v159_v21, 0.0  ;;  %v169_v31 = vadd.f32 %v145_v62, %v111_v22 }
  0x29   :  { %1059 = vmatpush3.bf16.msra.mxu1 %v1117_v32  ;;  %1038 = vmatprep.subr.bf16.mxu0 %v1118_v33  ;;  %v174_v32 = vmax.f32 %v158_v23, 0.0  ;;  %v160_v33 = vadd.f32 %v141_v6, %v102_v19 }
  0x2a   :  { %1060 = vmatprep.subr.bf16.mxu1 %v1119_v34  ;;  %v183_v34 = vmax.f32 %v167_v26, 0.0 }
  0x2c   :  { %1039 = vmatpush3.bf16.msra.mxu0 %v1120_v35  ;;  %v177_v35 = vmax.f32 %v161_v27, 0.0 }
  0x2d   :  { %1061 = vmatpush3.bf16.msra.mxu1 %v1121_v36  ;;  %1040 = vmatprep.subr.bf16.mxu0 %v1122_v37  ;;  %v182_v36 = vmax.f32 %v166_v29, 0.0  ;;  %v168_v37 = vadd.f32 %v141_v6, %v110_v24 }
  0x2e   :  { %1062 = vmatprep.subr.bf16.mxu1 %v1123_v39  ;;  %v185_v39 = vmax.f32 %v169_v31, 0.0 }
  0x30   :  { %1041 = vmatpush3.bf16.msra.mxu0 %v1124_v40  ;;  %v176_v40 = vmax.f32 %v160_v33, 0.0 }
  0x31   :  { %1063 = vmatpush3.bf16.msra.mxu1 %v1125_v41  ;;  %1042 = vmatprep.subr.bf16.mxu0 %v1126_v42  ;;  %v191_v41 = vpack.c.bf16 %v183_v34, %v175_v30  ;;  %v190_v42 = vpack.c.bf16 %v182_v36, %v174_v32 }
  0x32   :  { %1064 = vmatprep.subr.bf16.mxu1 %v1127_v43  ;;  %v184_v43 = vmax.f32 %v168_v37, 0.0 }
  0x33   :  { %822 = vmatprep.mubr.bf16.mxu0 %v191_v41 }
  0x34   :  { %1043 = vmatpush3.bf16.msra.mxu0 %v1128_v44  ;;  %v193_v44 = vpack.c.bf16 %v185_v39, %v177_v35 }
  0x35   :  { %1065 = vmatpush3.bf16.msra.mxu1 %v1129_v46  ;;  %1044 = vmatprep.subr.bf16.mxu0 %v1130_v48  ;;  %v192_v46 = vpack.c.bf16 %v184_v43, %v176_v40 }
  0x36   :  { %1066 = vmatprep.subr.bf16.mxu1 %v1131_v50  ;;  %863 = vmatprep.mubr.bf16.mxu1 %v193_v44 }
  0x38   :  { %1045 = vmatpush3.bf16.msra.mxu0 %v1132_v52 }
  0x39   :  { %1067 = vmatpush3.bf16.msra.mxu1 %v1133_v54  ;;  %1046 = vmatprep.subr.bf16.mxu0 %v1134_v55 }
  0x3a   :  { %1068 = vmatprep.subr.bf16.mxu1 %v1135_v56 }
  0x3c   :  { %1047 = vmatpush3.bf16.msra.mxu0 %v1136_v58 }
  0x3d   :  { %1069 = vmatpush3.bf16.msra.mxu1 %v1137_v38  ;;  %1048 = vmatprep.subr.bf16.mxu0 %v1138_v7  ;;  %v979_v7 = vld [vmem:[%s1442_s4] ss:$0 sm:$0xff] }
  0x3e   :  { %1070 = vmatprep.subr.bf16.mxu1 %v1139_v12 }
  0x40   :  { %1049 = vmatpush3.bf16.msra.mxu0 %v1140_v20 }
  0x41   :  { %1071 = vmatpush3.bf16.msra.mxu1 %v1141_v25 }
  0x43   :  { %823 = vmatmul.mubr.bf16.vlgmr.msra.gmra.mrb[4].mxu0 %v190_v42 }
  0x44   :  { %864 = vmatmul.mubr.bf16.vlgmr.msra.gmra.mrb[4].mxu1 %v192_v46 }
  0xf6   :  { %v1006_v47 = vpop.f32.mrb[0].mxu0 }
  0xf7   :  { %v1028_v48 = vpop.f32.mrb[0].mxu1  ;;  %v1007_v49 = vpop.f32.mrb[1].mxu0 }
  0xf8   :  { %v1008_v50 = vadd.f32 %v1007_v49, %v1006_v47  ;;  %v1029_v51 = vpop.f32.mrb[1].mxu1  ;;  %v1009_v52 = vpop.f32.mrb[2].mxu0 }
  0xf9   :  { %v1030_v53 = vadd.f32 %v1029_v51, %v1028_v48  ;;  %v1031_v54 = vpop.f32.mrb[2].mxu1  ;;  %v1010_v55 = vpop.f32.mrb[3].mxu0 }
  0xfa   :  { %v1011_v56 = vadd.f32 %v1010_v55, %v1009_v52  ;;  %v1032_v57 = vpop.f32.mrb[3].mxu1 }
  0xfb   :  { %v784_v28 = vadd.f32 %v1030_v53, %v1008_v50  ;;  %v1033_v58 = vadd.f32 %v1032_v57, %v1031_v54 }
  0xfd   :  { %v787_v59 = vadd.f32 %v1033_v58, %v1011_v56 }
 0x116   :  { %v1050_v60 = vpop.f32.mrb[4].mxu0 }
 0x117   :  { %v1072_v61 = vpop.f32.mrb[4].mxu1  ;;  %v1051_v62 = vpop.f32.mrb[5].mxu0 }
 0x118   :  { %v1052_v63 = vadd.f32 %v1051_v62, %v1050_v60  ;;  %v1073_v0 = vpop.f32.mrb[5].mxu1  ;;  %v1053_v1 = vpop.f32.mrb[6].mxu0 }
 0x119   :  { %v1074_v2 = vadd.f32 %v1073_v0, %v1072_v61  ;;  %v1075_v3 = vpop.f32.mrb[6].mxu1  ;;  %v1054_v4 = vpop.f32.mrb[7].mxu0 }
 0x11a   :  { %v825_v5 = vadd.f32 %v1052_v63, %v784_v28  ;;  %v1055_v6 = vadd.f32 %v1054_v4, %v1053_v1  ;;  %v1076_v38 = vpop.f32.mrb[7].mxu1 }
 0x11b   :  { %v1077_v8 = vadd.f32 %v1076_v38, %v1075_v3 }
 0x11c   :  { %v866_v9 = vadd.f32 %v1074_v2, %v825_v5  ;;  %v828_v10 = vadd.f32 %v1055_v6, %v787_v59 }
 0x11e   :  { %v888_v12 = vmul.f32 %v979_v7, %v866_v9  ;;  %v869_v45 = vadd.f32 %v1077_v8, %v828_v10 }
 0x120   :  { %v897_v13 = vadd.f32 %v980_v11, %v888_v12  ;;  %v889_v14 = vmul.f32 %v979_v7, %v869_v45 }
 0x122   :  { %v898_v15 = vadd.f32 %v980_v11, %v889_v14  ;;  %v899_v16 = vmax.f32 %v897_v13, 0.0 }
 0x124   :  { %v900_v17 = vmax.f32 %v898_v15, 0.0 }
 0x126   :  { %v988_v18 = vpack.c.bf16 %v900_v17, %v899_v16 }
 0x128   :  { %989 = vst [vmem:[%s1444_s6] sm:$0xff] %v988_v18  }

// kernel: xray_analyzer_forward.162
= control target key start
LH: loop header
LB: loop body
LE: loop exit
PB: predicated region body
PF: predicated region fallthrough
CT: control target
= control target key end

     0   :  { %vm1175_vm0 = vmmov 0   ;;  %s1437_s1 = inlined_call_operand.vmem [shape: bf16[1152,128], index: 1, kind: input, shape index: {}]   ;;  %s1438_s0 = inlined_call_operand.vmem [shape: bf16[16,1152], index: 0, kind: input, shape index: {}]   ;;  %s1439_s2 = inlined_call_operand.vmem [shape: bf16[16,128], index: 2, kind: output, shape index: {}]  }
   0x1   :  { %v1089_v0 = vld [vmem:[%s1437_s1 + $0x40] sm:$0xff]   ;;  %v1093_v4 = vld [vmem:[%s1437_s1 + $0x48] sm:$0xff]   ;;  %v1097_v8 = vld [vmem:[%s1437_s1 + $0x50] sm:$0xff]  }
   0x2   :  { %v1090_v1 = vld [vmem:[%s1437_s1 + $0xc0] sm:$0xff]   ;;  %970 = vmatprep.subr.bf16.mxu0 %v1089_v0  ;;  %v1094_v5 = vld [vmem:[%s1437_s1 + $0xc8] sm:$0xff]   ;;  %v1098_v9 = vld [vmem:[%s1437_s1 + $0xd0] sm:$0xff]  }
   0x3   :  { %v1091_v2 = vld [vmem:[%s1437_s1] sm:$0xff]   ;;  %992 = vmatprep.subr.bf16.mxu1 %v1090_v1  ;;  %v1095_v6 = vld [vmem:[%s1437_s1 + $0x8] sm:$0xff]   ;;  %v1099_v10 = vld [vmem:[%s1437_s1 + $0x10] sm:$0xff]  }
   0x4   :  { %v1092_v3 = vld [vmem:[%s1437_s1 + $0x80] sm:$0xff]   ;;  %971 = vmatpush3.bf16.msra.mxu0 %v1091_v2  ;;  %v1096_v7 = vld [vmem:[%s1437_s1 + $0x88] sm:$0xff]   ;;  %v1100_v11 = vld [vmem:[%s1437_s1 + $0x90] sm:$0xff]  }
   0x5   :  { %993 = vmatpush3.bf16.msra.mxu1 %v1092_v3  ;;  %972 = vmatprep.subr.bf16.mxu0 %v1093_v4  ;;  %v1101_v12 = vld [vmem:[%s1437_s1 + $0x58] sm:$0xff]   ;;  %v1105_v16 = vld [vmem:[%s1437_s1 + $0x60] sm:$0xff]   ;;  %v1109_v20 = vld [vmem:[%s1437_s1 + $0x68] sm:$0xff]  }
   0x6   :  { %994 = vmatprep.subr.bf16.mxu1 %v1094_v5  ;;  %v1102_v13 = vld [vmem:[%s1437_s1 + $0xd8] sm:$0xff]   ;;  %v1106_v17 = vld [vmem:[%s1437_s1 + $0xe0] sm:$0xff]   ;;  %v1110_v21 = vld [vmem:[%s1437_s1 + $0xe8] sm:$0xff]  }
   0x7   :  { %v1103_v14 = vld [vmem:[%s1437_s1 + $0x18] sm:$0xff]   ;;  %v1107_v18 = vld [vmem:[%s1437_s1 + $0x20] sm:$0xff]   ;;  %v1111_v22 = vld [vmem:[%s1437_s1 + $0x28] sm:$0xff]  }
   0x8   :  { %973 = vmatpush3.bf16.msra.mxu0 %v1095_v6  ;;  %v1104_v15 = vld [vmem:[%s1437_s1 + $0x98] sm:$0xff]   ;;  %v1108_v19 = vld [vmem:[%s1437_s1 + $0xa0] sm:$0xff]   ;;  %v1112_v23 = vld [vmem:[%s1437_s1 + $0xa8] sm:$0xff]   ;;  %v1174_v6 = vmov 0.0  }
   0x9   :  { %995 = vmatpush3.bf16.msra.mxu1 %v1096_v7  ;;  %974 = vmatprep.subr.bf16.mxu0 %v1097_v8  ;;  %v1113_v24 = vld [vmem:[%s1437_s1 + $0x70] sm:$0xff]   ;;  %v1117_v28 = vld [vmem:[%s1437_s1 + $0x78] sm:$0xff]   ;;  %v1121_v32 = vld [vmem:[%s1438_s0] ss:$36 sps:$4 sm:$0xff]  }
   0xa   :  { %996 = vmatprep.subr.bf16.mxu1 %v1098_v9  ;;  %v1114_v25 = vld [vmem:[%s1437_s1 + $0xf0] sm:$0xff]   ;;  %v1118_v29 = vld [vmem:[%s1437_s1 + $0xf8] sm:$0xff]   ;;  %v1123_v33 = vld [vmem:[%s1438_s0 + $0x4] ss:$36 sps:$4 sm:$0xff]  }
   0xb   :  { %v1115_v26 = vld [vmem:[%s1437_s1 + $0x30] sm:$0xff]   ;;  %v1119_v30 = vld [vmem:[%s1437_s1 + $0x38] sm:$0xff]   ;;  %v1124_v34 = vld [vmem:[%s1438_s0 + $0x8] ss:$36 sps:$4 sm:$0xff]   ;;  %684 = vmatprep.mubr.bf16.mxu0 %v1123_v33 }
   0xc   :  { %975 = vmatpush3.bf16.msra.mxu0 %v1099_v10  ;;  %v1116_v27 = vld [vmem:[%s1437_s1 + $0xb0] sm:$0xff]   ;;  %v1120_v31 = vld [vmem:[%s1437_s1 + $0xb8] sm:$0xff]   ;;  %v1127_v36 = vld [vmem:[%s1437_s1 + $0x140] sm:$0xff]  }
   0xd   :  { %997 = vmatpush3.bf16.msra.mxu1 %v1100_v11  ;;  %976 = vmatprep.subr.bf16.mxu0 %v1101_v12  ;;  %v1126_v35 = vld [vmem:[%s1438_s0 + $0xc] ss:$36 sps:$4 sm:$0xff]   ;;  %v1128_v37 = vld [vmem:[%s1437_s1 + $0x100] sm:$0xff]   ;;  %v1139_v48 = vld [vmem:[%s1437_s1 + $0x158] sm:$0xff]  }
   0xe   :  { %998 = vmatprep.subr.bf16.mxu1 %v1102_v13  ;;  %725 = vmatprep.mubr.bf16.mxu1 %v1126_v35  ;;  %v1129_v38 = vld [vmem:[%s1437_s1 + $0x1c0] sm:$0xff]   ;;  %v1131_v40 = vld [vmem:[%s1437_s1 + $0x148] sm:$0xff]   ;;  %v1135_v44 = vld [vmem:[%s1437_s1 + $0x150] sm:$0xff]  }
   0xf   :  { %v1130_v39 = vld [vmem:[%s1437_s1 + $0x180] sm:$0xff]   ;;  %v1132_v41 = vld [vmem:[%s1437_s1 + $0x108] sm:$0xff]   ;;  %v1136_v45 = vld [vmem:[%s1437_s1 + $0x110] sm:$0xff]  }
  0x10   :  { %977 = vmatpush3.bf16.msra.mxu0 %v1103_v14  ;;  %v1133_v42 = vld [vmem:[%s1437_s1 + $0x1c8] sm:$0xff]   ;;  %v1137_v46 = vld [vmem:[%s1437_s1 + $0x1d0] sm:$0xff]   ;;  %v1140_v49 = vld [vmem:[%s1437_s1 + $0x118] sm:$0xff]  }
  0x11   :  { %999 = vmatpush3.bf16.msra.mxu1 %v1104_v15  ;;  %978 = vmatprep.subr.bf16.mxu0 %v1105_v16  ;;  %v1134_v43 = vld [vmem:[%s1437_s1 + $0x188] sm:$0xff]   ;;  %v1138_v47 = vld [vmem:[%s1437_s1 + $0x190] sm:$0xff]   ;;  %v1141_v50 = vld [vmem:[%s1437_s1 + $0x1d8] sm:$0xff]  }
  0x12   :  { %1000 = vmatprep.subr.bf16.mxu1 %v1106_v17  ;;  %v1142_v51 = vld [vmem:[%s1437_s1 + $0x198] sm:$0xff]   ;;  %v1143_v52 = vld [vmem:[%s1437_s1 + $0x160] sm:$0xff]   ;;  %v1147_v56 = vld [vmem:[%s1437_s1 + $0x168] sm:$0xff]  }
  0x13   :  { %v1144_v53 = vld [vmem:[%s1437_s1 + $0x120] sm:$0xff]   ;;  %v1148_v57 = vld [vmem:[%s1437_s1 + $0x128] sm:$0xff]   ;;  %v1151_v60 = vld [vmem:[%s1437_s1 + $0x170] sm:$0xff]  }
  0x14   :  { %979 = vmatpush3.bf16.msra.mxu0 %v1107_v18  ;;  %v1145_v54 = vld [vmem:[%s1437_s1 + $0x1e0] sm:$0xff]   ;;  %v1149_v58 = vld [vmem:[%s1437_s1 + $0x1e8] sm:$0xff]   ;;  %v1152_v61 = vld [vmem:[%s1437_s1 + $0x130] sm:$0xff]  }
  0x15   :  { %1001 = vmatpush3.bf16.msra.mxu1 %v1108_v19  ;;  %980 = vmatprep.subr.bf16.mxu0 %v1109_v20  ;;  %v1146_v55 = vld [vmem:[%s1437_s1 + $0x1a0] sm:$0xff]   ;;  %v1150_v59 = vld [vmem:[%s1437_s1 + $0x1a8] sm:$0xff]   ;;  %v1153_v62 = vld [vmem:[%s1437_s1 + $0x1f0] sm:$0xff]  }
  0x16   :  { %1002 = vmatprep.subr.bf16.mxu1 %v1110_v21  ;;  %v1154_v63 = vld [vmem:[%s1437_s1 + $0x1b0] sm:$0xff]   ;;  %v1155_v0 = vld [vmem:[%s1437_s1 + $0x178] sm:$0xff]   ;;  %v1165_v9 = vld [vmem:[%s1437_s1 + $0x200] sm:$0xff]  }
  0x17   :  { %v1156_v1 = vld [vmem:[%s1437_s1 + $0x138] sm:$0xff]   ;;  %v1158_v3 = vld [vmem:[%s1438_s0 + $0x10] ss:$36 sps:$4 sm:$0xff]   ;;  %v1166_v10 = vld [vmem:[%s1437_s1 + $0x208] sm:$0xff]  }
  0x18   :  { %981 = vmatpush3.bf16.msra.mxu0 %v1111_v22  ;;  %v1157_v2 = vld [vmem:[%s1437_s1 + $0x1f8] sm:$0xff]   ;;  %v1167_v11 = vld [vmem:[%s1437_s1 + $0x210] sm:$0xff]   ;;  %v1169_v13 = vld [vmem:[%s1437_s1 + $0x220] sm:$0xff]  }
  0x19   :  { %1003 = vmatpush3.bf16.msra.mxu1 %v1112_v23  ;;  %982 = vmatprep.subr.bf16.mxu0 %v1113_v24  ;;  %v1160_v4 = vld [vmem:[%s1438_s0 + $0x14] ss:$36 sps:$4 sm:$0xff]   ;;  %v1164_v8 = vld [vmem:[%s1438_s0 + $0x1c] ss:$36 sps:$4 sm:$0xff]   ;;  %v1170_v14 = vld [vmem:[%s1437_s1 + $0x228] sm:$0xff]  }
  0x1a   :  { %1004 = vmatprep.subr.bf16.mxu1 %v1114_v25  ;;  %v1161_v5 = vld [vmem:[%s1437_s1 + $0x1b8] sm:$0xff]   ;;  %v1171_v15 = vld [vmem:[%s1437_s1 + $0x230] sm:$0xff]   ;;  %v1173_v17 = vld [vmem:[%s1438_s0 + $0x20] ss:$36 sps:$4 sm:$0xff]  }
  0x1b   :  { %v1162_v7 = vld [vmem:[%s1438_s0 + $0x18] ss:$36 sps:$4 sm:$0xff]  }
  0x1c   :  { %983 = vmatpush3.bf16.msra.mxu0 %v1115_v26  ;;  %v1168_v12 = vld [vmem:[%s1437_s1 + $0x218] sm:$0xff]  }
  0x1d   :  { %1005 = vmatpush3.bf16.msra.mxu1 %v1116_v27  ;;  %984 = vmatprep.subr.bf16.mxu0 %v1117_v28  ;;  %v1172_v16 = vld [vmem:[%s1437_s1 + $0x238] sm:$0xff]  }
  0x1e   :  { %1006 = vmatprep.subr.bf16.mxu1 %v1118_v29 }
  0x20   :  { %985 = vmatpush3.bf16.msra.mxu0 %v1119_v30 }
  0x21   :  { %1007 = vmatpush3.bf16.msra.mxu1 %v1120_v31  ;;  %1014 = vmatprep.subr.bf16.mxu0 %v1127_v36 }
  0x22   :  { %1036 = vmatprep.subr.bf16.mxu1 %v1129_v38 }
  0x23   :  { %685 = vmatmul.mubr.bf16.vlgmr.msra.gmra.mrb[0].mxu0 %v1121_v32 }
  0x24   :  { %726 = vmatmul.mubr.bf16.vlgmr.msra.gmra.mrb[0].mxu1 %v1124_v34  ;;  %1015 = vmatpush3.bf16.msra.mxu0 %v1128_v37 }
  0x25   :  { %1037 = vmatpush3.bf16.msra.mxu1 %v1130_v39  ;;  %1016 = vmatprep.subr.bf16.mxu0 %v1131_v40 }
  0x26   :  { %1038 = vmatprep.subr.bf16.mxu1 %v1133_v42  ;;  %766 = vmatprep.mubr.bf16.mxu0 %v1160_v4 }
  0x27   :  { %807 = vmatprep.mubr.bf16.mxu1 %v1164_v8 }
  0x28   :  { %1017 = vmatpush3.bf16.msra.mxu0 %v1132_v41 }
  0x29   :  { %1039 = vmatpush3.bf16.msra.mxu1 %v1134_v43  ;;  %1018 = vmatprep.subr.bf16.mxu0 %v1135_v44 }
  0x2a   :  { %1040 = vmatprep.subr.bf16.mxu1 %v1137_v46 }
  0x2c   :  { %1019 = vmatpush3.bf16.msra.mxu0 %v1136_v45 }
  0x2d   :  { %1041 = vmatpush3.bf16.msra.mxu1 %v1138_v47  ;;  %1020 = vmatprep.subr.bf16.mxu0 %v1139_v48 }
  0x2e   :  { %1042 = vmatprep.subr.bf16.mxu1 %v1141_v50 }
  0x30   :  { %1021 = vmatpush3.bf16.msra.mxu0 %v1140_v49 }
  0x31   :  { %1043 = vmatpush3.bf16.msra.mxu1 %v1142_v51  ;;  %1022 = vmatprep.subr.bf16.mxu0 %v1143_v52 }
  0x32   :  { %1044 = vmatprep.subr.bf16.mxu1 %v1145_v54 }
  0x34   :  { %1023 = vmatpush3.bf16.msra.mxu0 %v1144_v53 }
  0x35   :  { %1045 = vmatpush3.bf16.msra.mxu1 %v1146_v55  ;;  %1024 = vmatprep.subr.bf16.mxu0 %v1147_v56 }
  0x36   :  { %1046 = vmatprep.subr.bf16.mxu1 %v1149_v58 }
  0x38   :  { %1025 = vmatpush3.bf16.msra.mxu0 %v1148_v57 }
  0x39   :  { %1047 = vmatpush3.bf16.msra.mxu1 %v1150_v59  ;;  %1026 = vmatprep.subr.bf16.mxu0 %v1151_v60 }
  0x3a   :  { %1048 = vmatprep.subr.bf16.mxu1 %v1153_v62 }
  0x3c   :  { %1027 = vmatpush3.bf16.msra.mxu0 %v1152_v61 }
  0x3d   :  { %1049 = vmatpush3.bf16.msra.mxu1 %v1154_v63  ;;  %1028 = vmatprep.subr.bf16.mxu0 %v1155_v0 }
  0x3e   :  { %1050 = vmatprep.subr.bf16.mxu1 %v1157_v2 }
  0x40   :  { %1029 = vmatpush3.bf16.msra.mxu0 %v1156_v1 }
  0x41   :  { %1067 = vmatprep.subr.bf16.mxu0 %v1174_v6  ;;  %1051 = vmatpush3.bf16.msra.mxu1 %v1161_v5 }
  0x43   :  { %767 = vmatmul.mubr.bf16.vlgmr.msra.gmra.mrb[4].mxu0 %v1158_v3 }
  0x44   :  { %1083 = vmatprep.mubr.msk.bf16.mxu0 %vm1175_vm0, %v1174_v6  ;;  %1068 = vmatpush3.bf16.msra.mxu0 %v1165_v9 }
  0x45   :  { %808 = vmatmul.mubr.bf16.vlgmr.msra.gmra.mrb[4].mxu1 %v1162_v7  ;;  %1069 = vmatprep.subr.bf16.mxu0 %v1174_v6 }
  0x48   :  { %1070 = vmatpush3.bf16.msra.mxu0 %v1166_v10 }
  0x49   :  { %1071 = vmatprep.subr.bf16.mxu0 %v1174_v6 }
  0x4c   :  { %1072 = vmatpush3.bf16.msra.mxu0 %v1167_v11 }
  0x4d   :  { %1073 = vmatprep.subr.bf16.mxu0 %v1174_v6 }
  0x50   :  { %1074 = vmatpush3.bf16.msra.mxu0 %v1168_v12 }
  0x51   :  { %1075 = vmatprep.subr.bf16.mxu0 %v1174_v6 }
  0x54   :  { %1076 = vmatpush3.bf16.msra.mxu0 %v1169_v13 }
  0x55   :  { %1077 = vmatprep.subr.bf16.mxu0 %v1174_v6 }
  0x58   :  { %1078 = vmatpush3.bf16.msra.mxu0 %v1170_v14 }
  0x59   :  { %1079 = vmatprep.subr.bf16.mxu0 %v1174_v6 }
  0x5c   :  { %1080 = vmatpush3.bf16.msra.mxu0 %v1171_v15 }
  0x5d   :  { %1081 = vmatprep.subr.bf16.mxu0 %v1174_v6 }
  0x60   :  { %1082 = vmatpush3.bf16.msra.mxu0 %v1172_v16 }
  0x63   :  { %1084 = vmatmul.mubr.bf16.vlgmr.msra.gmra.mrb[8].mxu0 %v1173_v17 }
  0xf6   :  { %v986_v18 = vpop.f32.mrb[0].mxu0 }
  0xf7   :  { %v1008_v19 = vpop.f32.mrb[0].mxu1  ;;  %v987_v20 = vpop.f32.mrb[1].mxu0 }
  0xf8   :  { %v988_v21 = vadd.f32 %v987_v20, %v986_v18  ;;  %v1009_v22 = vpop.f32.mrb[1].mxu1  ;;  %v989_v23 = vpop.f32.mrb[2].mxu0 }
  0xf9   :  { %v1010_v24 = vadd.f32 %v1009_v22, %v1008_v19  ;;  %v1011_v25 = vpop.f32.mrb[2].mxu1  ;;  %v990_v26 = vpop.f32.mrb[3].mxu0 }
  0xfa   :  { %v991_v27 = vadd.f32 %v990_v26, %v989_v23  ;;  %v1012_v28 = vpop.f32.mrb[3].mxu1 }
  0xfb   :  { %v728_v29 = vadd.f32 %v1010_v24, %v988_v21  ;;  %v1013_v30 = vadd.f32 %v1012_v28, %v1011_v25 }
  0xfd   :  { %v731_v31 = vadd.f32 %v1013_v30, %v991_v27 }
 0x116   :  { %v1030_v32 = vpop.f32.mrb[4].mxu0 }
 0x117   :  { %v1031_v33 = vpop.f32.mrb[5].mxu0 }
 0x118   :  { %v1032_v34 = vadd.f32 %v1031_v33, %v1030_v32  ;;  %v1033_v35 = vpop.f32.mrb[6].mxu0  ;;  %v1052_v36 = vpop.f32.mrb[4].mxu1 }
 0x119   :  { %v1034_v37 = vpop.f32.mrb[7].mxu0  ;;  %v1053_v40 = vpop.f32.mrb[5].mxu1 }
 0x11a   :  { %v769_v38 = vadd.f32 %v1032_v34, %v728_v29  ;;  %v1035_v39 = vadd.f32 %v1034_v37, %v1033_v35  ;;  %v1054_v41 = vadd.f32 %v1053_v40, %v1052_v36  ;;  %v1055_v42 = vpop.f32.mrb[6].mxu1 }
 0x11b   :  { %v1056_v44 = vpop.f32.mrb[7].mxu1 }
 0x11c   :  { %v772_v43 = vadd.f32 %v1035_v39, %v731_v31  ;;  %v1057_v45 = vadd.f32 %v1056_v44, %v1055_v42  ;;  %v810_v46 = vadd.f32 %v1054_v41, %v769_v38 }
 0x11e   :  { %v813_v47 = vadd.f32 %v1057_v45, %v772_v43 }
 0x136   :  { %v850_v48 = vpop.f32.mrb[8].mxu0 }
 0x137   :  { %v851_v49 = vadd.f32 %v850_v48, %v810_v46  ;;  %v1085_v50 = vpop.f32.mrb[9].mxu0 }
 0x138   :  { %v853_v51 = vpop.f32.mrb[10].mxu0 }
 0x139   :  { %v854_v52 = vadd.f32 %v853_v51, %v813_v47  ;;  %v1086_v53 = vpop.f32.mrb[11].mxu0 }
 0x13b   :  { %v968_v54 = vpack.c.bf16 %v854_v52, %v851_v49 }
 0x13d   :  { %969 = vst [vmem:[%s1439_s2] sm:$0xff] %v968_v54  }

// kernel: xray_analyzer_forward.209
= control target key start
LH: loop header
LB: loop body
LE: loop exit
PB: predicated region body
PF: predicated region fallthrough
CT: control target
= control target key end

     0   :  { %v55_v37 = vlaneseq  ;;  %s3713_s1 = inlined_call_operand.vmem [shape: bf16[1024,512], index: 1, kind: input, shape index: {}]   ;;  %s3714_s0 = inlined_call_operand.vmem [shape: bf16[16,1024], index: 0, kind: input, shape index: {}]   ;;  %s3715_s2 = inlined_call_operand.vmem [shape: f32[1,1024], index: 2, kind: input, shape index: {}]   ;;  %s3716_s3 = inlined_call_operand.vmem [shape: f32[1,1024], index: 3, kind: input, shape index: {}]   ;;  %s3717_s4 = inlined_call_operand.vmem [shape: bf16[16,512], index: 4, kind: output, shape index: {}]  }
   0x1   :  { %v2428_v0 = vld [vmem:[%s3713_s1 + $0x4] ss:$16 sps:$4 sm:$0xff]   ;;  %v2430_v1 = vld [vmem:[%s3713_s1 + $0xc] ss:$16 sps:$4 sm:$0xff]   ;;  %v2432_v2 = vld [vmem:[%s3713_s1] ss:$16 sps:$4 sm:$0xff]  }
   0x2   :  { %1737 = vmatprep.subr.bf16.mxu0 %v2428_v0  ;;  %v2433_v3 = vld [vmem:[%s3713_s1 + $0x8] ss:$16 sps:$4 sm:$0xff]   ;;  %1909 = vmatprep.subr.bf16.mxu1 %v2430_v1  ;;  %v2434_v4 = vld [vmem:[%s3713_s1 + $0x24] ss:$16 sps:$4 sm:$0xff]   ;;  %v2436_v5 = vld [vmem:[%s3713_s1 + $0x2c] ss:$16 sps:$4 sm:$0xff]  }
   0x3   :  { %1738 = vmatpush1.bf16.msra.mxu0 %v2432_v2  ;;  %1910 = vmatpush1.bf16.msra.mxu1 %v2433_v3  ;;  %v2438_v6 = vld [vmem:[%s3713_s1 + $0x20] ss:$16 sps:$4 sm:$0xff]   ;;  %v2439_v7 = vld [vmem:[%s3713_s1 + $0x28] ss:$16 sps:$4 sm:$0xff]   ;;  %v2440_v8 = vld [vmem:[%s3713_s1 + $0x44] ss:$16 sps:$4 sm:$0xff]  }
   0x4   :  { %1739 = vmatprep.subr.bf16.mxu0 %v2434_v4  ;;  %1911 = vmatprep.subr.bf16.mxu1 %v2436_v5  ;;  %v2442_v9 = vld [vmem:[%s3713_s1 + $0x4c] ss:$16 sps:$4 sm:$0xff]   ;;  %v2444_v10 = vld [vmem:[%s3713_s1 + $0x40] ss:$16 sps:$4 sm:$0xff]   ;;  %v2445_v11 = vld [vmem:[%s3713_s1 + $0x48] ss:$16 sps:$4 sm:$0xff]  }
   0x5   :  { %v2446_v12 = vld [vmem:[%s3713_s1 + $0x64] ss:$16 sps:$4 sm:$0xff]   ;;  %v2448_v13 = vld [vmem:[%s3713_s1 + $0x6c] ss:$16 sps:$4 sm:$0xff]   ;;  %v2450_v14 = vld [vmem:[%s3713_s1 + $0x60] ss:$16 sps:$4 sm:$0xff]  }
   0x6   :  { %v2451_v15 = vld [vmem:[%s3713_s1 + $0x68] ss:$16 sps:$4 sm:$0xff]   ;;  %v2452_v16 = vld [vmem:[%s3713_s1 + $0x84] ss:$16 sps:$4 sm:$0xff]   ;;  %v2454_v17 = vld [vmem:[%s3713_s1 + $0x8c] ss:$16 sps:$4 sm:$0xff]  }
   0x7   :  { %1740 = vmatpush1.bf16.msra.mxu0 %v2438_v6  ;;  %1912 = vmatpush1.bf16.msra.mxu1 %v2439_v7  ;;  %v2456_v18 = vld [vmem:[%s3713_s1 + $0x80] ss:$16 sps:$4 sm:$0xff]   ;;  %v2457_v19 = vld [vmem:[%s3713_s1 + $0x88] ss:$16 sps:$4 sm:$0xff]   ;;  %v2458_v20 = vld [vmem:[%s3713_s1 + $0xa4] ss:$16 sps:$4 sm:$0xff]  }
   0x8   :  { %1741 = vmatprep.subr.bf16.mxu0 %v2440_v8  ;;  %1913 = vmatprep.subr.bf16.mxu1 %v2442_v9  ;;  %v2460_v21 = vld [vmem:[%s3713_s1 + $0xac] ss:$16 sps:$4 sm:$0xff]   ;;  %v2462_v22 = vld [vmem:[%s3713_s1 + $0xa0] ss:$16 sps:$4 sm:$0xff]   ;;  %v2463_v23 = vld [vmem:[%s3713_s1 + $0xa8] ss:$16 sps:$4 sm:$0xff]  }
   0x9   :  { %v2464_v24 = vld [vmem:[%s3713_s1 + $0xc4] ss:$16 sps:$4 sm:$0xff]   ;;  %v2466_v25 = vld [vmem:[%s3713_s1 + $0xcc] ss:$16 sps:$4 sm:$0xff]   ;;  %v2468_v26 = vld [vmem:[%s3713_s1 + $0xc0] ss:$16 sps:$4 sm:$0xff]  }
   0xa   :  { %v2469_v27 = vld [vmem:[%s3713_s1 + $0xc8] ss:$16 sps:$4 sm:$0xff]   ;;  %v2470_v28 = vld [vmem:[%s3713_s1 + $0xe4] ss:$16 sps:$4 sm:$0xff]   ;;  %v2472_v29 = vld [vmem:[%s3713_s1 + $0xec] ss:$16 sps:$4 sm:$0xff]  }
   0xb   :  { %1742 = vmatpush1.bf16.msra.mxu0 %v2444_v10  ;;  %1914 = vmatpush1.bf16.msra.mxu1 %v2445_v11  ;;  %v2474_v30 = vld [vmem:[%s3713_s1 + $0xe0] ss:$16 sps:$4 sm:$0xff]   ;;  %v2475_v31 = vld [vmem:[%s3713_s1 + $0xe8] ss:$16 sps:$4 sm:$0xff]   ;;  %v2476_v32 = vld [vmem:[%s3713_s1 + $0x104] ss:$16 sps:$4 sm:$0xff]  }
   0xc   :  { %1743 = vmatprep.subr.bf16.mxu0 %v2446_v12  ;;  %1915 = vmatprep.subr.bf16.mxu1 %v2448_v13  ;;  %v2478_v33 = vld [vmem:[%s3713_s1 + $0x10c] ss:$16 sps:$4 sm:$0xff]   ;;  %v2480_v34 = vld [vmem:[%s3713_s1 + $0x100] ss:$16 sps:$4 sm:$0xff]   ;;  %v2481_v35 = vld [vmem:[%s3713_s1 + $0x108] ss:$16 sps:$4 sm:$0xff]  }
   0xd   :  { %v2482_v36 = vld [vmem:[%s3713_s1 + $0x124] ss:$16 sps:$4 sm:$0xff]   ;;  %v2484_v38 = vld [vmem:[%s3713_s1 + $0x12c] ss:$16 sps:$4 sm:$0xff]   ;;  %v2486_v39 = vld [vmem:[%s3713_s1 + $0x120] ss:$16 sps:$4 sm:$0xff]  }
   0xe   :  { %v2487_v40 = vld [vmem:[%s3713_s1 + $0x128] ss:$16 sps:$4 sm:$0xff]   ;;  %v2488_v41 = vld [vmem:[%s3713_s1 + $0x144] ss:$16 sps:$4 sm:$0xff]   ;;  %v2962_v42 = vshrl.u32 %v55_v37, 7 }
   0xf   :  { %1744 = vmatpush1.bf16.msra.mxu0 %v2450_v14  ;;  %1916 = vmatpush1.bf16.msra.mxu1 %v2451_v15  ;;  %v2490_v43 = vld [vmem:[%s3713_s1 + $0x14c] ss:$16 sps:$4 sm:$0xff]   ;;  %v2492_v44 = vld [vmem:[%s3713_s1 + $0x140] ss:$16 sps:$4 sm:$0xff]   ;;  %v2493_v45 = vld [vmem:[%s3713_s1 + $0x148] ss:$16 sps:$4 sm:$0xff]  }
  0x10   :  { %1745 = vmatprep.subr.bf16.mxu0 %v2452_v16  ;;  %1917 = vmatprep.subr.bf16.mxu1 %v2454_v17  ;;  %v2494_v46 = vld [vmem:[%s3713_s1 + $0x164] ss:$16 sps:$4 sm:$0xff]   ;;  %v61_v47 = vsub.s32 1, %v2962_v42  ;;  %v2496_v48 = vld [vmem:[%s3713_s1 + $0x16c] ss:$16 sps:$4 sm:$0xff]   ;;  %v57_v56 = vsub.s32 0, %v2962_v42 }
  0x11   :  { %v2498_v49 = vld [vmem:[%s3713_s1 + $0x160] ss:$16 sps:$4 sm:$0xff]   ;;  %v2499_v50 = vld [vmem:[%s3713_s1 + $0x168] ss:$16 sps:$4 sm:$0xff]   ;;  %v2500_v57 = vld [vmem:[%s3713_s1 + $0x184] ss:$16 sps:$4 sm:$0xff]  }
  0x12   :  { %v29_v51 = vld [vmem:[%s3714_s0] sm:$0xff]  ;;  %v2502_v61 = vld [vmem:[%s3713_s1 + $0x18c] ss:$16 sps:$4 sm:$0xff]   ;;  %v2505_v1 = vld [vmem:[%s3713_s1 + $0x188] ss:$16 sps:$4 sm:$0xff]  }
  0x13   :  { %1746 = vmatpush1.bf16.msra.mxu0 %v2456_v18  ;;  %1918 = vmatpush1.bf16.msra.mxu1 %v2457_v19  ;;  %v33_v52 = vld [vmem:[%s3714_s0 + $0x20] sm:$0xff]  ;;  %v38_v53 = vunpack.c.h.bf16 %v29_v51  ;;  %v37_v2 = vunpack.c.l.bf16 %v29_v51  ;;  %v2508_v8 = vld [vmem:[%s3713_s1 + $0x1ac] ss:$16 sps:$4 sm:$0xff]   ;;  %v2511_v15 = vld [vmem:[%s3713_s1 + $0x1a8] ss:$16 sps:$4 sm:$0xff]  }
  0x14   :  { %1747 = vmatprep.subr.bf16.mxu0 %v2458_v20  ;;  %1919 = vmatprep.subr.bf16.mxu1 %v2460_v21  ;;  %v2995_v54 = vld [vmem:[%s3715_s2] sm:$0xff]  ;;  %v46_v58 = vunpack.c.h.bf16 %v33_v52  ;;  %v45_v3 = vunpack.c.l.bf16 %v33_v52  ;;  %v2514_v18 = vld [vmem:[%s3713_s1 + $0x1cc] ss:$16 sps:$4 sm:$0xff]   ;;  %v2533_v37 = vld [vmem:[%s3713_s1 + $0x228] ss:$16 sps:$4 sm:$0xff]  }
  0x15   :  { %v3000_v55 = vld [vmem:[%s3716_s3] sm:$0xff]  ;;  %v62_v59 = vrot.slane %v2995_v54, %v61_v47  ;;  %v58_v4 = vrot.slane %v2995_v54, %v57_v56  ;;  %v2559_v52 = vld [vmem:[%s3713_s1 + $0x2ac] ss:$16 sps:$4 sm:$0xff]  }
  0x16   :  { %v120_v60 = vrot.slane %v3000_v55, %v61_v47  ;;  %v2504_v0 = vld [vmem:[%s3713_s1 + $0x180] ss:$16 sps:$4 sm:$0xff]   ;;  %v2506_v5 = vld [vmem:[%s3713_s1 + $0x1a4] ss:$16 sps:$4 sm:$0xff]   ;;  %v116_v14 = vrot.slane %v3000_v55, %v57_v56 }
  0x17   :  { %1748 = vmatpush1.bf16.msra.mxu0 %v2462_v22  ;;  %1920 = vmatpush1.bf16.msra.mxu1 %v2463_v23  ;;  %v96_v62 = vmul.f32 %v62_v59, %v38_v53  ;;  %v104_v63 = vmul.f32 %v62_v59, %v46_v58  ;;  %v2510_v11 = vld [vmem:[%s3713_s1 + $0x1a0] ss:$16 sps:$4 sm:$0xff]   ;;  %v95_v12 = vmul.f32 %v58_v4, %v37_v2  ;;  %v2512_v17 = vld [vmem:[%s3713_s1 + $0x1c4] ss:$16 sps:$4 sm:$0xff]   ;;  %v2517_v22 = vld [vmem:[%s3713_s1 + $0x1c8] ss:$16 sps:$4 sm:$0xff]  }
  0x18   :  { %1749 = vmatprep.subr.bf16.mxu0 %v2464_v24  ;;  %1921 = vmatprep.subr.bf16.mxu1 %v2466_v25  ;;  %v103_v13 = vmul.f32 %v58_v4, %v45_v3  ;;  %v2516_v19 = vld [vmem:[%s3713_s1 + $0x1c0] ss:$16 sps:$4 sm:$0xff]   ;;  %v2518_v23 = vld [vmem:[%s3713_s1 + $0x1e4] ss:$16 sps:$4 sm:$0xff]   ;;  %v2520_v24 = vld [vmem:[%s3713_s1 + $0x1ec] ss:$16 sps:$4 sm:$0xff]  }
  0x19   :  { %v154_v6 = vadd.f32 %v120_v60, %v96_v62  ;;  %v162_v7 = vadd.f32 %v120_v60, %v104_v63  ;;  %v153_v20 = vadd.f32 %v116_v14, %v95_v12  ;;  %v2522_v25 = vld [vmem:[%s3713_s1 + $0x1e0] ss:$16 sps:$4 sm:$0xff]   ;;  %v2550_v47 = vld [vmem:[%s3713_s1 + $0x284] ss:$16 sps:$4 sm:$0xff]   ;;  %v69_v53 = vsub.s32 3, %v2962_v42  ;;  %v3141_v62 = vld [vmem:[%s3714_s0 + $0x8] sm:$0xff] }
  0x1a   :  { %v161_v21 = vadd.f32 %v116_v14, %v103_v13  ;;  %v2556_v51 = vld [vmem:[%s3713_s1 + $0x2a4] ss:$16 sps:$4 sm:$0xff]   ;;  %v2554_v56 = vld [vmem:[%s3713_s1 + $0x2a0] ss:$16 sps:$4 sm:$0xff]   ;;  %v2565_v59 = vld [vmem:[%s3713_s1 + $0x2cc] ss:$16 sps:$4 sm:$0xff]   ;;  %v40_v2 = vunpack.c.h.bf16 %v3141_v62 }
  0x1b   :  { %1750 = vmatpush1.bf16.msra.mxu0 %v2468_v26  ;;  %1922 = vmatpush1.bf16.msra.mxu1 %v2469_v27  ;;  %v170_v9 = vmax.f32 %v154_v6, 0.0  ;;  %v178_v10 = vmax.f32 %v162_v7, 0.0  ;;  %v169_v26 = vmax.f32 %v153_v20, 0.0  ;;  %v2562_v58 = vld [vmem:[%s3713_s1 + $0x2c4] ss:$16 sps:$4 sm:$0xff]   ;;  %v3146_v63 = vld [vmem:[%s3714_s0 + $0x28] sm:$0xff]  ;;  %v128_v4 = vrot.slane %v3000_v55, %v69_v53 }
  0x1c   :  { %1751 = vmatprep.subr.bf16.mxu0 %v2470_v28  ;;  %1923 = vmatprep.subr.bf16.mxu1 %v2472_v29  ;;  %v177_v27 = vmax.f32 %v161_v21, 0.0  ;;  %v2523_v28 = vld [vmem:[%s3713_s1 + $0x1e8] ss:$16 sps:$4 sm:$0xff]   ;;  %v2526_v29 = vld [vmem:[%s3713_s1 + $0x204] ss:$16 sps:$4 sm:$0xff]   ;;  %v48_v3 = vunpack.c.h.bf16 %v3146_v63 }
  0x1d   :  { %v186_v16 = vpack.c.bf16 %v178_v10, %v170_v9  ;;  %v2560_v60 = vld [vmem:[%s3713_s1 + $0x2c0] ss:$16 sps:$4 sm:$0xff]   ;;  %v2569_v9 = vld [vmem:[%s3713_s1 + $0x2e8] ss:$16 sps:$4 sm:$0xff]   ;;  %v2574_v10 = vld [vmem:[%s3713_s1 + $0x304] ss:$16 sps:$4 sm:$0xff]  }
  0x1e   :  { %v2577_v13 = vld [vmem:[%s3713_s1 + $0x30c] ss:$16 sps:$4 sm:$0xff]   ;;  %v2578_v21 = vld [vmem:[%s3713_s1 + $0x320] ss:$16 sps:$4 sm:$0xff]  }
  0x1f   :  { %1752 = vmatpush1.bf16.msra.mxu0 %v2474_v30  ;;  %1924 = vmatpush1.bf16.msra.mxu1 %v2475_v31  ;;  %v2529_v30 = vld [vmem:[%s3713_s1 + $0x20c] ss:$16 sps:$4 sm:$0xff]   ;;  %v2524_v31 = vld [vmem:[%s3713_s1 + $0x200] ss:$16 sps:$4 sm:$0xff]  }
  0x20   :  { %1753 = vmatprep.subr.bf16.mxu0 %v2476_v32  ;;  %1925 = vmatprep.subr.bf16.mxu1 %v2478_v33  ;;  %v185_v32 = vpack.c.bf16 %v177_v27, %v169_v26  ;;  %v2527_v33 = vld [vmem:[%s3713_s1 + $0x208] ss:$16 sps:$4 sm:$0xff]   ;;  %v2583_v20 = vld [vmem:[%s3713_s1 + $0x32c] ss:$16 sps:$4 sm:$0xff]   ;;  %v2592_v27 = vld [vmem:[%s3713_s1 + $0x364] ss:$16 sps:$4 sm:$0xff]  }
  0x21   :  { %1769 = vmatprep.mubr.bf16.mxu0 %v186_v16  ;;  %1941 = vmatprep.mubr.bf16.mxu1 %v186_v16  ;;  %v2572_v16 = vld [vmem:[%s3713_s1 + $0x300] ss:$16 sps:$4 sm:$0xff]   ;;  %v2587_v26 = vld [vmem:[%s3713_s1 + $0x348] ss:$16 sps:$4 sm:$0xff]  }
  0x23   :  { %1754 = vmatpush1.bf16.msra.mxu0 %v2480_v34  ;;  %1926 = vmatpush1.bf16.msra.mxu1 %v2481_v35  ;;  %v2532_v34 = vld [vmem:[%s3713_s1 + $0x224] ss:$16 sps:$4 sm:$0xff]   ;;  %v2535_v35 = vld [vmem:[%s3713_s1 + $0x22c] ss:$16 sps:$4 sm:$0xff]  }
  0x24   :  { %1755 = vmatprep.subr.bf16.mxu0 %v2482_v36  ;;  %1927 = vmatprep.subr.bf16.mxu1 %v2484_v38  ;;  %v2530_v36 = vld [vmem:[%s3713_s1 + $0x220] ss:$16 sps:$4 sm:$0xff]   ;;  %v2538_v38 = vld [vmem:[%s3713_s1 + $0x244] ss:$16 sps:$4 sm:$0xff]  }
  0x27   :  { %1756 = vmatpush1.bf16.msra.mxu0 %v2486_v39  ;;  %1928 = vmatpush1.bf16.msra.mxu1 %v2487_v40  ;;  %v2541_v39 = vld [vmem:[%s3713_s1 + $0x24c] ss:$16 sps:$4 sm:$0xff]   ;;  %v2536_v40 = vld [vmem:[%s3713_s1 + $0x240] ss:$16 sps:$4 sm:$0xff]  }
  0x28   :  { %1757 = vmatprep.subr.bf16.mxu0 %v2488_v41  ;;  %1929 = vmatprep.subr.bf16.mxu1 %v2490_v43  ;;  %v2539_v41 = vld [vmem:[%s3713_s1 + $0x248] ss:$16 sps:$4 sm:$0xff]   ;;  %v2544_v43 = vld [vmem:[%s3713_s1 + $0x264] ss:$16 sps:$4 sm:$0xff]  }
  0x2b   :  { %1758 = vmatpush1.bf16.msra.mxu0 %v2492_v44  ;;  %1930 = vmatpush1.bf16.msra.mxu1 %v2493_v45  ;;  %v2547_v44 = vld [vmem:[%s3713_s1 + $0x26c] ss:$16 sps:$4 sm:$0xff]   ;;  %v2542_v45 = vld [vmem:[%s3713_s1 + $0x260] ss:$16 sps:$4 sm:$0xff]  }
  0x2c   :  { %1759 = vmatprep.subr.bf16.mxu0 %v2494_v46  ;;  %1931 = vmatprep.subr.bf16.mxu1 %v2496_v48  ;;  %v2545_v46 = vld [vmem:[%s3713_s1 + $0x268] ss:$16 sps:$4 sm:$0xff]   ;;  %v2553_v48 = vld [vmem:[%s3713_s1 + $0x28c] ss:$16 sps:$4 sm:$0xff]  }
  0x2f   :  { %1760 = vmatpush1.bf16.msra.mxu0 %v2498_v49  ;;  %1932 = vmatpush1.bf16.msra.mxu1 %v2499_v50  ;;  %v2548_v49 = vld [vmem:[%s3713_s1 + $0x280] ss:$16 sps:$4 sm:$0xff]   ;;  %v2551_v50 = vld [vmem:[%s3713_s1 + $0x288] ss:$16 sps:$4 sm:$0xff]  }
  0x30   :  { %1761 = vmatprep.subr.bf16.mxu0 %v2500_v57  ;;  %1933 = vmatprep.subr.bf16.mxu1 %v2502_v61  ;;  %v2557_v57 = vld [vmem:[%s3713_s1 + $0x2a8] ss:$16 sps:$4 sm:$0xff]   ;;  %v70_v61 = vrot.slane %v2995_v54, %v69_v53  ;;  %v2616_v53 = vld [vmem:[%s3713_s1 + $0x3e4] ss:$16 sps:$4 sm:$0xff]  }
  0x32   :  { %v98_v6 = vmul.f32 %v70_v61, %v40_v2  ;;  %v106_v7 = vmul.f32 %v70_v61, %v48_v3  ;;  %v2622_v61 = vld [vmem:[%s3713_s1 + $0x404] ss:$16 sps:$4 sm:$0xff]  }
  0x33   :  { %1762 = vmatpush1.bf16.msra.mxu0 %v2504_v0  ;;  %1934 = vmatpush1.bf16.msra.mxu1 %v2505_v1  ;;  %v2563_v0 = vld [vmem:[%s3713_s1 + $0x2c8] ss:$16 sps:$4 sm:$0xff]   ;;  %v2568_v1 = vld [vmem:[%s3713_s1 + $0x2e4] ss:$16 sps:$4 sm:$0xff]  }
  0x34   :  { %1763 = vmatprep.subr.bf16.mxu0 %v2506_v5  ;;  %1935 = vmatprep.subr.bf16.mxu1 %v2508_v8  ;;  %v2571_v5 = vld [vmem:[%s3713_s1 + $0x2ec] ss:$16 sps:$4 sm:$0xff]   ;;  %v2566_v8 = vld [vmem:[%s3713_s1 + $0x2e0] ss:$16 sps:$4 sm:$0xff]   ;;  %v164_v12 = vadd.f32 %v128_v4, %v106_v7  ;;  %v2628_v3 = vld [vmem:[%s3713_s1 + $0x424] ss:$16 sps:$4 sm:$0xff]  }
  0x35   :  { %v3295_v7 = vld [vmem:[%s3714_s0 + $0x30] sm:$0xff] }
  0x37   :  { %1764 = vmatpush1.bf16.msra.mxu0 %v2510_v11  ;;  %1936 = vmatpush1.bf16.msra.mxu1 %v2511_v15  ;;  %v156_v11 = vadd.f32 %v128_v4, %v98_v6  ;;  %v180_v15 = vmax.f32 %v164_v12, 0.0  ;;  %v2631_v4 = vld [vmem:[%s3713_s1 + $0x42c] ss:$16 sps:$4 sm:$0xff]   ;;  %v3290_v6 = vld [vmem:[%s3714_s0 + $0x10] sm:$0xff] }
  0x38   :  { %1765 = vmatprep.subr.bf16.mxu0 %v2512_v17  ;;  %1937 = vmatprep.subr.bf16.mxu1 %v2514_v18  ;;  %v2575_v17 = vld [vmem:[%s3713_s1 + $0x308] ss:$16 sps:$4 sm:$0xff]   ;;  %v2580_v18 = vld [vmem:[%s3713_s1 + $0x324] ss:$16 sps:$4 sm:$0xff]  }
  0x39   :  { %v172_v14 = vmax.f32 %v156_v11, 0.0  ;;  %v50_v11 = vunpack.c.h.bf16 %v3295_v7  ;;  %v2634_v12 = vld [vmem:[%s3713_s1 + $0x444] ss:$16 sps:$4 sm:$0xff]  }
  0x3b   :  { %1766 = vmatpush1.bf16.msra.mxu0 %v2516_v19  ;;  %1938 = vmatpush1.bf16.msra.mxu1 %v2517_v22  ;;  %v188_v19 = vpack.c.bf16 %v180_v15, %v172_v14  ;;  %v2581_v22 = vld [vmem:[%s3713_s1 + $0x328] ss:$16 sps:$4 sm:$0xff]   ;;  %v2632_v15 = vld [vmem:[%s3713_s1 + $0x440] ss:$16 sps:$4 sm:$0xff]  }
  0x3c   :  { %1767 = vmatprep.subr.bf16.mxu0 %v2518_v23  ;;  %1939 = vmatprep.subr.bf16.mxu1 %v2520_v24  ;;  %v2586_v23 = vld [vmem:[%s3713_s1 + $0x344] ss:$16 sps:$4 sm:$0xff]   ;;  %v2589_v24 = vld [vmem:[%s3713_s1 + $0x34c] ss:$16 sps:$4 sm:$0xff]  }
  0x3f   :  { %1768 = vmatpush1.bf16.msra.mxu0 %v2522_v25  ;;  %1940 = vmatpush1.bf16.msra.mxu1 %v2523_v28  ;;  %v2584_v25 = vld [vmem:[%s3713_s1 + $0x340] ss:$16 sps:$4 sm:$0xff]   ;;  %v2595_v28 = vld [vmem:[%s3713_s1 + $0x36c] ss:$16 sps:$4 sm:$0xff]  }
  0x40   :  { %1780 = vmatprep.subr.bf16.mxu0 %v2526_v29  ;;  %1952 = vmatprep.subr.bf16.mxu1 %v2529_v30  ;;  %v2590_v29 = vld [vmem:[%s3713_s1 + $0x360] ss:$16 sps:$4 sm:$0xff]   ;;  %v2593_v30 = vld [vmem:[%s3713_s1 + $0x368] ss:$16 sps:$4 sm:$0xff]  }
  0x42   :  { %1770 = vmatmul.mubr.bf16.vlgmr.msra.gmra.mrb[0].mxu0 %v185_v32  ;;  %1942 = vmatmul.mubr.bf16.vlgmr.msra.gmra.mrb[0].mxu1 %v185_v32  ;;  %v2598_v32 = vld [vmem:[%s3713_s1 + $0x384] ss:$16 sps:$4 sm:$0xff]  }
  0x43   :  { %1781 = vmatpush1.bf16.msra.mxu0 %v2524_v31  ;;  %1953 = vmatpush1.bf16.msra.mxu1 %v2527_v33  ;;  %v65_v31 = vsub.s32 2, %v2962_v42  ;;  %v2601_v33 = vld [vmem:[%s3713_s1 + $0x38c] ss:$16 sps:$4 sm:$0xff]  }
  0x44   :  { %1782 = vmatprep.subr.bf16.mxu0 %v2532_v34  ;;  %1954 = vmatprep.subr.bf16.mxu1 %v2535_v35  ;;  %v2596_v34 = vld [vmem:[%s3713_s1 + $0x380] ss:$16 sps:$4 sm:$0xff]   ;;  %v2599_v35 = vld [vmem:[%s3713_s1 + $0x388] ss:$16 sps:$4 sm:$0xff]  }
  0x45   :  { %1812 = vmatprep.mubr.bf16.mxu0 %v188_v19  ;;  %1984 = vmatprep.mubr.bf16.mxu1 %v188_v19 }
  0x47   :  { %1783 = vmatpush1.bf16.msra.mxu0 %v2530_v36  ;;  %1955 = vmatpush1.bf16.msra.mxu1 %v2533_v37  ;;  %v39_v36 = vunpack.c.l.bf16 %v3141_v62  ;;  %v47_v37 = vunpack.c.l.bf16 %v3146_v63  ;;  %v2625_v62 = vld [vmem:[%s3713_s1 + $0x40c] ss:$16 sps:$4 sm:$0xff]   ;;  %v77_v63 = vsub.s32 5, %v2962_v42 }
  0x48   :  { %1784 = vmatprep.subr.bf16.mxu0 %v2538_v38  ;;  %1956 = vmatprep.subr.bf16.mxu1 %v2541_v39  ;;  %v66_v38 = vrot.slane %v2995_v54, %v65_v31  ;;  %v2604_v39 = vld [vmem:[%s3713_s1 + $0x3a4] ss:$16 sps:$4 sm:$0xff]  }
  0x4b   :  { %1785 = vmatpush1.bf16.msra.mxu0 %v2536_v40  ;;  %1957 = vmatpush1.bf16.msra.mxu1 %v2539_v41  ;;  %v2607_v40 = vld [vmem:[%s3713_s1 + $0x3ac] ss:$16 sps:$4 sm:$0xff]   ;;  %v2602_v41 = vld [vmem:[%s3713_s1 + $0x3a0] ss:$16 sps:$4 sm:$0xff]  }
  0x4c   :  { %1786 = vmatprep.subr.bf16.mxu0 %v2544_v43  ;;  %1958 = vmatprep.subr.bf16.mxu1 %v2547_v44  ;;  %v2605_v43 = vld [vmem:[%s3713_s1 + $0x3a8] ss:$16 sps:$4 sm:$0xff]   ;;  %v97_v44 = vmul.f32 %v66_v38, %v39_v36  ;;  %v2656_v36 = vld [vmem:[%s3713_s1 + $0x4c0] ss:$16 sps:$4 sm:$0xff]  }
  0x4f   :  { %1787 = vmatpush1.bf16.msra.mxu0 %v2542_v45  ;;  %1959 = vmatpush1.bf16.msra.mxu1 %v2545_v46  ;;  %v105_v45 = vmul.f32 %v66_v38, %v47_v37  ;;  %v124_v46 = vrot.slane %v3000_v55, %v65_v31  ;;  %v2655_v31 = vld [vmem:[%s3713_s1 + $0x4ac] ss:$16 sps:$4 sm:$0xff]   ;;  %v2659_v37 = vld [vmem:[%s3713_s1 + $0x4c8] ss:$16 sps:$4 sm:$0xff]   ;;  %v2664_v38 = vld [vmem:[%s3713_s1 + $0x4e4] ss:$16 sps:$4 sm:$0xff]  }
  0x50   :  { %1788 = vmatprep.subr.bf16.mxu0 %v2550_v47  ;;  %1960 = vmatprep.subr.bf16.mxu1 %v2553_v48  ;;  %v2610_v47 = vld [vmem:[%s3713_s1 + $0x3c4] ss:$16 sps:$4 sm:$0xff]   ;;  %v2613_v48 = vld [vmem:[%s3713_s1 + $0x3cc] ss:$16 sps:$4 sm:$0xff]  }
  0x53   :  { %1789 = vmatpush1.bf16.msra.mxu0 %v2548_v49  ;;  %1961 = vmatpush1.bf16.msra.mxu1 %v2551_v50  ;;  %v2608_v49 = vld [vmem:[%s3713_s1 + $0x3c0] ss:$16 sps:$4 sm:$0xff]   ;;  %v2611_v50 = vld [vmem:[%s3713_s1 + $0x3c8] ss:$16 sps:$4 sm:$0xff]  }
  0x54   :  { %1790 = vmatprep.subr.bf16.mxu0 %v2556_v51  ;;  %1962 = vmatprep.subr.bf16.mxu1 %v2559_v52  ;;  %v155_v51 = vadd.f32 %v124_v46, %v97_v44  ;;  %v163_v52 = vadd.f32 %v124_v46, %v105_v45  ;;  %v2673_v44 = vld [vmem:[%s3713_s1 + $0x50c] ss:$16 sps:$4 sm:$0xff]   ;;  %v2668_v45 = vld [vmem:[%s3713_s1 + $0x500] ss:$16 sps:$4 sm:$0xff]   ;;  %v2671_v46 = vld [vmem:[%s3713_s1 + $0x508] ss:$16 sps:$4 sm:$0xff]  }
  0x57   :  { %1791 = vmatpush1.bf16.msra.mxu0 %v2554_v56  ;;  %1963 = vmatpush1.bf16.msra.mxu1 %v2557_v57  ;;  %v2619_v56 = vld [vmem:[%s3713_s1 + $0x3ec] ss:$16 sps:$4 sm:$0xff]   ;;  %v2614_v57 = vld [vmem:[%s3713_s1 + $0x3e0] ss:$16 sps:$4 sm:$0xff]  }
  0x58   :  { %1792 = vmatprep.subr.bf16.mxu0 %v2562_v58  ;;  %1964 = vmatprep.subr.bf16.mxu1 %v2565_v59  ;;  %v2617_v58 = vld [vmem:[%s3713_s1 + $0x3e8] ss:$16 sps:$4 sm:$0xff]   ;;  %v171_v59 = vmax.f32 %v155_v51, 0.0  ;;  %v2682_v51 = vld [vmem:[%s3713_s1 + $0x544] ss:$16 sps:$4 sm:$0xff]  }
  0x5b   :  { %1793 = vmatpush1.bf16.msra.mxu0 %v2560_v60  ;;  %1965 = vmatpush1.bf16.msra.mxu1 %v2563_v0  ;;  %v179_v60 = vmax.f32 %v163_v52, 0.0  ;;  %v2620_v0 = vld [vmem:[%s3713_s1 + $0x400] ss:$16 sps:$4 sm:$0xff]   ;;  %v2685_v52 = vld [vmem:[%s3713_s1 + $0x54c] ss:$16 sps:$4 sm:$0xff]  }
  0x5c   :  { %1794 = vmatprep.subr.bf16.mxu0 %v2568_v1  ;;  %1966 = vmatprep.subr.bf16.mxu1 %v2571_v5  ;;  %v2623_v1 = vld [vmem:[%s3713_s1 + $0x408] ss:$16 sps:$4 sm:$0xff]   ;;  %v78_v5 = vrot.slane %v2995_v54, %v77_v63  ;;  %v2626_v54 = vld [vmem:[%s3713_s1 + $0x420] ss:$16 sps:$4 sm:$0xff]  }
  0x5d   :  { %v187_v2 = vpack.c.bf16 %v179_v60, %v171_v59  ;;  %v73_v59 = vsub.s32 4, %v2962_v42  ;;  %v2686_v60 = vld [vmem:[%s3713_s1 + $0x560] ss:$16 sps:$4 sm:$0xff]  }
  0x5e   :  { %v108_v14 = vmul.f32 %v78_v5, %v50_v11 }
  0x5f   :  { %1795 = vmatpush1.bf16.msra.mxu0 %v2566_v8  ;;  %1967 = vmatpush1.bf16.msra.mxu1 %v2569_v9  ;;  %v42_v8 = vunpack.c.h.bf16 %v3290_v6  ;;  %v136_v9 = vrot.slane %v3000_v55, %v77_v63  ;;  %v2637_v55 = vld [vmem:[%s3713_s1 + $0x44c] ss:$16 sps:$4 sm:$0xff]  }
  0x60   :  { %1796 = vmatprep.subr.bf16.mxu0 %v2574_v10  ;;  %1968 = vmatprep.subr.bf16.mxu1 %v2577_v13  ;;  %v2629_v10 = vld [vmem:[%s3713_s1 + $0x428] ss:$16 sps:$4 sm:$0xff]   ;;  %v2697_v63 = vld [vmem:[%s3713_s1 + $0x58c] ss:$16 sps:$4 sm:$0xff]  }
  0x61   :  { %v100_v13 = vmul.f32 %v78_v5, %v42_v8  ;;  %v166_v19 = vadd.f32 %v136_v9, %v108_v14  ;;  %v3445_v5 = vld [vmem:[%s3714_s0 + $0x18] sm:$0xff]  ;;  %v3470_v14 = vld [vmem:[%s3716_s3] sm:$0xff] }
  0x62   :  { %v3450_v8 = vld [vmem:[%s3714_s0 + $0x38] sm:$0xff] }
  0x63   :  { %1797 = vmatpush1.bf16.msra.mxu0 %v2572_v16  ;;  %1969 = vmatpush1.bf16.msra.mxu1 %v2575_v17  ;;  %v158_v16 = vadd.f32 %v136_v9, %v100_v13  ;;  %v2635_v17 = vld [vmem:[%s3713_s1 + $0x448] ss:$16 sps:$4 sm:$0xff]   ;;  %v2700_v9 = vld [vmem:[%s3713_s1 + $0x5a4] ss:$16 sps:$4 sm:$0xff]   ;;  %v52_v11 = vunpack.c.h.bf16 %v3450_v8 }
  0x64   :  { %1798 = vmatprep.subr.bf16.mxu0 %v2580_v18  ;;  %1970 = vmatprep.subr.bf16.mxu1 %v2583_v20  ;;  %v2640_v18 = vld [vmem:[%s3713_s1 + $0x464] ss:$16 sps:$4 sm:$0xff]   ;;  %v2643_v20 = vld [vmem:[%s3713_s1 + $0x46c] ss:$16 sps:$4 sm:$0xff]  }
  0x67   :  { %1799 = vmatpush1.bf16.msra.mxu0 %v2578_v21  ;;  %1971 = vmatpush1.bf16.msra.mxu1 %v2581_v22  ;;  %v174_v21 = vmax.f32 %v158_v16, 0.0  ;;  %v182_v22 = vmax.f32 %v166_v19, 0.0  ;;  %v2698_v16 = vld [vmem:[%s3713_s1 + $0x5a0] ss:$16 sps:$4 sm:$0xff]   ;;  %v2709_v19 = vld [vmem:[%s3713_s1 + $0x5cc] ss:$16 sps:$4 sm:$0xff]  }
  0x68   :  { %1800 = vmatprep.subr.bf16.mxu0 %v2586_v23  ;;  %1972 = vmatprep.subr.bf16.mxu1 %v2589_v24  ;;  %v2638_v23 = vld [vmem:[%s3713_s1 + $0x460] ss:$16 sps:$4 sm:$0xff]   ;;  %v2641_v24 = vld [vmem:[%s3713_s1 + $0x468] ss:$16 sps:$4 sm:$0xff]  }
  0x6b   :  { %1801 = vmatpush1.bf16.msra.mxu0 %v2584_v25  ;;  %1973 = vmatpush1.bf16.msra.mxu1 %v2587_v26  ;;  %v190_v25 = vpack.c.bf16 %v182_v22, %v174_v21  ;;  %v2646_v26 = vld [vmem:[%s3713_s1 + $0x484] ss:$16 sps:$4 sm:$0xff]  }
  0x6c   :  { %1802 = vmatprep.subr.bf16.mxu0 %v2592_v27  ;;  %1974 = vmatprep.subr.bf16.mxu1 %v2595_v28  ;;  %v2649_v27 = vld [vmem:[%s3713_s1 + $0x48c] ss:$16 sps:$4 sm:$0xff]   ;;  %v2644_v28 = vld [vmem:[%s3713_s1 + $0x480] ss:$16 sps:$4 sm:$0xff]  }
  0x6f   :  { %1803 = vmatpush1.bf16.msra.mxu0 %v2590_v29  ;;  %1975 = vmatpush1.bf16.msra.mxu1 %v2593_v30  ;;  %v2647_v29 = vld [vmem:[%s3713_s1 + $0x488] ss:$16 sps:$4 sm:$0xff]   ;;  %v2652_v30 = vld [vmem:[%s3713_s1 + $0x4a4] ss:$16 sps:$4 sm:$0xff]  }
  0x70   :  { %1804 = vmatprep.subr.bf16.mxu0 %v2598_v32  ;;  %1976 = vmatprep.subr.bf16.mxu1 %v2601_v33  ;;  %v2650_v32 = vld [vmem:[%s3713_s1 + $0x4a0] ss:$16 sps:$4 sm:$0xff]   ;;  %v2653_v33 = vld [vmem:[%s3713_s1 + $0x4a8] ss:$16 sps:$4 sm:$0xff]  }
  0x73   :  { %1805 = vmatpush1.bf16.msra.mxu0 %v2596_v34  ;;  %1977 = vmatpush1.bf16.msra.mxu1 %v2599_v35  ;;  %v2658_v34 = vld [vmem:[%s3713_s1 + $0x4c4] ss:$16 sps:$4 sm:$0xff]   ;;  %v2661_v35 = vld [vmem:[%s3713_s1 + $0x4cc] ss:$16 sps:$4 sm:$0xff]  }
  0x74   :  { %1806 = vmatprep.subr.bf16.mxu0 %v2604_v39  ;;  %1978 = vmatprep.subr.bf16.mxu1 %v2607_v40  ;;  %v2667_v39 = vld [vmem:[%s3713_s1 + $0x4ec] ss:$16 sps:$4 sm:$0xff]   ;;  %v2662_v40 = vld [vmem:[%s3713_s1 + $0x4e0] ss:$16 sps:$4 sm:$0xff]  }
  0x77   :  { %1807 = vmatpush1.bf16.msra.mxu0 %v2602_v41  ;;  %1979 = vmatpush1.bf16.msra.mxu1 %v2605_v43  ;;  %v2665_v41 = vld [vmem:[%s3713_s1 + $0x4e8] ss:$16 sps:$4 sm:$0xff]   ;;  %v2670_v43 = vld [vmem:[%s3713_s1 + $0x504] ss:$16 sps:$4 sm:$0xff]  }
  0x78   :  { %1808 = vmatprep.subr.bf16.mxu0 %v2610_v47  ;;  %1980 = vmatprep.subr.bf16.mxu1 %v2613_v48  ;;  %v2676_v47 = vld [vmem:[%s3713_s1 + $0x524] ss:$16 sps:$4 sm:$0xff]   ;;  %v2679_v48 = vld [vmem:[%s3713_s1 + $0x52c] ss:$16 sps:$4 sm:$0xff]  }
  0x7b   :  { %1809 = vmatpush1.bf16.msra.mxu0 %v2608_v49  ;;  %1981 = vmatpush1.bf16.msra.mxu1 %v2611_v50  ;;  %v2674_v49 = vld [vmem:[%s3713_s1 + $0x520] ss:$16 sps:$4 sm:$0xff]   ;;  %v2677_v50 = vld [vmem:[%s3713_s1 + $0x528] ss:$16 sps:$4 sm:$0xff]  }
  0x7c   :  { %1810 = vmatprep.subr.bf16.mxu0 %v2616_v53  ;;  %1982 = vmatprep.subr.bf16.mxu1 %v2619_v56  ;;  %v2680_v53 = vld [vmem:[%s3713_s1 + $0x540] ss:$16 sps:$4 sm:$0xff]   ;;  %v2683_v56 = vld [vmem:[%s3713_s1 + $0x548] ss:$16 sps:$4 sm:$0xff]  }
  0x7f   :  { %1811 = vmatpush1.bf16.msra.mxu0 %v2614_v57  ;;  %1983 = vmatpush1.bf16.msra.mxu1 %v2617_v58  ;;  %v2688_v57 = vld [vmem:[%s3713_s1 + $0x564] ss:$16 sps:$4 sm:$0xff]   ;;  %v2691_v58 = vld [vmem:[%s3713_s1 + $0x56c] ss:$16 sps:$4 sm:$0xff]  }
  0x80   :  { %1823 = vmatprep.subr.bf16.mxu0 %v2622_v61  ;;  %1995 = vmatprep.subr.bf16.mxu1 %v2625_v62  ;;  %v2689_v61 = vld [vmem:[%s3713_s1 + $0x568] ss:$16 sps:$4 sm:$0xff]   ;;  %v2694_v62 = vld [vmem:[%s3713_s1 + $0x584] ss:$16 sps:$4 sm:$0xff]  }
  0x82   :  { %1813 = vmatmul.mubr.bf16.vlgmr.msra.gmra.mrb[0].mxu0 %v187_v2  ;;  %1985 = vmatmul.mubr.bf16.vlgmr.msra.gmra.mrb[0].mxu1 %v187_v2  ;;  %v49_v2 = vunpack.c.l.bf16 %v3295_v7  ;;  %v2695_v7 = vld [vmem:[%s3713_s1 + $0x588] ss:$16 sps:$4 sm:$0xff]  }
  0x83   :  { %1824 = vmatpush1.bf16.msra.mxu0 %v2620_v0  ;;  %1996 = vmatpush1.bf16.msra.mxu1 %v2623_v1  ;;  %v85_v0 = vsub.s32 7, %v2962_v42  ;;  %v41_v1 = vunpack.c.l.bf16 %v3290_v6  ;;  %v2692_v6 = vld [vmem:[%s3713_s1 + $0x580] ss:$16 sps:$4 sm:$0xff]  }
  0x84   :  { %1825 = vmatprep.subr.bf16.mxu0 %v2628_v3  ;;  %1997 = vmatprep.subr.bf16.mxu1 %v2631_v4  ;;  %v3439_v3 = vld [vmem:[%s3715_s2] sm:$0xff] }
  0x85   :  { %1855 = vmatprep.mubr.bf16.mxu0 %v190_v25  ;;  %2027 = vmatprep.mubr.bf16.mxu1 %v190_v25  ;;  %v74_v4 = vrot.slane %v3439_v3, %v73_v59  ;;  %v144_v22 = vrot.slane %v3470_v14, %v85_v0  ;;  %v2704_v25 = vld [vmem:[%s3713_s1 + $0x5c0] ss:$16 sps:$4 sm:$0xff]  }
  0x87   :  { %1826 = vmatpush1.bf16.msra.mxu0 %v2626_v54  ;;  %1998 = vmatpush1.bf16.msra.mxu1 %v2629_v10  ;;  %v2703_v54 = vld [vmem:[%s3713_s1 + $0x5ac] ss:$16 sps:$4 sm:$0xff]   ;;  %v44_v10 = vunpack.c.h.bf16 %v3445_v5  ;;  %v107_v13 = vmul.f32 %v74_v4, %v49_v2  ;;  %v2754_v2 = vld [vmem:[%s3713_s1 + $0x6c4] ss:$16 sps:$4 sm:$0xff]  }
  0x88   :  { %1827 = vmatprep.subr.bf16.mxu0 %v2634_v12  ;;  %1999 = vmatprep.subr.bf16.mxu1 %v2637_v55  ;;  %v86_v12 = vrot.slane %v3439_v3, %v85_v0  ;;  %v99_v55 = vmul.f32 %v74_v4, %v41_v1  ;;  %v2746_v0 = vld [vmem:[%s3713_s1 + $0x6a0] ss:$16 sps:$4 sm:$0xff]   ;;  %v2749_v1 = vld [vmem:[%s3713_s1 + $0x6a8] ss:$16 sps:$4 sm:$0xff]   ;;  %v2757_v4 = vld [vmem:[%s3713_s1 + $0x6cc] ss:$16 sps:$4 sm:$0xff]  }
  0x8a   :  { %v110_v21 = vmul.f32 %v86_v12, %v52_v11  ;;  %v2761_v11 = vld [vmem:[%s3713_s1 + $0x6e8] ss:$16 sps:$4 sm:$0xff]  }
  0x8b   :  { %1828 = vmatpush1.bf16.msra.mxu0 %v2632_v15  ;;  %2000 = vmatpush1.bf16.msra.mxu1 %v2635_v17  ;;  %v132_v15 = vrot.slane %v3470_v14, %v73_v59  ;;  %v2701_v17 = vld [vmem:[%s3713_s1 + $0x5a8] ss:$16 sps:$4 sm:$0xff]   ;;  %v2745_v59 = vld [vmem:[%s3713_s1 + $0x68c] ss:$16 sps:$4 sm:$0xff]  }
  0x8c   :  { %1829 = vmatprep.subr.bf16.mxu0 %v2640_v18  ;;  %2001 = vmatprep.subr.bf16.mxu1 %v2643_v20  ;;  %v2706_v18 = vld [vmem:[%s3713_s1 + $0x5c4] ss:$16 sps:$4 sm:$0xff]   ;;  %v102_v20 = vmul.f32 %v86_v12, %v44_v10  ;;  %v2758_v10 = vld [vmem:[%s3713_s1 + $0x6e0] ss:$16 sps:$4 sm:$0xff]  }
  0x8d   :  { %v2766_v12 = vld [vmem:[%s3713_s1 + $0x704] ss:$16 sps:$4 sm:$0xff]  }
  0x8f   :  { %1830 = vmatpush1.bf16.msra.mxu0 %v2638_v23  ;;  %2002 = vmatpush1.bf16.msra.mxu1 %v2641_v24  ;;  %v157_v23 = vadd.f32 %v132_v15, %v99_v55  ;;  %v165_v24 = vadd.f32 %v132_v15, %v107_v13  ;;  %v2769_v55 = vld [vmem:[%s3713_s1 + $0x70c] ss:$16 sps:$4 sm:$0xff]   ;;  %v2764_v13 = vld [vmem:[%s3713_s1 + $0x700] ss:$16 sps:$4 sm:$0xff]   ;;  %v2767_v15 = vld [vmem:[%s3713_s1 + $0x708] ss:$16 sps:$4 sm:$0xff]  }
  0x90   :  { %1831 = vmatprep.subr.bf16.mxu0 %v2646_v26  ;;  %2003 = vmatprep.subr.bf16.mxu1 %v2649_v27  ;;  %v2707_v26 = vld [vmem:[%s3713_s1 + $0x5c8] ss:$16 sps:$4 sm:$0xff]   ;;  %v2712_v27 = vld [vmem:[%s3713_s1 + $0x5e4] ss:$16 sps:$4 sm:$0xff]  }
  0x93   :  { %1832 = vmatpush1.bf16.msra.mxu0 %v2644_v28  ;;  %2004 = vmatpush1.bf16.msra.mxu1 %v2647_v29  ;;  %v2715_v28 = vld [vmem:[%s3713_s1 + $0x5ec] ss:$16 sps:$4 sm:$0xff]   ;;  %v160_v29 = vadd.f32 %v144_v22, %v102_v20  ;;  %v2778_v20 = vld [vmem:[%s3713_s1 + $0x744] ss:$16 sps:$4 sm:$0xff]  }
  0x94   :  { %1833 = vmatprep.subr.bf16.mxu0 %v2652_v30  ;;  %2005 = vmatprep.subr.bf16.mxu1 %v2655_v31  ;;  %v168_v30 = vadd.f32 %v144_v22, %v110_v21  ;;  %v173_v31 = vmax.f32 %v157_v23, 0.0  ;;  %v2781_v21 = vld [vmem:[%s3713_s1 + $0x74c] ss:$16 sps:$4 sm:$0xff]   ;;  %v2776_v22 = vld [vmem:[%s3713_s1 + $0x740] ss:$16 sps:$4 sm:$0xff]  }
  0x95   :  { %v2779_v23 = vld [vmem:[%s3713_s1 + $0x748] ss:$16 sps:$4 sm:$0xff]  }
  0x97   :  { %1834 = vmatpush1.bf16.msra.mxu0 %v2650_v32  ;;  %2006 = vmatpush1.bf16.msra.mxu1 %v2653_v33  ;;  %v181_v32 = vmax.f32 %v165_v24, 0.0  ;;  %v2710_v33 = vld [vmem:[%s3713_s1 + $0x5e0] ss:$16 sps:$4 sm:$0xff]   ;;  %v2784_v24 = vld [vmem:[%s3713_s1 + $0x764] ss:$16 sps:$4 sm:$0xff]  }
  0x98   :  { %1835 = vmatprep.subr.bf16.mxu0 %v2658_v34  ;;  %2007 = vmatprep.subr.bf16.mxu1 %v2661_v35  ;;  %v2713_v34 = vld [vmem:[%s3713_s1 + $0x5e8] ss:$16 sps:$4 sm:$0xff]   ;;  %v2718_v35 = vld [vmem:[%s3713_s1 + $0x604] ss:$16 sps:$4 sm:$0xff]  }
  0x9b   :  { %1836 = vmatpush1.bf16.msra.mxu0 %v2656_v36  ;;  %2008 = vmatpush1.bf16.msra.mxu1 %v2659_v37  ;;  %v2721_v36 = vld [vmem:[%s3713_s1 + $0x60c] ss:$16 sps:$4 sm:$0xff]   ;;  %v176_v37 = vmax.f32 %v160_v29, 0.0  ;;  %v2790_v29 = vld [vmem:[%s3713_s1 + $0x784] ss:$16 sps:$4 sm:$0xff]  }
  0x9c   :  { %1837 = vmatprep.subr.bf16.mxu0 %v2664_v38  ;;  %2009 = vmatprep.subr.bf16.mxu1 %v2667_v39  ;;  %v184_v38 = vmax.f32 %v168_v30, 0.0  ;;  %v189_v39 = vpack.c.bf16 %v181_v32, %v173_v31  ;;  %v43_v30 = vunpack.c.l.bf16 %v3445_v5  ;;  %v51_v31 = vunpack.c.l.bf16 %v3450_v8  ;;  %v2796_v5 = vld [vmem:[%s3713_s1 + $0x7a4] ss:$16 sps:$4 sm:$0xff]  }
  0x9f   :  { %1838 = vmatpush1.bf16.msra.mxu0 %v2662_v40  ;;  %2010 = vmatpush1.bf16.msra.mxu1 %v2665_v41  ;;  %v2716_v40 = vld [vmem:[%s3713_s1 + $0x600] ss:$16 sps:$4 sm:$0xff]   ;;  %v2719_v41 = vld [vmem:[%s3713_s1 + $0x608] ss:$16 sps:$4 sm:$0xff]  }
  0xa0   :  { %1839 = vmatprep.subr.bf16.mxu0 %v2670_v43  ;;  %2011 = vmatprep.subr.bf16.mxu1 %v2673_v44  ;;  %v2724_v43 = vld [vmem:[%s3713_s1 + $0x624] ss:$16 sps:$4 sm:$0xff]   ;;  %v2727_v44 = vld [vmem:[%s3713_s1 + $0x62c] ss:$16 sps:$4 sm:$0xff]  }
  0xa3   :  { %1840 = vmatpush1.bf16.msra.mxu0 %v2668_v45  ;;  %2012 = vmatpush1.bf16.msra.mxu1 %v2671_v46  ;;  %v192_v45 = vpack.c.bf16 %v184_v38, %v176_v37  ;;  %v2722_v46 = vld [vmem:[%s3713_s1 + $0x620] ss:$16 sps:$4 sm:$0xff]   ;;  %v2797_v38 = vld [vmem:[%s3713_s1 + $0x7a8] ss:$16 sps:$4 sm:$0xff]  }
  0xa4   :  { %1841 = vmatprep.subr.bf16.mxu0 %v2676_v47  ;;  %2013 = vmatprep.subr.bf16.mxu1 %v2679_v48  ;;  %v2725_v47 = vld [vmem:[%s3713_s1 + $0x628] ss:$16 sps:$4 sm:$0xff]   ;;  %v2730_v48 = vld [vmem:[%s3713_s1 + $0x644] ss:$16 sps:$4 sm:$0xff]   ;;  %v2794_v37 = vld [vmem:[%s3713_s1 + $0x7a0] ss:$16 sps:$4 sm:$0xff]  }
  0xa7   :  { %1842 = vmatpush1.bf16.msra.mxu0 %v2674_v49  ;;  %2014 = vmatpush1.bf16.msra.mxu1 %v2677_v50  ;;  %v2733_v49 = vld [vmem:[%s3713_s1 + $0x64c] ss:$16 sps:$4 sm:$0xff]   ;;  %v2728_v50 = vld [vmem:[%s3713_s1 + $0x640] ss:$16 sps:$4 sm:$0xff]  }
  0xa8   :  { %1843 = vmatprep.subr.bf16.mxu0 %v2682_v51  ;;  %2015 = vmatprep.subr.bf16.mxu1 %v2685_v52  ;;  %v2731_v51 = vld [vmem:[%s3713_s1 + $0x648] ss:$16 sps:$4 sm:$0xff]   ;;  %v2736_v52 = vld [vmem:[%s3713_s1 + $0x664] ss:$16 sps:$4 sm:$0xff]  }
  0xab   :  { %1844 = vmatpush1.bf16.msra.mxu0 %v2680_v53  ;;  %2016 = vmatpush1.bf16.msra.mxu1 %v2683_v56  ;;  %v2739_v53 = vld [vmem:[%s3713_s1 + $0x66c] ss:$16 sps:$4 sm:$0xff]   ;;  %v2734_v56 = vld [vmem:[%s3713_s1 + $0x660] ss:$16 sps:$4 sm:$0xff]  }
  0xac   :  { %1845 = vmatprep.subr.bf16.mxu0 %v2688_v57  ;;  %2017 = vmatprep.subr.bf16.mxu1 %v2691_v58  ;;  %v2737_v57 = vld [vmem:[%s3713_s1 + $0x668] ss:$16 sps:$4 sm:$0xff]   ;;  %v2742_v58 = vld [vmem:[%s3713_s1 + $0x684] ss:$16 sps:$4 sm:$0xff]  }
  0xaf   :  { %1846 = vmatpush1.bf16.msra.mxu0 %v2686_v60  ;;  %2018 = vmatpush1.bf16.msra.mxu1 %v2689_v61  ;;  %v2740_v60 = vld [vmem:[%s3713_s1 + $0x680] ss:$16 sps:$4 sm:$0xff]   ;;  %v2743_v61 = vld [vmem:[%s3713_s1 + $0x688] ss:$16 sps:$4 sm:$0xff]  }
  0xb0   :  { %1847 = vmatprep.subr.bf16.mxu0 %v2694_v62  ;;  %2019 = vmatprep.subr.bf16.mxu1 %v2697_v63  ;;  %v2748_v62 = vld [vmem:[%s3713_s1 + $0x6a4] ss:$16 sps:$4 sm:$0xff]   ;;  %v2751_v63 = vld [vmem:[%s3713_s1 + $0x6ac] ss:$16 sps:$4 sm:$0xff]  }
  0xb3   :  { %1848 = vmatpush1.bf16.msra.mxu0 %v2692_v6  ;;  %2020 = vmatpush1.bf16.msra.mxu1 %v2695_v7  ;;  %v2752_v6 = vld [vmem:[%s3713_s1 + $0x6c0] ss:$16 sps:$4 sm:$0xff]   ;;  %v2755_v7 = vld [vmem:[%s3713_s1 + $0x6c8] ss:$16 sps:$4 sm:$0xff]  }
  0xb4   :  { %1849 = vmatprep.subr.bf16.mxu0 %v2700_v9  ;;  %2021 = vmatprep.subr.bf16.mxu1 %v2703_v54  ;;  %v2760_v9 = vld [vmem:[%s3713_s1 + $0x6e4] ss:$16 sps:$4 sm:$0xff]   ;;  %v2763_v54 = vld [vmem:[%s3713_s1 + $0x6ec] ss:$16 sps:$4 sm:$0xff]  }
  0xb7   :  { %1850 = vmatpush1.bf16.msra.mxu0 %v2698_v16  ;;  %2022 = vmatpush1.bf16.msra.mxu1 %v2701_v17  ;;  %v2772_v16 = vld [vmem:[%s3713_s1 + $0x724] ss:$16 sps:$4 sm:$0xff]   ;;  %v2775_v17 = vld [vmem:[%s3713_s1 + $0x72c] ss:$16 sps:$4 sm:$0xff]  }
  0xb8   :  { %1851 = vmatprep.subr.bf16.mxu0 %v2706_v18  ;;  %2023 = vmatprep.subr.bf16.mxu1 %v2709_v19  ;;  %v2770_v18 = vld [vmem:[%s3713_s1 + $0x720] ss:$16 sps:$4 sm:$0xff]   ;;  %v2773_v19 = vld [vmem:[%s3713_s1 + $0x728] ss:$16 sps:$4 sm:$0xff]  }
  0xbb   :  { %1852 = vmatpush1.bf16.msra.mxu0 %v2704_v25  ;;  %2024 = vmatpush1.bf16.msra.mxu1 %v2707_v26  ;;  %v2787_v25 = vld [vmem:[%s3713_s1 + $0x76c] ss:$16 sps:$4 sm:$0xff]   ;;  %v81_v26 = vsub.s32 6, %v2962_v42 }
  0xbc   :  { %1853 = vmatprep.subr.bf16.mxu0 %v2712_v27  ;;  %2025 = vmatprep.subr.bf16.mxu1 %v2715_v28  ;;  %v2782_v27 = vld [vmem:[%s3713_s1 + $0x760] ss:$16 sps:$4 sm:$0xff]   ;;  %v2785_v28 = vld [vmem:[%s3713_s1 + $0x768] ss:$16 sps:$4 sm:$0xff]   ;;  %v2793_v42 = vld [vmem:[%s3713_s1 + $0x78c] ss:$16 sps:$4 sm:$0xff]  }
  0xbd   :  { %v82_v32 = vrot.slane %v3439_v3, %v81_v26  ;;  %v2799_v3 = vld [vmem:[%s3713_s1 + $0x7ac] ss:$16 sps:$4 sm:$0xff]  }
  0xbf   :  { %1854 = vmatpush1.bf16.msra.mxu0 %v2710_v33  ;;  %2026 = vmatpush1.bf16.msra.mxu1 %v2713_v34  ;;  %v2788_v33 = vld [vmem:[%s3713_s1 + $0x780] ss:$16 sps:$4 sm:$0xff]   ;;  %v2791_v34 = vld [vmem:[%s3713_s1 + $0x788] ss:$16 sps:$4 sm:$0xff]   ;;  %v101_v8 = vmul.f32 %v82_v32, %v43_v30 }
  0xc0   :  { %1866 = vmatprep.subr.bf16.mxu0 %v2718_v35  ;;  %2038 = vmatprep.subr.bf16.mxu1 %v2721_v36  ;;  %v109_v35 = vmul.f32 %v82_v32, %v51_v31  ;;  %v140_v36 = vrot.slane %v3470_v14, %v81_v26  ;;  %v2805_v14 = vld [vmem:[%s3713_s1 + $0x7cc] ss:$16 sps:$4 sm:$0xff]  }
  0xc2   :  { %1856 = vmatmul.mubr.bf16.vlgmr.msra.gmra.mrb[0].mxu0 %v189_v39  ;;  %2028 = vmatmul.mubr.bf16.vlgmr.msra.gmra.mrb[0].mxu1 %v189_v39  ;;  %v2802_v39 = vld [vmem:[%s3713_s1 + $0x7c4] ss:$16 sps:$4 sm:$0xff]  }
  0xc3   :  { %1867 = vmatpush1.bf16.msra.mxu0 %v2716_v40  ;;  %2039 = vmatpush1.bf16.msra.mxu1 %v2719_v41  ;;  %v159_v40 = vadd.f32 %v140_v36, %v101_v8  ;;  %v167_v41 = vadd.f32 %v140_v36, %v109_v35 }
  0xc4   :  { %1868 = vmatprep.subr.bf16.mxu0 %v2724_v43  ;;  %2040 = vmatprep.subr.bf16.mxu1 %v2727_v44  ;;  %v2800_v43 = vld [vmem:[%s3713_s1 + $0x7c0] ss:$16 sps:$4 sm:$0xff]   ;;  %v2803_v44 = vld [vmem:[%s3713_s1 + $0x7c8] ss:$16 sps:$4 sm:$0xff]  }
  0xc5   :  { %1898 = vmatprep.mubr.bf16.mxu0 %v192_v45  ;;  %2070 = vmatprep.mubr.bf16.mxu1 %v192_v45  ;;  %v2808_v45 = vld [vmem:[%s3713_s1 + $0x7e4] ss:$16 sps:$4 sm:$0xff]  }
  0xc7   :  { %1869 = vmatpush1.bf16.msra.mxu0 %v2722_v46  ;;  %2041 = vmatpush1.bf16.msra.mxu1 %v2725_v47  ;;  %v2811_v46 = vld [vmem:[%s3713_s1 + $0x7ec] ss:$16 sps:$4 sm:$0xff]   ;;  %v175_v47 = vmax.f32 %v159_v40, 0.0 }
  0xc8   :  { %1870 = vmatprep.subr.bf16.mxu0 %v2730_v48  ;;  %2042 = vmatprep.subr.bf16.mxu1 %v2733_v49  ;;  %v183_v48 = vmax.f32 %v167_v41, 0.0  ;;  %v2806_v49 = vld [vmem:[%s3713_s1 + $0x7e0] ss:$16 sps:$4 sm:$0xff]  }
  0xcb   :  { %1871 = vmatpush1.bf16.msra.mxu0 %v2728_v50  ;;  %2043 = vmatpush1.bf16.msra.mxu1 %v2731_v51  ;;  %v2809_v50 = vld [vmem:[%s3713_s1 + $0x7e8] ss:$16 sps:$4 sm:$0xff]   ;;  %v191_v51 = vpack.c.bf16 %v183_v48, %v175_v47 }
  0xcc   :  { %1872 = vmatprep.subr.bf16.mxu0 %v2736_v52  ;;  %2044 = vmatprep.subr.bf16.mxu1 %v2739_v53 }
  0xcf   :  { %1873 = vmatpush1.bf16.msra.mxu0 %v2734_v56  ;;  %2045 = vmatpush1.bf16.msra.mxu1 %v2737_v57 }
  0xd0   :  { %1874 = vmatprep.subr.bf16.mxu0 %v2742_v58  ;;  %2046 = vmatprep.subr.bf16.mxu1 %v2745_v59 }
  0xd3   :  { %1875 = vmatpush1.bf16.msra.mxu0 %v2740_v60  ;;  %2047 = vmatpush1.bf16.msra.mxu1 %v2743_v61 }
  0xd4   :  { %1876 = vmatprep.subr.bf16.mxu0 %v2748_v62  ;;  %2048 = vmatprep.subr.bf16.mxu1 %v2751_v63 }
  0xd7   :  { %1877 = vmatpush1.bf16.msra.mxu0 %v2746_v0  ;;  %2049 = vmatpush1.bf16.msra.mxu1 %v2749_v1 }
  0xd8   :  { %1878 = vmatprep.subr.bf16.mxu0 %v2754_v2  ;;  %2050 = vmatprep.subr.bf16.mxu1 %v2757_v4 }
  0xdb   :  { %1879 = vmatpush1.bf16.msra.mxu0 %v2752_v6  ;;  %2051 = vmatpush1.bf16.msra.mxu1 %v2755_v7 }
  0xdc   :  { %1880 = vmatprep.subr.bf16.mxu0 %v2760_v9  ;;  %2052 = vmatprep.subr.bf16.mxu1 %v2763_v54 }
  0xdf   :  { %1881 = vmatpush1.bf16.msra.mxu0 %v2758_v10  ;;  %2053 = vmatpush1.bf16.msra.mxu1 %v2761_v11 }
  0xe0   :  { %1882 = vmatprep.subr.bf16.mxu0 %v2766_v12  ;;  %2054 = vmatprep.subr.bf16.mxu1 %v2769_v55 }
  0xe3   :  { %1883 = vmatpush1.bf16.msra.mxu0 %v2764_v13  ;;  %2055 = vmatpush1.bf16.msra.mxu1 %v2767_v15 }
  0xe4   :  { %1884 = vmatprep.subr.bf16.mxu0 %v2772_v16  ;;  %2056 = vmatprep.subr.bf16.mxu1 %v2775_v17 }
  0xe7   :  { %1885 = vmatpush1.bf16.msra.mxu0 %v2770_v18  ;;  %2057 = vmatpush1.bf16.msra.mxu1 %v2773_v19 }
  0xe8   :  { %1886 = vmatprep.subr.bf16.mxu0 %v2778_v20  ;;  %2058 = vmatprep.subr.bf16.mxu1 %v2781_v21 }
  0xeb   :  { %1887 = vmatpush1.bf16.msra.mxu0 %v2776_v22  ;;  %2059 = vmatpush1.bf16.msra.mxu1 %v2779_v23 }
  0xec   :  { %1888 = vmatprep.subr.bf16.mxu0 %v2784_v24  ;;  %2060 = vmatprep.subr.bf16.mxu1 %v2787_v25 }
  0xef   :  { %1889 = vmatpush1.bf16.msra.mxu0 %v2782_v27  ;;  %2061 = vmatpush1.bf16.msra.mxu1 %v2785_v28 }
  0xf0   :  { %1890 = vmatprep.subr.bf16.mxu0 %v2790_v29  ;;  %2062 = vmatprep.subr.bf16.mxu1 %v2793_v42 }
  0xf3   :  { %1891 = vmatpush1.bf16.msra.mxu0 %v2788_v33  ;;  %2063 = vmatpush1.bf16.msra.mxu1 %v2791_v34 }
  0xf4   :  { %1892 = vmatprep.subr.bf16.mxu0 %v2796_v5  ;;  %2064 = vmatprep.subr.bf16.mxu1 %v2799_v3 }
  0xf7   :  { %1893 = vmatpush1.bf16.msra.mxu0 %v2794_v37  ;;  %2065 = vmatpush1.bf16.msra.mxu1 %v2797_v38 }
  0xf8   :  { %1894 = vmatprep.subr.bf16.mxu0 %v2802_v39  ;;  %2066 = vmatprep.subr.bf16.mxu1 %v2805_v14 }
  0xfb   :  { %1895 = vmatpush1.bf16.msra.mxu0 %v2800_v43  ;;  %2067 = vmatpush1.bf16.msra.mxu1 %v2803_v44 }
  0xfc   :  { %1896 = vmatprep.subr.bf16.mxu0 %v2808_v45  ;;  %2068 = vmatprep.subr.bf16.mxu1 %v2811_v46 }
  0xff   :  { %1897 = vmatpush1.bf16.msra.mxu0 %v2806_v49  ;;  %2069 = vmatpush1.bf16.msra.mxu1 %v2809_v50 }
 0x102   :  { %1899 = vmatmul.mubr.bf16.vlgmr.msra.gmra.mrb[0].mxu0 %v191_v51  ;;  %2071 = vmatmul.mubr.bf16.vlgmr.msra.gmra.mrb[0].mxu1 %v191_v51 }
 0x1d5   :  { %v1900_v52 = vpop.f32.mrb[0].mxu0  ;;  %v2072_v53 = vpop.f32.mrb[0].mxu1 }
 0x1d6   :  { %v1902_v56 = vpop.f32.mrb[1].mxu0  ;;  %v2074_v57 = vpop.f32.mrb[1].mxu1 }
 0x1d7   :  { %v2400_v58 = vpack.c.bf16 %v1902_v56, %v1900_v52  ;;  %v2401_v59 = vpack.c.bf16 %v2074_v57, %v2072_v53  ;;  %v1904_v60 = vpop.f32.mrb[2].mxu0  ;;  %v2076_v61 = vpop.f32.mrb[2].mxu1 }
 0x1d8   :  { %v1906_v62 = vpop.f32.mrb[3].mxu0  ;;  %v2078_v63 = vpop.f32.mrb[3].mxu1 }
 0x1d9   :  { %2132 = vst [vmem:[%s3717_s4] sm:$0xff] %v2400_v58  ;;  %2133 = vst [vmem:[%s3717_s4 + $0x8] sm:$0xff] %v2401_v59  ;;  %v2402_v0 = vpack.c.bf16 %v1906_v62, %v1904_v60  ;;  %v2403_v1 = vpack.c.bf16 %v2078_v63, %v2076_v61 }
 0x1db   :  { %2134 = vst [vmem:[%s3717_s4 + $0x10] sm:$0xff] %v2402_v0  ;;  %2135 = vst [vmem:[%s3717_s4 + $0x18] sm:$0xff] %v2403_v1 }

// kernel: xray_analyzer_forward.242
= control target key start
LH: loop header
LB: loop body
LE: loop exit
PB: predicated region body
PF: predicated region fallthrough
CT: control target
= control target key end

     0   :  { %v25_v0 = vlaneseq  ;;  %v106_v1 = vmov 857870592   ;;  %v107_v9 = vmov 2003195204   ;;  %vm81_vm0 = vcmask 1041409   ;;  %s146_s0 = inlined_call_operand.vmem [shape: bf16[2,1,1024], index: 0, kind: input, shape index: {}]   ;;  %s147_s1 = inlined_call_operand.vmem [shape: f32[1,1,1024], index: 1, kind: input, shape index: {}]   ;;  %s148_s2 = inlined_call_operand.vmem [shape: f32[1,1,1024], index: 2, kind: input, shape index: {}]   ;;  %s149_s3 = inlined_call_operand.vmem [shape: f32[2,1024], index: 3, kind: output, shape index: {}]  }
   0x1   :  { %v23_v2 = vunpack.c.l.s4 %v106_v1  ;;  %v14_v3 = vld [vmem:[%s146_s0] sm:$0xff]  ;;  %v15_v4 = vld [vmem:[%s146_s0 + $0x8] sm:$0xff]  ;;  %v30_v10 = vunpack.c.l.s4 %v107_v9  ;;  %vm83_vm1 = vcmask 1043459   ;;  %vm85_vm2 = vcmask 1045509  }
   0x2   :  { %v26_v5 = vshrl.u32 %v25_v0, 7  ;;  %v20_v7 = vld [vmem:[%s147_s1] sm:$0xff]  ;;  %v16_v11 = vunpack.c.l.bf16 %v14_v3  ;;  %v18_v12 = vunpack.c.l.bf16 %v15_v4  ;;  %v17_v17 = vunpack.c.h.bf16 %v14_v3 }
   0x3   :  { %v24_v6 = vunpack.c.0.s8 %v23_v2  ;;  %v42_v8 = vld [vmem:[%s148_s2] sm:$0xff]  ;;  %v31_v14 = vunpack.c.0.s8 %v30_v10  ;;  %v19_v18 = vunpack.c.h.bf16 %v15_v4  ;;  %vm87_vm3 = vcmask 1047559  }
   0x5   :  { %v27_v13 = vsub.s32 %v24_v6, %v26_v5  ;;  %v34_v19 = vsub.s32 %v31_v14, %v26_v5 }
   0x7   :  { %v28_v15 = vrot.slane %v20_v7, %v27_v13  ;;  %v50_v16 = vrot.slane %v42_v8, %v27_v13  ;;  %v35_v22 = vrot.slane %v20_v7, %v34_v19  ;;  %v57_v23 = vrot.slane %v42_v8, %v34_v19 }
   0x9   :  { %v38_v20 = vmul.f32 %v28_v15, %v16_v11  ;;  %v40_v21 = vmul.f32 %v28_v15, %v18_v12  ;;  %v39_v26 = vmul.f32 %v35_v22, %v17_v17  ;;  %v41_v27 = vmul.f32 %v35_v22, %v19_v18 }
   0xb   :  { %v60_v24 = vadd.f32 %v50_v16, %v38_v20  ;;  %v62_v25 = vadd.f32 %v50_v16, %v40_v21  ;;  %v61_v30 = vadd.f32 %v57_v23, %v39_v26  ;;  %v63_v31 = vadd.f32 %v57_v23, %v41_v27 }
   0xd   :  { %v64_v28 = vmax.f32 %v60_v24, 0.0  ;;  %v66_v29 = vmax.f32 %v62_v25, 0.0  ;;  %v65_v33 = vmax.f32 %v61_v30, 0.0  ;;  %v67_v34 = vmax.f32 %v63_v31, 0.0 }
   0xf   :  { %v80_v32 = vrot.slane %v66_v29, 7  ;;  %v91_v37 = vrot.slane %v67_v34, 7 }
  0x11   :  { %v82_v35 = vsel %vm81_vm0, %v80_v32, %v64_v28  ;;  %v92_v40 = vsel %vm81_vm0, %v91_v37, %v65_v33 }
  0x12   :  { %v84_v36 = vsel %vm83_vm1, %v80_v32, %v82_v35  ;;  %v93_v41 = vsel %vm83_vm1, %v91_v37, %v92_v40 }
  0x13   :  { %v86_v38 = vsel %vm85_vm2, %v80_v32, %v84_v36  ;;  %v94_v42 = vsel %vm85_vm2, %v91_v37, %v93_v41 }
  0x14   :  { %v88_v39 = vsel %vm87_vm3, %v80_v32, %v86_v38  ;;  %v95_v43 = vsel %vm87_vm3, %v91_v37, %v94_v42 }
  0x15   :  { %98 = vst [vmem:[%s149_s3] sm:$0xff] %v88_v39  ;;  %99 = vst [vmem:[%s149_s3 + $0x8] sm:$0xff] %v95_v43 }

// kernel: xray_analyzer_forward.243
= control target key start
LH: loop header
LB: loop body
LE: loop exit
PB: predicated region body
PF: predicated region fallthrough
CT: control target
= control target key end

     0   :  { %s4077_s1 = inlined_call_operand.vmem [shape: bf16[1024,512], index: 1, kind: input, shape index: {}]   ;;  %s4078_s0 = inlined_call_operand.vmem [shape: bf16[16,1024], index: 0, kind: input, shape index: {}]   ;;  %s4079_s3 = inlined_call_operand.vmem [shape: bf16[512,128], index: 3, kind: input, shape index: {}]   ;;  %s4080_s2 = inlined_call_operand.vmem [shape: f32[1,512], index: 2, kind: input, shape index: {}]   ;;  %s4081_s4 = inlined_call_operand.vmem [shape: f32[1,128], index: 4, kind: input, shape index: {}]   ;;  %s4082_s5 = inlined_call_operand.vmem [shape: f32[16,128], index: 5, kind: output, shape index: {}]  }
   0x1   :  { %v2707_v0 = vld [vmem:[%s4077_s1 + $0x4] ss:$16 sps:$4 sm:$0xff]   ;;  %v2709_v1 = vld [vmem:[%s4077_s1 + $0xc] ss:$16 sps:$4 sm:$0xff]   ;;  %v2711_v2 = vld [vmem:[%s4077_s1] ss:$16 sps:$4 sm:$0xff]  }
   0x2   :  { %1627 = vmatprep.subr.bf16.mxu0 %v2707_v0  ;;  %v2712_v3 = vld [vmem:[%s4077_s1 + $0x8] ss:$16 sps:$4 sm:$0xff]   ;;  %1799 = vmatprep.subr.bf16.mxu1 %v2709_v1  ;;  %v2713_v4 = vld [vmem:[%s4077_s1 + $0x24] ss:$16 sps:$4 sm:$0xff]   ;;  %v2715_v5 = vld [vmem:[%s4077_s1 + $0x2c] ss:$16 sps:$4 sm:$0xff]  }
   0x3   :  { %1628 = vmatpush1.bf16.msra.mxu0 %v2711_v2  ;;  %1800 = vmatpush1.bf16.msra.mxu1 %v2712_v3  ;;  %v2717_v6 = vld [vmem:[%s4077_s1 + $0x20] ss:$16 sps:$4 sm:$0xff]   ;;  %v2718_v7 = vld [vmem:[%s4077_s1 + $0x28] ss:$16 sps:$4 sm:$0xff]   ;;  %v2719_v8 = vld [vmem:[%s4077_s1 + $0x44] ss:$16 sps:$4 sm:$0xff]  }
   0x4   :  { %1629 = vmatprep.subr.bf16.mxu0 %v2713_v4  ;;  %1801 = vmatprep.subr.bf16.mxu1 %v2715_v5  ;;  %v2721_v9 = vld [vmem:[%s4077_s1 + $0x4c] ss:$16 sps:$4 sm:$0xff]   ;;  %v2723_v10 = vld [vmem:[%s4077_s1 + $0x40] ss:$16 sps:$4 sm:$0xff]   ;;  %v2724_v11 = vld [vmem:[%s4077_s1 + $0x48] ss:$16 sps:$4 sm:$0xff]  }
   0x5   :  { %v2725_v12 = vld [vmem:[%s4077_s1 + $0x64] ss:$16 sps:$4 sm:$0xff]   ;;  %v2727_v13 = vld [vmem:[%s4077_s1 + $0x6c] ss:$16 sps:$4 sm:$0xff]   ;;  %v2729_v14 = vld [vmem:[%s4077_s1 + $0x60] ss:$16 sps:$4 sm:$0xff]  }
   0x6   :  { %v2730_v15 = vld [vmem:[%s4077_s1 + $0x68] ss:$16 sps:$4 sm:$0xff]   ;;  %v2731_v16 = vld [vmem:[%s4077_s1 + $0x84] ss:$16 sps:$4 sm:$0xff]   ;;  %v2733_v17 = vld [vmem:[%s4077_s1 + $0x8c] ss:$16 sps:$4 sm:$0xff]  }
   0x7   :  { %1630 = vmatpush1.bf16.msra.mxu0 %v2717_v6  ;;  %1802 = vmatpush1.bf16.msra.mxu1 %v2718_v7  ;;  %v2735_v18 = vld [vmem:[%s4077_s1 + $0x80] ss:$16 sps:$4 sm:$0xff]   ;;  %v2736_v19 = vld [vmem:[%s4077_s1 + $0x88] ss:$16 sps:$4 sm:$0xff]   ;;  %v2737_v20 = vld [vmem:[%s4077_s1 + $0xa4] ss:$16 sps:$4 sm:$0xff]  }
   0x8   :  { %1631 = vmatprep.subr.bf16.mxu0 %v2719_v8  ;;  %1803 = vmatprep.subr.bf16.mxu1 %v2721_v9  ;;  %v2739_v21 = vld [vmem:[%s4077_s1 + $0xac] ss:$16 sps:$4 sm:$0xff]   ;;  %v2741_v22 = vld [vmem:[%s4077_s1 + $0xa0] ss:$16 sps:$4 sm:$0xff]   ;;  %v2742_v23 = vld [vmem:[%s4077_s1 + $0xa8] ss:$16 sps:$4 sm:$0xff]  }
   0x9   :  { %v2743_v24 = vld [vmem:[%s4077_s1 + $0xc4] ss:$16 sps:$4 sm:$0xff]   ;;  %v2745_v25 = vld [vmem:[%s4077_s1 + $0xcc] ss:$16 sps:$4 sm:$0xff]   ;;  %v2747_v26 = vld [vmem:[%s4077_s1 + $0xc0] ss:$16 sps:$4 sm:$0xff]  }
   0xa   :  { %v2748_v27 = vld [vmem:[%s4077_s1 + $0xc8] ss:$16 sps:$4 sm:$0xff]   ;;  %v2749_v28 = vld [vmem:[%s4077_s1 + $0xe4] ss:$16 sps:$4 sm:$0xff]   ;;  %v2751_v29 = vld [vmem:[%s4077_s1 + $0xec] ss:$16 sps:$4 sm:$0xff]  }
   0xb   :  { %1632 = vmatpush1.bf16.msra.mxu0 %v2723_v10  ;;  %1804 = vmatpush1.bf16.msra.mxu1 %v2724_v11  ;;  %v2753_v30 = vld [vmem:[%s4077_s1 + $0xe0] ss:$16 sps:$4 sm:$0xff]   ;;  %v2754_v31 = vld [vmem:[%s4077_s1 + $0xe8] ss:$16 sps:$4 sm:$0xff]   ;;  %v2755_v32 = vld [vmem:[%s4077_s1 + $0x104] ss:$16 sps:$4 sm:$0xff]  }
   0xc   :  { %1633 = vmatprep.subr.bf16.mxu0 %v2725_v12  ;;  %1805 = vmatprep.subr.bf16.mxu1 %v2727_v13  ;;  %v2757_v33 = vld [vmem:[%s4077_s1 + $0x10c] ss:$16 sps:$4 sm:$0xff]   ;;  %v2759_v34 = vld [vmem:[%s4077_s1 + $0x100] ss:$16 sps:$4 sm:$0xff]   ;;  %v2760_v35 = vld [vmem:[%s4077_s1 + $0x108] ss:$16 sps:$4 sm:$0xff]  }
   0xd   :  { %v2761_v36 = vld [vmem:[%s4077_s1 + $0x124] ss:$16 sps:$4 sm:$0xff]   ;;  %v2763_v37 = vld [vmem:[%s4077_s1 + $0x12c] ss:$16 sps:$4 sm:$0xff]   ;;  %v2765_v38 = vld [vmem:[%s4077_s1 + $0x120] ss:$16 sps:$4 sm:$0xff]  }
   0xe   :  { %v2766_v39 = vld [vmem:[%s4077_s1 + $0x128] ss:$16 sps:$4 sm:$0xff]   ;;  %v2767_v40 = vld [vmem:[%s4077_s1 + $0x144] ss:$16 sps:$4 sm:$0xff]   ;;  %v2769_v41 = vld [vmem:[%s4077_s1 + $0x14c] ss:$16 sps:$4 sm:$0xff]  }
   0xf   :  { %1634 = vmatpush1.bf16.msra.mxu0 %v2729_v14  ;;  %1806 = vmatpush1.bf16.msra.mxu1 %v2730_v15  ;;  %v2771_v42 = vld [vmem:[%s4077_s1 + $0x140] ss:$16 sps:$4 sm:$0xff]   ;;  %v2772_v43 = vld [vmem:[%s4077_s1 + $0x148] ss:$16 sps:$4 sm:$0xff]   ;;  %v2773_v44 = vld [vmem:[%s4077_s1 + $0x164] ss:$16 sps:$4 sm:$0xff]  }
  0x10   :  { %1635 = vmatprep.subr.bf16.mxu0 %v2731_v16  ;;  %1807 = vmatprep.subr.bf16.mxu1 %v2733_v17  ;;  %v2775_v45 = vld [vmem:[%s4077_s1 + $0x16c] ss:$16 sps:$4 sm:$0xff]   ;;  %v21_v46 = vld [vmem:[%s4078_s0] sm:$0xff]  ;;  %v2778_v49 = vld [vmem:[%s4077_s1 + $0x168] ss:$16 sps:$4 sm:$0xff]  }
  0x11   :  { %v25_v47 = vld [vmem:[%s4078_s0 + $0x20] sm:$0xff]  ;;  %v2781_v52 = vld [vmem:[%s4077_s1 + $0x18c] ss:$16 sps:$4 sm:$0xff]   ;;  %v2784_v54 = vld [vmem:[%s4077_s1 + $0x188] ss:$16 sps:$4 sm:$0xff]  }
  0x12   :  { %v2777_v48 = vld [vmem:[%s4077_s1 + $0x160] ss:$16 sps:$4 sm:$0xff]   ;;  %v2335_v50 = vcombine.high %v21_v46, %v25_v47  ;;  %v2779_v51 = vld [vmem:[%s4077_s1 + $0x184] ss:$16 sps:$4 sm:$0xff]   ;;  %v2787_v56 = vld [vmem:[%s4077_s1 + $0x1ac] ss:$16 sps:$4 sm:$0xff]   ;;  %v2334_v5 = vcombine.low %v21_v46, %v25_v47 }
  0x13   :  { %1636 = vmatpush1.bf16.msra.mxu0 %v2735_v18  ;;  %1808 = vmatpush1.bf16.msra.mxu1 %v2736_v19  ;;  %v2783_v53 = vld [vmem:[%s4077_s1 + $0x180] ss:$16 sps:$4 sm:$0xff]   ;;  %v2785_v55 = vld [vmem:[%s4077_s1 + $0x1a4] ss:$16 sps:$4 sm:$0xff]   ;;  %v2790_v58 = vld [vmem:[%s4077_s1 + $0x1a8] ss:$16 sps:$4 sm:$0xff]  }
  0x14   :  { %1637 = vmatprep.subr.bf16.mxu0 %v2737_v20  ;;  %1809 = vmatprep.subr.bf16.mxu1 %v2739_v21  ;;  %v2789_v57 = vld [vmem:[%s4077_s1 + $0x1a0] ss:$16 sps:$4 sm:$0xff]   ;;  %v2791_v59 = vld [vmem:[%s4077_s1 + $0x1c4] ss:$16 sps:$4 sm:$0xff]   ;;  %v2793_v60 = vld [vmem:[%s4077_s1 + $0x1cc] ss:$16 sps:$4 sm:$0xff]  }
  0x15   :  { %1659 = vmatprep.mubr.bf16.mxu0 %v2335_v50  ;;  %1831 = vmatprep.mubr.bf16.mxu1 %v2335_v50  ;;  %v2795_v61 = vld [vmem:[%s4077_s1 + $0x1c0] ss:$16 sps:$4 sm:$0xff]   ;;  %v2796_v62 = vld [vmem:[%s4077_s1 + $0x1c8] ss:$16 sps:$4 sm:$0xff]   ;;  %v2797_v63 = vld [vmem:[%s4077_s1 + $0x1e4] ss:$16 sps:$4 sm:$0xff]  }
  0x16   :  { %v2799_v0 = vld [vmem:[%s4077_s1 + $0x1ec] ss:$16 sps:$4 sm:$0xff]   ;;  %v2801_v1 = vld [vmem:[%s4077_s1 + $0x1e0] ss:$16 sps:$4 sm:$0xff]   ;;  %v2802_v2 = vld [vmem:[%s4077_s1 + $0x1e8] ss:$16 sps:$4 sm:$0xff]  }
  0x17   :  { %1638 = vmatpush1.bf16.msra.mxu0 %v2741_v22  ;;  %1810 = vmatpush1.bf16.msra.mxu1 %v2742_v23  ;;  %v2805_v3 = vld [vmem:[%s4077_s1 + $0x204] ss:$16 sps:$4 sm:$0xff]   ;;  %v2808_v4 = vld [vmem:[%s4077_s1 + $0x20c] ss:$16 sps:$4 sm:$0xff]   ;;  %v2803_v6 = vld [vmem:[%s4077_s1 + $0x200] ss:$16 sps:$4 sm:$0xff]  }
  0x18   :  { %1639 = vmatprep.subr.bf16.mxu0 %v2743_v24  ;;  %1811 = vmatprep.subr.bf16.mxu1 %v2745_v25  ;;  %v2806_v7 = vld [vmem:[%s4077_s1 + $0x208] ss:$16 sps:$4 sm:$0xff]   ;;  %v2811_v8 = vld [vmem:[%s4077_s1 + $0x224] ss:$16 sps:$4 sm:$0xff]   ;;  %v2814_v9 = vld [vmem:[%s4077_s1 + $0x22c] ss:$16 sps:$4 sm:$0xff]  }
  0x19   :  { %v2809_v10 = vld [vmem:[%s4077_s1 + $0x220] ss:$16 sps:$4 sm:$0xff]   ;;  %v2812_v11 = vld [vmem:[%s4077_s1 + $0x228] ss:$16 sps:$4 sm:$0xff]   ;;  %v2817_v12 = vld [vmem:[%s4077_s1 + $0x244] ss:$16 sps:$4 sm:$0xff]  }
  0x1a   :  { %v2820_v13 = vld [vmem:[%s4077_s1 + $0x24c] ss:$16 sps:$4 sm:$0xff]   ;;  %v2815_v14 = vld [vmem:[%s4077_s1 + $0x240] ss:$16 sps:$4 sm:$0xff]   ;;  %v2818_v15 = vld [vmem:[%s4077_s1 + $0x248] ss:$16 sps:$4 sm:$0xff]  }
  0x1b   :  { %1640 = vmatpush1.bf16.msra.mxu0 %v2747_v26  ;;  %1812 = vmatpush1.bf16.msra.mxu1 %v2748_v27  ;;  %v2823_v16 = vld [vmem:[%s4077_s1 + $0x264] ss:$16 sps:$4 sm:$0xff]   ;;  %v2826_v17 = vld [vmem:[%s4077_s1 + $0x26c] ss:$16 sps:$4 sm:$0xff]   ;;  %v2821_v18 = vld [vmem:[%s4077_s1 + $0x260] ss:$16 sps:$4 sm:$0xff]  }
  0x1c   :  { %1641 = vmatprep.subr.bf16.mxu0 %v2749_v28  ;;  %1813 = vmatprep.subr.bf16.mxu1 %v2751_v29  ;;  %v2824_v19 = vld [vmem:[%s4077_s1 + $0x268] ss:$16 sps:$4 sm:$0xff]   ;;  %v2829_v20 = vld [vmem:[%s4077_s1 + $0x284] ss:$16 sps:$4 sm:$0xff]   ;;  %v2832_v21 = vld [vmem:[%s4077_s1 + $0x28c] ss:$16 sps:$4 sm:$0xff]  }
  0x1d   :  { %v2827_v22 = vld [vmem:[%s4077_s1 + $0x280] ss:$16 sps:$4 sm:$0xff]   ;;  %v2830_v23 = vld [vmem:[%s4077_s1 + $0x288] ss:$16 sps:$4 sm:$0xff]   ;;  %v2835_v24 = vld [vmem:[%s4077_s1 + $0x2a4] ss:$16 sps:$4 sm:$0xff]  }
  0x1e   :  { %v2838_v25 = vld [vmem:[%s4077_s1 + $0x2ac] ss:$16 sps:$4 sm:$0xff]   ;;  %v2833_v26 = vld [vmem:[%s4077_s1 + $0x2a0] ss:$16 sps:$4 sm:$0xff]   ;;  %v2836_v27 = vld [vmem:[%s4077_s1 + $0x2a8] ss:$16 sps:$4 sm:$0xff]  }
  0x1f   :  { %1642 = vmatpush1.bf16.msra.mxu0 %v2753_v30  ;;  %1814 = vmatpush1.bf16.msra.mxu1 %v2754_v31  ;;  %v2841_v28 = vld [vmem:[%s4077_s1 + $0x2c4] ss:$16 sps:$4 sm:$0xff]   ;;  %v2844_v29 = vld [vmem:[%s4077_s1 + $0x2cc] ss:$16 sps:$4 sm:$0xff]   ;;  %v2860_v46 = vld [vmem:[%s4077_s1 + $0x328] ss:$16 sps:$4 sm:$0xff]  }
  0x20   :  { %1643 = vmatprep.subr.bf16.mxu0 %v2755_v32  ;;  %1815 = vmatprep.subr.bf16.mxu1 %v2757_v33  ;;  %v3432_v30 = vld [vmem:[%s4078_s0 + $0x8] sm:$0xff]  ;;  %v2839_v32 = vld [vmem:[%s4077_s1 + $0x2c0] ss:$16 sps:$4 sm:$0xff]   ;;  %v2865_v47 = vld [vmem:[%s4077_s1 + $0x344] ss:$16 sps:$4 sm:$0xff]  }
  0x21   :  { %v3437_v31 = vld [vmem:[%s4078_s0 + $0x28] sm:$0xff] }
  0x22   :  { %v2842_v33 = vld [vmem:[%s4077_s1 + $0x2c8] ss:$16 sps:$4 sm:$0xff]  }
  0x23   :  { %1644 = vmatpush1.bf16.msra.mxu0 %v2759_v34  ;;  %1816 = vmatpush1.bf16.msra.mxu1 %v2760_v35  ;;  %v2337_v34 = vcombine.high %v3432_v30, %v3437_v31  ;;  %v2847_v35 = vld [vmem:[%s4077_s1 + $0x2e4] ss:$16 sps:$4 sm:$0xff]   ;;  %v2866_v50 = vld [vmem:[%s4077_s1 + $0x348] ss:$16 sps:$4 sm:$0xff]  }
  0x24   :  { %1645 = vmatprep.subr.bf16.mxu0 %v2761_v36  ;;  %1817 = vmatprep.subr.bf16.mxu1 %v2763_v37  ;;  %v2850_v36 = vld [vmem:[%s4077_s1 + $0x2ec] ss:$16 sps:$4 sm:$0xff]   ;;  %v2845_v37 = vld [vmem:[%s4077_s1 + $0x2e0] ss:$16 sps:$4 sm:$0xff]  }
  0x27   :  { %1646 = vmatpush1.bf16.msra.mxu0 %v2765_v38  ;;  %1818 = vmatpush1.bf16.msra.mxu1 %v2766_v39  ;;  %v2848_v38 = vld [vmem:[%s4077_s1 + $0x2e8] ss:$16 sps:$4 sm:$0xff]   ;;  %v2853_v39 = vld [vmem:[%s4077_s1 + $0x304] ss:$16 sps:$4 sm:$0xff]  }
  0x28   :  { %1647 = vmatprep.subr.bf16.mxu0 %v2767_v40  ;;  %1819 = vmatprep.subr.bf16.mxu1 %v2769_v41  ;;  %v2856_v40 = vld [vmem:[%s4077_s1 + $0x30c] ss:$16 sps:$4 sm:$0xff]   ;;  %v2851_v41 = vld [vmem:[%s4077_s1 + $0x300] ss:$16 sps:$4 sm:$0xff]  }
  0x2b   :  { %1648 = vmatpush1.bf16.msra.mxu0 %v2771_v42  ;;  %1820 = vmatpush1.bf16.msra.mxu1 %v2772_v43  ;;  %v2854_v42 = vld [vmem:[%s4077_s1 + $0x308] ss:$16 sps:$4 sm:$0xff]   ;;  %v2859_v43 = vld [vmem:[%s4077_s1 + $0x324] ss:$16 sps:$4 sm:$0xff]  }
  0x2c   :  { %1649 = vmatprep.subr.bf16.mxu0 %v2773_v44  ;;  %1821 = vmatprep.subr.bf16.mxu1 %v2775_v45  ;;  %v2862_v44 = vld [vmem:[%s4077_s1 + $0x32c] ss:$16 sps:$4 sm:$0xff]   ;;  %v2857_v45 = vld [vmem:[%s4077_s1 + $0x320] ss:$16 sps:$4 sm:$0xff]  }
  0x2f   :  { %1650 = vmatpush1.bf16.msra.mxu0 %v2777_v48  ;;  %1822 = vmatpush1.bf16.msra.mxu1 %v2778_v49  ;;  %v2868_v48 = vld [vmem:[%s4077_s1 + $0x34c] ss:$16 sps:$4 sm:$0xff]   ;;  %v2863_v49 = vld [vmem:[%s4077_s1 + $0x340] ss:$16 sps:$4 sm:$0xff]  }
  0x30   :  { %1651 = vmatprep.subr.bf16.mxu0 %v2779_v51  ;;  %1823 = vmatprep.subr.bf16.mxu1 %v2781_v52  ;;  %v2871_v51 = vld [vmem:[%s4077_s1 + $0x364] ss:$16 sps:$4 sm:$0xff]   ;;  %v2874_v52 = vld [vmem:[%s4077_s1 + $0x36c] ss:$16 sps:$4 sm:$0xff]  }
  0x33   :  { %1652 = vmatpush1.bf16.msra.mxu0 %v2783_v53  ;;  %1824 = vmatpush1.bf16.msra.mxu1 %v2784_v54  ;;  %v2869_v53 = vld [vmem:[%s4077_s1 + $0x360] ss:$16 sps:$4 sm:$0xff]   ;;  %v2872_v54 = vld [vmem:[%s4077_s1 + $0x368] ss:$16 sps:$4 sm:$0xff]  }
  0x34   :  { %1653 = vmatprep.subr.bf16.mxu0 %v2785_v55  ;;  %1825 = vmatprep.subr.bf16.mxu1 %v2787_v56  ;;  %v2877_v55 = vld [vmem:[%s4077_s1 + $0x384] ss:$16 sps:$4 sm:$0xff]   ;;  %v2880_v56 = vld [vmem:[%s4077_s1 + $0x38c] ss:$16 sps:$4 sm:$0xff]  }
  0x37   :  { %1654 = vmatpush1.bf16.msra.mxu0 %v2789_v57  ;;  %1826 = vmatpush1.bf16.msra.mxu1 %v2790_v58  ;;  %v2875_v57 = vld [vmem:[%s4077_s1 + $0x380] ss:$16 sps:$4 sm:$0xff]   ;;  %v2878_v58 = vld [vmem:[%s4077_s1 + $0x388] ss:$16 sps:$4 sm:$0xff]  }
  0x38   :  { %1655 = vmatprep.subr.bf16.mxu0 %v2791_v59  ;;  %1827 = vmatprep.subr.bf16.mxu1 %v2793_v60  ;;  %v2883_v59 = vld [vmem:[%s4077_s1 + $0x3a4] ss:$16 sps:$4 sm:$0xff]   ;;  %v2886_v60 = vld [vmem:[%s4077_s1 + $0x3ac] ss:$16 sps:$4 sm:$0xff]  }
  0x3b   :  { %1656 = vmatpush1.bf16.msra.mxu0 %v2795_v61  ;;  %1828 = vmatpush1.bf16.msra.mxu1 %v2796_v62  ;;  %v2881_v61 = vld [vmem:[%s4077_s1 + $0x3a0] ss:$16 sps:$4 sm:$0xff]   ;;  %v2884_v62 = vld [vmem:[%s4077_s1 + $0x3a8] ss:$16 sps:$4 sm:$0xff]  }
  0x3c   :  { %1657 = vmatprep.subr.bf16.mxu0 %v2797_v63  ;;  %1829 = vmatprep.subr.bf16.mxu1 %v2799_v0  ;;  %v2889_v63 = vld [vmem:[%s4077_s1 + $0x3c4] ss:$16 sps:$4 sm:$0xff]   ;;  %v2892_v0 = vld [vmem:[%s4077_s1 + $0x3cc] ss:$16 sps:$4 sm:$0xff]  }
  0x3f   :  { %1658 = vmatpush1.bf16.msra.mxu0 %v2801_v1  ;;  %1830 = vmatpush1.bf16.msra.mxu1 %v2802_v2  ;;  %v2887_v1 = vld [vmem:[%s4077_s1 + $0x3c0] ss:$16 sps:$4 sm:$0xff]   ;;  %v2890_v2 = vld [vmem:[%s4077_s1 + $0x3c8] ss:$16 sps:$4 sm:$0xff]  }
  0x40   :  { %1670 = vmatprep.subr.bf16.mxu0 %v2805_v3  ;;  %1842 = vmatprep.subr.bf16.mxu1 %v2808_v4  ;;  %v2895_v3 = vld [vmem:[%s4077_s1 + $0x3e4] ss:$16 sps:$4 sm:$0xff]   ;;  %v2898_v4 = vld [vmem:[%s4077_s1 + $0x3ec] ss:$16 sps:$4 sm:$0xff]  }
  0x42   :  { %1660 = vmatmul.mubr.bf16.vlgmr.msra.gmra.mrb[0].mxu0 %v2334_v5  ;;  %1832 = vmatmul.mubr.bf16.vlgmr.msra.gmra.mrb[0].mxu1 %v2334_v5  ;;  %v2893_v5 = vld [vmem:[%s4077_s1 + $0x3e0] ss:$16 sps:$4 sm:$0xff]  }
  0x43   :  { %1671 = vmatpush1.bf16.msra.mxu0 %v2803_v6  ;;  %1843 = vmatpush1.bf16.msra.mxu1 %v2806_v7  ;;  %v2896_v6 = vld [vmem:[%s4077_s1 + $0x3e8] ss:$16 sps:$4 sm:$0xff]   ;;  %v2901_v7 = vld [vmem:[%s4077_s1 + $0x404] ss:$16 sps:$4 sm:$0xff]  }
  0x44   :  { %1672 = vmatprep.subr.bf16.mxu0 %v2811_v8  ;;  %1844 = vmatprep.subr.bf16.mxu1 %v2814_v9  ;;  %v2904_v8 = vld [vmem:[%s4077_s1 + $0x40c] ss:$16 sps:$4 sm:$0xff]   ;;  %v2336_v9 = vcombine.low %v3432_v30, %v3437_v31  ;;  %v2926_v30 = vld [vmem:[%s4077_s1 + $0x488] ss:$16 sps:$4 sm:$0xff]   ;;  %v2931_v31 = vld [vmem:[%s4077_s1 + $0x4a4] ss:$16 sps:$4 sm:$0xff]  }
  0x45   :  { %1702 = vmatprep.mubr.bf16.mxu0 %v2337_v34  ;;  %1874 = vmatprep.mubr.bf16.mxu1 %v2337_v34  ;;  %v2932_v34 = vld [vmem:[%s4077_s1 + $0x4a8] ss:$16 sps:$4 sm:$0xff]  }
  0x47   :  { %1673 = vmatpush1.bf16.msra.mxu0 %v2809_v10  ;;  %1845 = vmatpush1.bf16.msra.mxu1 %v2812_v11  ;;  %v2899_v10 = vld [vmem:[%s4077_s1 + $0x400] ss:$16 sps:$4 sm:$0xff]   ;;  %v2902_v11 = vld [vmem:[%s4077_s1 + $0x408] ss:$16 sps:$4 sm:$0xff]  }
  0x48   :  { %1674 = vmatprep.subr.bf16.mxu0 %v2817_v12  ;;  %1846 = vmatprep.subr.bf16.mxu1 %v2820_v13  ;;  %v2907_v12 = vld [vmem:[%s4077_s1 + $0x424] ss:$16 sps:$4 sm:$0xff]   ;;  %v2910_v13 = vld [vmem:[%s4077_s1 + $0x42c] ss:$16 sps:$4 sm:$0xff]  }
  0x4b   :  { %1675 = vmatpush1.bf16.msra.mxu0 %v2815_v14  ;;  %1847 = vmatpush1.bf16.msra.mxu1 %v2818_v15  ;;  %v3578_v14 = vld [vmem:[%s4078_s0 + $0x10] sm:$0xff] }
  0x4c   :  { %1676 = vmatprep.subr.bf16.mxu0 %v2823_v16  ;;  %1848 = vmatprep.subr.bf16.mxu1 %v2826_v17  ;;  %v3583_v15 = vld [vmem:[%s4078_s0 + $0x30] sm:$0xff] }
  0x4d   :  { %v2339_v16 = vcombine.high %v3578_v14, %v3583_v15  ;;  %v2905_v17 = vld [vmem:[%s4077_s1 + $0x420] ss:$16 sps:$4 sm:$0xff]  }
  0x4f   :  { %1677 = vmatpush1.bf16.msra.mxu0 %v2821_v18  ;;  %1849 = vmatpush1.bf16.msra.mxu1 %v2824_v19  ;;  %v2908_v18 = vld [vmem:[%s4077_s1 + $0x428] ss:$16 sps:$4 sm:$0xff]   ;;  %v2913_v19 = vld [vmem:[%s4077_s1 + $0x444] ss:$16 sps:$4 sm:$0xff]  }
  0x50   :  { %1678 = vmatprep.subr.bf16.mxu0 %v2829_v20  ;;  %1850 = vmatprep.subr.bf16.mxu1 %v2832_v21  ;;  %v2916_v20 = vld [vmem:[%s4077_s1 + $0x44c] ss:$16 sps:$4 sm:$0xff]   ;;  %v2911_v21 = vld [vmem:[%s4077_s1 + $0x440] ss:$16 sps:$4 sm:$0xff]  }
  0x53   :  { %1679 = vmatpush1.bf16.msra.mxu0 %v2827_v22  ;;  %1851 = vmatpush1.bf16.msra.mxu1 %v2830_v23  ;;  %v2914_v22 = vld [vmem:[%s4077_s1 + $0x448] ss:$16 sps:$4 sm:$0xff]   ;;  %v2919_v23 = vld [vmem:[%s4077_s1 + $0x464] ss:$16 sps:$4 sm:$0xff]  }
  0x54   :  { %1680 = vmatprep.subr.bf16.mxu0 %v2835_v24  ;;  %1852 = vmatprep.subr.bf16.mxu1 %v2838_v25  ;;  %v2922_v24 = vld [vmem:[%s4077_s1 + $0x46c] ss:$16 sps:$4 sm:$0xff]   ;;  %v2917_v25 = vld [vmem:[%s4077_s1 + $0x460] ss:$16 sps:$4 sm:$0xff]  }
  0x57   :  { %1681 = vmatpush1.bf16.msra.mxu0 %v2833_v26  ;;  %1853 = vmatpush1.bf16.msra.mxu1 %v2836_v27  ;;  %v2920_v26 = vld [vmem:[%s4077_s1 + $0x468] ss:$16 sps:$4 sm:$0xff]   ;;  %v2925_v27 = vld [vmem:[%s4077_s1 + $0x484] ss:$16 sps:$4 sm:$0xff]  }
  0x58   :  { %1682 = vmatprep.subr.bf16.mxu0 %v2841_v28  ;;  %1854 = vmatprep.subr.bf16.mxu1 %v2844_v29  ;;  %v2928_v28 = vld [vmem:[%s4077_s1 + $0x48c] ss:$16 sps:$4 sm:$0xff]   ;;  %v2923_v29 = vld [vmem:[%s4077_s1 + $0x480] ss:$16 sps:$4 sm:$0xff]  }
  0x5b   :  { %1683 = vmatpush1.bf16.msra.mxu0 %v2839_v32  ;;  %1855 = vmatpush1.bf16.msra.mxu1 %v2842_v33  ;;  %v2934_v32 = vld [vmem:[%s4077_s1 + $0x4ac] ss:$16 sps:$4 sm:$0xff]   ;;  %v2929_v33 = vld [vmem:[%s4077_s1 + $0x4a0] ss:$16 sps:$4 sm:$0xff]  }
  0x5c   :  { %1684 = vmatprep.subr.bf16.mxu0 %v2847_v35  ;;  %1856 = vmatprep.subr.bf16.mxu1 %v2850_v36  ;;  %v2937_v35 = vld [vmem:[%s4077_s1 + $0x4c4] ss:$16 sps:$4 sm:$0xff]   ;;  %v2940_v36 = vld [vmem:[%s4077_s1 + $0x4cc] ss:$16 sps:$4 sm:$0xff]  }
  0x5f   :  { %1685 = vmatpush1.bf16.msra.mxu0 %v2845_v37  ;;  %1857 = vmatpush1.bf16.msra.mxu1 %v2848_v38  ;;  %v2935_v37 = vld [vmem:[%s4077_s1 + $0x4c0] ss:$16 sps:$4 sm:$0xff]   ;;  %v2938_v38 = vld [vmem:[%s4077_s1 + $0x4c8] ss:$16 sps:$4 sm:$0xff]  }
  0x60   :  { %1686 = vmatprep.subr.bf16.mxu0 %v2853_v39  ;;  %1858 = vmatprep.subr.bf16.mxu1 %v2856_v40  ;;  %v2943_v39 = vld [vmem:[%s4077_s1 + $0x4e4] ss:$16 sps:$4 sm:$0xff]   ;;  %v2946_v40 = vld [vmem:[%s4077_s1 + $0x4ec] ss:$16 sps:$4 sm:$0xff]  }
  0x63   :  { %1687 = vmatpush1.bf16.msra.mxu0 %v2851_v41  ;;  %1859 = vmatpush1.bf16.msra.mxu1 %v2854_v42  ;;  %v2941_v41 = vld [vmem:[%s4077_s1 + $0x4e0] ss:$16 sps:$4 sm:$0xff]   ;;  %v2944_v42 = vld [vmem:[%s4077_s1 + $0x4e8] ss:$16 sps:$4 sm:$0xff]  }
  0x64   :  { %1688 = vmatprep.subr.bf16.mxu0 %v2859_v43  ;;  %1860 = vmatprep.subr.bf16.mxu1 %v2862_v44  ;;  %v2949_v43 = vld [vmem:[%s4077_s1 + $0x504] ss:$16 sps:$4 sm:$0xff]   ;;  %v2952_v44 = vld [vmem:[%s4077_s1 + $0x50c] ss:$16 sps:$4 sm:$0xff]  }
  0x67   :  { %1689 = vmatpush1.bf16.msra.mxu0 %v2857_v45  ;;  %1861 = vmatpush1.bf16.msra.mxu1 %v2860_v46  ;;  %v2947_v45 = vld [vmem:[%s4077_s1 + $0x500] ss:$16 sps:$4 sm:$0xff]   ;;  %v2950_v46 = vld [vmem:[%s4077_s1 + $0x508] ss:$16 sps:$4 sm:$0xff]  }
  0x68   :  { %1690 = vmatprep.subr.bf16.mxu0 %v2865_v47  ;;  %1862 = vmatprep.subr.bf16.mxu1 %v2868_v48  ;;  %v2955_v47 = vld [vmem:[%s4077_s1 + $0x524] ss:$16 sps:$4 sm:$0xff]   ;;  %v2958_v48 = vld [vmem:[%s4077_s1 + $0x52c] ss:$16 sps:$4 sm:$0xff]  }
  0x6b   :  { %1691 = vmatpush1.bf16.msra.mxu0 %v2863_v49  ;;  %1863 = vmatpush1.bf16.msra.mxu1 %v2866_v50  ;;  %v2953_v49 = vld [vmem:[%s4077_s1 + $0x520] ss:$16 sps:$4 sm:$0xff]   ;;  %v2956_v50 = vld [vmem:[%s4077_s1 + $0x528] ss:$16 sps:$4 sm:$0xff]  }
  0x6c   :  { %1692 = vmatprep.subr.bf16.mxu0 %v2871_v51  ;;  %1864 = vmatprep.subr.bf16.mxu1 %v2874_v52  ;;  %v2961_v51 = vld [vmem:[%s4077_s1 + $0x544] ss:$16 sps:$4 sm:$0xff]   ;;  %v2964_v52 = vld [vmem:[%s4077_s1 + $0x54c] ss:$16 sps:$4 sm:$0xff]  }
  0x6f   :  { %1693 = vmatpush1.bf16.msra.mxu0 %v2869_v53  ;;  %1865 = vmatpush1.bf16.msra.mxu1 %v2872_v54  ;;  %v2959_v53 = vld [vmem:[%s4077_s1 + $0x540] ss:$16 sps:$4 sm:$0xff]   ;;  %v2962_v54 = vld [vmem:[%s4077_s1 + $0x548] ss:$16 sps:$4 sm:$0xff]  }
  0x70   :  { %1694 = vmatprep.subr.bf16.mxu0 %v2877_v55  ;;  %1866 = vmatprep.subr.bf16.mxu1 %v2880_v56  ;;  %v2967_v55 = vld [vmem:[%s4077_s1 + $0x564] ss:$16 sps:$4 sm:$0xff]   ;;  %v2970_v56 = vld [vmem:[%s4077_s1 + $0x56c] ss:$16 sps:$4 sm:$0xff]  }
  0x73   :  { %1695 = vmatpush1.bf16.msra.mxu0 %v2875_v57  ;;  %1867 = vmatpush1.bf16.msra.mxu1 %v2878_v58  ;;  %v2965_v57 = vld [vmem:[%s4077_s1 + $0x560] ss:$16 sps:$4 sm:$0xff]   ;;  %v2968_v58 = vld [vmem:[%s4077_s1 + $0x568] ss:$16 sps:$4 sm:$0xff]  }
  0x74   :  { %1696 = vmatprep.subr.bf16.mxu0 %v2883_v59  ;;  %1868 = vmatprep.subr.bf16.mxu1 %v2886_v60  ;;  %v2973_v59 = vld [vmem:[%s4077_s1 + $0x584] ss:$16 sps:$4 sm:$0xff]   ;;  %v2976_v60 = vld [vmem:[%s4077_s1 + $0x58c] ss:$16 sps:$4 sm:$0xff]  }
  0x77   :  { %1697 = vmatpush1.bf16.msra.mxu0 %v2881_v61  ;;  %1869 = vmatpush1.bf16.msra.mxu1 %v2884_v62  ;;  %v2971_v61 = vld [vmem:[%s4077_s1 + $0x580] ss:$16 sps:$4 sm:$0xff]   ;;  %v2974_v62 = vld [vmem:[%s4077_s1 + $0x588] ss:$16 sps:$4 sm:$0xff]  }
  0x78   :  { %1698 = vmatprep.subr.bf16.mxu0 %v2889_v63  ;;  %1870 = vmatprep.subr.bf16.mxu1 %v2892_v0  ;;  %v2979_v63 = vld [vmem:[%s4077_s1 + $0x5a4] ss:$16 sps:$4 sm:$0xff]   ;;  %v2982_v0 = vld [vmem:[%s4077_s1 + $0x5ac] ss:$16 sps:$4 sm:$0xff]  }
  0x7b   :  { %1699 = vmatpush1.bf16.msra.mxu0 %v2887_v1  ;;  %1871 = vmatpush1.bf16.msra.mxu1 %v2890_v2  ;;  %v2977_v1 = vld [vmem:[%s4077_s1 + $0x5a0] ss:$16 sps:$4 sm:$0xff]   ;;  %v2980_v2 = vld [vmem:[%s4077_s1 + $0x5a8] ss:$16 sps:$4 sm:$0xff]  }
  0x7c   :  { %1700 = vmatprep.subr.bf16.mxu0 %v2895_v3  ;;  %1872 = vmatprep.subr.bf16.mxu1 %v2898_v4  ;;  %v2985_v3 = vld [vmem:[%s4077_s1 + $0x5c4] ss:$16 sps:$4 sm:$0xff]   ;;  %v2988_v4 = vld [vmem:[%s4077_s1 + $0x5cc] ss:$16 sps:$4 sm:$0xff]  }
  0x7f   :  { %1701 = vmatpush1.bf16.msra.mxu0 %v2893_v5  ;;  %1873 = vmatpush1.bf16.msra.mxu1 %v2896_v6  ;;  %v2983_v5 = vld [vmem:[%s4077_s1 + $0x5c0] ss:$16 sps:$4 sm:$0xff]   ;;  %v2986_v6 = vld [vmem:[%s4077_s1 + $0x5c8] ss:$16 sps:$4 sm:$0xff]  }
  0x80   :  { %1713 = vmatprep.subr.bf16.mxu0 %v2901_v7  ;;  %1885 = vmatprep.subr.bf16.mxu1 %v2904_v8  ;;  %v2991_v7 = vld [vmem:[%s4077_s1 + $0x5e4] ss:$16 sps:$4 sm:$0xff]   ;;  %v2994_v8 = vld [vmem:[%s4077_s1 + $0x5ec] ss:$16 sps:$4 sm:$0xff]  }
  0x82   :  { %1703 = vmatmul.mubr.bf16.vlgmr.msra.gmra.mrb[0].mxu0 %v2336_v9  ;;  %1875 = vmatmul.mubr.bf16.vlgmr.msra.gmra.mrb[0].mxu1 %v2336_v9  ;;  %v2989_v9 = vld [vmem:[%s4077_s1 + $0x5e0] ss:$16 sps:$4 sm:$0xff]  }
  0x83   :  { %1714 = vmatpush1.bf16.msra.mxu0 %v2899_v10  ;;  %1886 = vmatpush1.bf16.msra.mxu1 %v2902_v11  ;;  %v2992_v10 = vld [vmem:[%s4077_s1 + $0x5e8] ss:$16 sps:$4 sm:$0xff]   ;;  %v2997_v11 = vld [vmem:[%s4077_s1 + $0x604] ss:$16 sps:$4 sm:$0xff]  }
  0x84   :  { %1715 = vmatprep.subr.bf16.mxu0 %v2907_v12  ;;  %1887 = vmatprep.subr.bf16.mxu1 %v2910_v13  ;;  %v3000_v12 = vld [vmem:[%s4077_s1 + $0x60c] ss:$16 sps:$4 sm:$0xff]   ;;  %v2995_v13 = vld [vmem:[%s4077_s1 + $0x600] ss:$16 sps:$4 sm:$0xff]  }
  0x85   :  { %1745 = vmatprep.mubr.bf16.mxu0 %v2339_v16  ;;  %1917 = vmatprep.mubr.bf16.mxu1 %v2339_v16  ;;  %v2998_v16 = vld [vmem:[%s4077_s1 + $0x608] ss:$16 sps:$4 sm:$0xff]  }
  0x87   :  { %1716 = vmatpush1.bf16.msra.mxu0 %v2905_v17  ;;  %1888 = vmatpush1.bf16.msra.mxu1 %v2908_v18  ;;  %v3776_v17 = vld [vmem:[%s4078_s0 + $0x18] sm:$0xff]  ;;  %v2338_v18 = vcombine.low %v3578_v14, %v3583_v15  ;;  %v3001_v14 = vld [vmem:[%s4077_s1 + $0x620] ss:$16 sps:$4 sm:$0xff]  }
  0x88   :  { %1717 = vmatprep.subr.bf16.mxu0 %v2913_v19  ;;  %1889 = vmatprep.subr.bf16.mxu1 %v2916_v20  ;;  %v3783_v19 = vld [vmem:[%s4078_s0 + $0x38] sm:$0xff]  ;;  %v3003_v20 = vld [vmem:[%s4077_s1 + $0x624] ss:$16 sps:$4 sm:$0xff]  }
  0x89   :  { %v3004_v15 = vld [vmem:[%s4077_s1 + $0x628] ss:$16 sps:$4 sm:$0xff]  }
  0x8b   :  { %1718 = vmatpush1.bf16.msra.mxu0 %v2911_v21  ;;  %1890 = vmatpush1.bf16.msra.mxu1 %v2914_v22  ;;  %v3006_v21 = vld [vmem:[%s4077_s1 + $0x62c] ss:$16 sps:$4 sm:$0xff]   ;;  %v2341_v22 = vcombine.high %v3776_v17, %v3783_v19 }
  0x8c   :  { %1719 = vmatprep.subr.bf16.mxu0 %v2919_v23  ;;  %1891 = vmatprep.subr.bf16.mxu1 %v2922_v24  ;;  %v3009_v23 = vld [vmem:[%s4077_s1 + $0x644] ss:$16 sps:$4 sm:$0xff]   ;;  %v3012_v24 = vld [vmem:[%s4077_s1 + $0x64c] ss:$16 sps:$4 sm:$0xff]  }
  0x8f   :  { %1720 = vmatpush1.bf16.msra.mxu0 %v2917_v25  ;;  %1892 = vmatpush1.bf16.msra.mxu1 %v2920_v26  ;;  %v3007_v25 = vld [vmem:[%s4077_s1 + $0x640] ss:$16 sps:$4 sm:$0xff]   ;;  %v3010_v26 = vld [vmem:[%s4077_s1 + $0x648] ss:$16 sps:$4 sm:$0xff]  }
  0x90   :  { %1721 = vmatprep.subr.bf16.mxu0 %v2925_v27  ;;  %1893 = vmatprep.subr.bf16.mxu1 %v2928_v28  ;;  %v3015_v27 = vld [vmem:[%s4077_s1 + $0x664] ss:$16 sps:$4 sm:$0xff]   ;;  %v3018_v28 = vld [vmem:[%s4077_s1 + $0x66c] ss:$16 sps:$4 sm:$0xff]  }
  0x93   :  { %1722 = vmatpush1.bf16.msra.mxu0 %v2923_v29  ;;  %1894 = vmatpush1.bf16.msra.mxu1 %v2926_v30  ;;  %v3013_v29 = vld [vmem:[%s4077_s1 + $0x660] ss:$16 sps:$4 sm:$0xff]   ;;  %v3016_v30 = vld [vmem:[%s4077_s1 + $0x668] ss:$16 sps:$4 sm:$0xff]  }
  0x94   :  { %1723 = vmatprep.subr.bf16.mxu0 %v2931_v31  ;;  %1895 = vmatprep.subr.bf16.mxu1 %v2934_v32  ;;  %v3021_v31 = vld [vmem:[%s4077_s1 + $0x684] ss:$16 sps:$4 sm:$0xff]   ;;  %v3024_v32 = vld [vmem:[%s4077_s1 + $0x68c] ss:$16 sps:$4 sm:$0xff]  }
  0x97   :  { %1724 = vmatpush1.bf16.msra.mxu0 %v2929_v33  ;;  %1896 = vmatpush1.bf16.msra.mxu1 %v2932_v34  ;;  %v3019_v33 = vld [vmem:[%s4077_s1 + $0x680] ss:$16 sps:$4 sm:$0xff]   ;;  %v3022_v34 = vld [vmem:[%s4077_s1 + $0x688] ss:$16 sps:$4 sm:$0xff]  }
  0x98   :  { %1725 = vmatprep.subr.bf16.mxu0 %v2937_v35  ;;  %1897 = vmatprep.subr.bf16.mxu1 %v2940_v36  ;;  %v3027_v35 = vld [vmem:[%s4077_s1 + $0x6a4] ss:$16 sps:$4 sm:$0xff]   ;;  %v3030_v36 = vld [vmem:[%s4077_s1 + $0x6ac] ss:$16 sps:$4 sm:$0xff]  }
  0x9b   :  { %1726 = vmatpush1.bf16.msra.mxu0 %v2935_v37  ;;  %1898 = vmatpush1.bf16.msra.mxu1 %v2938_v38  ;;  %v3025_v37 = vld [vmem:[%s4077_s1 + $0x6a0] ss:$16 sps:$4 sm:$0xff]   ;;  %v3028_v38 = vld [vmem:[%s4077_s1 + $0x6a8] ss:$16 sps:$4 sm:$0xff]  }
  0x9c   :  { %1727 = vmatprep.subr.bf16.mxu0 %v2943_v39  ;;  %1899 = vmatprep.subr.bf16.mxu1 %v2946_v40  ;;  %v3033_v39 = vld [vmem:[%s4077_s1 + $0x6c4] ss:$16 sps:$4 sm:$0xff]   ;;  %v3036_v40 = vld [vmem:[%s4077_s1 + $0x6cc] ss:$16 sps:$4 sm:$0xff]  }
  0x9f   :  { %1728 = vmatpush1.bf16.msra.mxu0 %v2941_v41  ;;  %1900 = vmatpush1.bf16.msra.mxu1 %v2944_v42  ;;  %v3031_v41 = vld [vmem:[%s4077_s1 + $0x6c0] ss:$16 sps:$4 sm:$0xff]   ;;  %v3034_v42 = vld [vmem:[%s4077_s1 + $0x6c8] ss:$16 sps:$4 sm:$0xff]  }
  0xa0   :  { %1729 = vmatprep.subr.bf16.mxu0 %v2949_v43  ;;  %1901 = vmatprep.subr.bf16.mxu1 %v2952_v44  ;;  %v3039_v43 = vld [vmem:[%s4077_s1 + $0x6e4] ss:$16 sps:$4 sm:$0xff]   ;;  %v3042_v44 = vld [vmem:[%s4077_s1 + $0x6ec] ss:$16 sps:$4 sm:$0xff]  }
  0xa3   :  { %1730 = vmatpush1.bf16.msra.mxu0 %v2947_v45  ;;  %1902 = vmatpush1.bf16.msra.mxu1 %v2950_v46  ;;  %v3037_v45 = vld [vmem:[%s4077_s1 + $0x6e0] ss:$16 sps:$4 sm:$0xff]   ;;  %v3040_v46 = vld [vmem:[%s4077_s1 + $0x6e8] ss:$16 sps:$4 sm:$0xff]  }
  0xa4   :  { %1731 = vmatprep.subr.bf16.mxu0 %v2955_v47  ;;  %1903 = vmatprep.subr.bf16.mxu1 %v2958_v48  ;;  %v3045_v47 = vld [vmem:[%s4077_s1 + $0x704] ss:$16 sps:$4 sm:$0xff]   ;;  %v3048_v48 = vld [vmem:[%s4077_s1 + $0x70c] ss:$16 sps:$4 sm:$0xff]  }
  0xa7   :  { %1732 = vmatpush1.bf16.msra.mxu0 %v2953_v49  ;;  %1904 = vmatpush1.bf16.msra.mxu1 %v2956_v50  ;;  %v3043_v49 = vld [vmem:[%s4077_s1 + $0x700] ss:$16 sps:$4 sm:$0xff]   ;;  %v3046_v50 = vld [vmem:[%s4077_s1 + $0x708] ss:$16 sps:$4 sm:$0xff]  }
  0xa8   :  { %1733 = vmatprep.subr.bf16.mxu0 %v2961_v51  ;;  %1905 = vmatprep.subr.bf16.mxu1 %v2964_v52  ;;  %v3051_v51 = vld [vmem:[%s4077_s1 + $0x724] ss:$16 sps:$4 sm:$0xff]   ;;  %v3054_v52 = vld [vmem:[%s4077_s1 + $0x72c] ss:$16 sps:$4 sm:$0xff]  }
  0xab   :  { %1734 = vmatpush1.bf16.msra.mxu0 %v2959_v53  ;;  %1906 = vmatpush1.bf16.msra.mxu1 %v2962_v54  ;;  %v3049_v53 = vld [vmem:[%s4077_s1 + $0x720] ss:$16 sps:$4 sm:$0xff]   ;;  %v3052_v54 = vld [vmem:[%s4077_s1 + $0x728] ss:$16 sps:$4 sm:$0xff]  }
  0xac   :  { %1735 = vmatprep.subr.bf16.mxu0 %v2967_v55  ;;  %1907 = vmatprep.subr.bf16.mxu1 %v2970_v56  ;;  %v3057_v55 = vld [vmem:[%s4077_s1 + $0x744] ss:$16 sps:$4 sm:$0xff]   ;;  %v3060_v56 = vld [vmem:[%s4077_s1 + $0x74c] ss:$16 sps:$4 sm:$0xff]  }
  0xaf   :  { %1736 = vmatpush1.bf16.msra.mxu0 %v2965_v57  ;;  %1908 = vmatpush1.bf16.msra.mxu1 %v2968_v58  ;;  %v3055_v57 = vld [vmem:[%s4077_s1 + $0x740] ss:$16 sps:$4 sm:$0xff]   ;;  %v3058_v58 = vld [vmem:[%s4077_s1 + $0x748] ss:$16 sps:$4 sm:$0xff]  }
  0xb0   :  { %1737 = vmatprep.subr.bf16.mxu0 %v2973_v59  ;;  %1909 = vmatprep.subr.bf16.mxu1 %v2976_v60  ;;  %v3063_v59 = vld [vmem:[%s4077_s1 + $0x764] ss:$16 sps:$4 sm:$0xff]   ;;  %v3066_v60 = vld [vmem:[%s4077_s1 + $0x76c] ss:$16 sps:$4 sm:$0xff]  }
  0xb3   :  { %1738 = vmatpush1.bf16.msra.mxu0 %v2971_v61  ;;  %1910 = vmatpush1.bf16.msra.mxu1 %v2974_v62  ;;  %v3061_v61 = vld [vmem:[%s4077_s1 + $0x760] ss:$16 sps:$4 sm:$0xff]   ;;  %v3064_v62 = vld [vmem:[%s4077_s1 + $0x768] ss:$16 sps:$4 sm:$0xff]  }
  0xb4   :  { %1739 = vmatprep.subr.bf16.mxu0 %v2979_v63  ;;  %1911 = vmatprep.subr.bf16.mxu1 %v2982_v0  ;;  %v3069_v63 = vld [vmem:[%s4077_s1 + $0x784] ss:$16 sps:$4 sm:$0xff]   ;;  %v3072_v0 = vld [vmem:[%s4077_s1 + $0x78c] ss:$16 sps:$4 sm:$0xff]  }
  0xb7   :  { %1740 = vmatpush1.bf16.msra.mxu0 %v2977_v1  ;;  %1912 = vmatpush1.bf16.msra.mxu1 %v2980_v2  ;;  %v3067_v1 = vld [vmem:[%s4077_s1 + $0x780] ss:$16 sps:$4 sm:$0xff]   ;;  %v3070_v2 = vld [vmem:[%s4077_s1 + $0x788] ss:$16 sps:$4 sm:$0xff]  }
  0xb8   :  { %1741 = vmatprep.subr.bf16.mxu0 %v2985_v3  ;;  %1913 = vmatprep.subr.bf16.mxu1 %v2988_v4  ;;  %v3075_v3 = vld [vmem:[%s4077_s1 + $0x7a4] ss:$16 sps:$4 sm:$0xff]   ;;  %v3078_v4 = vld [vmem:[%s4077_s1 + $0x7ac] ss:$16 sps:$4 sm:$0xff]  }
  0xbb   :  { %1742 = vmatpush1.bf16.msra.mxu0 %v2983_v5  ;;  %1914 = vmatpush1.bf16.msra.mxu1 %v2986_v6  ;;  %v3073_v5 = vld [vmem:[%s4077_s1 + $0x7a0] ss:$16 sps:$4 sm:$0xff]   ;;  %v3076_v6 = vld [vmem:[%s4077_s1 + $0x7a8] ss:$16 sps:$4 sm:$0xff]  }
  0xbc   :  { %1743 = vmatprep.subr.bf16.mxu0 %v2991_v7  ;;  %1915 = vmatprep.subr.bf16.mxu1 %v2994_v8  ;;  %v3081_v7 = vld [vmem:[%s4077_s1 + $0x7c4] ss:$16 sps:$4 sm:$0xff]   ;;  %v3084_v8 = vld [vmem:[%s4077_s1 + $0x7cc] ss:$16 sps:$4 sm:$0xff]  }
  0xbf   :  { %1744 = vmatpush1.bf16.msra.mxu0 %v2989_v9  ;;  %1916 = vmatpush1.bf16.msra.mxu1 %v2992_v10  ;;  %v3079_v9 = vld [vmem:[%s4077_s1 + $0x7c0] ss:$16 sps:$4 sm:$0xff]   ;;  %v3082_v10 = vld [vmem:[%s4077_s1 + $0x7c8] ss:$16 sps:$4 sm:$0xff]  }
  0xc0   :  { %1756 = vmatprep.subr.bf16.mxu0 %v2997_v11  ;;  %1928 = vmatprep.subr.bf16.mxu1 %v3000_v12  ;;  %v3087_v11 = vld [vmem:[%s4077_s1 + $0x7e4] ss:$16 sps:$4 sm:$0xff]   ;;  %v3090_v12 = vld [vmem:[%s4077_s1 + $0x7ec] ss:$16 sps:$4 sm:$0xff]  }
  0xc2   :  { %1746 = vmatmul.mubr.bf16.vlgmr.msra.gmra.mrb[0].mxu0 %v2338_v18  ;;  %1918 = vmatmul.mubr.bf16.vlgmr.msra.gmra.mrb[0].mxu1 %v2338_v18  ;;  %v3091_v18 = vld [vmem:[%s4079_s3 + $0x40] sm:$0xff]  }
  0xc3   :  { %1757 = vmatpush1.bf16.msra.mxu0 %v2995_v13  ;;  %1929 = vmatpush1.bf16.msra.mxu1 %v2998_v16  ;;  %v3085_v13 = vld [vmem:[%s4077_s1 + $0x7e0] ss:$16 sps:$4 sm:$0xff]   ;;  %v3088_v16 = vld [vmem:[%s4077_s1 + $0x7e8] ss:$16 sps:$4 sm:$0xff]  }
  0xc4   :  { %1758 = vmatprep.subr.bf16.mxu0 %v3003_v20  ;;  %1930 = vmatprep.subr.bf16.mxu1 %v3006_v21  ;;  %v3092_v20 = vld [vmem:[%s4079_s3 + $0xc0] sm:$0xff]   ;;  %v2340_v21 = vcombine.low %v3776_v17, %v3783_v19  ;;  %v3096_v17 = vld [vmem:[%s4079_s3 + $0xc8] sm:$0xff]  }
  0xc5   :  { %1788 = vmatprep.mubr.bf16.mxu0 %v2341_v22  ;;  %1960 = vmatprep.mubr.bf16.mxu1 %v2341_v22  ;;  %v3095_v22 = vld [vmem:[%s4079_s3 + $0x48] sm:$0xff]  }
  0xc6   :  { %v3097_v19 = vld [vmem:[%s4079_s3 + $0x8] sm:$0xff]  }
  0xc7   :  { %1759 = vmatpush1.bf16.msra.mxu0 %v3001_v14  ;;  %1931 = vmatpush1.bf16.msra.mxu1 %v3004_v15  ;;  %v3093_v14 = vld [vmem:[%s4079_s3] sm:$0xff]  }
  0xc8   :  { %1760 = vmatprep.subr.bf16.mxu0 %v3009_v23  ;;  %1932 = vmatprep.subr.bf16.mxu1 %v3012_v24  ;;  %v3094_v15 = vld [vmem:[%s4079_s3 + $0x80] sm:$0xff]   ;;  %v3098_v23 = vld [vmem:[%s4079_s3 + $0x88] sm:$0xff]   ;;  %v3099_v24 = vld [vmem:[%s4079_s3 + $0x50] sm:$0xff]  }
  0xcb   :  { %1761 = vmatpush1.bf16.msra.mxu0 %v3007_v25  ;;  %1933 = vmatpush1.bf16.msra.mxu1 %v3010_v26  ;;  %v3100_v25 = vld [vmem:[%s4079_s3 + $0xd0] sm:$0xff]  }
  0xcc   :  { %1762 = vmatprep.subr.bf16.mxu0 %v3015_v27  ;;  %1934 = vmatprep.subr.bf16.mxu1 %v3018_v28  ;;  %v3101_v26 = vld [vmem:[%s4079_s3 + $0x10] sm:$0xff]   ;;  %v3103_v28 = vld [vmem:[%s4079_s3 + $0x58] sm:$0xff]  }
  0xcd   :  { %v3102_v27 = vld [vmem:[%s4079_s3 + $0x90] sm:$0xff]  }
  0xcf   :  { %1763 = vmatpush1.bf16.msra.mxu0 %v3013_v29  ;;  %1935 = vmatpush1.bf16.msra.mxu1 %v3016_v30  ;;  %v3104_v29 = vld [vmem:[%s4079_s3 + $0xd8] sm:$0xff]  }
  0xd0   :  { %1764 = vmatprep.subr.bf16.mxu0 %v3021_v31  ;;  %1936 = vmatprep.subr.bf16.mxu1 %v3024_v32  ;;  %v3105_v30 = vld [vmem:[%s4079_s3 + $0x18] sm:$0xff]   ;;  %v3107_v32 = vld [vmem:[%s4079_s3 + $0x60] sm:$0xff]  }
  0xd1   :  { %v3106_v31 = vld [vmem:[%s4079_s3 + $0x98] sm:$0xff]  }
  0xd3   :  { %1765 = vmatpush1.bf16.msra.mxu0 %v3019_v33  ;;  %1937 = vmatpush1.bf16.msra.mxu1 %v3022_v34  ;;  %v3108_v33 = vld [vmem:[%s4079_s3 + $0xe0] sm:$0xff]  }
  0xd4   :  { %1766 = vmatprep.subr.bf16.mxu0 %v3027_v35  ;;  %1938 = vmatprep.subr.bf16.mxu1 %v3030_v36  ;;  %v3109_v34 = vld [vmem:[%s4079_s3 + $0x20] sm:$0xff]   ;;  %v3111_v36 = vld [vmem:[%s4079_s3 + $0x68] sm:$0xff]  }
  0xd5   :  { %v3110_v35 = vld [vmem:[%s4079_s3 + $0xa0] sm:$0xff]  }
  0xd7   :  { %1767 = vmatpush1.bf16.msra.mxu0 %v3025_v37  ;;  %1939 = vmatpush1.bf16.msra.mxu1 %v3028_v38  ;;  %v3112_v37 = vld [vmem:[%s4079_s3 + $0xe8] sm:$0xff]  }
  0xd8   :  { %1768 = vmatprep.subr.bf16.mxu0 %v3033_v39  ;;  %1940 = vmatprep.subr.bf16.mxu1 %v3036_v40  ;;  %v3113_v38 = vld [vmem:[%s4079_s3 + $0x28] sm:$0xff]   ;;  %v3115_v40 = vld [vmem:[%s4079_s3 + $0x70] sm:$0xff]  }
  0xd9   :  { %v3114_v39 = vld [vmem:[%s4079_s3 + $0xa8] sm:$0xff]  }
  0xdb   :  { %1769 = vmatpush1.bf16.msra.mxu0 %v3031_v41  ;;  %1941 = vmatpush1.bf16.msra.mxu1 %v3034_v42  ;;  %v3116_v41 = vld [vmem:[%s4079_s3 + $0xf0] sm:$0xff]  }
  0xdc   :  { %1770 = vmatprep.subr.bf16.mxu0 %v3039_v43  ;;  %1942 = vmatprep.subr.bf16.mxu1 %v3042_v44  ;;  %v3117_v42 = vld [vmem:[%s4079_s3 + $0x30] sm:$0xff]   ;;  %v3119_v44 = vld [vmem:[%s4079_s3 + $0x78] sm:$0xff]  }
  0xdd   :  { %v3118_v43 = vld [vmem:[%s4079_s3 + $0xb0] sm:$0xff]  }
  0xdf   :  { %1771 = vmatpush1.bf16.msra.mxu0 %v3037_v45  ;;  %1943 = vmatpush1.bf16.msra.mxu1 %v3040_v46  ;;  %v3120_v45 = vld [vmem:[%s4079_s3 + $0xf8] sm:$0xff]  }
  0xe0   :  { %1772 = vmatprep.subr.bf16.mxu0 %v3045_v47  ;;  %1944 = vmatprep.subr.bf16.mxu1 %v3048_v48  ;;  %v3121_v46 = vld [vmem:[%s4079_s3 + $0x38] sm:$0xff]   ;;  %v287_v48 = vlaneseq }
  0xe1   :  { %v3122_v47 = vld [vmem:[%s4079_s3 + $0xb8] sm:$0xff]  }
  0xe3   :  { %1773 = vmatpush1.bf16.msra.mxu0 %v3043_v49  ;;  %1945 = vmatpush1.bf16.msra.mxu1 %v3046_v50  ;;  %v288_v49 = vshrl.u32 %v287_v48, 7 }
  0xe4   :  { %1774 = vmatprep.subr.bf16.mxu0 %v3051_v51  ;;  %1946 = vmatprep.subr.bf16.mxu1 %v3054_v52  ;;  %v285_v52 = vld [vmem:[%s4080_s2] sm:$0xf] }
  0xe5   :  { %v289_v50 = vsub.s32 0, %v288_v49  ;;  %v297_v51 = vsub.s32 2, %v288_v49 }
  0xe7   :  { %1775 = vmatpush1.bf16.msra.mxu0 %v3049_v53  ;;  %1947 = vmatpush1.bf16.msra.mxu1 %v3052_v54  ;;  %v293_v53 = vsub.s32 1, %v288_v49  ;;  %v301_v54 = vsub.s32 3, %v288_v49 }
  0xe8   :  { %1776 = vmatprep.subr.bf16.mxu0 %v3057_v55  ;;  %1948 = vmatprep.subr.bf16.mxu1 %v3060_v56  ;;  %v290_v55 = vrot.slane %v285_v52, %v289_v50  ;;  %v298_v56 = vrot.slane %v285_v52, %v297_v51 }
  0xeb   :  { %1777 = vmatpush1.bf16.msra.mxu0 %v3055_v57  ;;  %1949 = vmatpush1.bf16.msra.mxu1 %v3058_v58  ;;  %v294_v57 = vrot.slane %v285_v52, %v293_v53  ;;  %v302_v58 = vrot.slane %v285_v52, %v301_v54 }
  0xec   :  { %1778 = vmatprep.subr.bf16.mxu0 %v3063_v59  ;;  %1950 = vmatprep.subr.bf16.mxu1 %v3066_v60 }
  0xef   :  { %1779 = vmatpush1.bf16.msra.mxu0 %v3061_v61  ;;  %1951 = vmatpush1.bf16.msra.mxu1 %v3064_v62 }
  0xf0   :  { %1780 = vmatprep.subr.bf16.mxu0 %v3069_v63  ;;  %1952 = vmatprep.subr.bf16.mxu1 %v3072_v0 }
  0xf3   :  { %1781 = vmatpush1.bf16.msra.mxu0 %v3067_v1  ;;  %1953 = vmatpush1.bf16.msra.mxu1 %v3070_v2 }
  0xf4   :  { %1782 = vmatprep.subr.bf16.mxu0 %v3075_v3  ;;  %1954 = vmatprep.subr.bf16.mxu1 %v3078_v4 }
  0xf7   :  { %1783 = vmatpush1.bf16.msra.mxu0 %v3073_v5  ;;  %1955 = vmatpush1.bf16.msra.mxu1 %v3076_v6 }
  0xf8   :  { %1784 = vmatprep.subr.bf16.mxu0 %v3081_v7  ;;  %1956 = vmatprep.subr.bf16.mxu1 %v3084_v8 }
  0xfb   :  { %1785 = vmatpush1.bf16.msra.mxu0 %v3079_v9  ;;  %1957 = vmatpush1.bf16.msra.mxu1 %v3082_v10 }
  0xfc   :  { %1786 = vmatprep.subr.bf16.mxu0 %v3087_v11  ;;  %1958 = vmatprep.subr.bf16.mxu1 %v3090_v12 }
  0xff   :  { %1787 = vmatpush1.bf16.msra.mxu0 %v3085_v13  ;;  %1959 = vmatpush1.bf16.msra.mxu1 %v3088_v16 }
 0x100   :  { %2631 = vmatprep.subr.bf16.mxu0 %v3091_v18  ;;  %2653 = vmatprep.subr.bf16.mxu1 %v3092_v20 }
 0x102   :  { %1789 = vmatmul.mubr.bf16.vlgmr.msra.gmra.mrb[0].mxu0 %v2340_v21  ;;  %1961 = vmatmul.mubr.bf16.vlgmr.msra.gmra.mrb[0].mxu1 %v2340_v21 }
 0x103   :  { %2632 = vmatpush3.bf16.msra.mxu0 %v3093_v14  ;;  %2654 = vmatpush3.bf16.msra.mxu1 %v3094_v15 }
 0x104   :  { %2633 = vmatprep.subr.bf16.mxu0 %v3095_v22  ;;  %2655 = vmatprep.subr.bf16.mxu1 %v3096_v17 }
 0x107   :  { %2634 = vmatpush3.bf16.msra.mxu0 %v3097_v19  ;;  %2656 = vmatpush3.bf16.msra.mxu1 %v3098_v23 }
 0x108   :  { %2635 = vmatprep.subr.bf16.mxu0 %v3099_v24  ;;  %2657 = vmatprep.subr.bf16.mxu1 %v3100_v25  ;;  %v2598_v25 = vld [vmem:[%s4081_s4] ss:$0 sm:$0xff] }
 0x10b   :  { %2636 = vmatpush3.bf16.msra.mxu0 %v3101_v26  ;;  %2658 = vmatpush3.bf16.msra.mxu1 %v3102_v27 }
 0x10c   :  { %2637 = vmatprep.subr.bf16.mxu0 %v3103_v28  ;;  %2659 = vmatprep.subr.bf16.mxu1 %v3104_v29 }
 0x10f   :  { %2638 = vmatpush3.bf16.msra.mxu0 %v3105_v30  ;;  %2660 = vmatpush3.bf16.msra.mxu1 %v3106_v31 }
 0x110   :  { %2639 = vmatprep.subr.bf16.mxu0 %v3107_v32  ;;  %2661 = vmatprep.subr.bf16.mxu1 %v3108_v33 }
 0x113   :  { %2640 = vmatpush3.bf16.msra.mxu0 %v3109_v34  ;;  %2662 = vmatpush3.bf16.msra.mxu1 %v3110_v35 }
 0x114   :  { %2641 = vmatprep.subr.bf16.mxu0 %v3111_v36  ;;  %2663 = vmatprep.subr.bf16.mxu1 %v3112_v37 }
 0x117   :  { %2642 = vmatpush3.bf16.msra.mxu0 %v3113_v38  ;;  %2664 = vmatpush3.bf16.msra.mxu1 %v3114_v39 }
 0x118   :  { %2643 = vmatprep.subr.bf16.mxu0 %v3115_v40  ;;  %2665 = vmatprep.subr.bf16.mxu1 %v3116_v41 }
 0x11b   :  { %2644 = vmatpush3.bf16.msra.mxu0 %v3117_v42  ;;  %2666 = vmatpush3.bf16.msra.mxu1 %v3118_v43 }
 0x11c   :  { %2645 = vmatprep.subr.bf16.mxu0 %v3119_v44  ;;  %2667 = vmatprep.subr.bf16.mxu1 %v3120_v45 }
 0x11f   :  { %2646 = vmatpush3.bf16.msra.mxu0 %v3121_v46  ;;  %2668 = vmatpush3.bf16.msra.mxu1 %v3122_v47 }
 0x1d5   :  { %v1790_v59 = vpop.f32.mrb[0].mxu0  ;;  %v1962_v60 = vpop.f32.mrb[0].mxu1 }
 0x1d6   :  { %v2675_v61 = vadd.f32 %v1790_v59, %v290_v55  ;;  %v2679_v62 = vadd.f32 %v1962_v60, %v298_v56  ;;  %v1792_v63 = vpop.f32.mrb[1].mxu0  ;;  %v1964_v0 = vpop.f32.mrb[1].mxu1 }
 0x1d7   :  { %v2676_v1 = vadd.f32 %v1792_v63, %v294_v57  ;;  %v2680_v2 = vadd.f32 %v1964_v0, %v302_v58  ;;  %v1794_v3 = vpop.f32.mrb[2].mxu0  ;;  %v1966_v4 = vpop.f32.mrb[2].mxu1 }
 0x1d8   :  { %v2677_v5 = vadd.f32 %v1794_v3, %v290_v55  ;;  %v2681_v6 = vadd.f32 %v1966_v4, %v298_v56  ;;  %v1796_v7 = vpop.f32.mrb[3].mxu0  ;;  %v1968_v8 = vpop.f32.mrb[3].mxu1  ;;  %v1971_v11 = vmax.f32 %v2675_v61, 0.0  ;;  %v1973_v12 = vmax.f32 %v2679_v62, 0.0 }
 0x1d9   :  { %v2678_v9 = vadd.f32 %v1796_v7, %v294_v57  ;;  %v2682_v10 = vadd.f32 %v1968_v8, %v302_v58  ;;  %v1972_v18 = vmax.f32 %v2676_v1, 0.0  ;;  %v1974_v20 = vmax.f32 %v2680_v2, 0.0 }
 0x1da   :  { %v1975_v13 = vmax.f32 %v2677_v5, 0.0  ;;  %v1977_v16 = vmax.f32 %v2681_v6, 0.0 }
 0x1db   :  { %v1976_v21 = vmax.f32 %v2678_v9, 0.0  ;;  %v1978_v14 = vmax.f32 %v2682_v10, 0.0 }
 0x1dc   :  { %v1979_v15 = vpack.c.bf16 %v1975_v13, %v1971_v11  ;;  %v1981_v22 = vpack.c.bf16 %v1977_v16, %v1973_v12 }
 0x1dd   :  { %v1980_v17 = vpack.c.bf16 %v1976_v21, %v1972_v18  ;;  %v1982_v19 = vpack.c.bf16 %v1978_v14, %v1974_v20 }
 0x1df   :  { %2278 = vmatprep.mubr.bf16.mxu0 %v1980_v17  ;;  %2319 = vmatprep.mubr.bf16.mxu1 %v1982_v19 }
 0x1e0   :  { %2279 = vmatmul.mubr.bf16.vlgmr.msra.gmra.mrb[4].mxu0 %v1979_v15  ;;  %2320 = vmatmul.mubr.bf16.vlgmr.msra.gmra.mrb[4].mxu1 %v1981_v22 }
 0x2b3   :  { %v2647_v23 = vpop.f32.mrb[4].mxu0  ;;  %v2669_v24 = vpop.f32.mrb[4].mxu1 }
 0x2b4   :  { %v2648_v26 = vpop.f32.mrb[5].mxu0  ;;  %v2670_v27 = vpop.f32.mrb[5].mxu1 }
 0x2b5   :  { %v2649_v28 = vadd.f32 %v2648_v26, %v2647_v23  ;;  %v2671_v29 = vadd.f32 %v2670_v27, %v2669_v24  ;;  %v2650_v30 = vpop.f32.mrb[6].mxu0  ;;  %v2672_v31 = vpop.f32.mrb[6].mxu1 }
 0x2b6   :  { %v2651_v32 = vpop.f32.mrb[7].mxu0  ;;  %v2673_v33 = vpop.f32.mrb[7].mxu1 }
 0x2b7   :  { %v2281_v34 = vadd.f32 %v2649_v28, %v2598_v25  ;;  %v2652_v35 = vadd.f32 %v2651_v32, %v2650_v30  ;;  %v2674_v36 = vadd.f32 %v2673_v33, %v2672_v31 }
 0x2b9   :  { %v2322_v37 = vadd.f32 %v2671_v29, %v2281_v34  ;;  %v2284_v38 = vadd.f32 %v2652_v35, %v2598_v25 }
 0x2bb   :  { %2328 = vst [vmem:[%s4082_s5] sm:$0xff] %v2322_v37  ;;  %v2325_v39 = vadd.f32 %v2674_v36, %v2284_v38 }
 0x2bd   :  { %2329 = vst [vmem:[%s4082_s5 + $0x8] sm:$0xff] %v2325_v39 }

</bundles_post_ra>
